<compile_context>
chip_gen: v5e
topology: v5e:2x2
jax: 0.10.0
libtpu: 0.0.40
codegen_flags: <defaults>
</compile_context>

<pallas_src>
import functools

import jax
import jax.numpy as jnp
from jax import lax
from jax.experimental import pallas as pl
from jax.experimental.pallas import tpu as pltpu


# ---------------------------------------------------------------------------
# Per-generation scoped-VMEM limit.
# v5e/v6e: 128 MiB physical -> 64 MiB scoped; v7x: 64 MiB physical -> 48 MiB.
# ---------------------------------------------------------------------------
@functools.lru_cache(maxsize=None)
def _vmem_limit_bytes():
    cap = None
    try:
        cap = getattr(pltpu.get_tpu_info(), "vmem_capacity_bytes", None)
    except Exception:
        cap = None
    if not cap:
        return 48 * 1024 * 1024          # safe default on every generation
    return int(min(64 * 1024 * 1024, (3 * int(cap)) // 4))


# ---------------------------------------------------------------------------
# In-kernel helpers
# ---------------------------------------------------------------------------
def _leaky_relu(y):
    return jnp.where(y > 0, y, 0.2 * y)


def _bn_lrelu(y, gamma, beta):
    """Training-mode BatchNorm (biased batch var, eps=1e-5) + LeakyReLU(0.2).

    y: (M, C) with M = N*H*W, so the axis-0 reduction is exactly PyTorch's
    reduction over (N, H, W)."""
    mean = jnp.mean(y, axis=0, keepdims=True)
    var = jnp.mean(jnp.square(y - mean), axis=0, keepdims=True)
    y = (y - mean) * lax.rsqrt(var + 1e-5) * gamma + beta
    return _leaky_relu(y)


# ---------------------------------------------------------------------------
# Pallas kernels
# ---------------------------------------------------------------------------
def _conv1_lrelu_kernel(x_ref, w_ref, o_ref):
    """One M-tile of (packed) patches @ block-diag weight + LeakyReLU(0.2)."""
    y = jnp.dot(x_ref[...], w_ref[...], preferred_element_type=jnp.float32)
    o_ref[...] = _leaky_relu(y)


def _conv_bn_lrelu_kernel(x_ref, w_ref, g_ref, b_ref, o_ref):
    """K-tiled conv matmul; (M, Cout) output block is the resident accumulator.

    BatchNorm(batch stats) + LeakyReLU run once all K chunks are accumulated."""
    k = pl.program_id(0)

    @pl.when(k == 0)
    def _init():
        o_ref[...] = jnp.zeros_like(o_ref)

    o_ref[...] += jnp.dot(x_ref[...], w_ref[...],
                          preferred_element_type=jnp.float32)

    @pl.when(k == pl.num_programs(0) - 1)
    def _epilogue():
        o_ref[...] = _bn_lrelu(o_ref[...], g_ref[...], b_ref[...])


def _conv_bn_lrelu_head_kernel(x_ref, w_ref, g_ref, b_ref, w5_ref, o_ref,
                               acc_ref):
    """Layer-4 conv (K-tiled) + BN + LeakyReLU fused with layer-5 conv+Sigmoid.

    x_ref  : (M, tk)     layer-4 im2col patch K-chunk, M = N*4*4
    w_ref  : (tk, 512)   layer-4 weight K-chunk
    w5_ref : (16, 512)   layer-5 weight, row t = tap (kh*4+kw)
    o_ref  : (N, 1)      sigmoid probabilities
    acc_ref: (M, 512)    f32 VMEM accumulator (resident across k)
    """
    k = pl.program_id(0)

    @pl.when(k == 0)
    def _init():
        acc_ref[...] = jnp.zeros_like(acc_ref)

    acc_ref[...] += jnp.dot(x_ref[...], w_ref[...],
                            preferred_element_type=jnp.float32)

    @pl.when(k == pl.num_programs(0) - 1)
    def _epilogue():
        y = _bn_lrelu(acc_ref[...], g_ref[...], b_ref[...])      # (N*16, 512)
        n = o_ref.shape[0]
        npix, c = w5_ref.shape
        # Layout-preserving split of the leading dim (16 % 8 == 0).
        y3 = y.reshape(n, npix, c)                                # (N, 16, 512)
        part = jnp.sum(y3 * w5_ref[...][None, :, :], axis=1)      # (N, 512)
        logit = jnp.sum(part, axis=-1, keepdims=True)             # (N, 1)
        o_ref[...] = jax.nn.sigmoid(logit)


# ---------------------------------------------------------------------------
# pallas_call wrappers
# ---------------------------------------------------------------------------
def conv1_lrelu(patches, w_packed):
    """Layer 1: LeakyReLU(patches @ W).

    Two output pixels are packed per kernel row via the block-diagonal weight,
    so the stored block is 128 lanes wide (no masked stores)."""
    m, _ = patches.shape
    m2 = m // 2
    p2 = patches.reshape(m2, patches.shape[1] * 2)        # free, contiguous
    kp, cp = w_packed.shape                                # (96, 128)
    tm = 256 if (m2 % 256 == 0) else m2                    # many pipelined steps
    flops = 2 * m2 * kp * cp
    bytes_accessed = 4 * (m2 * kp + kp * cp + m2 * cp)
    out = pl.pallas_call(
        _conv1_lrelu_kernel,
        out_shape=jax.ShapeDtypeStruct((m2, cp), jnp.float32),
        grid_spec=pltpu.PrefetchScalarGridSpec(
            num_scalar_prefetch=0,
            grid=(m2 // tm,),
            in_specs=[
                pl.BlockSpec((tm, kp), lambda i: (i, 0)),
                pl.BlockSpec((kp, cp), lambda i: (0, 0)),
            ],
            out_specs=pl.BlockSpec((tm, cp), lambda i: (i, 0)),
        ),
        compiler_params=pltpu.CompilerParams(
            dimension_semantics=("parallel",),
            vmem_limit_bytes=_vmem_limit_bytes(),
        ),
        cost_estimate=pl.CostEstimate(
            flops=flops, transcendentals=0, bytes_accessed=bytes_accessed),
    )(p2, w_packed)
    return out.reshape(m, cp // 2)                         # == (M, 64) NHWC rows


def conv_bn_lrelu(patches, w_mat, gamma, beta, *, tk):
    """K-tiled conv matmul + BN(batch stats) + LeakyReLU(0.2)."""
    m, kdim = patches.shape
    _, cout = w_mat.shape
    if kdim % tk != 0:
        tk = kdim
    flops = 2 * m * kdim * cout + 10 * m * cout
    bytes_accessed = 4 * (m * kdim + kdim * cout + m * cout + 4 * cout)
    return pl.pallas_call(
        _conv_bn_lrelu_kernel,
        out_shape=jax.ShapeDtypeStruct((m, cout), jnp.float32),
        grid_spec=pltpu.PrefetchScalarGridSpec(
            num_scalar_prefetch=0,
            grid=(kdim // tk,),
            in_specs=[
                pl.BlockSpec((m, tk), lambda k: (0, k)),
                pl.BlockSpec((tk, cout), lambda k: (k, 0)),
                pl.BlockSpec((1, cout), lambda k: (0, 0)),
                pl.BlockSpec((1, cout), lambda k: (0, 0)),
            ],
            out_specs=pl.BlockSpec((m, cout), lambda k: (0, 0)),
        ),
        compiler_params=pltpu.CompilerParams(
            dimension_semantics=("arbitrary",),
            vmem_limit_bytes=_vmem_limit_bytes(),
        ),
        cost_estimate=pl.CostEstimate(
            flops=flops, transcendentals=cout, bytes_accessed=bytes_accessed),
    )(patches, w_mat, gamma, beta)


def conv_bn_lrelu_head(patches, w_mat, gamma, beta, w5_taps, n, *, tk):
    """Layer-4 conv + BN + LReLU fused with the final 4x4 valid conv + Sigmoid."""
    m, kdim = patches.shape
    _, cout = w_mat.shape
    if kdim % tk != 0:
        tk = kdim
    flops = 2 * m * kdim * cout + 12 * m * cout
    bytes_accessed = 4 * (m * kdim + kdim * cout + m * cout + 18 * cout + n)
    return pl.pallas_call(
        _conv_bn_lrelu_head_kernel,
        out_shape=jax.ShapeDtypeStruct((n, 1), jnp.float32),
        grid_spec=pltpu.PrefetchScalarGridSpec(
            num_scalar_prefetch=0,
            grid=(kdim // tk,),
            in_specs=[
                pl.BlockSpec((m, tk), lambda k: (0, k)),
                pl.BlockSpec((tk, cout), lambda k: (k, 0)),
                pl.BlockSpec((1, cout), lambda k: (0, 0)),
                pl.BlockSpec((1, cout), lambda k: (0, 0)),
                pl.BlockSpec(w5_taps.shape, lambda k: (0, 0)),
            ],
            out_specs=pl.BlockSpec((n, 1), lambda k: (0, 0)),
            scratch_shapes=[pltpu.VMEM((m, cout), jnp.float32)],
        ),
        compiler_params=pltpu.CompilerParams(
            dimension_semantics=("arbitrary",),
            vmem_limit_bytes=_vmem_limit_bytes(),
        ),
        cost_estimate=pl.CostEstimate(
            flops=flops, transcendentals=cout + n,
            bytes_accessed=bytes_accessed),
    )(patches, w_mat, gamma, beta, w5_taps)


# ---------------------------------------------------------------------------
# Glue: im2col + weight preparation (plain JAX, hoisted where possible)
# ---------------------------------------------------------------------------
def im2col(x_nhwc, k, stride, pad):
    """Returns (patches (N*Ho*Wo, k*k*Cin), N, Ho, Wo)."""
    x = jnp.pad(x_nhwc, ((0, 0), (pad, pad), (pad, pad), (0, 0)))
    n, h, w, c = x.shape
    ho = (h - k) // stride + 1
    wo = (w - k) // stride + 1
    taps = []
    for i in range(k):
        for j in range(k):
            taps.append(x[:, i:i + stride * ho:stride, j:j + stride * wo:stride, :])
    p = jnp.stack(taps, axis=3)                      # (N, Ho, Wo, k*k, Cin)
    return p.reshape(n * ho * wo, k * k * c), n, ho, wo


def torch_conv_weight_to_mat(w_oihw):
    """(Cout, Cin, kh, kw) -> (kh*kw*Cin, Cout), matching im2col tap order."""
    cout, cin, kh, kw = w_oihw.shape
    return jnp.transpose(w_oihw, (2, 3, 1, 0)).reshape(kh * kw * cin, cout)


def prepare_weights(params):
    """Hoisted per-model weight prep (runs once, not per forward)."""
    w1m = torch_conv_weight_to_mat(params["conv"][0])          # (48, 64)
    k1, c1 = w1m.shape
    # Block-diagonal packing: two output pixels per kernel row -> 128-lane store.
    w1p = jnp.zeros((2 * k1, 2 * c1), jnp.float32)
    w1p = w1p.at[:k1, :c1].set(w1m).at[k1:, c1:].set(w1m)
    w5_taps = torch_conv_weight_to_mat(params["conv"][4]).reshape(16, 512)
    return {
        "w1_packed": w1p,
        "w2": torch_conv_weight_to_mat(params["conv"][1]),     # (1024, 128)
        "w3": torch_conv_weight_to_mat(params["conv"][2]),     # (2048, 256)
        "w4": torch_conv_weight_to_mat(params["conv"][3]),     # (4096, 512)
        "w5_taps": w5_taps,                                    # (16, 512)
        "bn_gamma": params["bn_gamma"],
        "bn_beta": params["bn_beta"],
    }


# ---------------------------------------------------------------------------
# Discriminator forward
# ---------------------------------------------------------------------------
def init_params(key):
    specs = [  # (Cout, Cin, k)
        (64, 3, 4),
        (128, 64, 4),
        (256, 128, 4),
        (512, 256, 4),
        (1, 512, 4),
    ]
    keys = jax.random.split(key, len(specs) + 3)
    params = {"conv": [], "bn_gamma": [], "bn_beta": []}
    for i, (co, ci, k) in enumerate(specs):
        params["conv"].append(
            0.02 * jax.random.normal(keys[i], (co, ci, k, k), jnp.float32))
    for i, c in enumerate((128, 256, 512)):
        g = 1.0 + 0.02 * jax.random.normal(keys[len(specs) + i], (1, c), jnp.float32)
        params["bn_gamma"].append(g)
        params["bn_beta"].append(jnp.zeros((1, c), jnp.float32))
    return params


def discriminator_forward(weights, x_nchw):
    x = jnp.transpose(x_nchw, (0, 2, 3, 1)).astype(jnp.float32)  # NCHW -> NHWC

    # Layer 1: Conv(3->64, 4, 2, 1) + LeakyReLU(0.2), lane-dense packed output.
    p, n, ho, wo = im2col(x, 4, 2, 1)
    y = conv1_lrelu(p, weights["w1_packed"])
    x = y.reshape(n, ho, wo, 64)

    # Layers 2-3: Conv + BatchNorm(batch stats) + LeakyReLU(0.2), K-tiled with
    # the (M, Cout) result resident in VMEM across the reduction grid axis.
    for li, (w_key, cout, tk) in enumerate((("w2", 128, 256), ("w3", 256, 256))):
        p, n, ho, wo = im2col(x, 4, 2, 1)
        y = conv_bn_lrelu(p, weights[w_key], weights["bn_gamma"][li],
                          weights["bn_beta"][li], tk=tk)
        x = y.reshape(n, ho, wo, cout)

    # Layer 4 (Conv 256->512 + BN + LeakyReLU) fused with layer 5
    # (Conv 512->1, 4, 1, 0, no bias) + Sigmoid in a single K-tiled kernel.
    p, n, ho, wo = im2col(x, 4, 2, 1)                  # (N*16, 4096), ho = wo = 4
    assert ho == 4 and wo == 4, (ho, wo)               # final conv covers full 4x4
    probs = conv_bn_lrelu_head(p, weights["w4"], weights["bn_gamma"][2],
                               weights["bn_beta"][2], weights["w5_taps"], n,
                               tk=512)
    return probs.reshape(-1)                           # (N,)


# ---------------------------------------------------------------------------
if __name__ == "__main__":
    key = jax.random.PRNGKey(0)
    k_param, k_input = jax.random.split(key)
    params = init_params(k_param)
    weights = prepare_weights(params)                  # hoisted weight prep

    # DCGAN discriminator expects 3x64x64 images (64 is forced by the
    # 4-stage stride-2 stack followed by a 4x4 valid conv).
    x = jax.random.normal(k_input, (2, 3, 64, 64), jnp.float32)

    out = jax.jit(discriminator_forward)(weights, x)
    out = jax.block_until_ready(out)

    assert out.shape == (2,), out.shape
    assert bool(jnp.all((out >= 0.0) & (out <= 1.0))), "sigmoid range violated"
    print("KERNEL_OK")
</pallas_src>

<mosaic_0001>
module attributes {stable_mosaic.version = 11 : i64} {
  func.func @_conv1_lrelu_kernel(%arg0: i32, %arg1: memref<256x96xf32, #tpu.memory_space<vmem>>, %arg2: memref<96x128xf32, #tpu.memory_space<vmem>>, %arg3: memref<256x128xf32, #tpu.memory_space<vmem>>) attributes {dimension_semantics = [#tpu.dimension_semantics<parallel>], iteration_bounds = array<i64: 4>, scalar_prefetch = 0 : i64, scratch_operands = 0 : i64, tpu.core_type = #tpu.core_type<tc>, window_params = [{transform_indices = @transform_0, window_bounds = array<i64: 256, 96>}, {pipeline_mode = #tpu.pipeline_mode<synchronous>, transform_indices = @transform_1, window_bounds = array<i64: 96, 128>}, {transform_indices = @transform_2, window_bounds = array<i64: 256, 128>}]} {
    %c0 = arith.constant 0 : index
    %c0_0 = arith.constant 0 : index
    %0 = vector.load %arg1[%c0, %c0_0] : memref<256x96xf32, #tpu.memory_space<vmem>>, vector<256x96xf32>
    %c0_1 = arith.constant 0 : index
    %c0_2 = arith.constant 0 : index
    %1 = vector.load %arg2[%c0_1, %c0_2] : memref<96x128xf32, #tpu.memory_space<vmem>>, vector<96x128xf32>
    %cst = arith.constant dense<0.000000e+00> : vector<256x128xf32>
    %2 = tpu.matmul %0, %1, %cst {dimension_numbers = #tpu.dot_dimension_numbers<[1], [0], [0], [1], [0, 0, 1, 1], [], []>} : vector<256x96xf32>, vector<96x128xf32>, vector<256x128xf32> -> vector<256x128xf32>
    %cst_3 = arith.constant 0.000000e+00 : f32
    %3 = vector.broadcast %cst_3 : f32 to vector<256x128xf32>
    %4 = arith.cmpf ogt, %2, %3 : vector<256x128xf32>
    %cst_4 = arith.constant 2.000000e-01 : f32
    %5 = vector.broadcast %cst_4 : f32 to vector<256x128xf32>
    %6 = arith.mulf %5, %2 : vector<256x128xf32>
    %7 = arith.select %4, %2, %6 : vector<256x128xi1>, vector<256x128xf32>
    %c0_5 = arith.constant 0 : index
    %c0_6 = arith.constant 0 : index
    %8 = vector.load %arg3[%c0_5, %c0_6] : memref<256x128xf32, #tpu.memory_space<vmem>>, vector<256x128xf32>
    tpu.vector_store %arg3[%c0_5, %c0_6], %7 {strides = array<i32>} : memref<256x128xf32, #tpu.memory_space<vmem>>, vector<256x128xf32>,
    return
  }
  func.func @transform_0(%arg0: i32) -> (i32, i32) {
    %c0_i32 = arith.constant 0 : i32
    %c0_i32_0 = arith.constant 0 : i32
    return %arg0, %c0_i32 : i32, i32
  }
  func.func @transform_1(%arg0: i32) -> (i32, i32) {
    %c0_i32 = arith.constant 0 : i32
    %c0_i32_0 = arith.constant 0 : i32
    %c0_i32_1 = arith.constant 0 : i32
    return %c0_i32, %c0_i32_0 : i32, i32
  }
  func.func @transform_2(%arg0: i32) -> (i32, i32) {
    %c0_i32 = arith.constant 0 : i32
    %c0_i32_0 = arith.constant 0 : i32
    return %arg0, %c0_i32 : i32, i32
  }
}

module attributes {stable_mosaic.version = 11 : i64} {
  func.func @_conv_bn_lrelu_kernel(%arg0: i32, %arg1: memref<512x256xf32, #tpu.memory_space<vmem>>, %arg2: memref<256x128xf32, #tpu.memory_space<vmem>>, %arg3: memref<1x128xf32, #tpu.memory_space<vmem>>, %arg4: memref<1x128xf32, #tpu.memory_space<vmem>>, %arg5: memref<512x128xf32, #tpu.memory_space<vmem>>) attributes {dimension_semantics = [#tpu.dimension_semantics<arbitrary>], iteration_bounds = array<i64: 4>, scalar_prefetch = 0 : i64, scratch_operands = 0 : i64, tpu.core_type = #tpu.core_type<tc>, window_params = [{transform_indices = @transform_0, window_bounds = array<i64: 512, 256>}, {transform_indices = @transform_1, window_bounds = array<i64: 256, 128>}, {pipeline_mode = #tpu.pipeline_mode<synchronous>, transform_indices = @transform_2, window_bounds = array<i64: 1, 128>}, {pipeline_mode = #tpu.pipeline_mode<synchronous>, transform_indices = @transform_3, window_bounds = array<i64: 1, 128>}, {pipeline_mode = #tpu.pipeline_mode<synchronous>, transform_indices = @transform_4, window_bounds = array<i64: 512, 128>}]} {
    %c0_i32 = arith.constant 0 : i32
    %0 = arith.cmpi eq, %arg0, %c0_i32 : i32
    %1 = arith.extui %0 : i1 to i32
    %c0_i32_0 = arith.constant 0 : i32
    %2 = arith.cmpi ne, %1, %c0_i32_0 : i32
    scf.if %2 {
      %cst_9 = arith.constant 0.000000e+00 : f32
      %12 = vector.broadcast %cst_9 : f32 to vector<512x128xf32>
      %c0_10 = arith.constant 0 : index
      %c0_11 = arith.constant 0 : index
      %13 = vector.load %arg5[%c0_10, %c0_11] : memref<512x128xf32, #tpu.memory_space<vmem>>, vector<512x128xf32>
      tpu.vector_store %arg5[%c0_10, %c0_11], %12 {strides = array<i32>} : memref<512x128xf32, #tpu.memory_space<vmem>>, vector<512x128xf32>,
    } else {
    }
    %c0 = arith.constant 0 : index
    %c0_1 = arith.constant 0 : index
    %3 = vector.load %arg5[%c0, %c0_1] : memref<512x128xf32, #tpu.memory_space<vmem>>, vector<512x128xf32>
    %c0_2 = arith.constant 0 : index
    %c0_3 = arith.constant 0 : index
    %4 = vector.load %arg1[%c0_2, %c0_3] : memref<512x256xf32, #tpu.memory_space<vmem>>, vector<512x256xf32>
    %c0_4 = arith.constant 0 : index
    %c0_5 = arith.constant 0 : index
    %5 = vector.load %arg2[%c0_4, %c0_5] : memref<256x128xf32, #tpu.memory_space<vmem>>, vector<256x128xf32>
    %cst = arith.constant dense<0.000000e+00> : vector<512x128xf32>
    %6 = tpu.matmul %4, %5, %cst {dimension_numbers = #tpu.dot_dimension_numbers<[1], [0], [0], [1], [0, 0, 1, 1], [], []>} : vector<512x256xf32>, vector<256x128xf32>, vector<512x128xf32> -> vector<512x128xf32>
    %7 = arith.addf %3, %6 : vector<512x128xf32>
    %c0_6 = arith.constant 0 : index
    %c0_7 = arith.constant 0 : index
    %8 = vector.load %arg5[%c0_6, %c0_7] : memref<512x128xf32, #tpu.memory_space<vmem>>, vector<512x128xf32>
    tpu.vector_store %arg5[%c0_6, %c0_7], %7 {strides = array<i32>} : memref<512x128xf32, #tpu.memory_space<vmem>>, vector<512x128xf32>,
    %c3_i32 = arith.constant 3 : i32
    %9 = arith.cmpi eq, %arg0, %c3_i32 : i32
    %10 = arith.extui %9 : i1 to i32
    %c0_i32_8 = arith.constant 0 : i32
    %11 = arith.cmpi ne, %10, %c0_i32_8 : i32
    scf.if %11 {
      %c0_9 = arith.constant 0 : index
      %c0_10 = arith.constant 0 : index
      %12 = vector.load %arg5[%c0_9, %c0_10] : memref<512x128xf32, #tpu.memory_space<vmem>>, vector<512x128xf32>
      %c0_11 = arith.constant 0 : index
      %c0_12 = arith.constant 0 : index
      %13 = vector.load %arg3[%c0_11, %c0_12] : memref<1x128xf32, #tpu.memory_space<vmem>>, vector<1x128xf32>
      %c0_13 = arith.constant 0 : index
      %c0_14 = arith.constant 0 : index
      %14 = vector.load %arg4[%c0_13, %c0_14] : memref<1x128xf32, #tpu.memory_space<vmem>>, vector<1x128xf32>
      %cst_15 = arith.constant dense<0.000000e+00> : vector<128xf32>
      %15 = vector.multi_reduction <add>, %12, %cst_15 [0] : vector<512x128xf32> to vector<128xf32>
      %16 = vector.shape_cast %15 : vector<128xf32> to vector<1x128xf32>
      %cst_16 = arith.constant 5.120000e+02 : f32
      %17 = vector.broadcast %cst_16 : f32 to vector<1x128xf32>
      %18 = arith.divf %16, %17 : vector<1x128xf32>
      %19 = vector.broadcast %18 : vector<1x128xf32> to vector<512x128xf32>
      %20 = arith.subf %12, %19 : vector<512x128xf32>
      %21 = arith.mulf %20, %20 : vector<512x128xf32>
      %cst_17 = arith.constant dense<0.000000e+00> : vector<128xf32>
      %22 = vector.multi_reduction <add>, %21, %cst_17 [0] : vector<512x128xf32> to vector<128xf32>
      %23 = vector.shape_cast %22 : vector<128xf32> to vector<1x128xf32>
      %cst_18 = arith.constant 5.120000e+02 : f32
      %24 = vector.broadcast %cst_18 : f32 to vector<1x128xf32>
      %25 = arith.divf %23, %24 : vector<1x128xf32>
      %26 = vector.broadcast %18 : vector<1x128xf32> to vector<512x128xf32>
      %27 = arith.subf %12, %26 : vector<512x128xf32>
      %cst_19 = arith.constant 9.99999974E-6 : f32
      %28 = vector.broadcast %cst_19 : f32 to vector<1x128xf32>
      %29 = arith.addf %25, %28 : vector<1x128xf32>
      %30 = math.rsqrt %29 : vector<1x128xf32>
      %31 = vector.broadcast %30 : vector<1x128xf32> to vector<512x128xf32>
      %32 = arith.mulf %27, %31 : vector<512x128xf32>
      %33 = vector.broadcast %13 : vector<1x128xf32> to vector<512x128xf32>
      %34 = arith.mulf %32, %33 : vector<512x128xf32>
      %35 = vector.broadcast %14 : vector<1x128xf32> to vector<512x128xf32>
      %36 = arith.addf %34, %35 : vector<512x128xf32>
      %cst_20 = arith.constant 0.000000e+00 : f32
      %37 = vector.broadcast %cst_20 : f32 to vector<512x128xf32>
      %38 = arith.cmpf ogt, %36, %37 : vector<512x128xf32>
      %cst_21 = arith.constant 2.000000e-01 : f32
      %39 = vector.broadcast %cst_21 : f32 to vector<512x128xf32>
      %40 = arith.mulf %39, %36 : vector<512x128xf32>
      %41 = arith.select %38, %36, %40 : vector<512x128xi1>, vector<512x128xf32>
      %c0_22 = arith.constant 0 : index
      %c0_23 = arith.constant 0 : index
      %42 = vector.load %arg5[%c0_22, %c0_23] : memref<512x128xf32, #tpu.memory_space<vmem>>, vector<512x128xf32>
      tpu.vector_store %arg5[%c0_22, %c0_23], %41 {strides = array<i32>} : memref<512x128xf32, #tpu.memory_space<vmem>>, vector<512x128xf32>,
    } else {
    }
    return
  }
  func.func @transform_0(%arg0: i32) -> (i32, i32) {
    %c0_i32 = arith.constant 0 : i32
    %c0_i32_0 = arith.constant 0 : i32
    return %c0_i32, %arg0 : i32, i32
  }
  func.func @transform_1(%arg0: i32) -> (i32, i32) {
    %c0_i32 = arith.constant 0 : i32
    %c0_i32_0 = arith.constant 0 : i32
    return %arg0, %c0_i32 : i32, i32
  }
  func.func @transform_2(%arg0: i32) -> (i32, i32) {
    %c0_i32 = arith.constant 0 : i32
    %c0_i32_0 = arith.constant 0 : i32
    %c0_i32_1 = arith.constant 0 : i32
    return %c0_i32, %c0_i32_0 : i32, i32
  }
  func.func @transform_3(%arg0: i32) -> (i32, i32) {
    %c0_i32 = arith.constant 0 : i32
    %c0_i32_0 = arith.constant 0 : i32
    %c0_i32_1 = arith.constant 0 : i32
    return %c0_i32, %c0_i32_0 : i32, i32
  }
  func.func @transform_4(%arg0: i32) -> (i32, i32) {
    %c0_i32 = arith.constant 0 : i32
    %c0_i32_0 = arith.constant 0 : i32
    %c0_i32_1 = arith.constant 0 : i32
    return %c0_i32, %c0_i32_0 : i32, i32
  }
}

module attributes {stable_mosaic.version = 11 : i64} {
  func.func @_conv_bn_lrelu_kernel(%arg0: i32, %arg1: memref<128x256xf32, #tpu.memory_space<vmem>>, %arg2: memref<256x256xf32, #tpu.memory_space<vmem>>, %arg3: memref<1x256xf32, #tpu.memory_space<vmem>>, %arg4: memref<1x256xf32, #tpu.memory_space<vmem>>, %arg5: memref<128x256xf32, #tpu.memory_space<vmem>>) attributes {dimension_semantics = [#tpu.dimension_semantics<arbitrary>], iteration_bounds = array<i64: 8>, scalar_prefetch = 0 : i64, scratch_operands = 0 : i64, tpu.core_type = #tpu.core_type<tc>, window_params = [{transform_indices = @transform_0, window_bounds = array<i64: 128, 256>}, {transform_indices = @transform_1, window_bounds = array<i64: 256, 256>}, {pipeline_mode = #tpu.pipeline_mode<synchronous>, transform_indices = @transform_2, window_bounds = array<i64: 1, 256>}, {pipeline_mode = #tpu.pipeline_mode<synchronous>, transform_indices = @transform_3, window_bounds = array<i64: 1, 256>}, {pipeline_mode = #tpu.pipeline_mode<synchronous>, transform_indices = @transform_4, window_bounds = array<i64: 128, 256>}]} {
    %c0_i32 = arith.constant 0 : i32
    %0 = arith.cmpi eq, %arg0, %c0_i32 : i32
    %1 = arith.extui %0 : i1 to i32
    %c0_i32_0 = arith.constant 0 : i32
    %2 = arith.cmpi ne, %1, %c0_i32_0 : i32
    scf.if %2 {
      %cst_9 = arith.constant 0.000000e+00 : f32
      %12 = vector.broadcast %cst_9 : f32 to vector<128x256xf32>
      %c0_10 = arith.constant 0 : index
      %c0_11 = arith.constant 0 : index
      %13 = vector.load %arg5[%c0_10, %c0_11] : memref<128x256xf32, #tpu.memory_space<vmem>>, vector<128x256xf32>
      tpu.vector_store %arg5[%c0_10, %c0_11], %12 {strides = array<i32>} : memref<128x256xf32, #tpu.memory_space<vmem>>, vector<128x256xf32>,
    } else {
    }
    %c0 = arith.constant 0 : index
    %c0_1 = arith.constant 0 : index
    %3 = vector.load %arg5[%c0, %c0_1] : memref<128x256xf32, #tpu.memory_space<vmem>>, vector<128x256xf32>
    %c0_2 = arith.constant 0 : index
    %c0_3 = arith.constant 0 : index
    %4 = vector.load %arg1[%c0_2, %c0_3] : memref<128x256xf32, #tpu.memory_space<vmem>>, vector<128x256xf32>
    %c0_4 = arith.constant 0 : index
    %c0_5 = arith.constant 0 : index
    %5 = vector.load %arg2[%c0_4, %c0_5] : memref<256x256xf32, #tpu.memory_space<vmem>>, vector<256x256xf32>
    %cst = arith.constant dense<0.000000e+00> : vector<128x256xf32>
    %6 = tpu.matmul %4, %5, %cst {dimension_numbers = #tpu.dot_dimension_numbers<[1], [0], [0], [1], [0, 0, 1, 1], [], []>} : vector<128x256xf32>, vector<256x256xf32>, vector<128x256xf32> -> vector<128x256xf32>
    %7 = arith.addf %3, %6 : vector<128x256xf32>
    %c0_6 = arith.constant 0 : index
    %c0_7 = arith.constant 0 : index
    %8 = vector.load %arg5[%c0_6, %c0_7] : memref<128x256xf32, #tpu.memory_space<vmem>>, vector<128x256xf32>
    tpu.vector_store %arg5[%c0_6, %c0_7], %7 {strides = array<i32>} : memref<128x256xf32, #tpu.memory_space<vmem>>, vector<128x256xf32>,
    %c7_i32 = arith.constant 7 : i32
    %9 = arith.cmpi eq, %arg0, %c7_i32 : i32
    %10 = arith.extui %9 : i1 to i32
    %c0_i32_8 = arith.constant 0 : i32
    %11 = arith.cmpi ne, %10, %c0_i32_8 : i32
    scf.if %11 {
      %c0_9 = arith.constant 0 : index
      %c0_10 = arith.constant 0 : index
      %12 = vector.load %arg5[%c0_9, %c0_10] : memref<128x256xf32, #tpu.memory_space<vmem>>, vector<128x256xf32>
      %c0_11 = arith.constant 0 : index
      %c0_12 = arith.constant 0 : index
      %13 = vector.load %arg3[%c0_11, %c0_12] : memref<1x256xf32, #tpu.memory_space<vmem>>, vector<1x256xf32>
      %c0_13 = arith.constant 0 : index
      %c0_14 = arith.constant 0 : index
      %14 = vector.load %arg4[%c0_13, %c0_14] : memref<1x256xf32, #tpu.memory_space<vmem>>, vector<1x256xf32>
      %cst_15 = arith.constant dense<0.000000e+00> : vector<256xf32>
      %15 = vector.multi_reduction <add>, %12, %cst_15 [0] : vector<128x256xf32> to vector<256xf32>
      %16 = vector.shape_cast %15 : vector<256xf32> to vector<1x256xf32>
      %cst_16 = arith.constant 1.280000e+02 : f32
      %17 = vector.broadcast %cst_16 : f32 to vector<1x256xf32>
      %18 = arith.divf %16, %17 : vector<1x256xf32>
      %19 = vector.broadcast %18 : vector<1x256xf32> to vector<128x256xf32>
      %20 = arith.subf %12, %19 : vector<128x256xf32>
      %21 = arith.mulf %20, %20 : vector<128x256xf32>
      %cst_17 = arith.constant dense<0.000000e+00> : vector<256xf32>
      %22 = vector.multi_reduction <add>, %21, %cst_17 [0] : vector<128x256xf32> to vector<256xf32>
      %23 = vector.shape_cast %22 : vector<256xf32> to vector<1x256xf32>
      %cst_18 = arith.constant 1.280000e+02 : f32
      %24 = vector.broadcast %cst_18 : f32 to vector<1x256xf32>
      %25 = arith.divf %23, %24 : vector<1x256xf32>
      %26 = vector.broadcast %18 : vector<1x256xf32> to vector<128x256xf32>
      %27 = arith.subf %12, %26 : vector<128x256xf32>
      %cst_19 = arith.constant 9.99999974E-6 : f32
      %28 = vector.broadcast %cst_19 : f32 to vector<1x256xf32>
      %29 = arith.addf %25, %28 : vector<1x256xf32>
      %30 = math.rsqrt %29 : vector<1x256xf32>
      %31 = vector.broadcast %30 : vector<1x256xf32> to vector<128x256xf32>
      %32 = arith.mulf %27, %31 : vector<128x256xf32>
      %33 = vector.broadcast %13 : vector<1x256xf32> to vector<128x256xf32>
      %34 = arith.mulf %32, %33 : vector<128x256xf32>
      %35 = vector.broadcast %14 : vector<1x256xf32> to vector<128x256xf32>
      %36 = arith.addf %34, %35 : vector<128x256xf32>
      %cst_20 = arith.constant 0.000000e+00 : f32
      %37 = vector.broadcast %cst_20 : f32 to vector<128x256xf32>
      %38 = arith.cmpf ogt, %36, %37 : vector<128x256xf32>
      %cst_21 = arith.constant 2.000000e-01 : f32
      %39 = vector.broadcast %cst_21 : f32 to vector<128x256xf32>
      %40 = arith.mulf %39, %36 : vector<128x256xf32>
      %41 = arith.select %38, %36, %40 : vector<128x256xi1>, vector<128x256xf32>
      %c0_22 = arith.constant 0 : index
      %c0_23 = arith.constant 0 : index
      %42 = vector.load %arg5[%c0_22, %c0_23] : memref<128x256xf32, #tpu.memory_space<vmem>>, vector<128x256xf32>
      tpu.vector_store %arg5[%c0_22, %c0_23], %41 {strides = array<i32>} : memref<128x256xf32, #tpu.memory_space<vmem>>, vector<128x256xf32>,
    } else {
    }
    return
  }
  func.func @transform_0(%arg0: i32) -> (i32, i32) {
    %c0_i32 = arith.constant 0 : i32
    %c0_i32_0 = arith.constant 0 : i32
    return %c0_i32, %arg0 : i32, i32
  }
  func.func @transform_1(%arg0: i32) -> (i32, i32) {
    %c0_i32 = arith.constant 0 : i32
    %c0_i32_0 = arith.constant 0 : i32
    return %arg0, %c0_i32 : i32, i32
  }
  func.func @transform_2(%arg0: i32) -> (i32, i32) {
    %c0_i32 = arith.constant 0 : i32
    %c0_i32_0 = arith.constant 0 : i32
    %c0_i32_1 = arith.constant 0 : i32
    return %c0_i32, %c0_i32_0 : i32, i32
  }
  func.func @transform_3(%arg0: i32) -> (i32, i32) {
    %c0_i32 = arith.constant 0 : i32
    %c0_i32_0 = arith.constant 0 : i32
    %c0_i32_1 = arith.constant 0 : i32
    return %c0_i32, %c0_i32_0 : i32, i32
  }
  func.func @transform_4(%arg0: i32) -> (i32, i32) {
    %c0_i32 = arith.constant 0 : i32
    %c0_i32_0 = arith.constant 0 : i32
    %c0_i32_1 = arith.constant 0 : i32
    return %c0_i32, %c0_i32_0 : i32, i32
  }
}

module attributes {stable_mosaic.version = 11 : i64} {
  func.func @_conv_bn_lrelu_head_kernel(%arg0: i32, %arg1: memref<32x512xf32, #tpu.memory_space<vmem>>, %arg2: memref<512x512xf32, #tpu.memory_space<vmem>>, %arg3: memref<1x512xf32, #tpu.memory_space<vmem>>, %arg4: memref<1x512xf32, #tpu.memory_space<vmem>>, %arg5: memref<16x512xf32, #tpu.memory_space<vmem>>, %arg6: memref<2x1xf32, #tpu.memory_space<vmem>>, %arg7: memref<32x512xf32, #tpu.memory_space<vmem>>) attributes {dimension_semantics = [#tpu.dimension_semantics<arbitrary>], iteration_bounds = array<i64: 8>, scalar_prefetch = 0 : i64, scratch_operands = 1 : i64, tpu.core_type = #tpu.core_type<tc>, window_params = [{transform_indices = @transform_0, window_bounds = array<i64: 32, 512>}, {transform_indices = @transform_1, window_bounds = array<i64: 512, 512>}, {pipeline_mode = #tpu.pipeline_mode<synchronous>, transform_indices = @transform_2, window_bounds = array<i64: 1, 512>}, {pipeline_mode = #tpu.pipeline_mode<synchronous>, transform_indices = @transform_3, window_bounds = array<i64: 1, 512>}, {pipeline_mode = #tpu.pipeline_mode<synchronous>, transform_indices = @transform_4, window_bounds = array<i64: 16, 512>}, {pipeline_mode = #tpu.pipeline_mode<synchronous>, transform_indices = @transform_5, window_bounds = array<i64: 2, 1>}]} {
    %c0_i32 = arith.constant 0 : i32
    %0 = arith.cmpi eq, %arg0, %c0_i32 : i32
    %1 = arith.extui %0 : i1 to i32
    %c0_i32_0 = arith.constant 0 : i32
    %2 = arith.cmpi ne, %1, %c0_i32_0 : i32
    scf.if %2 {
      %cst_9 = arith.constant 0.000000e+00 : f32
      %12 = vector.broadcast %cst_9 : f32 to vector<32x512xf32>
      %c0_10 = arith.constant 0 : index
      %c0_11 = arith.constant 0 : index
      %13 = vector.load %arg7[%c0_10, %c0_11] : memref<32x512xf32, #tpu.memory_space<vmem>>, vector<32x512xf32>
      tpu.vector_store %arg7[%c0_10, %c0_11], %12 {strides = array<i32>} : memref<32x512xf32, #tpu.memory_space<vmem>>, vector<32x512xf32>,
    } else {
    }
    %c0 = arith.constant 0 : index
    %c0_1 = arith.constant 0 : index
    %3 = vector.load %arg7[%c0, %c0_1] : memref<32x512xf32, #tpu.memory_space<vmem>>, vector<32x512xf32>
    %c0_2 = arith.constant 0 : index
    %c0_3 = arith.constant 0 : index
    %4 = vector.load %arg1[%c0_2, %c0_3] : memref<32x512xf32, #tpu.memory_space<vmem>>, vector<32x512xf32>
    %c0_4 = arith.constant 0 : index
    %c0_5 = arith.constant 0 : index
    %5 = vector.load %arg2[%c0_4, %c0_5] : memref<512x512xf32, #tpu.memory_space<vmem>>, vector<512x512xf32>
    %cst = arith.constant dense<0.000000e+00> : vector<32x512xf32>
    %6 = tpu.matmul %4, %5, %cst {dimension_numbers = #tpu.dot_dimension_numbers<[1], [0], [0], [1], [0, 0, 1, 1], [], []>} : vector<32x512xf32>, vector<512x512xf32>, vector<32x512xf32> -> vector<32x512xf32>
    %7 = arith.addf %3, %6 : vector<32x512xf32>
    %c0_6 = arith.constant 0 : index
    %c0_7 = arith.constant 0 : index
    %8 = vector.load %arg7[%c0_6, %c0_7] : memref<32x512xf32, #tpu.memory_space<vmem>>, vector<32x512xf32>
    tpu.vector_store %arg7[%c0_6, %c0_7], %7 {strides = array<i32>} : memref<32x512xf32, #tpu.memory_space<vmem>>, vector<32x512xf32>,
    %c7_i32 = arith.constant 7 : i32
    %9 = arith.cmpi eq, %arg0, %c7_i32 : i32
    %10 = arith.extui %9 : i1 to i32
    %c0_i32_8 = arith.constant 0 : i32
    %11 = arith.cmpi ne, %10, %c0_i32_8 : i32
    scf.if %11 {
      %c0_9 = arith.constant 0 : index
      %c0_10 = arith.constant 0 : index
      %12 = vector.load %arg7[%c0_9, %c0_10] : memref<32x512xf32, #tpu.memory_space<vmem>>, vector<32x512xf32>
      %c0_11 = arith.constant 0 : index
      %c0_12 = arith.constant 0 : index
      %13 = vector.load %arg3[%c0_11, %c0_12] : memref<1x512xf32, #tpu.memory_space<vmem>>, vector<1x512xf32>
      %c0_13 = arith.constant 0 : index
      %c0_14 = arith.constant 0 : index
      %14 = vector.load %arg4[%c0_13, %c0_14] : memref<1x512xf32, #tpu.memory_space<vmem>>, vector<1x512xf32>
      %cst_15 = arith.constant dense<0.000000e+00> : vector<512xf32>
      %15 = vector.multi_reduction <add>, %12, %cst_15 [0] : vector<32x512xf32> to vector<512xf32>
      %16 = vector.shape_cast %15 : vector<512xf32> to vector<1x512xf32>
      %cst_16 = arith.constant 3.200000e+01 : f32
      %17 = vector.broadcast %cst_16 : f32 to vector<1x512xf32>
      %18 = arith.divf %16, %17 : vector<1x512xf32>
      %19 = vector.broadcast %18 : vector<1x512xf32> to vector<32x512xf32>
      %20 = arith.subf %12, %19 : vector<32x512xf32>
      %21 = arith.mulf %20, %20 : vector<32x512xf32>
      %cst_17 = arith.constant dense<0.000000e+00> : vector<512xf32>
      %22 = vector.multi_reduction <add>, %21, %cst_17 [0] : vector<32x512xf32> to vector<512xf32>
      %23 = vector.shape_cast %22 : vector<512xf32> to vector<1x512xf32>
      %cst_18 = arith.constant 3.200000e+01 : f32
      %24 = vector.broadcast %cst_18 : f32 to vector<1x512xf32>
      %25 = arith.divf %23, %24 : vector<1x512xf32>
      %26 = vector.broadcast %18 : vector<1x512xf32> to vector<32x512xf32>
      %27 = arith.subf %12, %26 : vector<32x512xf32>
      %cst_19 = arith.constant 9.99999974E-6 : f32
      %28 = vector.broadcast %cst_19 : f32 to vector<1x512xf32>
      %29 = arith.addf %25, %28 : vector<1x512xf32>
      %30 = math.rsqrt %29 : vector<1x512xf32>
      %31 = vector.broadcast %30 : vector<1x512xf32> to vector<32x512xf32>
      %32 = arith.mulf %27, %31 : vector<32x512xf32>
      %33 = vector.broadcast %13 : vector<1x512xf32> to vector<32x512xf32>
      %34 = arith.mulf %32, %33 : vector<32x512xf32>
      %35 = vector.broadcast %14 : vector<1x512xf32> to vector<32x512xf32>
      %36 = arith.addf %34, %35 : vector<32x512xf32>
      %cst_20 = arith.constant 0.000000e+00 : f32
      %37 = vector.broadcast %cst_20 : f32 to vector<32x512xf32>
      %38 = arith.cmpf ogt, %36, %37 : vector<32x512xf32>
      %cst_21 = arith.constant 2.000000e-01 : f32
      %39 = vector.broadcast %cst_21 : f32 to vector<32x512xf32>
      %40 = arith.mulf %39, %36 : vector<32x512xf32>
      %41 = arith.select %38, %36, %40 : vector<32x512xi1>, vector<32x512xf32>
      %42 = vector.shape_cast %41 : vector<32x512xf32> to vector<2x16x512xf32>
      %c0_22 = arith.constant 0 : index
      %c0_23 = arith.constant 0 : index
      %43 = vector.load %arg5[%c0_22, %c0_23] : memref<16x512xf32, #tpu.memory_space<vmem>>, vector<16x512xf32>
      %44 = vector.shape_cast %43 : vector<16x512xf32> to vector<1x16x512xf32>
      %45 = vector.broadcast %44 : vector<1x16x512xf32> to vector<2x16x512xf32>
      %46 = arith.mulf %42, %45 : vector<2x16x512xf32>
      %cst_24 = arith.constant dense<0.000000e+00> : vector<2x512xf32>
      %47 = vector.multi_reduction <add>, %46, %cst_24 [1] : vector<2x16x512xf32> to vector<2x512xf32>
      %cst_25 = arith.constant dense<0.000000e+00> : vector<2xf32>
      %48 = vector.multi_reduction <add>, %47, %cst_25 [1] : vector<2x512xf32> to vector<2xf32>
      %49 = vector.shape_cast %48 : vector<2xf32> to vector<2x1xf32>
      %50 = arith.negf %49 : vector<2x1xf32>
      %51 = math.exp %50 : vector<2x1xf32>
      %cst_26 = arith.constant 1.000000e+00 : f32
      %52 = vector.broadcast %cst_26 : f32 to vector<2x1xf32>
      %53 = arith.addf %52, %51 : vector<2x1xf32>
      %54 = arith.divf %52, %53 : vector<2x1xf32>
      %c0_27 = arith.constant 0 : index
      %c0_28 = arith.constant 0 : index
      %55 = vector.load %arg6[%c0_27, %c0_28] : memref<2x1xf32, #tpu.memory_space<vmem>>, vector<2x1xf32>
      tpu.vector_store %arg6[%c0_27, %c0_28], %54 {strides = array<i32>} : memref<2x1xf32, #tpu.memory_space<vmem>>, vector<2x1xf32>,
    } else {
    }
    return
  }
  func.func @transform_0(%arg0: i32) -> (i32, i32) {
    %c0_i32 = arith.constant 0 : i32
    %c0_i32_0 = arith.constant 0 : i32
    return %c0_i32, %arg0 : i32, i32
  }
  func.func @transform_1(%arg0: i32) -> (i32, i32) {
    %c0_i32 = arith.constant 0 : i32
    %c0_i32_0 = arith.constant 0 : i32
    return %arg0, %c0_i32 : i32, i32
  }
  func.func @transform_2(%arg0: i32) -> (i32, i32) {
    %c0_i32 = arith.constant 0 : i32
    %c0_i32_0 = arith.constant 0 : i32
    %c0_i32_1 = arith.constant 0 : i32
    return %c0_i32, %c0_i32_0 : i32, i32
  }
  func.func @transform_3(%arg0: i32) -> (i32, i32) {
    %c0_i32 = arith.constant 0 : i32
    %c0_i32_0 = arith.constant 0 : i32
    %c0_i32_1 = arith.constant 0 : i32
    return %c0_i32, %c0_i32_0 : i32, i32
  }
  func.func @transform_4(%arg0: i32) -> (i32, i32) {
    %c0_i32 = arith.constant 0 : i32
    %c0_i32_0 = arith.constant 0 : i32
    %c0_i32_1 = arith.constant 0 : i32
    return %c0_i32, %c0_i32_0 : i32, i32
  }
  func.func @transform_5(%arg0: i32) -> (i32, i32) {
    %c0_i32 = arith.constant 0 : i32
    %c0_i32_0 = arith.constant 0 : i32
    %c0_i32_1 = arith.constant 0 : i32
    return %c0_i32, %c0_i32_0 : i32, i32
  }
}

</mosaic_0001>

<bundles_post_ra>
// kernel: discriminator_forward.4
= control target key start
LH: loop header
LB: loop body
LE: loop exit
PB: predicated region body
PF: predicated region fallthrough
CT: control target
= control target key end

     0   :  { %s695_s9 = smov 0   ;;  %s855_s0 = inlined_call_operand.vmem [shape: f32[1024,96], index: 0, kind: input, shape index: {}]   ;;  %s856_s1 = inlined_call_operand.vmem [shape: f32[96,128], index: 1, kind: input, shape index: {}]   ;;  %s857_s2 = inlined_call_operand.vmem [shape: f32[1024,128], index: 2, kind: output, shape index: {}]  }
   0x1 LB: > { %s585_s10 = sadd.s32 4294967295, %s678_s9   ;;  %p589_p0 = scmp.ge.s32.totalorder %s678_s9, 1  ;;  %s678_s9 = sphi %s695_s9, %s12_s9  }
   0x2   : > { %p113_p1 = scmp.lt.s32.totalorder %s678_s9, 5 }
   0x4   : > { %p114_p2 = pnand %p589_p0, %p113_p1 }
   0x5   : > { %s590_s19 = sshll.u32 (!%p114_p2), %s585_s10, 5 }
   0x6   : > { %117 = sbr.rel (%p114_p2) target bundleno = 228 (0xe4), region = 28  ;;  %p136_p3 = scmp.lt.s32.totalorder (!%p114_p2), %s590_s19, 127 }
   0xb   : > { %v190_v0 = vld [vmem:[%s856_s1 + $0x58] sm:$0xff]  ;;  %v189_v1 = vld [vmem:[%s856_s1 + $0x50] sm:$0xff]  ;;  %v188_v2 = vld [vmem:[%s856_s1 + $0x48] sm:$0xff]  ;;  %s859_s19 = smov (!%p136_p3, %s590_s19), 127  ;;  %vm191_vm0 = vcmask 785408  }
   0xc   : > { %629 = vmatpush.msra.mxu2 %v190_v0  ;;  %630 = vmatpush.msra.mxu3 %v190_v0  ;;  %v187_v3 = vld [vmem:[%s856_s1 + $0x40] sm:$0xff]  ;;  %v186_v4 = vld [vmem:[%s856_s1 + $0x38] sm:$0xff]  ;;  %v185_v5 = vld [vmem:[%s856_s1 + $0x30] sm:$0xff]  ;;  %s591_s30 = sshll.u32 %s859_s19, 3 }
   0xd   : > { %292 = vmatpush.msra.mxu0 %v190_v0  ;;  %628 = vmatpush.msra.mxu1 %v190_v0  ;;  %v184_v6 = vld [vmem:[%s856_s1 + $0x28] sm:$0xff]  ;;  %v183_v7 = vld [vmem:[%s856_s1 + $0x20] sm:$0xff]  ;;  %v182_v8 = vld [vmem:[%s856_s1 + $0x18] sm:$0xff]  ;;  %s744_s10 = scalar_lea.vmem %s855_s0, %s591_s30  ;;  %s818_s15 = scalar_lea.vmem %s857_s2, %s591_s30 }
   0xe   : > { %632 = vmatpush.msra.mxu2 %v189_v1  ;;  %633 = vmatpush.msra.mxu3 %v189_v1  ;;  %v181_v9 = vld [vmem:[%s856_s1 + $0x10] sm:$0xff]  ;;  %v180_v10 = vld [vmem:[%s856_s1 + $0x8] sm:$0xff]  ;;  %v179_v11 = vld [vmem:[%s856_s1] sm:$0xff] }
   0xf   : > { %293 = vmatpush.msra.mxu0 %v189_v1  ;;  %631 = vmatpush.msra.mxu1 %v189_v1  ;;  %v163_v12 = vld [vmem:[%s744_s10 + $0x80] sm:$0xff]  ;;  %v164_v16 = vld [vmem:[%s744_s10 + $0x88] sm:$0xff]  ;;  %v165_v20 = vld [vmem:[%s744_s10 + $0x90] sm:$0xff] }
  0x10   : > { %635 = vmatpush.msra.mxu2 %v188_v2  ;;  %636 = vmatpush.msra.mxu3 %v188_v2  ;;  %v171_v13 = vld [vmem:[%s744_s10 + $0xc0] sm:$0xff]  ;;  %v172_v17 = vld [vmem:[%s744_s10 + $0xc8] sm:$0xff]  ;;  %v173_v21 = vld [vmem:[%s744_s10 + $0xd0] sm:$0xff] }
  0x11   : > { %294 = vmatpush.msra.mxu0 %v188_v2  ;;  %634 = vmatpush.msra.mxu1 %v188_v2  ;;  %v147_v14 = vld [vmem:[%s744_s10] sm:$0xff]  ;;  %v148_v18 = vld [vmem:[%s744_s10 + $0x8] sm:$0xff]  ;;  %v149_v22 = vld [vmem:[%s744_s10 + $0x10] sm:$0xff] }
  0x12   : > { %638 = vmatpush.msra.mxu2 %v187_v3  ;;  %639 = vmatpush.msra.mxu3 %v187_v3  ;;  %v155_v15 = vld [vmem:[%s744_s10 + $0x40] sm:$0xff]  ;;  %v156_v19 = vld [vmem:[%s744_s10 + $0x48] sm:$0xff]  ;;  %v157_v23 = vld [vmem:[%s744_s10 + $0x50] sm:$0xff] }
  0x13   : > { %295 = vmatpush.msra.mxu0 %v187_v3  ;;  %637 = vmatpush.msra.mxu1 %v187_v3  ;;  %v166_v24 = vld [vmem:[%s744_s10 + $0x98] sm:$0xff]  ;;  %v167_v28 = vld [vmem:[%s744_s10 + $0xa0] sm:$0xff]  ;;  %v168_v32 = vld [vmem:[%s744_s10 + $0xa8] sm:$0xff] }
  0x14   : > { %641 = vmatpush.msra.mxu2 %v186_v4  ;;  %642 = vmatpush.msra.mxu3 %v186_v4  ;;  %v174_v25 = vld [vmem:[%s744_s10 + $0xd8] sm:$0xff]  ;;  %v175_v29 = vld [vmem:[%s744_s10 + $0xe0] sm:$0xff]  ;;  %v176_v33 = vld [vmem:[%s744_s10 + $0xe8] sm:$0xff] }
  0x15   : > { %296 = vmatpush.msra.mxu0 %v186_v4  ;;  %640 = vmatpush.msra.mxu1 %v186_v4  ;;  %v150_v26 = vld [vmem:[%s744_s10 + $0x18] sm:$0xff]  ;;  %v151_v30 = vld [vmem:[%s744_s10 + $0x20] sm:$0xff]  ;;  %v152_v34 = vld [vmem:[%s744_s10 + $0x28] sm:$0xff] }
  0x16   : > { %644 = vmatpush.msra.mxu2 %v185_v5  ;;  %645 = vmatpush.msra.mxu3 %v185_v5  ;;  %v158_v27 = vld [vmem:[%s744_s10 + $0x58] sm:$0xff]  ;;  %v159_v31 = vld [vmem:[%s744_s10 + $0x60] sm:$0xff]  ;;  %v160_v35 = vld [vmem:[%s744_s10 + $0x68] sm:$0xff] }
  0x17   : > { %297 = vmatpush.msra.mxu0 %v185_v5  ;;  %643 = vmatpush.msra.mxu1 %v185_v5  ;;  %v169_v36 = vld [vmem:[%s744_s10 + $0xb0] sm:$0xff]  ;;  %v170_v40 = vld [vmem:[%s744_s10 + $0xb8] sm:$0xff] }
  0x18   : > { %647 = vmatpush.msra.mxu2 %v184_v6  ;;  %648 = vmatpush.msra.mxu3 %v184_v6  ;;  %v177_v37 = vld [vmem:[%s744_s10 + $0xf0] sm:$0xff]  ;;  %v178_v41 = vld [vmem:[%s744_s10 + $0xf8] sm:$0xff] }
  0x19   : > { %298 = vmatpush.msra.mxu0 %v184_v6  ;;  %646 = vmatpush.msra.mxu1 %v184_v6  ;;  %v153_v38 = vld [vmem:[%s744_s10 + $0x30] sm:$0xff]  ;;  %v154_v42 = vld [vmem:[%s744_s10 + $0x38] sm:$0xff] }
  0x1a   : > { %650 = vmatpush.msra.mxu2 %v183_v7  ;;  %651 = vmatpush.msra.mxu3 %v183_v7  ;;  %v161_v39 = vld [vmem:[%s744_s10 + $0x70] sm:$0xff]  ;;  %v162_v43 = vld [vmem:[%s744_s10 + $0x78] sm:$0xff] }
  0x1b   : > { %299 = vmatpush.msra.mxu0 %v183_v7  ;;  %649 = vmatpush.msra.mxu1 %v183_v7 }
  0x1c   : > { %653 = vmatpush.msra.mxu2 %v182_v8  ;;  %654 = vmatpush.msra.mxu3 %v182_v8 }
  0x1d   : > { %300 = vmatpush.msra.mxu0 %v182_v8  ;;  %652 = vmatpush.msra.mxu1 %v182_v8 }
  0x1e   : > { %656 = vmatpush.msra.mxu2 %v181_v9  ;;  %657 = vmatpush.msra.mxu3 %v181_v9 }
  0x1f   : > { %301 = vmatpush.msra.mxu0 %v181_v9  ;;  %655 = vmatpush.msra.mxu1 %v181_v9 }
  0x20   : > { %659 = vmatpush.msra.mxu2 %v180_v10  ;;  %660 = vmatpush.msra.mxu3 %v180_v10 }
  0x21   : > { %302 = vmatpush.msra.mxu0 %v180_v10  ;;  %658 = vmatpush.msra.mxu1 %v180_v10 }
  0x22   : > { %662 = vmatpush.msra.mxu2 %v179_v11  ;;  %663 = vmatpush.msra.mxu3 %v179_v11 }
  0x23   : > { %610 = vmatmul.msk.f32.vlgmr.msra.gmra.mxu2 %vm191_vm0, %v163_v12  ;;  %618 = vmatmul.msk.f32.vlgmr.msra.gmra.mxu3 %vm191_vm0, %v171_v13 }
  0x24   : > { %303 = vmatpush.msra.mxu0 %v179_v11  ;;  %661 = vmatpush.msra.mxu1 %v179_v11 }
  0x25   : > { %594 = vmatmul.msk.f32.vlgmr.msra.gmra.mxu0 %vm191_vm0, %v147_v14  ;;  %602 = vmatmul.msk.f32.vlgmr.msra.gmra.mxu1 %vm191_vm0, %v155_v15 }
  0x2b   : > { %611 = vmatmul.msk.f32.gmra.mxu2 %vm191_vm0, %v164_v16  ;;  %619 = vmatmul.msk.f32.gmra.mxu3 %vm191_vm0, %v172_v17 }
  0x2d   : > { %595 = vmatmul.msk.f32.gmra.mxu0 %vm191_vm0, %v148_v18  ;;  %603 = vmatmul.msk.f32.gmra.mxu1 %vm191_vm0, %v156_v19 }
  0x33   : > { %612 = vmatmul.msk.f32.gmra.mxu2 %vm191_vm0, %v165_v20  ;;  %620 = vmatmul.msk.f32.gmra.mxu3 %vm191_vm0, %v173_v21 }
  0x35   : > { %596 = vmatmul.msk.f32.gmra.mxu0 %vm191_vm0, %v149_v22  ;;  %604 = vmatmul.msk.f32.gmra.mxu1 %vm191_vm0, %v157_v23 }
  0x3b   : > { %613 = vmatmul.msk.f32.gmra.mxu2 %vm191_vm0, %v166_v24  ;;  %621 = vmatmul.msk.f32.gmra.mxu3 %vm191_vm0, %v174_v25 }
  0x3d   : > { %597 = vmatmul.msk.f32.gmra.mxu0 %vm191_vm0, %v150_v26  ;;  %605 = vmatmul.msk.f32.gmra.mxu1 %vm191_vm0, %v158_v27 }
  0x43   : > { %614 = vmatmul.msk.f32.gmra.mxu2 %vm191_vm0, %v167_v28  ;;  %622 = vmatmul.msk.f32.gmra.mxu3 %vm191_vm0, %v175_v29 }
  0x45   : > { %598 = vmatmul.msk.f32.gmra.mxu0 %vm191_vm0, %v151_v30  ;;  %606 = vmatmul.msk.f32.gmra.mxu1 %vm191_vm0, %v159_v31 }
  0x4b   : > { %615 = vmatmul.msk.f32.gmra.mxu2 %vm191_vm0, %v168_v32  ;;  %623 = vmatmul.msk.f32.gmra.mxu3 %vm191_vm0, %v176_v33 }
  0x4d   : > { %599 = vmatmul.msk.f32.gmra.mxu0 %vm191_vm0, %v152_v34  ;;  %607 = vmatmul.msk.f32.gmra.mxu1 %vm191_vm0, %v160_v35 }
  0x53   : > { %616 = vmatmul.msk.f32.gmra.mxu2 %vm191_vm0, %v169_v36  ;;  %624 = vmatmul.msk.f32.gmra.mxu3 %vm191_vm0, %v177_v37 }
  0x55   : > { %600 = vmatmul.msk.f32.gmra.mxu0 %vm191_vm0, %v153_v38  ;;  %608 = vmatmul.msk.f32.gmra.mxu1 %vm191_vm0, %v161_v39 }
  0x5b   : > { %617 = vmatmul.msk.f32.gmra.mxu2 %vm191_vm0, %v170_v40  ;;  %625 = vmatmul.msk.f32.gmra.mxu3 %vm191_vm0, %v178_v41 }
  0x5d   : > { %601 = vmatmul.msk.f32.gmra.mxu0 %vm191_vm0, %v154_v42  ;;  %609 = vmatmul.msk.f32.gmra.mxu1 %vm191_vm0, %v162_v43 }
  0xa2   : > { %v305_v44 = vpop.f32.mrf.mxu0  ;;  %v329_v45 = vpop.f32.mrf.mxu1 }
  0xa3   : > { %vm401_vm1 = vcmp.gt.f32.partialorder %v305_v44, 0.0  ;;  %v433_v46 = vmul.f32 0.2, %v305_v44  ;;  %vm409_vm2 = vcmp.gt.f32.partialorder %v329_v45, 0.0  ;;  %v441_v47 = vmul.f32 0.2, %v329_v45 }
  0xa5   : > { %v465_v48 = vsel %vm401_vm1, %v305_v44, %v433_v46  ;;  %v473_v49 = vsel %vm409_vm2, %v329_v45, %v441_v47 }
  0xa6   : > { %497 = vst [vmem:[%s818_s15] sm:$0xff] %v465_v48  ;;  %v353_v50 = vpop.f32.mrf.mxu2  ;;  %v377_v51 = vpop.f32.mrf.mxu3 }
  0xa7   : > { %505 = vst [vmem:[%s818_s15 + $0x40] sm:$0xff] %v473_v49  ;;  %vm417_vm3 = vcmp.gt.f32.partialorder %v353_v50, 0.0  ;;  %v449_v52 = vmul.f32 0.2, %v353_v50  ;;  %vm425_vm4 = vcmp.gt.f32.partialorder %v377_v51, 0.0 }
  0xa8   : > { %v457_v53 = vmul.f32 0.2, %v377_v51 }
  0xa9   : > { %v481_v54 = vsel %vm417_vm3, %v353_v50, %v449_v52 }
  0xaa   : > { %513 = vst [vmem:[%s818_s15 + $0x80] sm:$0xff] %v481_v54  ;;  %v489_v55 = vsel %vm425_vm4, %v377_v51, %v457_v53  ;;  %v308_v56 = vpop.f32.mrf.mxu0  ;;  %v332_v57 = vpop.f32.mrf.mxu1 }
  0xab   : > { %521 = vst [vmem:[%s818_s15 + $0xc0] sm:$0xff] %v489_v55  ;;  %vm402_vm5 = vcmp.gt.f32.partialorder %v308_v56, 0.0  ;;  %v434_v58 = vmul.f32 0.2, %v308_v56  ;;  %vm410_vm6 = vcmp.gt.f32.partialorder %v332_v57, 0.0 }
  0xac   : > { %v442_v59 = vmul.f32 0.2, %v332_v57 }
  0xad   : > { %v466_v60 = vsel %vm402_vm5, %v308_v56, %v434_v58 }
  0xae   : > { %498 = vst [vmem:[%s818_s15 + $0x8] sm:$0xff] %v466_v60  ;;  %v474_v61 = vsel %vm410_vm6, %v332_v57, %v442_v59  ;;  %v356_v62 = vpop.f32.mrf.mxu2  ;;  %v380_v63 = vpop.f32.mrf.mxu3 }
  0xaf   : > { %506 = vst [vmem:[%s818_s15 + $0x48] sm:$0xff] %v474_v61  ;;  %vm418_vm7 = vcmp.gt.f32.partialorder %v356_v62, 0.0  ;;  %v450_v0 = vmul.f32 0.2, %v356_v62  ;;  %vm426_vm8 = vcmp.gt.f32.partialorder %v380_v63, 0.0 }
  0xb0   : > { %v458_v1 = vmul.f32 0.2, %v380_v63 }
  0xb1   : > { %v482_v2 = vsel %vm418_vm7, %v356_v62, %v450_v0 }
  0xb2   : > { %514 = vst [vmem:[%s818_s15 + $0x88] sm:$0xff] %v482_v2  ;;  %v490_v3 = vsel %vm426_vm8, %v380_v63, %v458_v1  ;;  %v311_v4 = vpop.f32.mrf.mxu0  ;;  %v335_v5 = vpop.f32.mrf.mxu1 }
  0xb3   : > { %522 = vst [vmem:[%s818_s15 + $0xc8] sm:$0xff] %v490_v3  ;;  %vm403_vm9 = vcmp.gt.f32.partialorder %v311_v4, 0.0  ;;  %v435_v6 = vmul.f32 0.2, %v311_v4  ;;  %vm411_vm10 = vcmp.gt.f32.partialorder %v335_v5, 0.0 }
  0xb4   : > { %v443_v7 = vmul.f32 0.2, %v335_v5 }
  0xb5   : > { %v467_v8 = vsel %vm403_vm9, %v311_v4, %v435_v6 }
  0xb6   : > { %499 = vst [vmem:[%s818_s15 + $0x10] sm:$0xff] %v467_v8  ;;  %v475_v9 = vsel %vm411_vm10, %v335_v5, %v443_v7  ;;  %v359_v10 = vpop.f32.mrf.mxu2  ;;  %v383_v11 = vpop.f32.mrf.mxu3 }
  0xb7   : > { %507 = vst [vmem:[%s818_s15 + $0x50] sm:$0xff] %v475_v9  ;;  %vm419_vm11 = vcmp.gt.f32.partialorder %v359_v10, 0.0  ;;  %v451_v12 = vmul.f32 0.2, %v359_v10  ;;  %vm427_vm12 = vcmp.gt.f32.partialorder %v383_v11, 0.0 }
  0xb8   : > { %v459_v13 = vmul.f32 0.2, %v383_v11 }
  0xb9   : > { %v483_v14 = vsel %vm419_vm11, %v359_v10, %v451_v12 }
  0xba   : > { %515 = vst [vmem:[%s818_s15 + $0x90] sm:$0xff] %v483_v14  ;;  %v491_v15 = vsel %vm427_vm12, %v383_v11, %v459_v13  ;;  %v314_v16 = vpop.f32.mrf.mxu0  ;;  %v338_v17 = vpop.f32.mrf.mxu1 }
  0xbb   : > { %523 = vst [vmem:[%s818_s15 + $0xd0] sm:$0xff] %v491_v15  ;;  %vm404_vm13 = vcmp.gt.f32.partialorder %v314_v16, 0.0  ;;  %v436_v18 = vmul.f32 0.2, %v314_v16  ;;  %vm412_vm14 = vcmp.gt.f32.partialorder %v338_v17, 0.0 }
  0xbc   : > { %v444_v19 = vmul.f32 0.2, %v338_v17 }
  0xbd   : > { %v468_v20 = vsel %vm404_vm13, %v314_v16, %v436_v18 }
  0xbe   : > { %500 = vst [vmem:[%s818_s15 + $0x18] sm:$0xff] %v468_v20  ;;  %v476_v21 = vsel %vm412_vm14, %v338_v17, %v444_v19  ;;  %v362_v22 = vpop.f32.mrf.mxu2  ;;  %v386_v23 = vpop.f32.mrf.mxu3 }
  0xbf   : > { %508 = vst [vmem:[%s818_s15 + $0x58] sm:$0xff] %v476_v21  ;;  %vm420_vm15 = vcmp.gt.f32.partialorder %v362_v22, 0.0  ;;  %v452_v24 = vmul.f32 0.2, %v362_v22  ;;  %vm428_vm0 = vcmp.gt.f32.partialorder %v386_v23, 0.0 }
  0xc0   : > { %v460_v25 = vmul.f32 0.2, %v386_v23 }
  0xc1   : > { %v484_v26 = vsel %vm420_vm15, %v362_v22, %v452_v24 }
  0xc2   : > { %516 = vst [vmem:[%s818_s15 + $0x98] sm:$0xff] %v484_v26  ;;  %v492_v27 = vsel %vm428_vm0, %v386_v23, %v460_v25  ;;  %v317_v28 = vpop.f32.mrf.mxu0  ;;  %v341_v29 = vpop.f32.mrf.mxu1 }
  0xc3   : > { %524 = vst [vmem:[%s818_s15 + $0xd8] sm:$0xff] %v492_v27  ;;  %vm405_vm1 = vcmp.gt.f32.partialorder %v317_v28, 0.0  ;;  %v437_v30 = vmul.f32 0.2, %v317_v28  ;;  %vm413_vm2 = vcmp.gt.f32.partialorder %v341_v29, 0.0 }
  0xc4   : > { %v445_v31 = vmul.f32 0.2, %v341_v29 }
  0xc5   : > { %v469_v32 = vsel %vm405_vm1, %v317_v28, %v437_v30 }
  0xc6   : > { %501 = vst [vmem:[%s818_s15 + $0x20] sm:$0xff] %v469_v32  ;;  %v477_v33 = vsel %vm413_vm2, %v341_v29, %v445_v31  ;;  %v365_v34 = vpop.f32.mrf.mxu2  ;;  %v389_v35 = vpop.f32.mrf.mxu3 }
  0xc7   : > { %509 = vst [vmem:[%s818_s15 + $0x60] sm:$0xff] %v477_v33  ;;  %vm421_vm3 = vcmp.gt.f32.partialorder %v365_v34, 0.0  ;;  %v453_v36 = vmul.f32 0.2, %v365_v34  ;;  %vm429_vm4 = vcmp.gt.f32.partialorder %v389_v35, 0.0 }
  0xc8   : > { %v461_v37 = vmul.f32 0.2, %v389_v35 }
  0xc9   : > { %v485_v38 = vsel %vm421_vm3, %v365_v34, %v453_v36 }
  0xca   : > { %517 = vst [vmem:[%s818_s15 + $0xa0] sm:$0xff] %v485_v38  ;;  %v493_v39 = vsel %vm429_vm4, %v389_v35, %v461_v37  ;;  %v320_v40 = vpop.f32.mrf.mxu0  ;;  %v344_v41 = vpop.f32.mrf.mxu1 }
  0xcb   : > { %525 = vst [vmem:[%s818_s15 + $0xe0] sm:$0xff] %v493_v39  ;;  %vm406_vm5 = vcmp.gt.f32.partialorder %v320_v40, 0.0  ;;  %v438_v42 = vmul.f32 0.2, %v320_v40  ;;  %vm414_vm6 = vcmp.gt.f32.partialorder %v344_v41, 0.0 }
  0xcc   : > { %v446_v43 = vmul.f32 0.2, %v344_v41 }
  0xcd   : > { %v470_v44 = vsel %vm406_vm5, %v320_v40, %v438_v42 }
  0xce   : > { %502 = vst [vmem:[%s818_s15 + $0x28] sm:$0xff] %v470_v44  ;;  %v478_v45 = vsel %vm414_vm6, %v344_v41, %v446_v43  ;;  %v368_v46 = vpop.f32.mrf.mxu2  ;;  %v392_v47 = vpop.f32.mrf.mxu3 }
  0xcf   : > { %510 = vst [vmem:[%s818_s15 + $0x68] sm:$0xff] %v478_v45  ;;  %vm422_vm7 = vcmp.gt.f32.partialorder %v368_v46, 0.0  ;;  %v454_v48 = vmul.f32 0.2, %v368_v46  ;;  %vm430_vm8 = vcmp.gt.f32.partialorder %v392_v47, 0.0 }
  0xd0   : > { %v462_v49 = vmul.f32 0.2, %v392_v47 }
  0xd1   : > { %v486_v50 = vsel %vm422_vm7, %v368_v46, %v454_v48 }
  0xd2   : > { %518 = vst [vmem:[%s818_s15 + $0xa8] sm:$0xff] %v486_v50  ;;  %v494_v51 = vsel %vm430_vm8, %v392_v47, %v462_v49  ;;  %v323_v52 = vpop.f32.mrf.mxu0  ;;  %v347_v53 = vpop.f32.mrf.mxu1 }
  0xd3   : > { %526 = vst [vmem:[%s818_s15 + $0xe8] sm:$0xff] %v494_v51  ;;  %vm407_vm9 = vcmp.gt.f32.partialorder %v323_v52, 0.0  ;;  %v439_v54 = vmul.f32 0.2, %v323_v52  ;;  %vm415_vm10 = vcmp.gt.f32.partialorder %v347_v53, 0.0 }
  0xd4   : > { %v447_v55 = vmul.f32 0.2, %v347_v53 }
  0xd5   : > { %v471_v56 = vsel %vm407_vm9, %v323_v52, %v439_v54 }
  0xd6   : > { %503 = vst [vmem:[%s818_s15 + $0x30] sm:$0xff] %v471_v56  ;;  %v479_v57 = vsel %vm415_vm10, %v347_v53, %v447_v55  ;;  %v371_v58 = vpop.f32.mrf.mxu2  ;;  %v395_v59 = vpop.f32.mrf.mxu3 }
  0xd7   : > { %511 = vst [vmem:[%s818_s15 + $0x70] sm:$0xff] %v479_v57  ;;  %vm423_vm11 = vcmp.gt.f32.partialorder %v371_v58, 0.0  ;;  %v455_v60 = vmul.f32 0.2, %v371_v58  ;;  %vm431_vm12 = vcmp.gt.f32.partialorder %v395_v59, 0.0 }
  0xd8   : > { %v463_v61 = vmul.f32 0.2, %v395_v59 }
  0xd9   : > { %v487_v62 = vsel %vm423_vm11, %v371_v58, %v455_v60 }
  0xda   : > { %519 = vst [vmem:[%s818_s15 + $0xb0] sm:$0xff] %v487_v62  ;;  %v495_v63 = vsel %vm431_vm12, %v395_v59, %v463_v61  ;;  %v326_v0 = vpop.f32.mrf.mxu0  ;;  %v350_v1 = vpop.f32.mrf.mxu1 }
  0xdb   : > { %527 = vst [vmem:[%s818_s15 + $0xf0] sm:$0xff] %v495_v63  ;;  %vm408_vm13 = vcmp.gt.f32.partialorder %v326_v0, 0.0  ;;  %v440_v2 = vmul.f32 0.2, %v326_v0  ;;  %vm416_vm14 = vcmp.gt.f32.partialorder %v350_v1, 0.0 }
  0xdc   : > { %v448_v3 = vmul.f32 0.2, %v350_v1 }
  0xdd   : > { %v472_v4 = vsel %vm408_vm13, %v326_v0, %v440_v2 }
  0xde   : > { %504 = vst [vmem:[%s818_s15 + $0x38] sm:$0xff] %v472_v4  ;;  %v480_v5 = vsel %vm416_vm14, %v350_v1, %v448_v3  ;;  %v374_v6 = vpop.f32.mrf.mxu2  ;;  %v398_v7 = vpop.f32.mrf.mxu3 }
  0xdf   : > { %512 = vst [vmem:[%s818_s15 + $0x78] sm:$0xff] %v480_v5  ;;  %vm424_vm15 = vcmp.gt.f32.partialorder %v374_v6, 0.0  ;;  %v456_v8 = vmul.f32 0.2, %v374_v6  ;;  %vm432_vm0 = vcmp.gt.f32.partialorder %v398_v7, 0.0 }
  0xe0   : > { %v464_v9 = vmul.f32 0.2, %v398_v7 }
  0xe1   : > { %v488_v10 = vsel %vm424_vm15, %v374_v6, %v456_v8 }
  0xe2   : > { %520 = vst [vmem:[%s818_s15 + $0xb8] sm:$0xff] %v488_v10  ;;  %v496_v11 = vsel %vm432_vm0, %v398_v7, %v464_v9 }
  0xe3   : > { %528 = vst [vmem:[%s818_s15 + $0xf8] sm:$0xff] %v496_v11 }
  0xe4 PF: > { %s12_s9 = sadd.s32 1, %s678_s9  }
  0xe5   : > { %p9_p4 = scmp.ge.s32.totalorder %s12_s9, 6  }
  0xe7   :  { %11 = sbr.rel (!%p9_p4) target bundleno = 1 (0x1), region = 58 }

// kernel: discriminator_forward.5
= control target key start
LH: loop header
LB: loop body
LE: loop exit
PB: predicated region body
PF: predicated region fallthrough
CT: control target
= control target key end

     0   :  { %s2304_s15 = smov 0   ;;  %s2306_s16 = smov 0   ;;  %s4657_s0 = inlined_call_operand.vmem [shape: f32[512,1024], index: 0, kind: input, shape index: {}]   ;;  %s4658_s1 = inlined_call_operand.vmem [shape: f32[1024,128], index: 1, kind: input, shape index: {}]   ;;  %s4659_s2 = inlined_call_operand.vmem [shape: f32[1,128], index: 2, kind: input, shape index: {}]   ;;  %s4660_s3 = inlined_call_operand.vmem [shape: f32[1,128], index: 3, kind: input, shape index: {}]   ;;  %s4661_s4 = inlined_call_operand.vmem [shape: f32[512,128], index: 4, kind: output, shape index: {}]  }
   0x1   :  { %s2308_s17 = smov 0  }
   0x2 LB: > { %s2320_s18 = sadd.s32 4294967295, %s2275_s17   ;;  %s2323_s19 = sadd.s32 1, %s2275_s17   ;;  %s2275_s17 = sphi %s2308_s17, %s4775_s17   ;;  %s2271_s16 = sphi %s2306_s16, %s4774_s16   ;;  %s2267_s15 = sphi %s2304_s15, %s4773_s15  }
   0x3   : > { %s18_s20 = ssub.s32 %s2275_s17, %s2323_s19  ;;  %s21_s21 = sadd.s32 1, %s2271_s16 }
   0x4   : > { %p19_p0 = scmp.eq.s32.totalorder %s18_s20, 0  ;;  %p28_p1 = scmp.ne.s32.totalorder %s2271_s16, %s2267_s15 }
   0x5   : > { %p29_p2 = scmp.eq.s32.totalorder %s2275_s17, 0  ;;  %p2176_p4 = scmp.ge.s32.totalorder %s2275_s17, 4 }
   0x6   : > { %s2332_s22 = scalar_select %p19_p0, %s2271_s16, %s21_s21  }
   0x7   : > { %p30_p3 = por %p29_p2, %p28_p1  ;;  %149 = sbr.rel (%p2176_p4) target bundleno = 144 (0x90), region = 24 }
   0xc   : > { %152 = sbr.rel (!%p30_p3) target bundleno = 144 (0x90), region = 28  ;;  %s154_s23 = sand.u32 (%p30_p3), 1, %s2271_s16  }
   0xd   : > { %s2188_s24 = sshll.u32 (%p30_p3), %s2275_s17, 4  ;;  %s2177_s25 = sshll.u32 (%p30_p3), %s154_s23, 10 }
   0xe   : > { %s2340_s28 = scalar_lea.vmem (%p30_p3), %s4657_s0, %s2188_s24  ;;  %s2345_s29 = scalar_lea.vmem (%p30_p3), [#allocation2], %s2177_s25 }
   0xf   : > { %v172_v0 = vld [vmem:[%s2340_s28] sm:$0xff] (%p30_p3)  ;;  %v174_v1 = vld [vmem:[%s2340_s28 + $0x8] sm:$0xff] (%p30_p3) }
  0x10   : > { %v176_v2 = vld [vmem:[%s2340_s28 + $0x40] sm:$0xff] (%p30_p3)  ;;  %173 = vst [vmem:[%s2345_s29] sm:$0xff] (%p30_p3), %v172_v0  ;;  %v178_v3 = vld [vmem:[%s2340_s28 + $0x48] sm:$0xff] (%p30_p3) }
  0x11   : > { %175 = vst [vmem:[%s2345_s29 + $0x8] sm:$0xff] %v174_v1  ;;  %v180_v4 = vld [vmem:[%s2340_s28 + $0x80] sm:$0xff]  ;;  %v182_v5 = vld [vmem:[%s2340_s28 + $0x88] sm:$0xff] }
  0x12   : > { %177 = vst [vmem:[%s2345_s29 + $0x10] sm:$0xff] %v176_v2  ;;  %v184_v6 = vld [vmem:[%s2340_s28 + $0xc0] sm:$0xff]  ;;  %v186_v7 = vld [vmem:[%s2340_s28 + $0xc8] sm:$0xff] }
  0x13   : > { %179 = vst [vmem:[%s2345_s29 + $0x18] sm:$0xff] %v178_v3  ;;  %v188_v8 = vld [vmem:[%s2340_s28 + $0x100] sm:$0xff]  ;;  %v190_v9 = vld [vmem:[%s2340_s28 + $0x108] sm:$0xff] }
  0x14   : > { %181 = vst [vmem:[%s2345_s29 + $0x20] sm:$0xff] %v180_v4  ;;  %v192_v10 = vld [vmem:[%s2340_s28 + $0x140] sm:$0xff]  ;;  %v194_v11 = vld [vmem:[%s2340_s28 + $0x148] sm:$0xff] }
  0x15   : > { %183 = vst [vmem:[%s2345_s29 + $0x28] sm:$0xff] %v182_v5  ;;  %v196_v12 = vld [vmem:[%s2340_s28 + $0x180] sm:$0xff]  ;;  %v198_v13 = vld [vmem:[%s2340_s28 + $0x188] sm:$0xff] }
  0x16   : > { %185 = vst [vmem:[%s2345_s29 + $0x30] sm:$0xff] %v184_v6  ;;  %v200_v14 = vld [vmem:[%s2340_s28 + $0x1c0] sm:$0xff]  ;;  %v202_v15 = vld [vmem:[%s2340_s28 + $0x1c8] sm:$0xff] }
  0x17   : > { %187 = vst [vmem:[%s2345_s29 + $0x38] sm:$0xff] %v186_v7  ;;  %v204_v16 = vld [vmem:[%s2340_s28 + $0x200] sm:$0xff]  ;;  %v206_v17 = vld [vmem:[%s2340_s28 + $0x208] sm:$0xff] }
  0x18   : > { %189 = vst [vmem:[%s2345_s29 + $0x40] sm:$0xff] %v188_v8  ;;  %v208_v18 = vld [vmem:[%s2340_s28 + $0x240] sm:$0xff]  ;;  %v210_v19 = vld [vmem:[%s2340_s28 + $0x248] sm:$0xff] }
  0x19   : > { %191 = vst [vmem:[%s2345_s29 + $0x48] sm:$0xff] %v190_v9  ;;  %v212_v20 = vld [vmem:[%s2340_s28 + $0x280] sm:$0xff]  ;;  %v214_v21 = vld [vmem:[%s2340_s28 + $0x288] sm:$0xff] }
  0x1a   : > { %193 = vst [vmem:[%s2345_s29 + $0x50] sm:$0xff] %v192_v10  ;;  %v216_v22 = vld [vmem:[%s2340_s28 + $0x2c0] sm:$0xff]  ;;  %v218_v23 = vld [vmem:[%s2340_s28 + $0x2c8] sm:$0xff] }
  0x1b   : > { %195 = vst [vmem:[%s2345_s29 + $0x58] sm:$0xff] %v194_v11  ;;  %v220_v24 = vld [vmem:[%s2340_s28 + $0x300] sm:$0xff]  ;;  %v222_v25 = vld [vmem:[%s2340_s28 + $0x308] sm:$0xff] }
  0x1c   : > { %197 = vst [vmem:[%s2345_s29 + $0x60] sm:$0xff] %v196_v12  ;;  %v224_v26 = vld [vmem:[%s2340_s28 + $0x340] sm:$0xff]  ;;  %v226_v27 = vld [vmem:[%s2340_s28 + $0x348] sm:$0xff] }
  0x1d   : > { %199 = vst [vmem:[%s2345_s29 + $0x68] sm:$0xff] %v198_v13  ;;  %v228_v28 = vld [vmem:[%s2340_s28 + $0x380] sm:$0xff]  ;;  %v230_v29 = vld [vmem:[%s2340_s28 + $0x388] sm:$0xff] }
  0x1e   : > { %201 = vst [vmem:[%s2345_s29 + $0x70] sm:$0xff] %v200_v14  ;;  %v232_v30 = vld [vmem:[%s2340_s28 + $0x3c0] sm:$0xff]  ;;  %v234_v31 = vld [vmem:[%s2340_s28 + $0x3c8] sm:$0xff] }
  0x1f   : > { %203 = vst [vmem:[%s2345_s29 + $0x78] sm:$0xff] %v202_v15  ;;  %v236_v32 = vld [vmem:[%s2340_s28 + $0x400] sm:$0xff]  ;;  %v238_v33 = vld [vmem:[%s2340_s28 + $0x408] sm:$0xff] }
  0x20   : > { %205 = vst [vmem:[%s2345_s29 + $0x80] sm:$0xff] %v204_v16  ;;  %v240_v34 = vld [vmem:[%s2340_s28 + $0x440] sm:$0xff]  ;;  %v242_v35 = vld [vmem:[%s2340_s28 + $0x448] sm:$0xff] }
  0x21   : > { %207 = vst [vmem:[%s2345_s29 + $0x88] sm:$0xff] %v206_v17  ;;  %v244_v36 = vld [vmem:[%s2340_s28 + $0x480] sm:$0xff]  ;;  %v246_v37 = vld [vmem:[%s2340_s28 + $0x488] sm:$0xff] }
  0x22   : > { %209 = vst [vmem:[%s2345_s29 + $0x90] sm:$0xff] %v208_v18  ;;  %v248_v38 = vld [vmem:[%s2340_s28 + $0x4c0] sm:$0xff]  ;;  %v250_v39 = vld [vmem:[%s2340_s28 + $0x4c8] sm:$0xff] }
  0x23   : > { %211 = vst [vmem:[%s2345_s29 + $0x98] sm:$0xff] %v210_v19  ;;  %v252_v40 = vld [vmem:[%s2340_s28 + $0x500] sm:$0xff]  ;;  %v254_v41 = vld [vmem:[%s2340_s28 + $0x508] sm:$0xff] }
  0x24   : > { %213 = vst [vmem:[%s2345_s29 + $0xa0] sm:$0xff] %v212_v20  ;;  %v256_v42 = vld [vmem:[%s2340_s28 + $0x540] sm:$0xff]  ;;  %v258_v43 = vld [vmem:[%s2340_s28 + $0x548] sm:$0xff] }
  0x25   : > { %215 = vst [vmem:[%s2345_s29 + $0xa8] sm:$0xff] %v214_v21  ;;  %v260_v44 = vld [vmem:[%s2340_s28 + $0x580] sm:$0xff]  ;;  %v262_v45 = vld [vmem:[%s2340_s28 + $0x588] sm:$0xff] }
  0x26   : > { %217 = vst [vmem:[%s2345_s29 + $0xb0] sm:$0xff] %v216_v22  ;;  %v264_v46 = vld [vmem:[%s2340_s28 + $0x5c0] sm:$0xff]  ;;  %v266_v47 = vld [vmem:[%s2340_s28 + $0x5c8] sm:$0xff] }
  0x27   : > { %219 = vst [vmem:[%s2345_s29 + $0xb8] sm:$0xff] %v218_v23  ;;  %v268_v48 = vld [vmem:[%s2340_s28 + $0x600] sm:$0xff]  ;;  %v270_v49 = vld [vmem:[%s2340_s28 + $0x608] sm:$0xff] }
  0x28   : > { %221 = vst [vmem:[%s2345_s29 + $0xc0] sm:$0xff] %v220_v24  ;;  %v272_v50 = vld [vmem:[%s2340_s28 + $0x640] sm:$0xff]  ;;  %v274_v51 = vld [vmem:[%s2340_s28 + $0x648] sm:$0xff] }
  0x29   : > { %223 = vst [vmem:[%s2345_s29 + $0xc8] sm:$0xff] %v222_v25  ;;  %v276_v52 = vld [vmem:[%s2340_s28 + $0x680] sm:$0xff]  ;;  %v278_v53 = vld [vmem:[%s2340_s28 + $0x688] sm:$0xff] }
  0x2a   : > { %225 = vst [vmem:[%s2345_s29 + $0xd0] sm:$0xff] %v224_v26  ;;  %v280_v54 = vld [vmem:[%s2340_s28 + $0x6c0] sm:$0xff]  ;;  %v282_v55 = vld [vmem:[%s2340_s28 + $0x6c8] sm:$0xff] }
  0x2b   : > { %227 = vst [vmem:[%s2345_s29 + $0xd8] sm:$0xff] %v226_v27  ;;  %v284_v56 = vld [vmem:[%s2340_s28 + $0x700] sm:$0xff]  ;;  %v286_v57 = vld [vmem:[%s2340_s28 + $0x708] sm:$0xff] }
  0x2c   : > { %229 = vst [vmem:[%s2345_s29 + $0xe0] sm:$0xff] %v228_v28  ;;  %v288_v58 = vld [vmem:[%s2340_s28 + $0x740] sm:$0xff]  ;;  %v290_v59 = vld [vmem:[%s2340_s28 + $0x748] sm:$0xff] }
  0x2d   : > { %231 = vst [vmem:[%s2345_s29 + $0xe8] sm:$0xff] %v230_v29  ;;  %v292_v60 = vld [vmem:[%s2340_s28 + $0x780] sm:$0xff]  ;;  %v294_v61 = vld [vmem:[%s2340_s28 + $0x788] sm:$0xff] }
  0x2e   : > { %233 = vst [vmem:[%s2345_s29 + $0xf0] sm:$0xff] %v232_v30  ;;  %v296_v62 = vld [vmem:[%s2340_s28 + $0x7c0] sm:$0xff]  ;;  %v298_v63 = vld [vmem:[%s2340_s28 + $0x7c8] sm:$0xff] }
  0x2f   : > { %235 = vst [vmem:[%s2345_s29 + $0xf8] sm:$0xff] %v234_v31  ;;  %v300_v0 = vld [vmem:[%s2340_s28 + $0x800] sm:$0xff]  ;;  %v302_v1 = vld [vmem:[%s2340_s28 + $0x808] sm:$0xff] }
  0x30   : > { %237 = vst [vmem:[%s2345_s29 + $0x100] sm:$0xff] %v236_v32  ;;  %v304_v2 = vld [vmem:[%s2340_s28 + $0x840] sm:$0xff]  ;;  %v306_v3 = vld [vmem:[%s2340_s28 + $0x848] sm:$0xff] }
  0x31   : > { %239 = vst [vmem:[%s2345_s29 + $0x108] sm:$0xff] %v238_v33  ;;  %v308_v4 = vld [vmem:[%s2340_s28 + $0x880] sm:$0xff]  ;;  %v310_v5 = vld [vmem:[%s2340_s28 + $0x888] sm:$0xff] }
  0x32   : > { %241 = vst [vmem:[%s2345_s29 + $0x110] sm:$0xff] %v240_v34  ;;  %v312_v6 = vld [vmem:[%s2340_s28 + $0x8c0] sm:$0xff]  ;;  %v314_v7 = vld [vmem:[%s2340_s28 + $0x8c8] sm:$0xff] }
  0x33   : > { %243 = vst [vmem:[%s2345_s29 + $0x118] sm:$0xff] %v242_v35  ;;  %v316_v8 = vld [vmem:[%s2340_s28 + $0x900] sm:$0xff]  ;;  %v318_v9 = vld [vmem:[%s2340_s28 + $0x908] sm:$0xff] }
  0x34   : > { %245 = vst [vmem:[%s2345_s29 + $0x120] sm:$0xff] %v244_v36  ;;  %v320_v10 = vld [vmem:[%s2340_s28 + $0x940] sm:$0xff]  ;;  %v322_v11 = vld [vmem:[%s2340_s28 + $0x948] sm:$0xff] }
  0x35   : > { %247 = vst [vmem:[%s2345_s29 + $0x128] sm:$0xff] %v246_v37  ;;  %v324_v12 = vld [vmem:[%s2340_s28 + $0x980] sm:$0xff]  ;;  %v326_v13 = vld [vmem:[%s2340_s28 + $0x988] sm:$0xff] }
  0x36   : > { %249 = vst [vmem:[%s2345_s29 + $0x130] sm:$0xff] %v248_v38  ;;  %v328_v14 = vld [vmem:[%s2340_s28 + $0x9c0] sm:$0xff]  ;;  %v330_v15 = vld [vmem:[%s2340_s28 + $0x9c8] sm:$0xff] }
  0x37   : > { %251 = vst [vmem:[%s2345_s29 + $0x138] sm:$0xff] %v250_v39  ;;  %v332_v16 = vld [vmem:[%s2340_s28 + $0xa00] sm:$0xff]  ;;  %v334_v17 = vld [vmem:[%s2340_s28 + $0xa08] sm:$0xff] }
  0x38   : > { %253 = vst [vmem:[%s2345_s29 + $0x140] sm:$0xff] %v252_v40  ;;  %v336_v18 = vld [vmem:[%s2340_s28 + $0xa40] sm:$0xff]  ;;  %v338_v19 = vld [vmem:[%s2340_s28 + $0xa48] sm:$0xff] }
  0x39   : > { %255 = vst [vmem:[%s2345_s29 + $0x148] sm:$0xff] %v254_v41  ;;  %v340_v20 = vld [vmem:[%s2340_s28 + $0xa80] sm:$0xff]  ;;  %v342_v21 = vld [vmem:[%s2340_s28 + $0xa88] sm:$0xff] }
  0x3a   : > { %257 = vst [vmem:[%s2345_s29 + $0x150] sm:$0xff] %v256_v42  ;;  %v344_v22 = vld [vmem:[%s2340_s28 + $0xac0] sm:$0xff]  ;;  %v346_v23 = vld [vmem:[%s2340_s28 + $0xac8] sm:$0xff] }
  0x3b   : > { %259 = vst [vmem:[%s2345_s29 + $0x158] sm:$0xff] %v258_v43  ;;  %v348_v24 = vld [vmem:[%s2340_s28 + $0xb00] sm:$0xff]  ;;  %v350_v25 = vld [vmem:[%s2340_s28 + $0xb08] sm:$0xff] }
  0x3c   : > { %261 = vst [vmem:[%s2345_s29 + $0x160] sm:$0xff] %v260_v44  ;;  %v352_v26 = vld [vmem:[%s2340_s28 + $0xb40] sm:$0xff]  ;;  %v354_v27 = vld [vmem:[%s2340_s28 + $0xb48] sm:$0xff] }
  0x3d   : > { %263 = vst [vmem:[%s2345_s29 + $0x168] sm:$0xff] %v262_v45  ;;  %v356_v28 = vld [vmem:[%s2340_s28 + $0xb80] sm:$0xff]  ;;  %v358_v29 = vld [vmem:[%s2340_s28 + $0xb88] sm:$0xff] }
  0x3e   : > { %265 = vst [vmem:[%s2345_s29 + $0x170] sm:$0xff] %v264_v46  ;;  %v360_v30 = vld [vmem:[%s2340_s28 + $0xbc0] sm:$0xff]  ;;  %v362_v31 = vld [vmem:[%s2340_s28 + $0xbc8] sm:$0xff] }
  0x3f   : > { %267 = vst [vmem:[%s2345_s29 + $0x178] sm:$0xff] %v266_v47  ;;  %v364_v32 = vld [vmem:[%s2340_s28 + $0xc00] sm:$0xff]  ;;  %v366_v33 = vld [vmem:[%s2340_s28 + $0xc08] sm:$0xff] }
  0x40   : > { %269 = vst [vmem:[%s2345_s29 + $0x180] sm:$0xff] %v268_v48  ;;  %v368_v34 = vld [vmem:[%s2340_s28 + $0xc40] sm:$0xff]  ;;  %v370_v35 = vld [vmem:[%s2340_s28 + $0xc48] sm:$0xff] }
  0x41   : > { %271 = vst [vmem:[%s2345_s29 + $0x188] sm:$0xff] %v270_v49  ;;  %v372_v36 = vld [vmem:[%s2340_s28 + $0xc80] sm:$0xff]  ;;  %v374_v37 = vld [vmem:[%s2340_s28 + $0xc88] sm:$0xff] }
  0x42   : > { %273 = vst [vmem:[%s2345_s29 + $0x190] sm:$0xff] %v272_v50  ;;  %v376_v38 = vld [vmem:[%s2340_s28 + $0xcc0] sm:$0xff]  ;;  %v378_v39 = vld [vmem:[%s2340_s28 + $0xcc8] sm:$0xff] }
  0x43   : > { %275 = vst [vmem:[%s2345_s29 + $0x198] sm:$0xff] %v274_v51  ;;  %v380_v40 = vld [vmem:[%s2340_s28 + $0xd00] sm:$0xff]  ;;  %v382_v41 = vld [vmem:[%s2340_s28 + $0xd08] sm:$0xff] }
  0x44   : > { %277 = vst [vmem:[%s2345_s29 + $0x1a0] sm:$0xff] %v276_v52  ;;  %v384_v42 = vld [vmem:[%s2340_s28 + $0xd40] sm:$0xff]  ;;  %v386_v43 = vld [vmem:[%s2340_s28 + $0xd48] sm:$0xff] }
  0x45   : > { %279 = vst [vmem:[%s2345_s29 + $0x1a8] sm:$0xff] %v278_v53  ;;  %v388_v44 = vld [vmem:[%s2340_s28 + $0xd80] sm:$0xff]  ;;  %v390_v45 = vld [vmem:[%s2340_s28 + $0xd88] sm:$0xff] }
  0x46   : > { %281 = vst [vmem:[%s2345_s29 + $0x1b0] sm:$0xff] %v280_v54  ;;  %v392_v46 = vld [vmem:[%s2340_s28 + $0xdc0] sm:$0xff]  ;;  %v394_v47 = vld [vmem:[%s2340_s28 + $0xdc8] sm:$0xff] }
  0x47   : > { %283 = vst [vmem:[%s2345_s29 + $0x1b8] sm:$0xff] %v282_v55  ;;  %v396_v48 = vld [vmem:[%s2340_s28 + $0xe00] sm:$0xff]  ;;  %v398_v49 = vld [vmem:[%s2340_s28 + $0xe08] sm:$0xff] }
  0x48   : > { %285 = vst [vmem:[%s2345_s29 + $0x1c0] sm:$0xff] %v284_v56  ;;  %v400_v50 = vld [vmem:[%s2340_s28 + $0xe40] sm:$0xff]  ;;  %v402_v51 = vld [vmem:[%s2340_s28 + $0xe48] sm:$0xff] }
  0x49   : > { %287 = vst [vmem:[%s2345_s29 + $0x1c8] sm:$0xff] %v286_v57  ;;  %v404_v52 = vld [vmem:[%s2340_s28 + $0xe80] sm:$0xff]  ;;  %v406_v53 = vld [vmem:[%s2340_s28 + $0xe88] sm:$0xff] }
  0x4a   : > { %289 = vst [vmem:[%s2345_s29 + $0x1d0] sm:$0xff] %v288_v58  ;;  %v408_v54 = vld [vmem:[%s2340_s28 + $0xec0] sm:$0xff]  ;;  %v410_v55 = vld [vmem:[%s2340_s28 + $0xec8] sm:$0xff] }
  0x4b   : > { %291 = vst [vmem:[%s2345_s29 + $0x1d8] sm:$0xff] %v290_v59  ;;  %v412_v56 = vld [vmem:[%s2340_s28 + $0xf00] sm:$0xff]  ;;  %v414_v57 = vld [vmem:[%s2340_s28 + $0xf08] sm:$0xff] }
  0x4c   : > { %293 = vst [vmem:[%s2345_s29 + $0x1e0] sm:$0xff] %v292_v60  ;;  %v416_v58 = vld [vmem:[%s2340_s28 + $0xf40] sm:$0xff]  ;;  %v418_v59 = vld [vmem:[%s2340_s28 + $0xf48] sm:$0xff] }
  0x4d   : > { %295 = vst [vmem:[%s2345_s29 + $0x1e8] sm:$0xff] %v294_v61  ;;  %v420_v60 = vld [vmem:[%s2340_s28 + $0xf80] sm:$0xff]  ;;  %v422_v61 = vld [vmem:[%s2340_s28 + $0xf88] sm:$0xff] }
  0x4e   : > { %297 = vst [vmem:[%s2345_s29 + $0x1f0] sm:$0xff] %v296_v62  ;;  %v424_v62 = vld [vmem:[%s2340_s28 + $0xfc0] sm:$0xff] }
  0x4f   : > { %299 = vst [vmem:[%s2345_s29 + $0x1f8] sm:$0xff] %v298_v63  ;;  %v426_v63 = vld [vmem:[%s2340_s28 + $0xfc8] sm:$0xff] }
  0x50   : > { %301 = vst [vmem:[%s2345_s29 + $0x200] sm:$0xff] %v300_v0 }
  0x51   : > { %303 = vst [vmem:[%s2345_s29 + $0x208] sm:$0xff] %v302_v1 }
  0x52   : > { %305 = vst [vmem:[%s2345_s29 + $0x210] sm:$0xff] %v304_v2 }
  0x53   : > { %307 = vst [vmem:[%s2345_s29 + $0x218] sm:$0xff] %v306_v3 }
  0x54   : > { %309 = vst [vmem:[%s2345_s29 + $0x220] sm:$0xff] %v308_v4 }
  0x55   : > { %311 = vst [vmem:[%s2345_s29 + $0x228] sm:$0xff] %v310_v5 }
  0x56   : > { %313 = vst [vmem:[%s2345_s29 + $0x230] sm:$0xff] %v312_v6 }
  0x57   : > { %315 = vst [vmem:[%s2345_s29 + $0x238] sm:$0xff] %v314_v7 }
  0x58   : > { %317 = vst [vmem:[%s2345_s29 + $0x240] sm:$0xff] %v316_v8 }
  0x59   : > { %319 = vst [vmem:[%s2345_s29 + $0x248] sm:$0xff] %v318_v9 }
  0x5a   : > { %321 = vst [vmem:[%s2345_s29 + $0x250] sm:$0xff] %v320_v10 }
  0x5b   : > { %323 = vst [vmem:[%s2345_s29 + $0x258] sm:$0xff] %v322_v11 }
  0x5c   : > { %325 = vst [vmem:[%s2345_s29 + $0x260] sm:$0xff] %v324_v12 }
  0x5d   : > { %327 = vst [vmem:[%s2345_s29 + $0x268] sm:$0xff] %v326_v13 }
  0x5e   : > { %329 = vst [vmem:[%s2345_s29 + $0x270] sm:$0xff] %v328_v14 }
  0x5f   : > { %331 = vst [vmem:[%s2345_s29 + $0x278] sm:$0xff] %v330_v15 }
  0x60   : > { %333 = vst [vmem:[%s2345_s29 + $0x280] sm:$0xff] %v332_v16 }
  0x61   : > { %335 = vst [vmem:[%s2345_s29 + $0x288] sm:$0xff] %v334_v17 }
  0x62   : > { %337 = vst [vmem:[%s2345_s29 + $0x290] sm:$0xff] %v336_v18 }
  0x63   : > { %339 = vst [vmem:[%s2345_s29 + $0x298] sm:$0xff] %v338_v19 }
  0x64   : > { %341 = vst [vmem:[%s2345_s29 + $0x2a0] sm:$0xff] %v340_v20 }
  0x65   : > { %343 = vst [vmem:[%s2345_s29 + $0x2a8] sm:$0xff] %v342_v21 }
  0x66   : > { %345 = vst [vmem:[%s2345_s29 + $0x2b0] sm:$0xff] %v344_v22 }
  0x67   : > { %347 = vst [vmem:[%s2345_s29 + $0x2b8] sm:$0xff] %v346_v23 }
  0x68   : > { %349 = vst [vmem:[%s2345_s29 + $0x2c0] sm:$0xff] %v348_v24 }
  0x69   : > { %351 = vst [vmem:[%s2345_s29 + $0x2c8] sm:$0xff] %v350_v25 }
  0x6a   : > { %353 = vst [vmem:[%s2345_s29 + $0x2d0] sm:$0xff] %v352_v26 }
  0x6b   : > { %355 = vst [vmem:[%s2345_s29 + $0x2d8] sm:$0xff] %v354_v27 }
  0x6c   : > { %357 = vst [vmem:[%s2345_s29 + $0x2e0] sm:$0xff] %v356_v28 }
  0x6d   : > { %359 = vst [vmem:[%s2345_s29 + $0x2e8] sm:$0xff] %v358_v29 }
  0x6e   : > { %361 = vst [vmem:[%s2345_s29 + $0x2f0] sm:$0xff] %v360_v30 }
  0x6f   : > { %363 = vst [vmem:[%s2345_s29 + $0x2f8] sm:$0xff] %v362_v31 }
  0x70   : > { %365 = vst [vmem:[%s2345_s29 + $0x300] sm:$0xff] %v364_v32 }
  0x71   : > { %367 = vst [vmem:[%s2345_s29 + $0x308] sm:$0xff] %v366_v33 }
  0x72   : > { %369 = vst [vmem:[%s2345_s29 + $0x310] sm:$0xff] %v368_v34 }
  0x73   : > { %371 = vst [vmem:[%s2345_s29 + $0x318] sm:$0xff] %v370_v35 }
  0x74   : > { %373 = vst [vmem:[%s2345_s29 + $0x320] sm:$0xff] %v372_v36 }
  0x75   : > { %375 = vst [vmem:[%s2345_s29 + $0x328] sm:$0xff] %v374_v37 }
  0x76   : > { %377 = vst [vmem:[%s2345_s29 + $0x330] sm:$0xff] %v376_v38 }
  0x77   : > { %379 = vst [vmem:[%s2345_s29 + $0x338] sm:$0xff] %v378_v39 }
  0x78   : > { %381 = vst [vmem:[%s2345_s29 + $0x340] sm:$0xff] %v380_v40 }
  0x79   : > { %383 = vst [vmem:[%s2345_s29 + $0x348] sm:$0xff] %v382_v41 }
  0x7a   : > { %385 = vst [vmem:[%s2345_s29 + $0x350] sm:$0xff] %v384_v42 }
  0x7b   : > { %387 = vst [vmem:[%s2345_s29 + $0x358] sm:$0xff] %v386_v43 }
  0x7c   : > { %389 = vst [vmem:[%s2345_s29 + $0x360] sm:$0xff] %v388_v44 }
  0x7d   : > { %391 = vst [vmem:[%s2345_s29 + $0x368] sm:$0xff] %v390_v45 }
  0x7e   : > { %393 = vst [vmem:[%s2345_s29 + $0x370] sm:$0xff] %v392_v46 }
  0x7f   : > { %395 = vst [vmem:[%s2345_s29 + $0x378] sm:$0xff] %v394_v47 }
  0x80   : > { %397 = vst [vmem:[%s2345_s29 + $0x380] sm:$0xff] %v396_v48 }
  0x81   : > { %399 = vst [vmem:[%s2345_s29 + $0x388] sm:$0xff] %v398_v49 }
  0x82   : > { %401 = vst [vmem:[%s2345_s29 + $0x390] sm:$0xff] %v400_v50 }
  0x83   : > { %403 = vst [vmem:[%s2345_s29 + $0x398] sm:$0xff] %v402_v51 }
  0x84   : > { %405 = vst [vmem:[%s2345_s29 + $0x3a0] sm:$0xff] %v404_v52 }
  0x85   : > { %407 = vst [vmem:[%s2345_s29 + $0x3a8] sm:$0xff] %v406_v53 }
  0x86   : > { %409 = vst [vmem:[%s2345_s29 + $0x3b0] sm:$0xff] %v408_v54 }
  0x87   : > { %411 = vst [vmem:[%s2345_s29 + $0x3b8] sm:$0xff] %v410_v55 }
  0x88   : > { %413 = vst [vmem:[%s2345_s29 + $0x3c0] sm:$0xff] %v412_v56 }
  0x89   : > { %415 = vst [vmem:[%s2345_s29 + $0x3c8] sm:$0xff] %v414_v57 }
  0x8a   : > { %417 = vst [vmem:[%s2345_s29 + $0x3d0] sm:$0xff] %v416_v58 }
  0x8b   : > { %419 = vst [vmem:[%s2345_s29 + $0x3d8] sm:$0xff] %v418_v59 }
  0x8c   : > { %421 = vst [vmem:[%s2345_s29 + $0x3e0] sm:$0xff] %v420_v60 }
  0x8d   : > { %423 = vst [vmem:[%s2345_s29 + $0x3e8] sm:$0xff] %v422_v61 }
  0x8e   : > { %425 = vst [vmem:[%s2345_s29 + $0x3f0] sm:$0xff] %v424_v62 }
  0x8f   : > { %427 = vst [vmem:[%s2345_s29 + $0x3f8] sm:$0xff] %v426_v63 }
  0x90 PF: > { %p2180_p5 = scmp.ge.s32.totalorder %s2275_s17, 1  ;;  %p441_p6 = scmp.lt.s32.totalorder %s2275_s17, 5 }
  0x92   : > { %p442_p7 = pnand %p2180_p5, %p441_p6 }
  0x93   : > { %s448_s30 = sand.u32 (!%p442_p7), 1, %s2267_s15   ;;  %s2182_s5 = sshll.u32 (!%p442_p7), %s2320_s18, 5 }
  0x94   : > { %445 = sbr.rel (%p442_p7) target bundleno = 1048 (0x418), region = 55  ;;  %s2181_s6 = sshll.u32 (!%p442_p7), %s448_s30, 10 }
  0x95   : > { %p475_p8 = scmp.lt.s32.totalorder (!%p442_p7), %s2182_s5, 127  ;;  %s2609_s11 = scalar_lea.vmem (!%p442_p7), [#allocation2], %s2181_s6 }
  0x96   : > { %p2184_p9 = scmp.ne.s32.totalorder (!%p442_p7), %s2320_s18, 0 }
  0x99   : > { %s4777_s5 = smov (!%p475_p8, %s2182_s5), 127  ;;  %483 = sbr.rel (%p2184_p9) target bundleno = 223 (0xdf), region = 63 }
  0x9a   : > { %s2183_s7 = sshll.u32 %s4777_s5, 3 }
  0x9b   : > { %s2607_s10 = scalar_lea.vmem %s4658_s1, %s2183_s7 }
  0x9e   : > { %v2277_v0 = vmov 0.0  }
  0x9f   : > { %484 = vst [vmem:[%s4661_s4] sm:$0xff] %v2277_v0 }
  0xa0   : > { %485 = vst [vmem:[%s4661_s4 + $0x8] sm:$0xff] %v2277_v0 }
  0xa1   : > { %486 = vst [vmem:[%s4661_s4 + $0x10] sm:$0xff] %v2277_v0 }
  0xa2   : > { %487 = vst [vmem:[%s4661_s4 + $0x18] sm:$0xff] %v2277_v0 }
  0xa3   : > { %488 = vst [vmem:[%s4661_s4 + $0x20] sm:$0xff] %v2277_v0 }
  0xa4   : > { %489 = vst [vmem:[%s4661_s4 + $0x28] sm:$0xff] %v2277_v0 }
  0xa5   : > { %490 = vst [vmem:[%s4661_s4 + $0x30] sm:$0xff] %v2277_v0 }
  0xa6   : > { %491 = vst [vmem:[%s4661_s4 + $0x38] sm:$0xff] %v2277_v0 }
  0xa7   : > { %492 = vst [vmem:[%s4661_s4 + $0x40] sm:$0xff] %v2277_v0 }
  0xa8   : > { %493 = vst [vmem:[%s4661_s4 + $0x48] sm:$0xff] %v2277_v0 }
  0xa9   : > { %494 = vst [vmem:[%s4661_s4 + $0x50] sm:$0xff] %v2277_v0 }
  0xaa   : > { %495 = vst [vmem:[%s4661_s4 + $0x58] sm:$0xff] %v2277_v0 }
  0xab   : > { %496 = vst [vmem:[%s4661_s4 + $0x60] sm:$0xff] %v2277_v0 }
  0xac   : > { %497 = vst [vmem:[%s4661_s4 + $0x68] sm:$0xff] %v2277_v0 }
  0xad   : > { %498 = vst [vmem:[%s4661_s4 + $0x70] sm:$0xff] %v2277_v0 }
  0xae   : > { %499 = vst [vmem:[%s4661_s4 + $0x78] sm:$0xff] %v2277_v0 }
  0xaf   : > { %500 = vst [vmem:[%s4661_s4 + $0x80] sm:$0xff] %v2277_v0 }
  0xb0   : > { %501 = vst [vmem:[%s4661_s4 + $0x88] sm:$0xff] %v2277_v0 }
  0xb1   : > { %502 = vst [vmem:[%s4661_s4 + $0x90] sm:$0xff] %v2277_v0 }
  0xb2   : > { %503 = vst [vmem:[%s4661_s4 + $0x98] sm:$0xff] %v2277_v0 }
  0xb3   : > { %504 = vst [vmem:[%s4661_s4 + $0xa0] sm:$0xff] %v2277_v0 }
  0xb4   : > { %505 = vst [vmem:[%s4661_s4 + $0xa8] sm:$0xff] %v2277_v0 }
  0xb5   : > { %506 = vst [vmem:[%s4661_s4 + $0xb0] sm:$0xff] %v2277_v0 }
  0xb6   : > { %507 = vst [vmem:[%s4661_s4 + $0xb8] sm:$0xff] %v2277_v0 }
  0xb7   : > { %508 = vst [vmem:[%s4661_s4 + $0xc0] sm:$0xff] %v2277_v0 }
  0xb8   : > { %509 = vst [vmem:[%s4661_s4 + $0xc8] sm:$0xff] %v2277_v0 }
  0xb9   : > { %510 = vst [vmem:[%s4661_s4 + $0xd0] sm:$0xff] %v2277_v0 }
  0xba   : > { %511 = vst [vmem:[%s4661_s4 + $0xd8] sm:$0xff] %v2277_v0 }
  0xbb   : > { %512 = vst [vmem:[%s4661_s4 + $0xe0] sm:$0xff] %v2277_v0 }
  0xbc   : > { %513 = vst [vmem:[%s4661_s4 + $0xe8] sm:$0xff] %v2277_v0 }
  0xbd   : > { %514 = vst [vmem:[%s4661_s4 + $0xf0] sm:$0xff] %v2277_v0 }
  0xbe   : > { %515 = vst [vmem:[%s4661_s4 + $0xf8] sm:$0xff] %v2277_v0 }
  0xbf   : > { %516 = vst [vmem:[%s4661_s4 + $0x100] sm:$0xff] %v2277_v0 }
  0xc0   : > { %517 = vst [vmem:[%s4661_s4 + $0x108] sm:$0xff] %v2277_v0 }
  0xc1   : > { %518 = vst [vmem:[%s4661_s4 + $0x110] sm:$0xff] %v2277_v0 }
  0xc2   : > { %519 = vst [vmem:[%s4661_s4 + $0x118] sm:$0xff] %v2277_v0 }
  0xc3   : > { %520 = vst [vmem:[%s4661_s4 + $0x120] sm:$0xff] %v2277_v0 }
  0xc4   : > { %521 = vst [vmem:[%s4661_s4 + $0x128] sm:$0xff] %v2277_v0 }
  0xc5   : > { %522 = vst [vmem:[%s4661_s4 + $0x130] sm:$0xff] %v2277_v0 }
  0xc6   : > { %523 = vst [vmem:[%s4661_s4 + $0x138] sm:$0xff] %v2277_v0 }
  0xc7   : > { %524 = vst [vmem:[%s4661_s4 + $0x140] sm:$0xff] %v2277_v0 }
  0xc8   : > { %525 = vst [vmem:[%s4661_s4 + $0x148] sm:$0xff] %v2277_v0 }
  0xc9   : > { %526 = vst [vmem:[%s4661_s4 + $0x150] sm:$0xff] %v2277_v0 }
  0xca   : > { %527 = vst [vmem:[%s4661_s4 + $0x158] sm:$0xff] %v2277_v0 }
  0xcb   : > { %528 = vst [vmem:[%s4661_s4 + $0x160] sm:$0xff] %v2277_v0 }
  0xcc   : > { %529 = vst [vmem:[%s4661_s4 + $0x168] sm:$0xff] %v2277_v0 }
  0xcd   : > { %530 = vst [vmem:[%s4661_s4 + $0x170] sm:$0xff] %v2277_v0 }
  0xce   : > { %531 = vst [vmem:[%s4661_s4 + $0x178] sm:$0xff] %v2277_v0 }
  0xcf   : > { %532 = vst [vmem:[%s4661_s4 + $0x180] sm:$0xff] %v2277_v0 }
  0xd0   : > { %533 = vst [vmem:[%s4661_s4 + $0x188] sm:$0xff] %v2277_v0 }
  0xd1   : > { %534 = vst [vmem:[%s4661_s4 + $0x190] sm:$0xff] %v2277_v0 }
  0xd2   : > { %535 = vst [vmem:[%s4661_s4 + $0x198] sm:$0xff] %v2277_v0 }
  0xd3   : > { %536 = vst [vmem:[%s4661_s4 + $0x1a0] sm:$0xff] %v2277_v0 }
  0xd4   : > { %537 = vst [vmem:[%s4661_s4 + $0x1a8] sm:$0xff] %v2277_v0 }
  0xd5   : > { %538 = vst [vmem:[%s4661_s4 + $0x1b0] sm:$0xff] %v2277_v0 }
  0xd6   : > { %539 = vst [vmem:[%s4661_s4 + $0x1b8] sm:$0xff] %v2277_v0 }
  0xd7   : > { %540 = vst [vmem:[%s4661_s4 + $0x1c0] sm:$0xff] %v2277_v0 }
  0xd8   : > { %541 = vst [vmem:[%s4661_s4 + $0x1c8] sm:$0xff] %v2277_v0 }
  0xd9   : > { %542 = vst [vmem:[%s4661_s4 + $0x1d0] sm:$0xff] %v2277_v0 }
  0xda   : > { %543 = vst [vmem:[%s4661_s4 + $0x1d8] sm:$0xff] %v2277_v0 }
  0xdb   : > { %544 = vst [vmem:[%s4661_s4 + $0x1e0] sm:$0xff] %v2277_v0 }
  0xdc   : > { %545 = vst [vmem:[%s4661_s4 + $0x1e8] sm:$0xff] %v2277_v0 }
  0xdd   : > { %546 = vst [vmem:[%s4661_s4 + $0x1f0] sm:$0xff] %v2277_v0 }
  0xde   : > { %547 = vst [vmem:[%s4661_s4 + $0x1f8] sm:$0xff] %v2277_v0 }
  0xdf PF: > { %v755_v1 = vld [vmem:[%s2607_s10 + $0x78] sm:$0xff]  ;;  %v754_v3 = vld [vmem:[%s2607_s10 + $0x70] sm:$0xff]  ;;  %v753_v5 = vld [vmem:[%s2607_s10 + $0x68] sm:$0xff]  ;;  %p2185_p10 = scmp.ne.s32.totalorder %s2320_s18, 3 }
  0xe0   : > { %v771_v2 = vld [vmem:[%s2607_s10 + $0xf8] sm:$0xff]  ;;  %2189 = vmatpush.msra.mxu2 %v755_v1  ;;  %v770_v4 = vld [vmem:[%s2607_s10 + $0xf0] sm:$0xff]  ;;  %v769_v6 = vld [vmem:[%s2607_s10 + $0xe8] sm:$0xff]  ;;  %772 = vmatpush.msra.mxu0 %v755_v1 }
  0xe1   : > { %2205 = vmatpush.msra.mxu3 %v771_v2  ;;  %981 = vmatpush.msra.mxu1 %v771_v2  ;;  %v752_v7 = vld [vmem:[%s2607_s10 + $0x60] sm:$0xff]  ;;  %v751_v9 = vld [vmem:[%s2607_s10 + $0x58] sm:$0xff]  ;;  %v750_v11 = vld [vmem:[%s2607_s10 + $0x50] sm:$0xff] }
  0xe2   : > { %2190 = vmatpush.msra.mxu2 %v754_v3  ;;  %v768_v8 = vld [vmem:[%s2607_s10 + $0xe0] sm:$0xff]  ;;  %773 = vmatpush.msra.mxu0 %v754_v3  ;;  %v767_v10 = vld [vmem:[%s2607_s10 + $0xd8] sm:$0xff]  ;;  %v766_v12 = vld [vmem:[%s2607_s10 + $0xd0] sm:$0xff] }
  0xe3   : > { %2206 = vmatpush.msra.mxu3 %v770_v4  ;;  %982 = vmatpush.msra.mxu1 %v770_v4  ;;  %v749_v13 = vld [vmem:[%s2607_s10 + $0x48] sm:$0xff]  ;;  %v748_v15 = vld [vmem:[%s2607_s10 + $0x40] sm:$0xff]  ;;  %v747_v17 = vld [vmem:[%s2607_s10 + $0x38] sm:$0xff] }
  0xe4   : > { %2191 = vmatpush.msra.mxu2 %v753_v5  ;;  %774 = vmatpush.msra.mxu0 %v753_v5  ;;  %v765_v14 = vld [vmem:[%s2607_s10 + $0xc8] sm:$0xff]  ;;  %v764_v16 = vld [vmem:[%s2607_s10 + $0xc0] sm:$0xff]  ;;  %v763_v18 = vld [vmem:[%s2607_s10 + $0xb8] sm:$0xff] }
  0xe5   : > { %2207 = vmatpush.msra.mxu3 %v769_v6  ;;  %983 = vmatpush.msra.mxu1 %v769_v6  ;;  %v746_v19 = vld [vmem:[%s2607_s10 + $0x30] sm:$0xff]  ;;  %v745_v21 = vld [vmem:[%s2607_s10 + $0x28] sm:$0xff]  ;;  %v744_v23 = vld [vmem:[%s2607_s10 + $0x20] sm:$0xff] }
  0xe6   : > { %2192 = vmatpush.msra.mxu2 %v752_v7  ;;  %775 = vmatpush.msra.mxu0 %v752_v7  ;;  %v762_v20 = vld [vmem:[%s2607_s10 + $0xb0] sm:$0xff]  ;;  %v761_v22 = vld [vmem:[%s2607_s10 + $0xa8] sm:$0xff]  ;;  %v760_v24 = vld [vmem:[%s2607_s10 + $0xa0] sm:$0xff] }
  0xe7   : > { %2208 = vmatpush.msra.mxu3 %v768_v8  ;;  %984 = vmatpush.msra.mxu1 %v768_v8  ;;  %v743_v25 = vld [vmem:[%s2607_s10 + $0x18] sm:$0xff]  ;;  %v742_v27 = vld [vmem:[%s2607_s10 + $0x10] sm:$0xff]  ;;  %v741_v29 = vld [vmem:[%s2607_s10 + $0x8] sm:$0xff] }
  0xe8   : > { %2193 = vmatpush.msra.mxu2 %v751_v9  ;;  %776 = vmatpush.msra.mxu0 %v751_v9  ;;  %v759_v26 = vld [vmem:[%s2607_s10 + $0x98] sm:$0xff]  ;;  %v758_v28 = vld [vmem:[%s2607_s10 + $0x90] sm:$0xff]  ;;  %v757_v30 = vld [vmem:[%s2607_s10 + $0x88] sm:$0xff] }
  0xe9   : > { %2209 = vmatpush.msra.mxu3 %v767_v10  ;;  %985 = vmatpush.msra.mxu1 %v767_v10  ;;  %v740_v31 = vld [vmem:[%s2607_s10] sm:$0xff]  ;;  %v677_v34 = vld [vmem:[%s2609_s11 + $0x208] sm:$0xff]  ;;  %v678_v37 = vld [vmem:[%s2609_s11 + $0x210] sm:$0xff] }
  0xea   : > { %2194 = vmatpush.msra.mxu2 %v750_v11  ;;  %777 = vmatpush.msra.mxu0 %v750_v11  ;;  %v756_v32 = vld [vmem:[%s2607_s10 + $0x80] sm:$0xff]  ;;  %v613_v36 = vld [vmem:[%s2609_s11 + $0x8] sm:$0xff]  ;;  %v679_v38 = vld [vmem:[%s2609_s11 + $0x218] sm:$0xff] }
  0xeb   : > { %2210 = vmatpush.msra.mxu3 %v766_v12  ;;  %986 = vmatpush.msra.mxu1 %v766_v12  ;;  %v676_v33 = vld [vmem:[%s2609_s11 + $0x200] sm:$0xff]  ;;  %v614_v39 = vld [vmem:[%s2609_s11 + $0x10] sm:$0xff]  ;;  %v615_v40 = vld [vmem:[%s2609_s11 + $0x18] sm:$0xff] }
  0xec   : > { %2195 = vmatpush.msra.mxu2 %v749_v13  ;;  %778 = vmatpush.msra.mxu0 %v749_v13  ;;  %v612_v35 = vld [vmem:[%s2609_s11] sm:$0xff]  ;;  %v681_v42 = vld [vmem:[%s2609_s11 + $0x228] sm:$0xff]  ;;  %v682_v45 = vld [vmem:[%s2609_s11 + $0x230] sm:$0xff] }
  0xed   : > { %2211 = vmatpush.msra.mxu3 %v765_v14  ;;  %987 = vmatpush.msra.mxu1 %v765_v14  ;;  %v680_v41 = vld [vmem:[%s2609_s11 + $0x220] sm:$0xff]  ;;  %v617_v44 = vld [vmem:[%s2609_s11 + $0x28] sm:$0xff]  ;;  %v683_v46 = vld [vmem:[%s2609_s11 + $0x238] sm:$0xff] }
  0xee   : > { %2196 = vmatpush.msra.mxu2 %v748_v15  ;;  %779 = vmatpush.msra.mxu0 %v748_v15  ;;  %v616_v43 = vld [vmem:[%s2609_s11 + $0x20] sm:$0xff]  ;;  %v618_v47 = vld [vmem:[%s2609_s11 + $0x30] sm:$0xff]  ;;  %v619_v48 = vld [vmem:[%s2609_s11 + $0x38] sm:$0xff] }
  0xef   : > { %2212 = vmatpush.msra.mxu3 %v764_v16  ;;  %988 = vmatpush.msra.mxu1 %v764_v16  ;;  %v684_v49 = vld [vmem:[%s2609_s11 + $0x240] sm:$0xff]  ;;  %v685_v50 = vld [vmem:[%s2609_s11 + $0x248] sm:$0xff]  ;;  %v686_v53 = vld [vmem:[%s2609_s11 + $0x250] sm:$0xff] }
  0xf0   : > { %2197 = vmatpush.msra.mxu2 %v747_v17  ;;  %780 = vmatpush.msra.mxu0 %v747_v17  ;;  %v620_v51 = vld [vmem:[%s2609_s11 + $0x40] sm:$0xff]  ;;  %v621_v52 = vld [vmem:[%s2609_s11 + $0x48] sm:$0xff]  ;;  %v687_v54 = vld [vmem:[%s2609_s11 + $0x258] sm:$0xff] }
  0xf1   : > { %2213 = vmatpush.msra.mxu3 %v763_v18  ;;  %989 = vmatpush.msra.mxu1 %v763_v18  ;;  %v622_v55 = vld [vmem:[%s2609_s11 + $0x50] sm:$0xff]  ;;  %v623_v56 = vld [vmem:[%s2609_s11 + $0x58] sm:$0xff]  ;;  %v688_v57 = vld [vmem:[%s2609_s11 + $0x260] sm:$0xff] }
  0xf2   : > { %2198 = vmatpush.msra.mxu2 %v746_v19  ;;  %781 = vmatpush.msra.mxu0 %v746_v19  ;;  %v689_v58 = vld [vmem:[%s2609_s11 + $0x268] sm:$0xff]  ;;  %v624_v59 = vld [vmem:[%s2609_s11 + $0x60] sm:$0xff]  ;;  %v690_v61 = vld [vmem:[%s2609_s11 + $0x270] sm:$0xff] }
  0xf3   : > { %2214 = vmatpush.msra.mxu3 %v762_v20  ;;  %990 = vmatpush.msra.mxu1 %v762_v20  ;;  %v625_v60 = vld [vmem:[%s2609_s11 + $0x68] sm:$0xff]  ;;  %v691_v62 = vld [vmem:[%s2609_s11 + $0x278] sm:$0xff]  ;;  %v626_v63 = vld [vmem:[%s2609_s11 + $0x70] sm:$0xff] }
  0xf4   : > { %2199 = vmatpush.msra.mxu2 %v745_v21  ;;  %782 = vmatpush.msra.mxu0 %v745_v21  ;;  %v627_v0 = vld [vmem:[%s2609_s11 + $0x78] sm:$0xff]  ;;  %v692_v1 = vld [vmem:[%s2609_s11 + $0x280] sm:$0xff]  ;;  %v693_v2 = vld [vmem:[%s2609_s11 + $0x288] sm:$0xff] }
  0xf5   : > { %2215 = vmatpush.msra.mxu3 %v761_v22  ;;  %991 = vmatpush.msra.mxu1 %v761_v22  ;;  %v628_v3 = vld [vmem:[%s2609_s11 + $0x80] sm:$0xff]  ;;  %v629_v4 = vld [vmem:[%s2609_s11 + $0x88] sm:$0xff]  ;;  %v694_v5 = vld [vmem:[%s2609_s11 + $0x290] sm:$0xff] }
  0xf6   : > { %2200 = vmatpush.msra.mxu2 %v744_v23  ;;  %783 = vmatpush.msra.mxu0 %v744_v23  ;;  %v695_v6 = vld [vmem:[%s2609_s11 + $0x298] sm:$0xff]  ;;  %v630_v7 = vld [vmem:[%s2609_s11 + $0x90] sm:$0xff]  ;;  %v696_v9 = vld [vmem:[%s2609_s11 + $0x2a0] sm:$0xff] }
  0xf7   : > { %2216 = vmatpush.msra.mxu3 %v760_v24  ;;  %992 = vmatpush.msra.mxu1 %v760_v24  ;;  %v631_v8 = vld [vmem:[%s2609_s11 + $0x98] sm:$0xff]  ;;  %v697_v10 = vld [vmem:[%s2609_s11 + $0x2a8] sm:$0xff]  ;;  %v632_v11 = vld [vmem:[%s2609_s11 + $0xa0] sm:$0xff] }
  0xf8   : > { %2201 = vmatpush.msra.mxu2 %v743_v25  ;;  %784 = vmatpush.msra.mxu0 %v743_v25  ;;  %v633_v12 = vld [vmem:[%s2609_s11 + $0xa8] sm:$0xff]  ;;  %v698_v13 = vld [vmem:[%s2609_s11 + $0x2b0] sm:$0xff]  ;;  %v699_v14 = vld [vmem:[%s2609_s11 + $0x2b8] sm:$0xff] }
  0xf9   : > { %2217 = vmatpush.msra.mxu3 %v759_v26  ;;  %993 = vmatpush.msra.mxu1 %v759_v26  ;;  %v634_v15 = vld [vmem:[%s2609_s11 + $0xb0] sm:$0xff]  ;;  %v635_v16 = vld [vmem:[%s2609_s11 + $0xb8] sm:$0xff]  ;;  %v700_v17 = vld [vmem:[%s2609_s11 + $0x2c0] sm:$0xff] }
  0xfa   : > { %2202 = vmatpush.msra.mxu2 %v742_v27  ;;  %785 = vmatpush.msra.mxu0 %v742_v27  ;;  %v701_v18 = vld [vmem:[%s2609_s11 + $0x2c8] sm:$0xff]  ;;  %v636_v19 = vld [vmem:[%s2609_s11 + $0xc0] sm:$0xff]  ;;  %v702_v21 = vld [vmem:[%s2609_s11 + $0x2d0] sm:$0xff] }
  0xfb   : > { %2218 = vmatpush.msra.mxu3 %v758_v28  ;;  %994 = vmatpush.msra.mxu1 %v758_v28  ;;  %v637_v20 = vld [vmem:[%s2609_s11 + $0xc8] sm:$0xff]  ;;  %v703_v22 = vld [vmem:[%s2609_s11 + $0x2d8] sm:$0xff]  ;;  %v638_v23 = vld [vmem:[%s2609_s11 + $0xd0] sm:$0xff] }
  0xfc   : > { %2203 = vmatpush.msra.mxu2 %v741_v29  ;;  %786 = vmatpush.msra.mxu0 %v741_v29  ;;  %v639_v24 = vld [vmem:[%s2609_s11 + $0xd8] sm:$0xff]  ;;  %v704_v25 = vld [vmem:[%s2609_s11 + $0x2e0] sm:$0xff]  ;;  %v705_v26 = vld [vmem:[%s2609_s11 + $0x2e8] sm:$0xff] }
  0xfd   : > { %2219 = vmatpush.msra.mxu3 %v757_v30  ;;  %995 = vmatpush.msra.mxu1 %v757_v30  ;;  %v640_v27 = vld [vmem:[%s2609_s11 + $0xe0] sm:$0xff]  ;;  %v641_v28 = vld [vmem:[%s2609_s11 + $0xe8] sm:$0xff]  ;;  %v706_v29 = vld [vmem:[%s2609_s11 + $0x2f0] sm:$0xff] }
  0xfe   : > { %2204 = vmatpush.msra.mxu2 %v740_v31  ;;  %787 = vmatpush.msra.mxu0 %v740_v31  ;;  %v707_v30 = vld [vmem:[%s2609_s11 + $0x2f8] sm:$0xff]  ;;  %v642_v31 = vld [vmem:[%s2609_s11 + $0xf0] sm:$0xff] }
  0xff   : > { %2220 = vmatpush.msra.mxu3 %v756_v32  ;;  %884 = vmatmul.f32.vlgmr.msra.gmra.mxu2 %v676_v33  ;;  %v708_v33 = vld [vmem:[%s2609_s11 + $0x300] sm:$0xff] }
 0x100   : > { %1093 = vmatmul.f32.vlgmr.msra.gmra.mxu3 %v677_v34  ;;  %996 = vmatpush.msra.mxu1 %v756_v32  ;;  %v643_v32 = vld [vmem:[%s2609_s11 + $0xf8] sm:$0xff]  ;;  %v709_v34 = vld [vmem:[%s2609_s11 + $0x308] sm:$0xff] }
 0x101   : > { %788 = vmatmul.f32.vlgmr.msra.gmra.mxu0 %v612_v35  ;;  %997 = vmatmul.f32.vlgmr.msra.gmra.mxu1 %v613_v36  ;;  %v548_v36 = vld [vmem:[%s4661_s4] sm:$0xff] }
 0x107   : > { %887 = vmatmul.f32.gmra.mxu2 %v678_v37 }
 0x108   : > { %1096 = vmatmul.f32.gmra.mxu3 %v679_v38  ;;  %v644_v38 = vld [vmem:[%s2609_s11 + $0x100] sm:$0xff] }
 0x109   : > { %791 = vmatmul.f32.gmra.mxu0 %v614_v39  ;;  %1000 = vmatmul.f32.gmra.mxu1 %v615_v40  ;;  %v645_v39 = vld [vmem:[%s2609_s11 + $0x108] sm:$0xff] }
 0x10f   : > { %890 = vmatmul.f32.gmra.mxu2 %v680_v41 }
 0x110   : > { %1099 = vmatmul.f32.gmra.mxu3 %v681_v42 }
 0x111   : > { %794 = vmatmul.f32.gmra.mxu0 %v616_v43  ;;  %1003 = vmatmul.f32.gmra.mxu1 %v617_v44  ;;  %v580_v43 = vld [vmem:[%s4661_s4 + $0x100] sm:$0xff] }
 0x117   : > { %893 = vmatmul.f32.gmra.mxu2 %v682_v45 }
 0x118   : > { %1102 = vmatmul.f32.gmra.mxu3 %v683_v46  ;;  %v710_v46 = vld [vmem:[%s2609_s11 + $0x310] sm:$0xff] }
 0x119   : > { %797 = vmatmul.f32.gmra.mxu0 %v618_v47  ;;  %1006 = vmatmul.f32.gmra.mxu1 %v619_v48  ;;  %v711_v47 = vld [vmem:[%s2609_s11 + $0x318] sm:$0xff] }
 0x11f   : > { %896 = vmatmul.f32.gmra.mxu2 %v684_v49 }
 0x120   : > { %1105 = vmatmul.f32.gmra.mxu3 %v685_v50  ;;  %v549_v50 = vld [vmem:[%s4661_s4 + $0x8] sm:$0xff] }
 0x121   : > { %800 = vmatmul.f32.gmra.mxu0 %v620_v51  ;;  %1009 = vmatmul.f32.gmra.mxu1 %v621_v52  ;;  %v646_v52 = vld [vmem:[%s2609_s11 + $0x110] sm:$0xff] }
 0x127   : > { %899 = vmatmul.f32.gmra.mxu2 %v686_v53  ;;  %v647_v53 = vld [vmem:[%s2609_s11 + $0x118] sm:$0xff] }
 0x128   : > { %1108 = vmatmul.f32.gmra.mxu3 %v687_v54 }
 0x129   : > { %803 = vmatmul.f32.gmra.mxu0 %v622_v55  ;;  %1012 = vmatmul.f32.gmra.mxu1 %v623_v56 }
 0x12f   : > { %902 = vmatmul.f32.gmra.mxu2 %v688_v57  ;;  %v581_v57 = vld [vmem:[%s4661_s4 + $0x108] sm:$0xff] }
 0x130   : > { %1111 = vmatmul.f32.gmra.mxu3 %v689_v58 }
 0x131   : > { %806 = vmatmul.f32.gmra.mxu0 %v624_v59  ;;  %1015 = vmatmul.f32.gmra.mxu1 %v625_v60  ;;  %v712_v60 = vld [vmem:[%s2609_s11 + $0x320] sm:$0xff] }
 0x137   : > { %905 = vmatmul.f32.gmra.mxu2 %v690_v61  ;;  %v713_v61 = vld [vmem:[%s2609_s11 + $0x328] sm:$0xff] }
 0x138   : > { %1114 = vmatmul.f32.gmra.mxu3 %v691_v62 }
 0x139   : > { %809 = vmatmul.f32.gmra.mxu0 %v626_v63  ;;  %1018 = vmatmul.f32.gmra.mxu1 %v627_v0  ;;  %v550_v0 = vld [vmem:[%s4661_s4 + $0x10] sm:$0xff] }
 0x13f   : > { %908 = vmatmul.f32.gmra.mxu2 %v692_v1 }
 0x140   : > { %1117 = vmatmul.f32.gmra.mxu3 %v693_v2  ;;  %v648_v2 = vld [vmem:[%s2609_s11 + $0x120] sm:$0xff] }
 0x141   : > { %812 = vmatmul.f32.gmra.mxu0 %v628_v3  ;;  %1021 = vmatmul.f32.gmra.mxu1 %v629_v4  ;;  %v649_v3 = vld [vmem:[%s2609_s11 + $0x128] sm:$0xff] }
 0x147   : > { %911 = vmatmul.f32.gmra.mxu2 %v694_v5 }
 0x148   : > { %1120 = vmatmul.f32.gmra.mxu3 %v695_v6 }
 0x149   : > { %815 = vmatmul.f32.gmra.mxu0 %v630_v7  ;;  %1024 = vmatmul.f32.gmra.mxu1 %v631_v8  ;;  %v582_v7 = vld [vmem:[%s4661_s4 + $0x110] sm:$0xff] }
 0x14f   : > { %914 = vmatmul.f32.gmra.mxu2 %v696_v9 }
 0x150   : > { %1123 = vmatmul.f32.gmra.mxu3 %v697_v10  ;;  %v714_v10 = vld [vmem:[%s2609_s11 + $0x330] sm:$0xff] }
 0x151   : > { %818 = vmatmul.f32.gmra.mxu0 %v632_v11  ;;  %1027 = vmatmul.f32.gmra.mxu1 %v633_v12  ;;  %v715_v11 = vld [vmem:[%s2609_s11 + $0x338] sm:$0xff] }
 0x157   : > { %917 = vmatmul.f32.gmra.mxu2 %v698_v13 }
 0x158   : > { %1126 = vmatmul.f32.gmra.mxu3 %v699_v14  ;;  %v551_v14 = vld [vmem:[%s4661_s4 + $0x18] sm:$0xff] }
 0x159   : > { %821 = vmatmul.f32.gmra.mxu0 %v634_v15  ;;  %1030 = vmatmul.f32.gmra.mxu1 %v635_v16  ;;  %v650_v16 = vld [vmem:[%s2609_s11 + $0x130] sm:$0xff] }
 0x15f   : > { %920 = vmatmul.f32.gmra.mxu2 %v700_v17  ;;  %v651_v17 = vld [vmem:[%s2609_s11 + $0x138] sm:$0xff] }
 0x160   : > { %1129 = vmatmul.f32.gmra.mxu3 %v701_v18 }
 0x161   : > { %824 = vmatmul.f32.gmra.mxu0 %v636_v19  ;;  %1033 = vmatmul.f32.gmra.mxu1 %v637_v20 }
 0x167   : > { %923 = vmatmul.f32.gmra.mxu2 %v702_v21  ;;  %v583_v21 = vld [vmem:[%s4661_s4 + $0x118] sm:$0xff] }
 0x168   : > { %1132 = vmatmul.f32.gmra.mxu3 %v703_v22 }
 0x169   : > { %827 = vmatmul.f32.gmra.mxu0 %v638_v23  ;;  %1036 = vmatmul.f32.gmra.mxu1 %v639_v24  ;;  %v716_v24 = vld [vmem:[%s2609_s11 + $0x340] sm:$0xff] }
 0x16f   : > { %926 = vmatmul.f32.gmra.mxu2 %v704_v25  ;;  %v717_v25 = vld [vmem:[%s2609_s11 + $0x348] sm:$0xff] }
 0x170   : > { %1135 = vmatmul.f32.gmra.mxu3 %v705_v26 }
 0x171   : > { %830 = vmatmul.f32.gmra.mxu0 %v640_v27  ;;  %1039 = vmatmul.f32.gmra.mxu1 %v641_v28  ;;  %v552_v28 = vld [vmem:[%s4661_s4 + $0x20] sm:$0xff] }
 0x177   : > { %929 = vmatmul.f32.gmra.mxu2 %v706_v29 }
 0x178   : > { %1138 = vmatmul.f32.gmra.mxu3 %v707_v30  ;;  %v652_v30 = vld [vmem:[%s2609_s11 + $0x140] sm:$0xff] }
 0x179   : > { %833 = vmatmul.f32.gmra.mxu0 %v642_v31  ;;  %1042 = vmatmul.f32.gmra.mxu1 %v643_v32  ;;  %v653_v31 = vld [vmem:[%s2609_s11 + $0x148] sm:$0xff] }
 0x17e   : > { %v789_v35 = vpop.f32.mrf.mxu0  ;;  %v998_v37 = vpop.f32.mrf.mxu1 }
 0x17f   : > { %932 = vmatmul.f32.gmra.mxu2 %v708_v33  ;;  %v999_v40 = vadd.f32 %v998_v37, %v789_v35  ;;  %v584_v35 = vld [vmem:[%s4661_s4 + $0x120] sm:$0xff] }
 0x180   : > { %1141 = vmatmul.f32.gmra.mxu3 %v709_v34 }
 0x181   : > { %v1190_v41 = vadd.f32 %v999_v40, %v548_v36  ;;  %836 = vmatmul.f32.gmra.mxu0 %v644_v38  ;;  %1045 = vmatmul.f32.gmra.mxu1 %v645_v39  ;;  %v718_v38 = vld [vmem:[%s2609_s11 + $0x350] sm:$0xff]  ;;  %v719_v39 = vld [vmem:[%s2609_s11 + $0x358] sm:$0xff] }
 0x182   : > { %v885_v42 = vpop.f32.mrf.mxu2 }
 0x183   : > { %v1094_v44 = vpop.f32.mrf.mxu3  ;;  %1254 = vst [vmem:[%s4661_s4] sm:$0xff] %v1190_v41 }
 0x184   : > { %v1095_v45 = vadd.f32 %v1094_v44, %v885_v42  ;;  %v553_v42 = vld [vmem:[%s4661_s4 + $0x28] sm:$0xff]  ;;  %v654_v44 = vld [vmem:[%s2609_s11 + $0x150] sm:$0xff] }
 0x186   : > { %v1222_v48 = vadd.f32 %v1095_v45, %v580_v43  ;;  %v792_v49 = vpop.f32.mrf.mxu0  ;;  %v1001_v51 = vpop.f32.mrf.mxu1  ;;  %v655_v45 = vld [vmem:[%s2609_s11 + $0x158] sm:$0xff] }
 0x187   : > { %935 = vmatmul.f32.gmra.mxu2 %v710_v46  ;;  %v1002_v54 = vadd.f32 %v1001_v51, %v792_v49  ;;  %v585_v49 = vld [vmem:[%s4661_s4 + $0x128] sm:$0xff] }
 0x188   : > { %1286 = vst [vmem:[%s4661_s4 + $0x100] sm:$0xff] %v1222_v48  ;;  %1144 = vmatmul.f32.gmra.mxu3 %v711_v47 }
 0x189   : > { %v1191_v55 = vadd.f32 %v1002_v54, %v549_v50  ;;  %839 = vmatmul.f32.gmra.mxu0 %v646_v52  ;;  %1048 = vmatmul.f32.gmra.mxu1 %v647_v53  ;;  %v720_v52 = vld [vmem:[%s2609_s11 + $0x360] sm:$0xff]  ;;  %v721_v53 = vld [vmem:[%s2609_s11 + $0x368] sm:$0xff] }
 0x18a   : > { %v888_v56 = vpop.f32.mrf.mxu2 }
 0x18b   : > { %v1097_v58 = vpop.f32.mrf.mxu3  ;;  %1255 = vst [vmem:[%s4661_s4 + $0x8] sm:$0xff] %v1191_v55 }
 0x18c   : > { %v1098_v59 = vadd.f32 %v1097_v58, %v888_v56  ;;  %v554_v56 = vld [vmem:[%s4661_s4 + $0x30] sm:$0xff]  ;;  %v656_v58 = vld [vmem:[%s2609_s11 + $0x160] sm:$0xff] }
 0x18e   : > { %v1223_v62 = vadd.f32 %v1098_v59, %v581_v57  ;;  %v795_v63 = vpop.f32.mrf.mxu0  ;;  %v1004_v1 = vpop.f32.mrf.mxu1  ;;  %v657_v59 = vld [vmem:[%s2609_s11 + $0x168] sm:$0xff] }
 0x18f   : > { %938 = vmatmul.f32.gmra.mxu2 %v712_v60  ;;  %v1005_v4 = vadd.f32 %v1004_v1, %v795_v63  ;;  %v586_v63 = vld [vmem:[%s4661_s4 + $0x130] sm:$0xff] }
 0x190   : > { %1287 = vst [vmem:[%s4661_s4 + $0x108] sm:$0xff] %v1223_v62  ;;  %1147 = vmatmul.f32.gmra.mxu3 %v713_v61 }
 0x191   : > { %v1192_v5 = vadd.f32 %v1005_v4, %v550_v0  ;;  %842 = vmatmul.f32.gmra.mxu0 %v648_v2  ;;  %1051 = vmatmul.f32.gmra.mxu1 %v649_v3  ;;  %v722_v2 = vld [vmem:[%s2609_s11 + $0x370] sm:$0xff]  ;;  %v723_v3 = vld [vmem:[%s2609_s11 + $0x378] sm:$0xff] }
 0x192   : > { %v891_v6 = vpop.f32.mrf.mxu2 }
 0x193   : > { %v1100_v8 = vpop.f32.mrf.mxu3  ;;  %1256 = vst [vmem:[%s4661_s4 + $0x10] sm:$0xff] %v1192_v5 }
 0x194   : > { %v1101_v9 = vadd.f32 %v1100_v8, %v891_v6  ;;  %v555_v6 = vld [vmem:[%s4661_s4 + $0x38] sm:$0xff]  ;;  %v658_v8 = vld [vmem:[%s2609_s11 + $0x170] sm:$0xff] }
 0x196   : > { %v1224_v12 = vadd.f32 %v1101_v9, %v582_v7  ;;  %v798_v13 = vpop.f32.mrf.mxu0  ;;  %v1007_v15 = vpop.f32.mrf.mxu1  ;;  %v659_v9 = vld [vmem:[%s2609_s11 + $0x178] sm:$0xff] }
 0x197   : > { %941 = vmatmul.f32.gmra.mxu2 %v714_v10  ;;  %v1008_v18 = vadd.f32 %v1007_v15, %v798_v13  ;;  %v587_v13 = vld [vmem:[%s4661_s4 + $0x138] sm:$0xff] }
 0x198   : > { %1288 = vst [vmem:[%s4661_s4 + $0x110] sm:$0xff] %v1224_v12  ;;  %1150 = vmatmul.f32.gmra.mxu3 %v715_v11 }
 0x199   : > { %v1193_v19 = vadd.f32 %v1008_v18, %v551_v14  ;;  %845 = vmatmul.f32.gmra.mxu0 %v650_v16  ;;  %1054 = vmatmul.f32.gmra.mxu1 %v651_v17  ;;  %v724_v16 = vld [vmem:[%s2609_s11 + $0x380] sm:$0xff]  ;;  %v725_v17 = vld [vmem:[%s2609_s11 + $0x388] sm:$0xff] }
 0x19a   : > { %v894_v20 = vpop.f32.mrf.mxu2 }
 0x19b   : > { %v1103_v22 = vpop.f32.mrf.mxu3  ;;  %1257 = vst [vmem:[%s4661_s4 + $0x18] sm:$0xff] %v1193_v19 }
 0x19c   : > { %v1104_v23 = vadd.f32 %v1103_v22, %v894_v20  ;;  %v556_v20 = vld [vmem:[%s4661_s4 + $0x40] sm:$0xff] }
 0x19d   : > { %v660_v22 = vld [vmem:[%s2609_s11 + $0x180] sm:$0xff] }
 0x19e   : > { %v1225_v26 = vadd.f32 %v1104_v23, %v583_v21  ;;  %v801_v27 = vpop.f32.mrf.mxu0  ;;  %v1010_v29 = vpop.f32.mrf.mxu1  ;;  %v661_v23 = vld [vmem:[%s2609_s11 + $0x188] sm:$0xff] }
 0x19f   : > { %944 = vmatmul.f32.gmra.mxu2 %v716_v24  ;;  %v1011_v32 = vadd.f32 %v1010_v29, %v801_v27  ;;  %v588_v27 = vld [vmem:[%s4661_s4 + $0x140] sm:$0xff] }
 0x1a0   : > { %1289 = vst [vmem:[%s4661_s4 + $0x118] sm:$0xff] %v1225_v26  ;;  %1153 = vmatmul.f32.gmra.mxu3 %v717_v25 }
 0x1a1   : > { %v1194_v33 = vadd.f32 %v1011_v32, %v552_v28  ;;  %848 = vmatmul.f32.gmra.mxu0 %v652_v30  ;;  %1057 = vmatmul.f32.gmra.mxu1 %v653_v31  ;;  %v726_v30 = vld [vmem:[%s2609_s11 + $0x390] sm:$0xff]  ;;  %v727_v31 = vld [vmem:[%s2609_s11 + $0x398] sm:$0xff] }
 0x1a2   : > { %v897_v34 = vpop.f32.mrf.mxu2 }
 0x1a3   : > { %v1106_v36 = vpop.f32.mrf.mxu3  ;;  %1258 = vst [vmem:[%s4661_s4 + $0x20] sm:$0xff] %v1194_v33 }
 0x1a4   : > { %v1107_v37 = vadd.f32 %v1106_v36, %v897_v34  ;;  %v557_v34 = vld [vmem:[%s4661_s4 + $0x48] sm:$0xff]  ;;  %v662_v36 = vld [vmem:[%s2609_s11 + $0x190] sm:$0xff] }
 0x1a6   : > { %v1226_v40 = vadd.f32 %v1107_v37, %v584_v35  ;;  %v804_v41 = vpop.f32.mrf.mxu0  ;;  %v1013_v43 = vpop.f32.mrf.mxu1  ;;  %v663_v37 = vld [vmem:[%s2609_s11 + $0x198] sm:$0xff] }
 0x1a7   : > { %947 = vmatmul.f32.gmra.mxu2 %v718_v38  ;;  %v1014_v46 = vadd.f32 %v1013_v43, %v804_v41  ;;  %v589_v41 = vld [vmem:[%s4661_s4 + $0x148] sm:$0xff] }
 0x1a8   : > { %1290 = vst [vmem:[%s4661_s4 + $0x120] sm:$0xff] %v1226_v40  ;;  %1156 = vmatmul.f32.gmra.mxu3 %v719_v39 }
 0x1a9   : > { %v1195_v47 = vadd.f32 %v1014_v46, %v553_v42  ;;  %851 = vmatmul.f32.gmra.mxu0 %v654_v44  ;;  %1060 = vmatmul.f32.gmra.mxu1 %v655_v45  ;;  %v728_v44 = vld [vmem:[%s2609_s11 + $0x3a0] sm:$0xff]  ;;  %v729_v45 = vld [vmem:[%s2609_s11 + $0x3a8] sm:$0xff] }
 0x1aa   : > { %v900_v48 = vpop.f32.mrf.mxu2 }
 0x1ab   : > { %v1109_v50 = vpop.f32.mrf.mxu3  ;;  %1259 = vst [vmem:[%s4661_s4 + $0x28] sm:$0xff] %v1195_v47 }
 0x1ac   : > { %v1110_v51 = vadd.f32 %v1109_v50, %v900_v48  ;;  %v558_v48 = vld [vmem:[%s4661_s4 + $0x50] sm:$0xff]  ;;  %v664_v50 = vld [vmem:[%s2609_s11 + $0x1a0] sm:$0xff] }
 0x1ae   : > { %v1227_v54 = vadd.f32 %v1110_v51, %v585_v49  ;;  %v807_v55 = vpop.f32.mrf.mxu0  ;;  %v1016_v57 = vpop.f32.mrf.mxu1  ;;  %v665_v51 = vld [vmem:[%s2609_s11 + $0x1a8] sm:$0xff] }
 0x1af   : > { %950 = vmatmul.f32.gmra.mxu2 %v720_v52  ;;  %v1017_v60 = vadd.f32 %v1016_v57, %v807_v55  ;;  %v590_v55 = vld [vmem:[%s4661_s4 + $0x150] sm:$0xff] }
 0x1b0   : > { %1291 = vst [vmem:[%s4661_s4 + $0x128] sm:$0xff] %v1227_v54  ;;  %1159 = vmatmul.f32.gmra.mxu3 %v721_v53 }
 0x1b1   : > { %v1196_v61 = vadd.f32 %v1017_v60, %v554_v56  ;;  %854 = vmatmul.f32.gmra.mxu0 %v656_v58  ;;  %1063 = vmatmul.f32.gmra.mxu1 %v657_v59  ;;  %v730_v58 = vld [vmem:[%s2609_s11 + $0x3b0] sm:$0xff]  ;;  %v731_v59 = vld [vmem:[%s2609_s11 + $0x3b8] sm:$0xff] }
 0x1b2   : > { %v903_v62 = vpop.f32.mrf.mxu2 }
 0x1b3   : > { %v1112_v0 = vpop.f32.mrf.mxu3  ;;  %1260 = vst [vmem:[%s4661_s4 + $0x30] sm:$0xff] %v1196_v61 }
 0x1b4   : > { %v1113_v1 = vadd.f32 %v1112_v0, %v903_v62  ;;  %v559_v62 = vld [vmem:[%s4661_s4 + $0x58] sm:$0xff]  ;;  %v666_v0 = vld [vmem:[%s2609_s11 + $0x1b0] sm:$0xff] }
 0x1b6   : > { %v1228_v4 = vadd.f32 %v1113_v1, %v586_v63  ;;  %v810_v5 = vpop.f32.mrf.mxu0  ;;  %v1019_v7 = vpop.f32.mrf.mxu1  ;;  %v667_v1 = vld [vmem:[%s2609_s11 + $0x1b8] sm:$0xff] }
 0x1b7   : > { %953 = vmatmul.f32.gmra.mxu2 %v722_v2  ;;  %v1020_v10 = vadd.f32 %v1019_v7, %v810_v5  ;;  %v591_v5 = vld [vmem:[%s4661_s4 + $0x158] sm:$0xff] }
 0x1b8   : > { %1292 = vst [vmem:[%s4661_s4 + $0x130] sm:$0xff] %v1228_v4  ;;  %1162 = vmatmul.f32.gmra.mxu3 %v723_v3 }
 0x1b9   : > { %v1197_v11 = vadd.f32 %v1020_v10, %v555_v6  ;;  %857 = vmatmul.f32.gmra.mxu0 %v658_v8  ;;  %1066 = vmatmul.f32.gmra.mxu1 %v659_v9  ;;  %v732_v8 = vld [vmem:[%s2609_s11 + $0x3c0] sm:$0xff]  ;;  %v733_v9 = vld [vmem:[%s2609_s11 + $0x3c8] sm:$0xff] }
 0x1ba   : > { %v906_v12 = vpop.f32.mrf.mxu2 }
 0x1bb   : > { %v1115_v14 = vpop.f32.mrf.mxu3  ;;  %1261 = vst [vmem:[%s4661_s4 + $0x38] sm:$0xff] %v1197_v11 }
 0x1bc   : > { %v1116_v15 = vadd.f32 %v1115_v14, %v906_v12  ;;  %v560_v12 = vld [vmem:[%s4661_s4 + $0x60] sm:$0xff] }
 0x1bd   : > { %v668_v14 = vld [vmem:[%s2609_s11 + $0x1c0] sm:$0xff] }
 0x1be   : > { %v1229_v18 = vadd.f32 %v1116_v15, %v587_v13  ;;  %v813_v19 = vpop.f32.mrf.mxu0  ;;  %v1022_v21 = vpop.f32.mrf.mxu1  ;;  %v669_v15 = vld [vmem:[%s2609_s11 + $0x1c8] sm:$0xff] }
 0x1bf   : > { %956 = vmatmul.f32.gmra.mxu2 %v724_v16  ;;  %v1023_v24 = vadd.f32 %v1022_v21, %v813_v19  ;;  %v592_v19 = vld [vmem:[%s4661_s4 + $0x160] sm:$0xff] }
 0x1c0   : > { %1293 = vst [vmem:[%s4661_s4 + $0x138] sm:$0xff] %v1229_v18  ;;  %1165 = vmatmul.f32.gmra.mxu3 %v725_v17 }
 0x1c1   : > { %v1198_v25 = vadd.f32 %v1023_v24, %v556_v20  ;;  %860 = vmatmul.f32.gmra.mxu0 %v660_v22  ;;  %1069 = vmatmul.f32.gmra.mxu1 %v661_v23  ;;  %v734_v22 = vld [vmem:[%s2609_s11 + $0x3d0] sm:$0xff]  ;;  %v735_v23 = vld [vmem:[%s2609_s11 + $0x3d8] sm:$0xff] }
 0x1c2   : > { %v909_v26 = vpop.f32.mrf.mxu2 }
 0x1c3   : > { %v1118_v28 = vpop.f32.mrf.mxu3  ;;  %1262 = vst [vmem:[%s4661_s4 + $0x40] sm:$0xff] %v1198_v25 }
 0x1c4   : > { %v1119_v29 = vadd.f32 %v1118_v28, %v909_v26  ;;  %v561_v26 = vld [vmem:[%s4661_s4 + $0x68] sm:$0xff]  ;;  %v670_v28 = vld [vmem:[%s2609_s11 + $0x1d0] sm:$0xff] }
 0x1c6   : > { %v1230_v32 = vadd.f32 %v1119_v29, %v588_v27  ;;  %v816_v33 = vpop.f32.mrf.mxu0  ;;  %v1025_v35 = vpop.f32.mrf.mxu1  ;;  %v671_v29 = vld [vmem:[%s2609_s11 + $0x1d8] sm:$0xff] }
 0x1c7   : > { %959 = vmatmul.f32.gmra.mxu2 %v726_v30  ;;  %v1026_v38 = vadd.f32 %v1025_v35, %v816_v33  ;;  %v593_v33 = vld [vmem:[%s4661_s4 + $0x168] sm:$0xff] }
 0x1c8   : > { %1294 = vst [vmem:[%s4661_s4 + $0x140] sm:$0xff] %v1230_v32  ;;  %1168 = vmatmul.f32.gmra.mxu3 %v727_v31 }
 0x1c9   : > { %v1199_v39 = vadd.f32 %v1026_v38, %v557_v34  ;;  %863 = vmatmul.f32.gmra.mxu0 %v662_v36  ;;  %1072 = vmatmul.f32.gmra.mxu1 %v663_v37  ;;  %v736_v36 = vld [vmem:[%s2609_s11 + $0x3e0] sm:$0xff]  ;;  %v737_v37 = vld [vmem:[%s2609_s11 + $0x3e8] sm:$0xff] }
 0x1ca   : > { %v912_v40 = vpop.f32.mrf.mxu2 }
 0x1cb   : > { %v1121_v42 = vpop.f32.mrf.mxu3  ;;  %1263 = vst [vmem:[%s4661_s4 + $0x48] sm:$0xff] %v1199_v39 }
 0x1cc   : > { %v1122_v43 = vadd.f32 %v1121_v42, %v912_v40  ;;  %v562_v40 = vld [vmem:[%s4661_s4 + $0x70] sm:$0xff]  ;;  %v672_v42 = vld [vmem:[%s2609_s11 + $0x1e0] sm:$0xff] }
 0x1ce   : > { %v1231_v46 = vadd.f32 %v1122_v43, %v589_v41  ;;  %v819_v47 = vpop.f32.mrf.mxu0  ;;  %v1028_v49 = vpop.f32.mrf.mxu1  ;;  %v673_v43 = vld [vmem:[%s2609_s11 + $0x1e8] sm:$0xff] }
 0x1cf   : > { %962 = vmatmul.f32.gmra.mxu2 %v728_v44  ;;  %v1029_v52 = vadd.f32 %v1028_v49, %v819_v47  ;;  %v594_v47 = vld [vmem:[%s4661_s4 + $0x170] sm:$0xff] }
 0x1d0   : > { %1295 = vst [vmem:[%s4661_s4 + $0x148] sm:$0xff] %v1231_v46  ;;  %1171 = vmatmul.f32.gmra.mxu3 %v729_v45 }
 0x1d1   : > { %v1200_v53 = vadd.f32 %v1029_v52, %v558_v48  ;;  %866 = vmatmul.f32.gmra.mxu0 %v664_v50  ;;  %1075 = vmatmul.f32.gmra.mxu1 %v665_v51  ;;  %v738_v50 = vld [vmem:[%s2609_s11 + $0x3f0] sm:$0xff]  ;;  %v739_v51 = vld [vmem:[%s2609_s11 + $0x3f8] sm:$0xff] }
 0x1d2   : > { %v915_v54 = vpop.f32.mrf.mxu2 }
 0x1d3   : > { %v1124_v56 = vpop.f32.mrf.mxu3  ;;  %1264 = vst [vmem:[%s4661_s4 + $0x50] sm:$0xff] %v1200_v53 }
 0x1d4   : > { %v1125_v57 = vadd.f32 %v1124_v56, %v915_v54  ;;  %v563_v54 = vld [vmem:[%s4661_s4 + $0x78] sm:$0xff]  ;;  %v674_v56 = vld [vmem:[%s2609_s11 + $0x1f0] sm:$0xff] }
 0x1d6   : > { %v1232_v60 = vadd.f32 %v1125_v57, %v590_v55  ;;  %v822_v61 = vpop.f32.mrf.mxu0  ;;  %v1031_v63 = vpop.f32.mrf.mxu1  ;;  %v675_v57 = vld [vmem:[%s2609_s11 + $0x1f8] sm:$0xff] }
 0x1d7   : > { %965 = vmatmul.f32.gmra.mxu2 %v730_v58  ;;  %v1032_v2 = vadd.f32 %v1031_v63, %v822_v61  ;;  %v595_v61 = vld [vmem:[%s4661_s4 + $0x178] sm:$0xff] }
 0x1d8   : > { %1296 = vst [vmem:[%s4661_s4 + $0x150] sm:$0xff] %v1232_v60  ;;  %1174 = vmatmul.f32.gmra.mxu3 %v731_v59 }
 0x1d9   : > { %v1201_v3 = vadd.f32 %v1032_v2, %v559_v62  ;;  %869 = vmatmul.f32.gmra.mxu0 %v666_v0  ;;  %1078 = vmatmul.f32.gmra.mxu1 %v667_v1  ;;  %v564_v2 = vld [vmem:[%s4661_s4 + $0x80] sm:$0xff] }
 0x1da   : > { %v918_v4 = vpop.f32.mrf.mxu2 }
 0x1db   : > { %v1127_v6 = vpop.f32.mrf.mxu3  ;;  %1265 = vst [vmem:[%s4661_s4 + $0x58] sm:$0xff] %v1201_v3 }
 0x1dc   : > { %v1128_v7 = vadd.f32 %v1127_v6, %v918_v4 }
 0x1de   : > { %v1233_v10 = vadd.f32 %v1128_v7, %v591_v5  ;;  %v825_v11 = vpop.f32.mrf.mxu0  ;;  %v1034_v13 = vpop.f32.mrf.mxu1  ;;  %v596_v7 = vld [vmem:[%s4661_s4 + $0x180] sm:$0xff] }
 0x1df   : > { %968 = vmatmul.f32.gmra.mxu2 %v732_v8  ;;  %v1035_v16 = vadd.f32 %v1034_v13, %v825_v11 }
 0x1e0   : > { %1297 = vst [vmem:[%s4661_s4 + $0x158] sm:$0xff] %v1233_v10  ;;  %1177 = vmatmul.f32.gmra.mxu3 %v733_v9 }
 0x1e1   : > { %v1202_v17 = vadd.f32 %v1035_v16, %v560_v12  ;;  %872 = vmatmul.f32.gmra.mxu0 %v668_v14  ;;  %1081 = vmatmul.f32.gmra.mxu1 %v669_v15  ;;  %v565_v12 = vld [vmem:[%s4661_s4 + $0x88] sm:$0xff] }
 0x1e2   : > { %v921_v18 = vpop.f32.mrf.mxu2 }
 0x1e3   : > { %v1130_v20 = vpop.f32.mrf.mxu3  ;;  %1266 = vst [vmem:[%s4661_s4 + $0x60] sm:$0xff] %v1202_v17  ;;  %v597_v17 = vld [vmem:[%s4661_s4 + $0x188] sm:$0xff] }
 0x1e4   : > { %v1131_v21 = vadd.f32 %v1130_v20, %v921_v18 }
 0x1e6   : > { %v1234_v24 = vadd.f32 %v1131_v21, %v592_v19  ;;  %v828_v25 = vpop.f32.mrf.mxu0  ;;  %v1037_v27 = vpop.f32.mrf.mxu1 }
 0x1e7   : > { %971 = vmatmul.f32.gmra.mxu2 %v734_v22  ;;  %v1038_v30 = vadd.f32 %v1037_v27, %v828_v25  ;;  %v566_v22 = vld [vmem:[%s4661_s4 + $0x90] sm:$0xff] }
 0x1e8   : > { %1298 = vst [vmem:[%s4661_s4 + $0x160] sm:$0xff] %v1234_v24  ;;  %1180 = vmatmul.f32.gmra.mxu3 %v735_v23  ;;  %v598_v27 = vld [vmem:[%s4661_s4 + $0x190] sm:$0xff] }
 0x1e9   : > { %v1203_v31 = vadd.f32 %v1038_v30, %v561_v26  ;;  %875 = vmatmul.f32.gmra.mxu0 %v670_v28  ;;  %1084 = vmatmul.f32.gmra.mxu1 %v671_v29 }
 0x1ea   : > { %v924_v32 = vpop.f32.mrf.mxu2 }
 0x1eb   : > { %v1133_v34 = vpop.f32.mrf.mxu3  ;;  %1267 = vst [vmem:[%s4661_s4 + $0x68] sm:$0xff] %v1203_v31 }
 0x1ec   : > { %v1134_v35 = vadd.f32 %v1133_v34, %v924_v32  ;;  %v567_v32 = vld [vmem:[%s4661_s4 + $0x98] sm:$0xff] }
 0x1ee   : > { %v1235_v38 = vadd.f32 %v1134_v35, %v593_v33  ;;  %v831_v39 = vpop.f32.mrf.mxu0  ;;  %v1040_v41 = vpop.f32.mrf.mxu1 }
 0x1ef   : > { %974 = vmatmul.f32.gmra.mxu2 %v736_v36  ;;  %v1041_v44 = vadd.f32 %v1040_v41, %v831_v39 }
 0x1f0   : > { %1299 = vst [vmem:[%s4661_s4 + $0x168] sm:$0xff] %v1235_v38  ;;  %1183 = vmatmul.f32.gmra.mxu3 %v737_v37  ;;  %v599_v37 = vld [vmem:[%s4661_s4 + $0x198] sm:$0xff] }
 0x1f1   : > { %v1204_v45 = vadd.f32 %v1041_v44, %v562_v40  ;;  %878 = vmatmul.f32.gmra.mxu0 %v672_v42  ;;  %1087 = vmatmul.f32.gmra.mxu1 %v673_v43  ;;  %v568_v42 = vld [vmem:[%s4661_s4 + $0xa0] sm:$0xff] }
 0x1f2   : > { %v927_v46 = vpop.f32.mrf.mxu2 }
 0x1f3   : > { %v1136_v48 = vpop.f32.mrf.mxu3  ;;  %1268 = vst [vmem:[%s4661_s4 + $0x70] sm:$0xff] %v1204_v45 }
 0x1f4   : > { %v1137_v49 = vadd.f32 %v1136_v48, %v927_v46 }
 0x1f6   : > { %v1236_v52 = vadd.f32 %v1137_v49, %v594_v47  ;;  %v834_v53 = vpop.f32.mrf.mxu0  ;;  %v1043_v55 = vpop.f32.mrf.mxu1  ;;  %v600_v47 = vld [vmem:[%s4661_s4 + $0x1a0] sm:$0xff] }
 0x1f7   : > { %977 = vmatmul.f32.gmra.mxu2 %v738_v50  ;;  %v1044_v58 = vadd.f32 %v1043_v55, %v834_v53 }
 0x1f8   : > { %1300 = vst [vmem:[%s4661_s4 + $0x170] sm:$0xff] %v1236_v52  ;;  %1186 = vmatmul.f32.gmra.mxu3 %v739_v51  ;;  %v569_v52 = vld [vmem:[%s4661_s4 + $0xa8] sm:$0xff] }
 0x1f9   : > { %v1205_v59 = vadd.f32 %v1044_v58, %v563_v54  ;;  %881 = vmatmul.f32.gmra.mxu0 %v674_v56  ;;  %1090 = vmatmul.f32.gmra.mxu1 %v675_v57  ;;  %v601_v57 = vld [vmem:[%s4661_s4 + $0x1a8] sm:$0xff] }
 0x1fa   : > { %v930_v60 = vpop.f32.mrf.mxu2 }
 0x1fb   : > { %v1139_v62 = vpop.f32.mrf.mxu3  ;;  %1269 = vst [vmem:[%s4661_s4 + $0x78] sm:$0xff] %v1205_v59 }
 0x1fc   : > { %v1140_v63 = vadd.f32 %v1139_v62, %v930_v60  ;;  %v570_v62 = vld [vmem:[%s4661_s4 + $0xb0] sm:$0xff] }
 0x1fe   : > { %v1237_v0 = vadd.f32 %v1140_v63, %v595_v61  ;;  %v837_v1 = vpop.f32.mrf.mxu0  ;;  %v1046_v3 = vpop.f32.mrf.mxu1 }
 0x1ff   : > { %v1047_v4 = vadd.f32 %v1046_v3, %v837_v1  ;;  %v602_v3 = vld [vmem:[%s4661_s4 + $0x1b0] sm:$0xff] }
 0x200   : > { %1301 = vst [vmem:[%s4661_s4 + $0x178] sm:$0xff] %v1237_v0 }
 0x201   : > { %v1206_v5 = vadd.f32 %v1047_v4, %v564_v2 }
 0x202   : > { %v933_v6 = vpop.f32.mrf.mxu2 }
 0x203   : > { %v1142_v8 = vpop.f32.mrf.mxu3  ;;  %1270 = vst [vmem:[%s4661_s4 + $0x80] sm:$0xff] %v1206_v5 }
 0x204   : > { %v1143_v9 = vadd.f32 %v1142_v8, %v933_v6  ;;  %v571_v8 = vld [vmem:[%s4661_s4 + $0xb8] sm:$0xff] }
 0x206   : > { %v1238_v10 = vadd.f32 %v1143_v9, %v596_v7  ;;  %v840_v11 = vpop.f32.mrf.mxu0  ;;  %v1049_v13 = vpop.f32.mrf.mxu1 }
 0x207   : > { %v1050_v14 = vadd.f32 %v1049_v13, %v840_v11  ;;  %v603_v13 = vld [vmem:[%s4661_s4 + $0x1b8] sm:$0xff] }
 0x208   : > { %1302 = vst [vmem:[%s4661_s4 + $0x180] sm:$0xff] %v1238_v10 }
 0x209   : > { %v1207_v15 = vadd.f32 %v1050_v14, %v565_v12 }
 0x20a   : > { %v936_v16 = vpop.f32.mrf.mxu2 }
 0x20b   : > { %v1145_v18 = vpop.f32.mrf.mxu3  ;;  %1271 = vst [vmem:[%s4661_s4 + $0x88] sm:$0xff] %v1207_v15 }
 0x20c   : > { %v1146_v19 = vadd.f32 %v1145_v18, %v936_v16  ;;  %v572_v18 = vld [vmem:[%s4661_s4 + $0xc0] sm:$0xff] }
 0x20e   : > { %v1239_v20 = vadd.f32 %v1146_v19, %v597_v17  ;;  %v843_v21 = vpop.f32.mrf.mxu0  ;;  %v1052_v23 = vpop.f32.mrf.mxu1 }
 0x20f   : > { %v1053_v24 = vadd.f32 %v1052_v23, %v843_v21  ;;  %v604_v23 = vld [vmem:[%s4661_s4 + $0x1c0] sm:$0xff] }
 0x210   : > { %1303 = vst [vmem:[%s4661_s4 + $0x188] sm:$0xff] %v1239_v20 }
 0x211   : > { %v1208_v25 = vadd.f32 %v1053_v24, %v566_v22 }
 0x212   : > { %v939_v26 = vpop.f32.mrf.mxu2 }
 0x213   : > { %v1148_v28 = vpop.f32.mrf.mxu3  ;;  %1272 = vst [vmem:[%s4661_s4 + $0x90] sm:$0xff] %v1208_v25 }
 0x214   : > { %v1149_v29 = vadd.f32 %v1148_v28, %v939_v26  ;;  %v573_v28 = vld [vmem:[%s4661_s4 + $0xc8] sm:$0xff] }
 0x216   : > { %v1240_v30 = vadd.f32 %v1149_v29, %v598_v27  ;;  %v846_v31 = vpop.f32.mrf.mxu0  ;;  %v1055_v33 = vpop.f32.mrf.mxu1 }
 0x217   : > { %v1056_v34 = vadd.f32 %v1055_v33, %v846_v31  ;;  %v605_v33 = vld [vmem:[%s4661_s4 + $0x1c8] sm:$0xff] }
 0x218   : > { %1304 = vst [vmem:[%s4661_s4 + $0x190] sm:$0xff] %v1240_v30 }
 0x219   : > { %v1209_v35 = vadd.f32 %v1056_v34, %v567_v32 }
 0x21a   : > { %v942_v36 = vpop.f32.mrf.mxu2 }
 0x21b   : > { %v1151_v38 = vpop.f32.mrf.mxu3  ;;  %1273 = vst [vmem:[%s4661_s4 + $0x98] sm:$0xff] %v1209_v35 }
 0x21c   : > { %v1152_v39 = vadd.f32 %v1151_v38, %v942_v36  ;;  %v574_v38 = vld [vmem:[%s4661_s4 + $0xd0] sm:$0xff] }
 0x21e   : > { %v1241_v40 = vadd.f32 %v1152_v39, %v599_v37  ;;  %v849_v41 = vpop.f32.mrf.mxu0  ;;  %v1058_v43 = vpop.f32.mrf.mxu1 }
 0x21f   : > { %v1059_v44 = vadd.f32 %v1058_v43, %v849_v41  ;;  %v606_v43 = vld [vmem:[%s4661_s4 + $0x1d0] sm:$0xff] }
 0x220   : > { %1305 = vst [vmem:[%s4661_s4 + $0x198] sm:$0xff] %v1241_v40 }
 0x221   : > { %v1210_v45 = vadd.f32 %v1059_v44, %v568_v42 }
 0x222   : > { %v945_v46 = vpop.f32.mrf.mxu2 }
 0x223   : > { %v1154_v48 = vpop.f32.mrf.mxu3  ;;  %1274 = vst [vmem:[%s4661_s4 + $0xa0] sm:$0xff] %v1210_v45 }
 0x224   : > { %v1155_v49 = vadd.f32 %v1154_v48, %v945_v46  ;;  %v575_v48 = vld [vmem:[%s4661_s4 + $0xd8] sm:$0xff] }
 0x226   : > { %v1242_v50 = vadd.f32 %v1155_v49, %v600_v47  ;;  %v852_v51 = vpop.f32.mrf.mxu0  ;;  %v1061_v53 = vpop.f32.mrf.mxu1 }
 0x227   : > { %v1062_v54 = vadd.f32 %v1061_v53, %v852_v51  ;;  %v607_v53 = vld [vmem:[%s4661_s4 + $0x1d8] sm:$0xff] }
 0x228   : > { %1306 = vst [vmem:[%s4661_s4 + $0x1a0] sm:$0xff] %v1242_v50 }
 0x229   : > { %v1211_v55 = vadd.f32 %v1062_v54, %v569_v52 }
 0x22a   : > { %v948_v56 = vpop.f32.mrf.mxu2 }
 0x22b   : > { %v1157_v58 = vpop.f32.mrf.mxu3  ;;  %1275 = vst [vmem:[%s4661_s4 + $0xa8] sm:$0xff] %v1211_v55 }
 0x22c   : > { %v1158_v59 = vadd.f32 %v1157_v58, %v948_v56  ;;  %v576_v58 = vld [vmem:[%s4661_s4 + $0xe0] sm:$0xff] }
 0x22e   : > { %v1243_v60 = vadd.f32 %v1158_v59, %v601_v57  ;;  %v855_v61 = vpop.f32.mrf.mxu0  ;;  %v1064_v63 = vpop.f32.mrf.mxu1 }
 0x22f   : > { %v1065_v0 = vadd.f32 %v1064_v63, %v855_v61  ;;  %v608_v63 = vld [vmem:[%s4661_s4 + $0x1e0] sm:$0xff] }
 0x230   : > { %1307 = vst [vmem:[%s4661_s4 + $0x1a8] sm:$0xff] %v1243_v60 }
 0x231   : > { %v1212_v1 = vadd.f32 %v1065_v0, %v570_v62 }
 0x232   : > { %v951_v2 = vpop.f32.mrf.mxu2 }
 0x233   : > { %v1160_v4 = vpop.f32.mrf.mxu3  ;;  %1276 = vst [vmem:[%s4661_s4 + $0xb0] sm:$0xff] %v1212_v1 }
 0x234   : > { %v1161_v5 = vadd.f32 %v1160_v4, %v951_v2  ;;  %v577_v4 = vld [vmem:[%s4661_s4 + $0xe8] sm:$0xff] }
 0x236   : > { %v1244_v6 = vadd.f32 %v1161_v5, %v602_v3  ;;  %v858_v7 = vpop.f32.mrf.mxu0  ;;  %v1067_v9 = vpop.f32.mrf.mxu1 }
 0x237   : > { %v1068_v10 = vadd.f32 %v1067_v9, %v858_v7  ;;  %v609_v9 = vld [vmem:[%s4661_s4 + $0x1e8] sm:$0xff] }
 0x238   : > { %1308 = vst [vmem:[%s4661_s4 + $0x1b0] sm:$0xff] %v1244_v6 }
 0x239   : > { %v1213_v11 = vadd.f32 %v1068_v10, %v571_v8 }
 0x23a   : > { %v954_v12 = vpop.f32.mrf.mxu2 }
 0x23b   : > { %v1163_v14 = vpop.f32.mrf.mxu3  ;;  %1277 = vst [vmem:[%s4661_s4 + $0xb8] sm:$0xff] %v1213_v11 }
 0x23c   : > { %v1164_v15 = vadd.f32 %v1163_v14, %v954_v12  ;;  %v578_v14 = vld [vmem:[%s4661_s4 + $0xf0] sm:$0xff] }
 0x23e   : > { %v1245_v16 = vadd.f32 %v1164_v15, %v603_v13  ;;  %v861_v17 = vpop.f32.mrf.mxu0  ;;  %v1070_v19 = vpop.f32.mrf.mxu1 }
 0x23f   : > { %v1071_v20 = vadd.f32 %v1070_v19, %v861_v17  ;;  %v610_v19 = vld [vmem:[%s4661_s4 + $0x1f0] sm:$0xff] }
 0x240   : > { %1309 = vst [vmem:[%s4661_s4 + $0x1b8] sm:$0xff] %v1245_v16 }
 0x241   : > { %v1214_v21 = vadd.f32 %v1071_v20, %v572_v18 }
 0x242   : > { %v957_v22 = vpop.f32.mrf.mxu2 }
 0x243   : > { %v1166_v24 = vpop.f32.mrf.mxu3  ;;  %1278 = vst [vmem:[%s4661_s4 + $0xc0] sm:$0xff] %v1214_v21 }
 0x244   : > { %v1167_v25 = vadd.f32 %v1166_v24, %v957_v22  ;;  %v579_v24 = vld [vmem:[%s4661_s4 + $0xf8] sm:$0xff] }
 0x246   : > { %v1246_v26 = vadd.f32 %v1167_v25, %v604_v23  ;;  %v864_v27 = vpop.f32.mrf.mxu0  ;;  %v1073_v29 = vpop.f32.mrf.mxu1 }
 0x247   : > { %v1074_v30 = vadd.f32 %v1073_v29, %v864_v27  ;;  %v611_v29 = vld [vmem:[%s4661_s4 + $0x1f8] sm:$0xff] }
 0x248   : > { %1310 = vst [vmem:[%s4661_s4 + $0x1c0] sm:$0xff] %v1246_v26 }
 0x249   : > { %v1215_v31 = vadd.f32 %v1074_v30, %v573_v28 }
 0x24a   : > { %v960_v32 = vpop.f32.mrf.mxu2 }
 0x24b   : > { %v1169_v34 = vpop.f32.mrf.mxu3  ;;  %1279 = vst [vmem:[%s4661_s4 + $0xc8] sm:$0xff] %v1215_v31 }
 0x24c   : > { %v1170_v35 = vadd.f32 %v1169_v34, %v960_v32 }
 0x24e   : > { %v1247_v36 = vadd.f32 %v1170_v35, %v605_v33  ;;  %v867_v37 = vpop.f32.mrf.mxu0  ;;  %v1076_v39 = vpop.f32.mrf.mxu1 }
 0x24f   : > { %v1077_v40 = vadd.f32 %v1076_v39, %v867_v37 }
 0x250   : > { %1311 = vst [vmem:[%s4661_s4 + $0x1c8] sm:$0xff] %v1247_v36 }
 0x251   : > { %v1216_v41 = vadd.f32 %v1077_v40, %v574_v38 }
 0x252   : > { %v963_v42 = vpop.f32.mrf.mxu2 }
 0x253   : > { %v1172_v44 = vpop.f32.mrf.mxu3  ;;  %1280 = vst [vmem:[%s4661_s4 + $0xd0] sm:$0xff] %v1216_v41 }
 0x254   : > { %v1173_v45 = vadd.f32 %v1172_v44, %v963_v42 }
 0x256   : > { %v1248_v46 = vadd.f32 %v1173_v45, %v606_v43  ;;  %v870_v47 = vpop.f32.mrf.mxu0  ;;  %v1079_v49 = vpop.f32.mrf.mxu1 }
 0x257   : > { %v1080_v50 = vadd.f32 %v1079_v49, %v870_v47 }
 0x258   : > { %1312 = vst [vmem:[%s4661_s4 + $0x1d0] sm:$0xff] %v1248_v46 }
 0x259   : > { %v1217_v51 = vadd.f32 %v1080_v50, %v575_v48 }
 0x25a   : > { %v966_v52 = vpop.f32.mrf.mxu2 }
 0x25b   : > { %v1175_v54 = vpop.f32.mrf.mxu3  ;;  %1281 = vst [vmem:[%s4661_s4 + $0xd8] sm:$0xff] %v1217_v51 }
 0x25c   : > { %v1176_v55 = vadd.f32 %v1175_v54, %v966_v52 }
 0x25e   : > { %v1249_v56 = vadd.f32 %v1176_v55, %v607_v53  ;;  %v873_v57 = vpop.f32.mrf.mxu0  ;;  %v1082_v59 = vpop.f32.mrf.mxu1 }
 0x25f   : > { %v1083_v60 = vadd.f32 %v1082_v59, %v873_v57 }
 0x260   : > { %1313 = vst [vmem:[%s4661_s4 + $0x1d8] sm:$0xff] %v1249_v56 }
 0x261   : > { %v1218_v61 = vadd.f32 %v1083_v60, %v576_v58 }
 0x262   : > { %v969_v62 = vpop.f32.mrf.mxu2 }
 0x263   : > { %v1178_v0 = vpop.f32.mrf.mxu3  ;;  %1282 = vst [vmem:[%s4661_s4 + $0xe0] sm:$0xff] %v1218_v61 }
 0x264   : > { %v1179_v1 = vadd.f32 %v1178_v0, %v969_v62 }
 0x266   : > { %v1250_v2 = vadd.f32 %v1179_v1, %v608_v63  ;;  %v876_v3 = vpop.f32.mrf.mxu0  ;;  %v1085_v5 = vpop.f32.mrf.mxu1 }
 0x267   : > { %v1086_v6 = vadd.f32 %v1085_v5, %v876_v3 }
 0x268   : > { %1314 = vst [vmem:[%s4661_s4 + $0x1e0] sm:$0xff] %v1250_v2 }
 0x269   : > { %v1219_v7 = vadd.f32 %v1086_v6, %v577_v4 }
 0x26a   : > { %v972_v8 = vpop.f32.mrf.mxu2 }
 0x26b   : > { %v1181_v10 = vpop.f32.mrf.mxu3  ;;  %1283 = vst [vmem:[%s4661_s4 + $0xe8] sm:$0xff] %v1219_v7 }
 0x26c   : > { %v1182_v11 = vadd.f32 %v1181_v10, %v972_v8 }
 0x26e   : > { %v1251_v12 = vadd.f32 %v1182_v11, %v609_v9  ;;  %v879_v13 = vpop.f32.mrf.mxu0  ;;  %v1088_v15 = vpop.f32.mrf.mxu1 }
 0x26f   : > { %v1089_v16 = vadd.f32 %v1088_v15, %v879_v13 }
 0x270   : > { %1315 = vst [vmem:[%s4661_s4 + $0x1e8] sm:$0xff] %v1251_v12 }
 0x271   : > { %v1220_v17 = vadd.f32 %v1089_v16, %v578_v14 }
 0x272   : > { %v975_v18 = vpop.f32.mrf.mxu2 }
 0x273   : > { %v1184_v20 = vpop.f32.mrf.mxu3  ;;  %1284 = vst [vmem:[%s4661_s4 + $0xf0] sm:$0xff] %v1220_v17 }
 0x274   : > { %v1185_v21 = vadd.f32 %v1184_v20, %v975_v18 }
 0x276   : > { %v1252_v22 = vadd.f32 %v1185_v21, %v610_v19  ;;  %v882_v23 = vpop.f32.mrf.mxu0  ;;  %v1091_v25 = vpop.f32.mrf.mxu1 }
 0x277   : > { %v1092_v26 = vadd.f32 %v1091_v25, %v882_v23 }
 0x278   : > { %1316 = vst [vmem:[%s4661_s4 + $0x1f0] sm:$0xff] %v1252_v22 }
 0x279   : > { %v1221_v27 = vadd.f32 %v1092_v26, %v579_v24 }
 0x27a   : > { %v978_v28 = vpop.f32.mrf.mxu2 }
 0x27b   : > { %v1187_v30 = vpop.f32.mrf.mxu3  ;;  %1285 = vst [vmem:[%s4661_s4 + $0xf8] sm:$0xff] %v1221_v27 }
 0x27c   : > { %v1188_v31 = vadd.f32 %v1187_v30, %v978_v28  ;;  %1321 = sbr.rel (%p2185_p10) target bundleno = 1048 (0x418), region = 67 }
 0x27e   : > { %v1253_v32 = vadd.f32 %v1188_v31, %v611_v29 }
 0x280   : > { %1317 = vst [vmem:[%s4661_s4 + $0x1f8] sm:$0xff] %v1253_v32 }
 0x281   : > { %v3416_v33 = vld [vmem:[%s4661_s4] sm:$0xff]  ;;  %v3421_v34 = vld [vmem:[%s4661_s4 + $0x8] sm:$0xff]  ;;  %v3426_v35 = vld [vmem:[%s4661_s4 + $0x10] sm:$0xff] }
 0x282   : > { %v1388_v36 = vadd.f32 %v3421_v34, %v3416_v33  ;;  %v3433_v37 = vld [vmem:[%s4661_s4 + $0x18] sm:$0xff]  ;;  %v3439_v39 = vld [vmem:[%s4661_s4 + $0x20] sm:$0xff]  ;;  %v3445_v41 = vld [vmem:[%s4661_s4 + $0x28] sm:$0xff] }
 0x283   : > { %v3451_v43 = vld [vmem:[%s4661_s4 + $0x30] sm:$0xff]  ;;  %v3457_v45 = vld [vmem:[%s4661_s4 + $0x38] sm:$0xff]  ;;  %v3463_v47 = vld [vmem:[%s4661_s4 + $0x40] sm:$0xff] }
 0x284   : > { %v1389_v38 = vadd.f32 %v1388_v36, %v3426_v35  ;;  %v3469_v49 = vld [vmem:[%s4661_s4 + $0x48] sm:$0xff]  ;;  %v3475_v51 = vld [vmem:[%s4661_s4 + $0x50] sm:$0xff]  ;;  %v3481_v53 = vld [vmem:[%s4661_s4 + $0x58] sm:$0xff] }
 0x285   : > { %v3487_v55 = vld [vmem:[%s4661_s4 + $0x60] sm:$0xff]  ;;  %v3493_v57 = vld [vmem:[%s4661_s4 + $0x68] sm:$0xff]  ;;  %v3499_v59 = vld [vmem:[%s4661_s4 + $0x70] sm:$0xff] }
 0x286   : > { %v1390_v40 = vadd.f32 %v1389_v38, %v3433_v37  ;;  %v3505_v61 = vld [vmem:[%s4661_s4 + $0x78] sm:$0xff]  ;;  %v3511_v63 = vld [vmem:[%s4661_s4 + $0x80] sm:$0xff]  ;;  %v3517_v1 = vld [vmem:[%s4661_s4 + $0x88] sm:$0xff] }
 0x287   : > { %v3523_v3 = vld [vmem:[%s4661_s4 + $0x90] sm:$0xff]  ;;  %v3529_v5 = vld [vmem:[%s4661_s4 + $0x98] sm:$0xff]  ;;  %v3535_v7 = vld [vmem:[%s4661_s4 + $0xa0] sm:$0xff] }
 0x288   : > { %v1391_v42 = vadd.f32 %v1390_v40, %v3439_v39  ;;  %v3541_v9 = vld [vmem:[%s4661_s4 + $0xa8] sm:$0xff]  ;;  %v3547_v11 = vld [vmem:[%s4661_s4 + $0xb0] sm:$0xff]  ;;  %v3553_v13 = vld [vmem:[%s4661_s4 + $0xb8] sm:$0xff] }
 0x289   : > { %v3559_v15 = vld [vmem:[%s4661_s4 + $0xc0] sm:$0xff]  ;;  %v3565_v17 = vld [vmem:[%s4661_s4 + $0xc8] sm:$0xff]  ;;  %v3571_v19 = vld [vmem:[%s4661_s4 + $0xd0] sm:$0xff] }
 0x28a   : > { %v1392_v44 = vadd.f32 %v1391_v42, %v3445_v41  ;;  %v3577_v21 = vld [vmem:[%s4661_s4 + $0xd8] sm:$0xff]  ;;  %v3583_v23 = vld [vmem:[%s4661_s4 + $0xe0] sm:$0xff]  ;;  %v3589_v25 = vld [vmem:[%s4661_s4 + $0xe8] sm:$0xff] }
 0x28b   : > { %v3595_v27 = vld [vmem:[%s4661_s4 + $0xf0] sm:$0xff]  ;;  %v3601_v29 = vld [vmem:[%s4661_s4 + $0xf8] sm:$0xff]  ;;  %v3607_v31 = vld [vmem:[%s4661_s4 + $0x100] sm:$0xff] }
 0x28c   : > { %v1393_v46 = vadd.f32 %v1392_v44, %v3451_v43  ;;  %v3613_v36 = vld [vmem:[%s4661_s4 + $0x108] sm:$0xff]  ;;  %v3619_v40 = vld [vmem:[%s4661_s4 + $0x110] sm:$0xff]  ;;  %v3625_v44 = vld [vmem:[%s4661_s4 + $0x118] sm:$0xff] }
 0x28e   : > { %v1394_v48 = vadd.f32 %v1393_v46, %v3457_v45 }
 0x290   : > { %v1395_v50 = vadd.f32 %v1394_v48, %v3463_v47  ;;  %v3631_v48 = vld [vmem:[%s4661_s4 + $0x120] sm:$0xff] }
 0x292   : > { %v1396_v52 = vadd.f32 %v1395_v50, %v3469_v49 }
 0x294   : > { %v1397_v54 = vadd.f32 %v1396_v52, %v3475_v51  ;;  %v3637_v52 = vld [vmem:[%s4661_s4 + $0x128] sm:$0xff] }
 0x296   : > { %v1398_v56 = vadd.f32 %v1397_v54, %v3481_v53 }
 0x298   : > { %v1399_v58 = vadd.f32 %v1398_v56, %v3487_v55  ;;  %v3643_v56 = vld [vmem:[%s4661_s4 + $0x130] sm:$0xff] }
 0x29a   : > { %v1400_v60 = vadd.f32 %v1399_v58, %v3493_v57 }
 0x29c   : > { %v1401_v62 = vadd.f32 %v1400_v60, %v3499_v59  ;;  %v3649_v60 = vld [vmem:[%s4661_s4 + $0x138] sm:$0xff] }
 0x29e   : > { %v1402_v0 = vadd.f32 %v1401_v62, %v3505_v61 }
 0x2a0   : > { %v1403_v2 = vadd.f32 %v1402_v0, %v3511_v63  ;;  %v3655_v0 = vld [vmem:[%s4661_s4 + $0x140] sm:$0xff] }
 0x2a2   : > { %v1404_v4 = vadd.f32 %v1403_v2, %v3517_v1 }
 0x2a4   : > { %v1405_v6 = vadd.f32 %v1404_v4, %v3523_v3  ;;  %v3661_v4 = vld [vmem:[%s4661_s4 + $0x148] sm:$0xff] }
 0x2a6   : > { %v1406_v8 = vadd.f32 %v1405_v6, %v3529_v5 }
 0x2a8   : > { %v1407_v10 = vadd.f32 %v1406_v8, %v3535_v7  ;;  %v3667_v8 = vld [vmem:[%s4661_s4 + $0x150] sm:$0xff] }
 0x2aa   : > { %v1408_v12 = vadd.f32 %v1407_v10, %v3541_v9 }
 0x2ac   : > { %v1409_v14 = vadd.f32 %v1408_v12, %v3547_v11  ;;  %v3673_v12 = vld [vmem:[%s4661_s4 + $0x158] sm:$0xff] }
 0x2ae   : > { %v1410_v16 = vadd.f32 %v1409_v14, %v3553_v13 }
 0x2b0   : > { %v1411_v18 = vadd.f32 %v1410_v16, %v3559_v15  ;;  %v3679_v16 = vld [vmem:[%s4661_s4 + $0x160] sm:$0xff] }
 0x2b2   : > { %v1412_v20 = vadd.f32 %v1411_v18, %v3565_v17 }
 0x2b4   : > { %v1413_v22 = vadd.f32 %v1412_v20, %v3571_v19  ;;  %v3685_v20 = vld [vmem:[%s4661_s4 + $0x168] sm:$0xff] }
 0x2b6   : > { %v1414_v24 = vadd.f32 %v1413_v22, %v3577_v21 }
 0x2b8   : > { %v1415_v26 = vadd.f32 %v1414_v24, %v3583_v23  ;;  %v3691_v24 = vld [vmem:[%s4661_s4 + $0x170] sm:$0xff] }
 0x2ba   : > { %v1416_v28 = vadd.f32 %v1415_v26, %v3589_v25 }
 0x2bc   : > { %v1417_v30 = vadd.f32 %v1416_v28, %v3595_v27  ;;  %v3697_v28 = vld [vmem:[%s4661_s4 + $0x178] sm:$0xff] }
 0x2bd   : > { %4699 = vst [vmem:[#allocation3_spill] sm:$0xff] %v3697_v28 }
 0x2be   : > { %v1418_v32 = vadd.f32 %v1417_v30, %v3601_v29 }
 0x2c0   : > { %v1419_v38 = vadd.f32 %v1418_v32, %v3607_v31  ;;  %v3703_v32 = vld [vmem:[%s4661_s4 + $0x180] sm:$0xff] }
 0x2c1   : > { %4700 = vst [vmem:[#allocation4_spill] sm:$0xff] %v3703_v32 }
 0x2c2   : > { %v1420_v42 = vadd.f32 %v1419_v38, %v3613_v36 }
 0x2c4   : > { %v1421_v46 = vadd.f32 %v1420_v42, %v3619_v40  ;;  %v3709_v42 = vld [vmem:[%s4661_s4 + $0x188] sm:$0xff] }
 0x2c5   : > { %4701 = vst [vmem:[#allocation5_spill] sm:$0xff] %v3709_v42 }
 0x2c6   : > { %v1422_v50 = vadd.f32 %v1421_v46, %v3625_v44 }
 0x2c8   : > { %v1423_v54 = vadd.f32 %v1422_v50, %v3631_v48  ;;  %v3715_v50 = vld [vmem:[%s4661_s4 + $0x190] sm:$0xff] }
 0x2c9   : > { %4702 = vst [vmem:[#allocation6_spill] sm:$0xff] %v3715_v50 }
 0x2ca   : > { %v1424_v58 = vadd.f32 %v1423_v54, %v3637_v52 }
 0x2cc   : > { %v1425_v62 = vadd.f32 %v1424_v58, %v3643_v56  ;;  %v3721_v58 = vld [vmem:[%s4661_s4 + $0x198] sm:$0xff] }
 0x2cd   : > { %4703 = vst [vmem:[#allocation7_spill] sm:$0xff] %v3721_v58 }
 0x2ce   : > { %v1426_v2 = vadd.f32 %v1425_v62, %v3649_v60 }
 0x2d0   : > { %v1427_v6 = vadd.f32 %v1426_v2, %v3655_v0  ;;  %v3727_v2 = vld [vmem:[%s4661_s4 + $0x1a0] sm:$0xff] }
 0x2d1   : > { %4704 = vst [vmem:[#allocation8_spill] sm:$0xff] %v3727_v2 }
 0x2d2   : > { %v1428_v10 = vadd.f32 %v1427_v6, %v3661_v4 }
 0x2d4   : > { %v1429_v14 = vadd.f32 %v1428_v10, %v3667_v8  ;;  %v3733_v10 = vld [vmem:[%s4661_s4 + $0x1a8] sm:$0xff] }
 0x2d5   : > { %4705 = vst [vmem:[#allocation9_spill] sm:$0xff] %v3733_v10 }
 0x2d6   : > { %v1430_v18 = vadd.f32 %v1429_v14, %v3673_v12 }
 0x2d8   : > { %v1431_v22 = vadd.f32 %v1430_v18, %v3679_v16  ;;  %v3739_v18 = vld [vmem:[%s4661_s4 + $0x1b0] sm:$0xff] }
 0x2d9   : > { %4706 = vst [vmem:[#allocation10_spill] sm:$0xff] %v3739_v18 }
 0x2da   : > { %v1432_v26 = vadd.f32 %v1431_v22, %v3685_v20 }
 0x2dc   : > { %v1433_v30 = vadd.f32 %v1432_v26, %v3691_v24  ;;  %v3745_v26 = vld [vmem:[%s4661_s4 + $0x1b8] sm:$0xff] }
 0x2dd   : > { %4707 = vst [vmem:[#allocation11_spill] sm:$0xff] %v3745_v26 }
 0x2de   : > { %v1434_v38 = vadd.f32 %v1433_v30, %v3697_v28 }
 0x2e0   : > { %v1435_v46 = vadd.f32 %v1434_v38, %v3703_v32  ;;  %v3751_v38 = vld [vmem:[%s4661_s4 + $0x1c0] sm:$0xff] }
 0x2e1   : > { %4708 = vst [vmem:[#allocation12_spill] sm:$0xff] %v3751_v38 }
 0x2e2   : > { %v1436_v54 = vadd.f32 %v1435_v46, %v3709_v42 }
 0x2e4   : > { %v1437_v62 = vadd.f32 %v1436_v54, %v3715_v50  ;;  %v3757_v54 = vld [vmem:[%s4661_s4 + $0x1c8] sm:$0xff] }
 0x2e5   : > { %4709 = vst [vmem:[#allocation13_spill] sm:$0xff] %v3757_v54 }
 0x2e6   : > { %v1438_v6 = vadd.f32 %v1437_v62, %v3721_v58 }
 0x2e8   : > { %v1439_v14 = vadd.f32 %v1438_v6, %v3727_v2  ;;  %v3763_v6 = vld [vmem:[%s4661_s4 + $0x1d0] sm:$0xff] }
 0x2e9   : > { %4710 = vst [vmem:[#allocation14_spill] sm:$0xff] %v3763_v6 }
 0x2ea   : > { %v1440_v22 = vadd.f32 %v1439_v14, %v3733_v10 }
 0x2ec   : > { %v1441_v30 = vadd.f32 %v1440_v22, %v3739_v18  ;;  %v3769_v22 = vld [vmem:[%s4661_s4 + $0x1d8] sm:$0xff] }
 0x2ed   : > { %4711 = vst [vmem:[#allocation15_spill] sm:$0xff] %v3769_v22 }
 0x2ee   : > { %v1442_v46 = vadd.f32 %v1441_v30, %v3745_v26 }
 0x2f0   : > { %v1443_v62 = vadd.f32 %v1442_v46, %v3751_v38  ;;  %v3776_v46 = vld [vmem:[%s4661_s4 + $0x1e0] sm:$0xff] }
 0x2f1   : > { %4712 = vst [vmem:[#allocation16_spill] sm:$0xff] %v3776_v46 }
 0x2f2   : > { %v1444_v14 = vadd.f32 %v1443_v62, %v3757_v54  ;;  %v3782_v62 = vld [vmem:[%s4661_s4 + $0x1e8] sm:$0xff] }
 0x2f3   : > { %4713 = vst [vmem:[#allocation17_spill] sm:$0xff] %v3782_v62 }
 0x2f4   : > { %v1445_v30 = vadd.f32 %v1444_v14, %v3763_v6  ;;  %v3788_v14 = vld [vmem:[%s4661_s4 + $0x1f0] sm:$0xff] }
 0x2f5   : > { %4714 = vst [vmem:[#allocation18_spill] sm:$0xff] %v3788_v14 }
 0x2f6   : > { %v1446_v26 = vadd.f32 %v1445_v30, %v3769_v22  ;;  %v3794_v22 = vld [vmem:[%s4661_s4 + $0x1f8] sm:$0xff] }
 0x2f8   : > { %v1447_v38 = vadd.f32 %v1446_v26, %v3776_v46  ;;  %v2278_v46 = vmov 512.0  }
 0x2f9   : > { %2249 = vrcp.f32 %v2278_v46 }
 0x2fa   : > { %v1448_v54 = vadd.f32 %v1447_v38, %v3782_v62 }
 0x2fc   : > { %v1449_v30 = vadd.f32 %v1448_v54, %v3788_v14 }
 0x2fe   : > { %v1450_v26 = vadd.f32 %v1449_v30, %v3794_v22 }
 0x2ff   : > { %v2250_v18 = vpop.eup %2249 }
 0x300   : > { %v1451_v6 = vrot.slane %v1450_v26, 4  ;;  %v1458_v38 = vmul.f32 512.0, %v2250_v18  ;;  %vm1462_vm0 = vweird.f32 %v2250_v18 }
 0x302   : > { %v1452_v10 = vadd.f32 %v1451_v6, %v1450_v26  ;;  %v1459_v2 = vsub.f32 1.0, %v1458_v38 }
 0x304   : > { %v1453_v62 = vrot.slane %v1452_v10, 2  ;;  %v1460_v50 = vmul.f32 %v2250_v18, %v1459_v2 }
 0x306   : > { %v1454_v58 = vadd.f32 %v1453_v62, %v1452_v10  ;;  %v1461_v32 = vadd.f32 %v2250_v18, %v1460_v50 }
 0x308   : > { %v1455_v42 = vrot.slane %v1454_v58, 1  ;;  %v3797_v14 = vsel %vm1462_vm0, %v2250_v18, %v1461_v32 }
 0x30a   : > { %v1456_v54 = vadd.f32 %v1455_v42, %v1454_v58 }
 0x30c   : > { %v3800_v28 = vmul.f32 %v3797_v14, %v1456_v54 }
 0x30e   : > { %v3804_v46 = vsub.f32 %v3416_v33, %v3800_v28  ;;  %v3808_v6 = vsub.f32 %v3421_v34, %v3800_v28  ;;  %v3812_v2 = vsub.f32 %v3426_v35, %v3800_v28  ;;  %v3816_v42 = vsub.f32 %v3433_v37, %v3800_v28 }
 0x30f   : > { %v3824_v33 = vsub.f32 %v3439_v39, %v3800_v28  ;;  %v3830_v35 = vsub.f32 %v3445_v41, %v3800_v28  ;;  %v3836_v10 = vsub.f32 %v3451_v43, %v3800_v28  ;;  %v3842_v62 = vsub.f32 %v3457_v45, %v3800_v28 }
 0x310   : > { %v1529_v32 = vmul.f32 %v3804_v46, %v3804_v46  ;;  %v1530_v50 = vmul.f32 %v3808_v6, %v3808_v6  ;;  %v1531_v34 = vmul.f32 %v3812_v2, %v3812_v2  ;;  %v1532_v37 = vmul.f32 %v3816_v42, %v3816_v42 }
 0x311   : > { %v1533_v18 = vmul.f32 %v3824_v33, %v3824_v33  ;;  %v1534_v41 = vmul.f32 %v3830_v35, %v3830_v35  ;;  %v3848_v26 = vsub.f32 %v3463_v47, %v3800_v28  ;;  %v1535_v43 = vmul.f32 %v3836_v10, %v3836_v10 }
 0x312   : > { %v1593_v58 = vadd.f32 %v1530_v50, %v1529_v32  ;;  %v3854_v54 = vsub.f32 %v3469_v49, %v3800_v28  ;;  %v1536_v45 = vmul.f32 %v3842_v62, %v3842_v62  ;;  %v3860_v50 = vsub.f32 %v3475_v51, %v3800_v28 }
 0x313   : > { %v1537_v47 = vmul.f32 %v3848_v26, %v3848_v26 }
 0x314   : > { %v1594_v39 = vadd.f32 %v1593_v58, %v1531_v34  ;;  %v1538_v49 = vmul.f32 %v3854_v54, %v3854_v54  ;;  %v1539_v51 = vmul.f32 %v3860_v50, %v3860_v50 }
 0x316   : > { %v1595_v30 = vadd.f32 %v1594_v39, %v1532_v37  ;;  %v3866_v37 = vsub.f32 %v3481_v53, %v3800_v28 }
 0x318   : > { %v1596_v38 = vadd.f32 %v1595_v30, %v1533_v18  ;;  %v3872_v18 = vsub.f32 %v3487_v55, %v3800_v28  ;;  %v1540_v53 = vmul.f32 %v3866_v37, %v3866_v37 }
 0x31a   : > { %v1597_v32 = vadd.f32 %v1596_v38, %v1534_v41  ;;  %v3878_v41 = vsub.f32 %v3493_v57, %v3800_v28  ;;  %v1541_v55 = vmul.f32 %v3872_v18, %v3872_v18 }
 0x31c   : > { %v1598_v34 = vadd.f32 %v1597_v32, %v1535_v43  ;;  %v3884_v43 = vsub.f32 %v3499_v59, %v3800_v28  ;;  %v1542_v57 = vmul.f32 %v3878_v41, %v3878_v41 }
 0x31e   : > { %v1599_v58 = vadd.f32 %v1598_v34, %v1536_v45  ;;  %v3890_v45 = vsub.f32 %v3505_v61, %v3800_v28  ;;  %v1543_v59 = vmul.f32 %v3884_v43, %v3884_v43 }
 0x320   : > { %v1600_v39 = vadd.f32 %v1599_v58, %v1537_v47  ;;  %v3896_v47 = vsub.f32 %v3511_v63, %v3800_v28  ;;  %v1544_v61 = vmul.f32 %v3890_v45, %v3890_v45 }
 0x322   : > { %v1601_v30 = vadd.f32 %v1600_v39, %v1538_v49  ;;  %v3902_v49 = vsub.f32 %v3517_v1, %v3800_v28  ;;  %v1545_v63 = vmul.f32 %v3896_v47, %v3896_v47 }
 0x324   : > { %v1602_v38 = vadd.f32 %v1601_v30, %v1539_v51  ;;  %v3908_v51 = vsub.f32 %v3523_v3, %v3800_v28  ;;  %v1546_v1 = vmul.f32 %v3902_v49, %v3902_v49 }
 0x326   : > { %v1603_v32 = vadd.f32 %v1602_v38, %v1540_v53  ;;  %v3914_v53 = vsub.f32 %v3529_v5, %v3800_v28  ;;  %v1547_v3 = vmul.f32 %v3908_v51, %v3908_v51 }
 0x328   : > { %v1604_v34 = vadd.f32 %v1603_v32, %v1541_v55  ;;  %v3920_v55 = vsub.f32 %v3535_v7, %v3800_v28  ;;  %v1548_v5 = vmul.f32 %v3914_v53, %v3914_v53 }
 0x32a   : > { %v1605_v58 = vadd.f32 %v1604_v34, %v1542_v57  ;;  %v3926_v57 = vsub.f32 %v3541_v9, %v3800_v28  ;;  %v1549_v7 = vmul.f32 %v3920_v55, %v3920_v55 }
 0x32c   : > { %v1606_v39 = vadd.f32 %v1605_v58, %v1543_v59  ;;  %v3932_v59 = vsub.f32 %v3547_v11, %v3800_v28  ;;  %v1550_v9 = vmul.f32 %v3926_v57, %v3926_v57 }
 0x32e   : > { %v1607_v30 = vadd.f32 %v1606_v39, %v1544_v61  ;;  %v3938_v61 = vsub.f32 %v3553_v13, %v3800_v28  ;;  %v1551_v11 = vmul.f32 %v3932_v59, %v3932_v59 }
 0x330   : > { %v1608_v38 = vadd.f32 %v1607_v30, %v1545_v63  ;;  %v3944_v63 = vsub.f32 %v3559_v15, %v3800_v28  ;;  %v1552_v13 = vmul.f32 %v3938_v61, %v3938_v61 }
 0x332   : > { %v1609_v32 = vadd.f32 %v1608_v38, %v1546_v1  ;;  %v3950_v1 = vsub.f32 %v3565_v17, %v3800_v28  ;;  %v1553_v15 = vmul.f32 %v3944_v63, %v3944_v63 }
 0x334   : > { %v1610_v34 = vadd.f32 %v1609_v32, %v1547_v3  ;;  %v3956_v3 = vsub.f32 %v3571_v19, %v3800_v28  ;;  %v1554_v17 = vmul.f32 %v3950_v1, %v3950_v1 }
 0x336   : > { %v1611_v58 = vadd.f32 %v1610_v34, %v1548_v5  ;;  %v3962_v5 = vsub.f32 %v3577_v21, %v3800_v28  ;;  %v1555_v19 = vmul.f32 %v3956_v3, %v3956_v3 }
 0x338   : > { %v1612_v39 = vadd.f32 %v1611_v58, %v1549_v7  ;;  %v3968_v7 = vsub.f32 %v3583_v23, %v3800_v28  ;;  %v1556_v21 = vmul.f32 %v3962_v5, %v3962_v5 }
 0x33a   : > { %v1613_v30 = vadd.f32 %v1612_v39, %v1550_v9  ;;  %v3974_v9 = vsub.f32 %v3589_v25, %v3800_v28  ;;  %v1557_v23 = vmul.f32 %v3968_v7, %v3968_v7 }
 0x33c   : > { %v1614_v38 = vadd.f32 %v1613_v30, %v1551_v11  ;;  %v3980_v11 = vsub.f32 %v3595_v27, %v3800_v28  ;;  %v1558_v25 = vmul.f32 %v3974_v9, %v3974_v9 }
 0x33e   : > { %v1615_v32 = vadd.f32 %v1614_v38, %v1552_v13  ;;  %v3986_v13 = vsub.f32 %v3601_v29, %v3800_v28  ;;  %v1559_v27 = vmul.f32 %v3980_v11, %v3980_v11 }
 0x340   : > { %v1616_v34 = vadd.f32 %v1615_v32, %v1553_v15  ;;  %v3992_v15 = vsub.f32 %v3607_v31, %v3800_v28  ;;  %v1560_v29 = vmul.f32 %v3986_v13, %v3986_v13 }
 0x342   : > { %v1617_v58 = vadd.f32 %v1616_v34, %v1554_v17  ;;  %v3998_v17 = vsub.f32 %v3613_v36, %v3800_v28  ;;  %v1561_v31 = vmul.f32 %v3992_v15, %v3992_v15 }
 0x344   : > { %v1618_v39 = vadd.f32 %v1617_v58, %v1555_v19  ;;  %v4004_v19 = vsub.f32 %v3619_v40, %v3800_v28  ;;  %v1562_v36 = vmul.f32 %v3998_v17, %v3998_v17 }
 0x346   : > { %v1619_v30 = vadd.f32 %v1618_v39, %v1556_v21  ;;  %v4010_v21 = vsub.f32 %v3625_v44, %v3800_v28  ;;  %v1563_v40 = vmul.f32 %v4004_v19, %v4004_v19 }
 0x348   : > { %v1620_v38 = vadd.f32 %v1619_v30, %v1557_v23  ;;  %v4016_v23 = vsub.f32 %v3631_v48, %v3800_v28  ;;  %v1564_v44 = vmul.f32 %v4010_v21, %v4010_v21 }
 0x34a   : > { %v1621_v32 = vadd.f32 %v1620_v38, %v1558_v25  ;;  %v4022_v25 = vsub.f32 %v3637_v52, %v3800_v28  ;;  %v1565_v48 = vmul.f32 %v4016_v23, %v4016_v23 }
 0x34c   : > { %v1622_v34 = vadd.f32 %v1621_v32, %v1559_v27  ;;  %v4028_v27 = vsub.f32 %v3643_v56, %v3800_v28  ;;  %v1566_v52 = vmul.f32 %v4022_v25, %v4022_v25 }
 0x34e   : > { %v1623_v58 = vadd.f32 %v1622_v34, %v1560_v29  ;;  %v4034_v29 = vsub.f32 %v3649_v60, %v3800_v28  ;;  %v1567_v56 = vmul.f32 %v4028_v27, %v4028_v27 }
 0x350   : > { %v1624_v39 = vadd.f32 %v1623_v58, %v1561_v31  ;;  %v4040_v31 = vsub.f32 %v3655_v0, %v3800_v28  ;;  %v1568_v60 = vmul.f32 %v4034_v29, %v4034_v29 }
 0x352   : > { %v1625_v30 = vadd.f32 %v1624_v39, %v1562_v36  ;;  %v4046_v36 = vsub.f32 %v3661_v4, %v3800_v28  ;;  %v1569_v0 = vmul.f32 %v4040_v31, %v4040_v31 }
 0x354   : > { %v1626_v38 = vadd.f32 %v1625_v30, %v1563_v40  ;;  %v4052_v40 = vsub.f32 %v3667_v8, %v3800_v28  ;;  %v1570_v4 = vmul.f32 %v4046_v36, %v4046_v36 }
 0x356   : > { %v1627_v32 = vadd.f32 %v1626_v38, %v1564_v44  ;;  %4715 = vst [vmem:[#allocation19_spill] sm:$0xff] %v4052_v40  ;;  %v4058_v44 = vsub.f32 %v3673_v12, %v3800_v28  ;;  %v1571_v8 = vmul.f32 %v4052_v40, %v4052_v40 }
 0x358   : > { %v1628_v34 = vadd.f32 %v1627_v32, %v1565_v48  ;;  %4716 = vst [vmem:[#allocation20_spill] sm:$0xff] %v4058_v44  ;;  %v4064_v48 = vsub.f32 %v3679_v16, %v3800_v28  ;;  %v1572_v12 = vmul.f32 %v4058_v44, %v4058_v44 }
 0x35a   : > { %v1629_v58 = vadd.f32 %v1628_v34, %v1566_v52  ;;  %4717 = vst [vmem:[#allocation21_spill] sm:$0xff] %v4064_v48  ;;  %v4070_v52 = vsub.f32 %v3685_v20, %v3800_v28  ;;  %v1573_v16 = vmul.f32 %v4064_v48, %v4064_v48 }
 0x35c   : > { %v1630_v39 = vadd.f32 %v1629_v58, %v1567_v56  ;;  %4718 = vst [vmem:[#allocation22_spill] sm:$0xff] %v4070_v52  ;;  %v4076_v56 = vsub.f32 %v3691_v24, %v3800_v28  ;;  %v1574_v20 = vmul.f32 %v4070_v52, %v4070_v52 }
 0x35e   : > { %v1631_v30 = vadd.f32 %v1630_v39, %v1568_v60  ;;  %4719 = vst [vmem:[#allocation23_spill] sm:$0xff] %v4076_v56  ;;  %v4720_v60 = vld [vmem:[#allocation3_spill] sm:$0xff]  ;;  %v4722_v39 = vld [vmem:[#allocation4_spill] sm:$0xff]  ;;  %v1575_v24 = vmul.f32 %v4076_v56, %v4076_v56 }
 0x35f   : > { %v4082_v58 = vsub.f32 %v4720_v60, %v3800_v28  ;;  %v4726_v60 = vld [vmem:[#allocation6_spill] sm:$0xff] }
 0x360   : > { %v1632_v38 = vadd.f32 %v1631_v30, %v1569_v0  ;;  %v4088_v30 = vsub.f32 %v4722_v39, %v3800_v28  ;;  %v4100_v52 = vsub.f32 %v4726_v60, %v3800_v28  ;;  %v4728_v39 = vld [vmem:[#allocation7_spill] sm:$0xff]  ;;  %v4732_v60 = vld [vmem:[#allocation9_spill] sm:$0xff] }
 0x361   : > { %4721 = vst [vmem:[#allocation3_spill] sm:$0xff] %v4082_v58  ;;  %v4106_v56 = vsub.f32 %v4728_v39, %v3800_v28  ;;  %v4734_v39 = vld [vmem:[#allocation10_spill] sm:$0xff] }
 0x362   : > { %v1633_v32 = vadd.f32 %v1632_v38, %v1570_v4  ;;  %4723 = vst [vmem:[#allocation4_spill] sm:$0xff] %v4088_v30  ;;  %v4724_v38 = vld [vmem:[#allocation5_spill] sm:$0xff] }
 0x363   : > { %v4094_v48 = vsub.f32 %v4724_v38, %v3800_v28  ;;  %4727 = vst [vmem:[#allocation6_spill] sm:$0xff] %v4100_v52  ;;  %v4730_v38 = vld [vmem:[#allocation8_spill] sm:$0xff] }
 0x364   : > { %v1634_v34 = vadd.f32 %v1633_v32, %v1571_v8  ;;  %v1576_v8 = vmul.f32 %v4082_v58, %v4082_v58  ;;  %4729 = vst [vmem:[#allocation7_spill] sm:$0xff] %v4106_v56  ;;  %v4112_v58 = vsub.f32 %v4730_v38, %v3800_v28  ;;  %v4736_v38 = vld [vmem:[#allocation11_spill] sm:$0xff] }
 0x365   : > { %4725 = vst [vmem:[#allocation5_spill] sm:$0xff] %v4094_v48 }
 0x366   : > { %v1635_v0 = vadd.f32 %v1634_v34, %v1572_v12  ;;  %v1577_v12 = vmul.f32 %v4088_v30, %v4088_v30  ;;  %4731 = vst [vmem:[#allocation8_spill] sm:$0xff] %v4112_v58  ;;  %v4118_v30 = vsub.f32 %v4732_v60, %v3800_v28  ;;  %v4738_v60 = vld [vmem:[#allocation12_spill] sm:$0xff] }
 0x368   : > { %v1636_v4 = vadd.f32 %v1635_v0, %v1573_v16  ;;  %v1578_v16 = vmul.f32 %v4094_v48, %v4094_v48  ;;  %4733 = vst [vmem:[#allocation9_spill] sm:$0xff] %v4118_v30  ;;  %v4124_v48 = vsub.f32 %v4734_v39, %v3800_v28  ;;  %v4740_v39 = vld [vmem:[#allocation13_spill] sm:$0xff] }
 0x36a   : > { %v1637_v32 = vadd.f32 %v1636_v4, %v1574_v20  ;;  %v1579_v20 = vmul.f32 %v4100_v52, %v4100_v52  ;;  %4735 = vst [vmem:[#allocation10_spill] sm:$0xff] %v4124_v48  ;;  %v4130_v52 = vsub.f32 %v4736_v38, %v3800_v28  ;;  %v4742_v38 = vld [vmem:[#allocation14_spill] sm:$0xff] }
 0x36c   : > { %v1638_v34 = vadd.f32 %v1637_v32, %v1575_v24  ;;  %v1580_v24 = vmul.f32 %v4106_v56, %v4106_v56  ;;  %4737 = vst [vmem:[#allocation11_spill] sm:$0xff] %v4130_v52  ;;  %v4136_v56 = vsub.f32 %v4738_v60, %v3800_v28  ;;  %v4744_v60 = vld [vmem:[#allocation15_spill] sm:$0xff] }
 0x36e   : > { %v1639_v0 = vadd.f32 %v1638_v34, %v1576_v8  ;;  %v1581_v8 = vmul.f32 %v4112_v58, %v4112_v58  ;;  %4739 = vst [vmem:[#allocation12_spill] sm:$0xff] %v4136_v56  ;;  %v4142_v58 = vsub.f32 %v4740_v39, %v3800_v28  ;;  %v4746_v39 = vld [vmem:[#allocation16_spill] sm:$0xff] }
 0x370   : > { %v1640_v4 = vadd.f32 %v1639_v0, %v1577_v12  ;;  %v1582_v12 = vmul.f32 %v4118_v30, %v4118_v30  ;;  %4741 = vst [vmem:[#allocation13_spill] sm:$0xff] %v4142_v58  ;;  %v4148_v30 = vsub.f32 %v4742_v38, %v3800_v28  ;;  %v4748_v38 = vld [vmem:[#allocation17_spill] sm:$0xff] }
 0x372   : > { %v1641_v32 = vadd.f32 %v1640_v4, %v1578_v16  ;;  %v1583_v16 = vmul.f32 %v4124_v48, %v4124_v48  ;;  %4743 = vst [vmem:[#allocation14_spill] sm:$0xff] %v4148_v30  ;;  %v4154_v48 = vsub.f32 %v4744_v60, %v3800_v28  ;;  %v4750_v60 = vld [vmem:[#allocation18_spill] sm:$0xff] }
 0x374   : > { %v1642_v34 = vadd.f32 %v1641_v32, %v1579_v20  ;;  %v1584_v20 = vmul.f32 %v4130_v52, %v4130_v52  ;;  %4745 = vst [vmem:[#allocation15_spill] sm:$0xff] %v4154_v48  ;;  %v4160_v52 = vsub.f32 %v4746_v39, %v3800_v28  ;;  %v4178_v39 = vsub.f32 %v3794_v22, %v3800_v28 }
 0x376   : > { %v1643_v0 = vadd.f32 %v1642_v34, %v1580_v24  ;;  %v1585_v24 = vmul.f32 %v4136_v56, %v4136_v56  ;;  %4747 = vst [vmem:[#allocation16_spill] sm:$0xff] %v4160_v52  ;;  %v4166_v56 = vsub.f32 %v4748_v38, %v3800_v28 }
 0x378   : > { %v1644_v4 = vadd.f32 %v1643_v0, %v1581_v8  ;;  %v1586_v8 = vmul.f32 %v4142_v58, %v4142_v58  ;;  %4749 = vst [vmem:[#allocation17_spill] sm:$0xff] %v4166_v56  ;;  %v4172_v58 = vsub.f32 %v4750_v60, %v3800_v28 }
 0x37a   : > { %v1645_v32 = vadd.f32 %v1644_v4, %v1582_v12  ;;  %v1587_v12 = vmul.f32 %v4148_v30, %v4148_v30  ;;  %4751 = vst [vmem:[#allocation18_spill] sm:$0xff] %v4172_v58  ;;  %v1591_v38 = vmul.f32 %v4172_v58, %v4172_v58 }
 0x37c   : > { %v1646_v34 = vadd.f32 %v1645_v32, %v1583_v16  ;;  %v1588_v16 = vmul.f32 %v4154_v48, %v4154_v48 }
 0x37e   : > { %v1647_v0 = vadd.f32 %v1646_v34, %v1584_v20  ;;  %v1589_v20 = vmul.f32 %v4160_v52, %v4160_v52 }
 0x380   : > { %v1648_v4 = vadd.f32 %v1647_v0, %v1585_v24  ;;  %v1590_v24 = vmul.f32 %v4166_v56, %v4166_v56 }
 0x382   : > { %v1649_v32 = vadd.f32 %v1648_v4, %v1586_v8  ;;  %v1592_v4 = vmul.f32 %v4178_v39, %v4178_v39 }
 0x384   : > { %v1650_v34 = vadd.f32 %v1649_v32, %v1587_v12 }
 0x386   : > { %v1651_v0 = vadd.f32 %v1650_v34, %v1588_v16 }
 0x388   : > { %v1652_v8 = vadd.f32 %v1651_v0, %v1589_v20 }
 0x38a   : > { %v1653_v60 = vadd.f32 %v1652_v8, %v1590_v24 }
 0x38c   : > { %v1654_v48 = vadd.f32 %v1653_v60, %v1591_v38 }
 0x38e   : > { %v1655_v30 = vadd.f32 %v1654_v48, %v1592_v4  ;;  %v4190_v48 = vld [vmem:[%s4659_s2] ss:$0 sm:$0xff] }
 0x390   : > { %v1656_v52 = vrot.slane %v1655_v30, 4 }
 0x392   : > { %v1657_v12 = vadd.f32 %v1656_v52, %v1655_v30 }
 0x394   : > { %v1658_v32 = vrot.slane %v1657_v12, 2 }
 0x396   : > { %v1659_v44 = vadd.f32 %v1658_v32, %v1657_v12 }
 0x398   : > { %v1660_v28 = vrot.slane %v1659_v44, 1 }
 0x39a   : > { %v1661_v22 = vadd.f32 %v1660_v28, %v1659_v44 }
 0x39c   : > { %v1662_v40 = vmul.f32 %v1661_v22, %v3797_v14 }
 0x39e   : > { %v1663_v56 = vadd.f32 1e-05, %v1662_v40  ;;  %v4199_v40 = vld [vmem:[%s4660_s3] ss:$0 sm:$0xff] }
 0x3a0   : > { %2251 = vrsqrt.f32 %v1663_v56  ;;  %vm1670_vm1 = vweird.f32 %v1663_v56 }
 0x3a6   : > { %v2252_v16 = vpop.eup %2251 }
 0x3a7   : > { %v1665_v34 = vmul.f32 %v2252_v16, %v1663_v56  ;;  %vm1671_vm2 = vweird.f32 %v2252_v16 }
 0x3a8   : > { %vm1672_vm3 = vmor %vm1670_vm1, %vm1671_vm2 }
 0x3a9   : > { %v1666_v58 = vmul.f32 %v2252_v16, %v1665_v34 }
 0x3ab   : > { %v1667_v20 = vmul.f32 0.5, %v1666_v58 }
 0x3ad   : > { %v1668_v0 = vsub.f32 1.5, %v1667_v20 }
 0x3af   : > { %v1669_v24 = vmul.f32 %v2252_v16, %v1668_v0 }
 0x3b1   : > { %v4192_v52 = vsel %vm1672_vm3, %v2252_v16, %v1669_v24 }
 0x3b2   : > { %v1674_v14 = vmul.f32 %v4192_v52, %v3804_v46  ;;  %v1675_v44 = vmul.f32 %v4192_v52, %v3808_v6  ;;  %v1676_v56 = vmul.f32 %v4192_v52, %v3812_v2  ;;  %v1677_v58 = vmul.f32 %v4192_v52, %v3816_v42 }
 0x3b3   : > { %v1678_v30 = vmul.f32 %v4192_v52, %v3824_v33  ;;  %v1679_v46 = vmul.f32 %v4192_v52, %v3830_v35  ;;  %v1680_v38 = vmul.f32 %v4192_v52, %v3836_v10  ;;  %v1681_v8 = vmul.f32 %v4192_v52, %v3842_v62 }
 0x3b4   : > { %v1741_v6 = vmul.f32 %v4190_v48, %v1674_v14  ;;  %v1742_v4 = vmul.f32 %v4190_v48, %v1675_v44  ;;  %v1743_v2 = vmul.f32 %v4190_v48, %v1676_v56  ;;  %v1744_v42 = vmul.f32 %v4190_v48, %v1677_v58 }
 0x3b5   : > { %v1745_v60 = vmul.f32 %v4190_v48, %v1678_v30  ;;  %v1746_v33 = vmul.f32 %v4190_v48, %v1679_v46  ;;  %v1747_v35 = vmul.f32 %v4190_v48, %v1680_v38  ;;  %v1748_v12 = vmul.f32 %v4190_v48, %v1681_v8 }
 0x3b6   : > { %v1808_v10 = vadd.f32 %v4199_v40, %v1741_v6  ;;  %v1809_v62 = vadd.f32 %v4199_v40, %v1742_v4  ;;  %v1810_v32 = vadd.f32 %v4199_v40, %v1743_v2  ;;  %v1811_v28 = vadd.f32 %v4199_v40, %v1744_v42 }
 0x3b7   : > { %v1812_v22 = vadd.f32 %v4199_v40, %v1745_v60  ;;  %v1813_v16 = vadd.f32 %v4199_v40, %v1746_v33  ;;  %v1814_v34 = vadd.f32 %v4199_v40, %v1747_v35  ;;  %v1815_v20 = vadd.f32 %v4199_v40, %v1748_v12 }
 0x3b8   : > { %vm1872_vm4 = vcmp.gt.f32.partialorder %v1808_v10, 0.0  ;;  %v1936_v0 = vmul.f32 0.2, %v1808_v10  ;;  %vm1873_vm5 = vcmp.gt.f32.partialorder %v1809_v62, 0.0  ;;  %v1937_v24 = vmul.f32 0.2, %v1809_v62 }
 0x3b9   : > { %vm1874_vm6 = vcmp.gt.f32.partialorder %v1810_v32, 0.0  ;;  %v1938_v14 = vmul.f32 0.2, %v1810_v32  ;;  %vm1875_vm7 = vcmp.gt.f32.partialorder %v1811_v28, 0.0  ;;  %v1939_v44 = vmul.f32 0.2, %v1811_v28 }
 0x3ba   : > { %v2000_v56 = vsel %vm1872_vm4, %v1808_v10, %v1936_v0  ;;  %v2001_v58 = vsel %vm1873_vm5, %v1809_v62, %v1937_v24  ;;  %vm1876_vm8 = vcmp.gt.f32.partialorder %v1812_v22, 0.0  ;;  %v1940_v30 = vmul.f32 0.2, %v1812_v22 }
 0x3bb   : > { %2064 = vst [vmem:[%s4661_s4] sm:$0xff] %v2000_v56  ;;  %v2002_v46 = vsel %vm1874_vm6, %v1810_v32, %v1938_v14  ;;  %v2003_v38 = vsel %vm1875_vm7, %v1811_v28, %v1939_v44  ;;  %vm1877_vm9 = vcmp.gt.f32.partialorder %v1813_v16, 0.0  ;;  %v1941_v8 = vmul.f32 0.2, %v1813_v16 }
 0x3bc   : > { %2065 = vst [vmem:[%s4661_s4 + $0x8] sm:$0xff] %v2001_v58  ;;  %v2004_v6 = vsel %vm1876_vm8, %v1812_v22, %v1940_v30  ;;  %vm1878_vm10 = vcmp.gt.f32.partialorder %v1814_v34, 0.0  ;;  %v1942_v4 = vmul.f32 0.2, %v1814_v34  ;;  %vm1879_vm11 = vcmp.gt.f32.partialorder %v1815_v20, 0.0 }
 0x3bd   : > { %2066 = vst [vmem:[%s4661_s4 + $0x10] sm:$0xff] %v2002_v46  ;;  %v2005_v2 = vsel %vm1877_vm9, %v1813_v16, %v1941_v8  ;;  %v1943_v42 = vmul.f32 0.2, %v1815_v20  ;;  %v1682_v60 = vmul.f32 %v4192_v52, %v3848_v26  ;;  %v1683_v33 = vmul.f32 %v4192_v52, %v3854_v54 }
 0x3be   : > { %2067 = vst [vmem:[%s4661_s4 + $0x18] sm:$0xff] %v2003_v38  ;;  %v2006_v35 = vsel %vm1878_vm10, %v1814_v34, %v1942_v4  ;;  %v1684_v12 = vmul.f32 %v4192_v52, %v3860_v50  ;;  %v1685_v10 = vmul.f32 %v4192_v52, %v3866_v37  ;;  %v1686_v62 = vmul.f32 %v4192_v52, %v3872_v18 }
 0x3bf   : > { %2068 = vst [vmem:[%s4661_s4 + $0x20] sm:$0xff] %v2004_v6  ;;  %v2007_v26 = vsel %vm1879_vm11, %v1815_v20, %v1943_v42  ;;  %v1749_v54 = vmul.f32 %v4190_v48, %v1682_v60  ;;  %v1750_v32 = vmul.f32 %v4190_v48, %v1683_v33  ;;  %v1687_v28 = vmul.f32 %v4192_v52, %v3878_v41 }
 0x3c0   : > { %2069 = vst [vmem:[%s4661_s4 + $0x28] sm:$0xff] %v2005_v2  ;;  %v1751_v50 = vmul.f32 %v4190_v48, %v1684_v12  ;;  %v1752_v37 = vmul.f32 %v4190_v48, %v1685_v10  ;;  %v1753_v18 = vmul.f32 %v4190_v48, %v1686_v62  ;;  %v1688_v22 = vmul.f32 %v4192_v52, %v3884_v43 }
 0x3c1   : > { %2070 = vst [vmem:[%s4661_s4 + $0x30] sm:$0xff] %v2006_v35  ;;  %v1816_v16 = vadd.f32 %v4199_v40, %v1749_v54  ;;  %v1817_v41 = vadd.f32 %v4199_v40, %v1750_v32  ;;  %v1754_v34 = vmul.f32 %v4190_v48, %v1687_v28  ;;  %v1689_v20 = vmul.f32 %v4192_v52, %v3890_v45 }
 0x3c2   : > { %2071 = vst [vmem:[%s4661_s4 + $0x38] sm:$0xff] %v2007_v26  ;;  %v1818_v0 = vadd.f32 %v4199_v40, %v1751_v50  ;;  %v1819_v43 = vadd.f32 %v4199_v40, %v1752_v37  ;;  %v1820_v24 = vadd.f32 %v4199_v40, %v1753_v18  ;;  %v1755_v14 = vmul.f32 %v4190_v48, %v1688_v22 }
 0x3c3   : > { %vm1880_vm12 = vcmp.gt.f32.partialorder %v1816_v16, 0.0  ;;  %v1944_v44 = vmul.f32 0.2, %v1816_v16  ;;  %vm1881_vm13 = vcmp.gt.f32.partialorder %v1817_v41, 0.0  ;;  %v1945_v56 = vmul.f32 0.2, %v1817_v41 }
 0x3c4   : > { %vm1882_vm14 = vcmp.gt.f32.partialorder %v1818_v0, 0.0  ;;  %v1946_v58 = vmul.f32 0.2, %v1818_v0  ;;  %vm1883_vm15 = vcmp.gt.f32.partialorder %v1819_v43, 0.0  ;;  %v1947_v45 = vmul.f32 0.2, %v1819_v43 }
 0x3c5   : > { %v2008_v30 = vsel %vm1880_vm12, %v1816_v16, %v1944_v44  ;;  %v2009_v46 = vsel %vm1881_vm13, %v1817_v41, %v1945_v56  ;;  %vm1884_vm0 = vcmp.gt.f32.partialorder %v1820_v24, 0.0  ;;  %v1948_v38 = vmul.f32 0.2, %v1820_v24 }
 0x3c6   : > { %2072 = vst [vmem:[%s4661_s4 + $0x40] sm:$0xff] %v2008_v30  ;;  %v2010_v8 = vsel %vm1882_vm14, %v1818_v0, %v1946_v58  ;;  %v2011_v6 = vsel %vm1883_vm15, %v1819_v43, %v1947_v45  ;;  %v1821_v4 = vadd.f32 %v4199_v40, %v1754_v34  ;;  %v1822_v2 = vadd.f32 %v4199_v40, %v1755_v14 }
 0x3c7   : > { %2073 = vst [vmem:[%s4661_s4 + $0x48] sm:$0xff] %v2009_v46  ;;  %v2012_v42 = vsel %vm1884_vm0, %v1820_v24, %v1948_v38  ;;  %v1756_v60 = vmul.f32 %v4190_v48, %v1689_v20  ;;  %v1690_v33 = vmul.f32 %v4192_v52, %v3896_v47  ;;  %v1691_v35 = vmul.f32 %v4192_v52, %v3902_v49 }
 0x3c8   : > { %2074 = vst [vmem:[%s4661_s4 + $0x50] sm:$0xff] %v2010_v8  ;;  %vm1885_vm1 = vcmp.gt.f32.partialorder %v1821_v4, 0.0  ;;  %v1949_v12 = vmul.f32 0.2, %v1821_v4  ;;  %vm1886_vm2 = vcmp.gt.f32.partialorder %v1822_v2, 0.0  ;;  %v1692_v10 = vmul.f32 %v4192_v52, %v3908_v51 }
 0x3c9   : > { %2075 = vst [vmem:[%s4661_s4 + $0x58] sm:$0xff] %v2011_v6  ;;  %v1950_v62 = vmul.f32 0.2, %v1822_v2  ;;  %v1823_v47 = vadd.f32 %v4199_v40, %v1756_v60  ;;  %v1757_v26 = vmul.f32 %v4190_v48, %v1690_v33  ;;  %v1758_v49 = vmul.f32 %v4190_v48, %v1691_v35 }
 0x3ca   : > { %2076 = vst [vmem:[%s4661_s4 + $0x60] sm:$0xff] %v2012_v42  ;;  %v2013_v54 = vsel %vm1885_vm1, %v1821_v4, %v1949_v12  ;;  %v1759_v32 = vmul.f32 %v4190_v48, %v1692_v10  ;;  %v1693_v51 = vmul.f32 %v4192_v52, %v3914_v53  ;;  %v1694_v28 = vmul.f32 %v4192_v52, %v3920_v55 }
 0x3cb   : > { %2077 = vst [vmem:[%s4661_s4 + $0x68] sm:$0xff] %v2013_v54  ;;  %v2014_v50 = vsel %vm1886_vm2, %v1822_v2, %v1950_v62  ;;  %vm1887_vm3 = vcmp.gt.f32.partialorder %v1823_v47, 0.0  ;;  %v1951_v37 = vmul.f32 0.2, %v1823_v47  ;;  %v1824_v18 = vadd.f32 %v4199_v40, %v1757_v26 }
 0x3cc   : > { %2078 = vst [vmem:[%s4661_s4 + $0x70] sm:$0xff] %v2014_v50  ;;  %v1825_v22 = vadd.f32 %v4199_v40, %v1758_v49  ;;  %v1826_v53 = vadd.f32 %v4199_v40, %v1759_v32  ;;  %v1760_v16 = vmul.f32 %v4190_v48, %v1693_v51  ;;  %v1761_v55 = vmul.f32 %v4190_v48, %v1694_v28 }
 0x3cd   : > { %v2015_v41 = vsel %vm1887_vm3, %v1823_v47, %v1951_v37  ;;  %vm1888_vm4 = vcmp.gt.f32.partialorder %v1824_v18, 0.0  ;;  %v1952_v34 = vmul.f32 0.2, %v1824_v18  ;;  %v1695_v20 = vmul.f32 %v4192_v52, %v3926_v57 }
 0x3ce   : > { %2079 = vst [vmem:[%s4661_s4 + $0x78] sm:$0xff] %v2015_v41  ;;  %vm1889_vm5 = vcmp.gt.f32.partialorder %v1825_v22, 0.0  ;;  %v1953_v0 = vmul.f32 0.2, %v1825_v22  ;;  %vm1890_vm6 = vcmp.gt.f32.partialorder %v1826_v53, 0.0  ;;  %v1827_v43 = vadd.f32 %v4199_v40, %v1760_v16 }
 0x3cf   : > { %v2016_v24 = vsel %vm1888_vm4, %v1824_v18, %v1952_v34  ;;  %v1954_v14 = vmul.f32 0.2, %v1826_v53  ;;  %v1828_v44 = vadd.f32 %v4199_v40, %v1761_v55  ;;  %v1762_v56 = vmul.f32 %v4190_v48, %v1695_v20 }
 0x3d0   : > { %2080 = vst [vmem:[%s4661_s4 + $0x80] sm:$0xff] %v2016_v24  ;;  %v2017_v57 = vsel %vm1889_vm5, %v1825_v22, %v1953_v0  ;;  %vm1891_vm7 = vcmp.gt.f32.partialorder %v1827_v43, 0.0  ;;  %v1955_v58 = vmul.f32 0.2, %v1827_v43  ;;  %v1696_v45 = vmul.f32 %v4192_v52, %v3932_v59 }
 0x3d1   : > { %2081 = vst [vmem:[%s4661_s4 + $0x88] sm:$0xff] %v2017_v57  ;;  %v2018_v30 = vsel %vm1890_vm6, %v1826_v53, %v1954_v14  ;;  %vm1892_vm8 = vcmp.gt.f32.partialorder %v1828_v44, 0.0  ;;  %v1956_v46 = vmul.f32 0.2, %v1828_v44  ;;  %v1829_v38 = vadd.f32 %v4199_v40, %v1762_v56 }
 0x3d2   : > { %2082 = vst [vmem:[%s4661_s4 + $0x90] sm:$0xff] %v2018_v30  ;;  %v2019_v8 = vsel %vm1891_vm7, %v1827_v43, %v1955_v58  ;;  %v1763_v6 = vmul.f32 %v4190_v48, %v1696_v45  ;;  %v1697_v4 = vmul.f32 %v4192_v52, %v3938_v61  ;;  %v1698_v59 = vmul.f32 %v4192_v52, %v3944_v63 }
 0x3d3   : > { %2083 = vst [vmem:[%s4661_s4 + $0x98] sm:$0xff] %v2019_v8  ;;  %v2020_v2 = vsel %vm1892_vm8, %v1828_v44, %v1956_v46  ;;  %vm1893_vm9 = vcmp.gt.f32.partialorder %v1829_v38, 0.0  ;;  %v1957_v42 = vmul.f32 0.2, %v1829_v38  ;;  %v1699_v60 = vmul.f32 %v4192_v52, %v3950_v1 }
 0x3d4   : > { %2084 = vst [vmem:[%s4661_s4 + $0xa0] sm:$0xff] %v2020_v2  ;;  %v1830_v33 = vadd.f32 %v4199_v40, %v1763_v6  ;;  %v1764_v61 = vmul.f32 %v4190_v48, %v1697_v4  ;;  %v1765_v63 = vmul.f32 %v4190_v48, %v1698_v59  ;;  %v1700_v35 = vmul.f32 %v4192_v52, %v3956_v3 }
 0x3d5   : > { %v2021_v12 = vsel %vm1893_vm9, %v1829_v38, %v1957_v42  ;;  %v1766_v10 = vmul.f32 %v4190_v48, %v1699_v60  ;;  %v1701_v62 = vmul.f32 %v4192_v52, %v3962_v5  ;;  %v1702_v1 = vmul.f32 %v4192_v52, %v3968_v7 }
 0x3d6   : > { %2085 = vst [vmem:[%s4661_s4 + $0xa8] sm:$0xff] %v2021_v12  ;;  %vm1894_vm10 = vcmp.gt.f32.partialorder %v1830_v33, 0.0  ;;  %v1958_v47 = vmul.f32 0.2, %v1830_v33  ;;  %v1831_v26 = vadd.f32 %v4199_v40, %v1764_v61  ;;  %v1832_v49 = vadd.f32 %v4199_v40, %v1765_v63 }
 0x3d7   : > { %v1833_v3 = vadd.f32 %v4199_v40, %v1766_v10  ;;  %v1767_v54 = vmul.f32 %v4190_v48, %v1700_v35  ;;  %v1768_v32 = vmul.f32 %v4190_v48, %v1701_v62  ;;  %v1769_v5 = vmul.f32 %v4190_v48, %v1702_v1 }
 0x3d8   : > { %v2022_v51 = vsel %vm1894_vm10, %v1830_v33, %v1958_v47  ;;  %vm1895_vm11 = vcmp.gt.f32.partialorder %v1831_v26, 0.0  ;;  %v1959_v7 = vmul.f32 0.2, %v1831_v26  ;;  %vm1896_vm12 = vcmp.gt.f32.partialorder %v1832_v49, 0.0 }
 0x3d9   : > { %2086 = vst [vmem:[%s4661_s4 + $0xb0] sm:$0xff] %v2022_v51  ;;  %v1960_v28 = vmul.f32 0.2, %v1832_v49  ;;  %vm1897_vm13 = vcmp.gt.f32.partialorder %v1833_v3, 0.0  ;;  %v1961_v50 = vmul.f32 0.2, %v1833_v3  ;;  %v1834_v37 = vadd.f32 %v4199_v40, %v1767_v54 }
 0x3da   : > { %v2023_v18 = vsel %vm1895_vm11, %v1831_v26, %v1959_v7  ;;  %v1835_v22 = vadd.f32 %v4199_v40, %v1768_v32  ;;  %v1836_v53 = vadd.f32 %v4199_v40, %v1769_v5  ;;  %v1703_v16 = vmul.f32 %v4192_v52, %v3974_v9 }
 0x3db   : > { %2087 = vst [vmem:[%s4661_s4 + $0xb8] sm:$0xff] %v2023_v18  ;;  %v2024_v55 = vsel %vm1896_vm12, %v1832_v49, %v1960_v28  ;;  %v2025_v41 = vsel %vm1897_vm13, %v1833_v3, %v1961_v50  ;;  %vm1898_vm14 = vcmp.gt.f32.partialorder %v1834_v37, 0.0  ;;  %v1962_v34 = vmul.f32 0.2, %v1834_v37  ;;  %v4752_v28 = vld [vmem:[#allocation19_spill] sm:$0xff] }
 0x3dc   : > { %2088 = vst [vmem:[%s4661_s4 + $0xc0] sm:$0xff] %v2024_v55  ;;  %vm1899_vm15 = vcmp.gt.f32.partialorder %v1835_v22, 0.0  ;;  %v1963_v20 = vmul.f32 0.2, %v1835_v22  ;;  %vm1900_vm0 = vcmp.gt.f32.partialorder %v1836_v53, 0.0  ;;  %v1770_v0 = vmul.f32 %v4190_v48, %v1703_v16 }
 0x3dd   : > { %2089 = vst [vmem:[%s4661_s4 + $0xc8] sm:$0xff] %v2025_v41  ;;  %v2026_v9 = vsel %vm1898_vm14, %v1834_v37, %v1962_v34  ;;  %v1964_v43 = vmul.f32 0.2, %v1836_v53  ;;  %v1704_v24 = vmul.f32 %v4192_v52, %v3980_v11  ;;  %v1705_v14 = vmul.f32 %v4192_v52, %v3986_v13 }
 0x3de   : > { %2090 = vst [vmem:[%s4661_s4 + $0xd0] sm:$0xff] %v2026_v9  ;;  %v2027_v44 = vsel %vm1899_vm15, %v1835_v22, %v1963_v20  ;;  %v1837_v56 = vadd.f32 %v4199_v40, %v1770_v0  ;;  %v1706_v57 = vmul.f32 %v4192_v52, %v3992_v15  ;;  %v1707_v58 = vmul.f32 %v4192_v52, %v3998_v17 }
 0x3df   : > { %2091 = vst [vmem:[%s4661_s4 + $0xd8] sm:$0xff] %v2027_v44  ;;  %v2028_v11 = vsel %vm1900_vm0, %v1836_v53, %v1964_v43  ;;  %v1771_v13 = vmul.f32 %v4190_v48, %v1704_v24  ;;  %v1772_v45 = vmul.f32 %v4190_v48, %v1705_v14  ;;  %v1708_v30 = vmul.f32 %v4192_v52, %v4004_v19 }
 0x3e0   : > { %2092 = vst [vmem:[%s4661_s4 + $0xe0] sm:$0xff] %v2028_v11  ;;  %vm1901_vm1 = vcmp.gt.f32.partialorder %v1837_v56, 0.0  ;;  %v1965_v15 = vmul.f32 0.2, %v1837_v56  ;;  %v1773_v17 = vmul.f32 %v4190_v48, %v1706_v57  ;;  %v1774_v46 = vmul.f32 %v4190_v48, %v1707_v58 }
 0x3e1   : > { %v1838_v38 = vadd.f32 %v4199_v40, %v1771_v13  ;;  %v1839_v8 = vadd.f32 %v4199_v40, %v1772_v45  ;;  %v1775_v6 = vmul.f32 %v4190_v48, %v1708_v30  ;;  %v1709_v4 = vmul.f32 %v4192_v52, %v4010_v21 }
 0x3e2   : > { %v2029_v19 = vsel %vm1901_vm1, %v1837_v56, %v1965_v15  ;;  %v1840_v59 = vadd.f32 %v4199_v40, %v1773_v17  ;;  %v1841_v2 = vadd.f32 %v4199_v40, %v1774_v46  ;;  %v1710_v42 = vmul.f32 %v4192_v52, %v4016_v23  ;;  %v4753_v56 = vld [vmem:[#allocation20_spill] sm:$0xff]  ;;  %v4754_v46 = vld [vmem:[#allocation21_spill] sm:$0xff] }
 0x3e3   : > { %2093 = vst [vmem:[%s4661_s4 + $0xe8] sm:$0xff] %v2029_v19  ;;  %vm1902_vm2 = vcmp.gt.f32.partialorder %v1838_v38, 0.0  ;;  %v1966_v60 = vmul.f32 0.2, %v1838_v38  ;;  %vm1903_vm3 = vcmp.gt.f32.partialorder %v1839_v8, 0.0  ;;  %v1842_v33 = vadd.f32 %v4199_v40, %v1775_v6 }
 0x3e4   : > { %v1967_v61 = vmul.f32 0.2, %v1839_v8  ;;  %vm1904_vm4 = vcmp.gt.f32.partialorder %v1840_v59, 0.0  ;;  %v1968_v21 = vmul.f32 0.2, %v1840_v59  ;;  %vm1905_vm5 = vcmp.gt.f32.partialorder %v1841_v2, 0.0 }
 0x3e5   : > { %v2030_v63 = vsel %vm1902_vm2, %v1838_v38, %v1966_v60  ;;  %v1969_v35 = vmul.f32 0.2, %v1841_v2  ;;  %vm1906_vm6 = vcmp.gt.f32.partialorder %v1842_v33, 0.0  ;;  %v1970_v12 = vmul.f32 0.2, %v1842_v33 }
 0x3e6   : > { %2094 = vst [vmem:[%s4661_s4 + $0xf0] sm:$0xff] %v2030_v63  ;;  %v2031_v23 = vsel %vm1903_vm3, %v1839_v8, %v1967_v61  ;;  %v2032_v10 = vsel %vm1904_vm4, %v1840_v59, %v1968_v21  ;;  %v1776_v62 = vmul.f32 %v4190_v48, %v1709_v4  ;;  %v1777_v1 = vmul.f32 %v4190_v48, %v1710_v42  ;;  %v4755_v8 = vld [vmem:[#allocation22_spill] sm:$0xff]  ;;  %v4756_v59 = vld [vmem:[#allocation23_spill] sm:$0xff]  ;;  %v4758_v63 = vld [vmem:[#allocation4_spill] sm:$0xff] }
 0x3e7   : > { %2095 = vst [vmem:[%s4661_s4 + $0xf8] sm:$0xff] %v2031_v23  ;;  %v2033_v47 = vsel %vm1905_vm5, %v1841_v2, %v1969_v35  ;;  %v2034_v26 = vsel %vm1906_vm6, %v1842_v33, %v1970_v12  ;;  %v1711_v49 = vmul.f32 %v4192_v52, %v4022_v25  ;;  %v1712_v3 = vmul.f32 %v4192_v52, %v4028_v27  ;;  %v4757_v42 = vld [vmem:[#allocation3_spill] sm:$0xff] }
 0x3e8   : > { %2096 = vst [vmem:[%s4661_s4 + $0x100] sm:$0xff] %v2032_v10  ;;  %v1843_v54 = vadd.f32 %v4199_v40, %v1776_v62  ;;  %v1844_v32 = vadd.f32 %v4199_v40, %v1777_v1  ;;  %v1713_v5 = vmul.f32 %v4192_v52, %v4034_v29  ;;  %v1714_v51 = vmul.f32 %v4192_v52, %v4040_v31 }
 0x3e9   : > { %2097 = vst [vmem:[%s4661_s4 + $0x108] sm:$0xff] %v2033_v47  ;;  %v1778_v25 = vmul.f32 %v4190_v48, %v1711_v49  ;;  %v1779_v27 = vmul.f32 %v4190_v48, %v1712_v3  ;;  %v1715_v7 = vmul.f32 %v4192_v52, %v4046_v36  ;;  %v1716_v50 = vmul.f32 %v4192_v52, %v4752_v28 }
 0x3ea   : > { %2098 = vst [vmem:[%s4661_s4 + $0x110] sm:$0xff] %v2034_v26  ;;  %vm1907_vm7 = vcmp.gt.f32.partialorder %v1843_v54, 0.0  ;;  %v1971_v29 = vmul.f32 0.2, %v1843_v54  ;;  %vm1908_vm8 = vcmp.gt.f32.partialorder %v1844_v32, 0.0  ;;  %v1780_v31 = vmul.f32 %v4190_v48, %v1713_v5  ;;  %v4759_v26 = vld [vmem:[#allocation5_spill] sm:$0xff] }
 0x3eb   : > { %v1972_v37 = vmul.f32 0.2, %v1844_v32  ;;  %v1845_v18 = vadd.f32 %v4199_v40, %v1778_v25  ;;  %v1846_v22 = vadd.f32 %v4199_v40, %v1779_v27  ;;  %v1781_v53 = vmul.f32 %v4190_v48, %v1714_v51  ;;  %v4760_v5 = vld [vmem:[#allocation6_spill] sm:$0xff] }
 0x3ec   : > { %v2035_v36 = vsel %vm1907_vm7, %v1843_v54, %v1971_v29  ;;  %v1847_v16 = vadd.f32 %v4199_v40, %v1780_v31  ;;  %v1782_v55 = vmul.f32 %v4190_v48, %v1715_v7  ;;  %v1783_v41 = vmul.f32 %v4190_v48, %v1716_v50 }
 0x3ed   : > { %2099 = vst [vmem:[%s4661_s4 + $0x118] sm:$0xff] %v2035_v36  ;;  %v2036_v34 = vsel %vm1908_vm8, %v1844_v32, %v1972_v37  ;;  %vm1909_vm9 = vcmp.gt.f32.partialorder %v1845_v18, 0.0  ;;  %v1973_v20 = vmul.f32 0.2, %v1845_v18  ;;  %vm1910_vm10 = vcmp.gt.f32.partialorder %v1846_v22, 0.0 }
 0x3ee   : > { %2100 = vst [vmem:[%s4661_s4 + $0x120] sm:$0xff] %v2036_v34  ;;  %v1974_v0 = vmul.f32 0.2, %v1846_v22  ;;  %vm1911_vm11 = vcmp.gt.f32.partialorder %v1847_v16, 0.0  ;;  %v1975_v9 = vmul.f32 0.2, %v1847_v16  ;;  %v1848_v43 = vadd.f32 %v4199_v40, %v1781_v53 }
 0x3ef   : > { %v2037_v24 = vsel %vm1909_vm9, %v1845_v18, %v1973_v20  ;;  %v1849_v14 = vadd.f32 %v4199_v40, %v1782_v55  ;;  %v1850_v44 = vadd.f32 %v4199_v40, %v1783_v41  ;;  %v1717_v57 = vmul.f32 %v4192_v52, %v4753_v56  ;;  %v4761_v55 = vld [vmem:[#allocation7_spill] sm:$0xff]  ;;  %v4762_v34 = vld [vmem:[#allocation8_spill] sm:$0xff] }
 0x3f0   : > { %2101 = vst [vmem:[%s4661_s4 + $0x128] sm:$0xff] %v2037_v24  ;;  %v2038_v58 = vsel %vm1910_vm10, %v1846_v22, %v1974_v0  ;;  %v2039_v11 = vsel %vm1911_vm11, %v1847_v16, %v1975_v9  ;;  %vm1912_vm12 = vcmp.gt.f32.partialorder %v1848_v43, 0.0  ;;  %v1976_v13 = vmul.f32 0.2, %v1848_v43 }
 0x3f1   : > { %2102 = vst [vmem:[%s4661_s4 + $0x130] sm:$0xff] %v2038_v58  ;;  %vm1913_vm13 = vcmp.gt.f32.partialorder %v1849_v14, 0.0  ;;  %v1977_v45 = vmul.f32 0.2, %v1849_v14  ;;  %vm1914_vm14 = vcmp.gt.f32.partialorder %v1850_v44, 0.0  ;;  %v1784_v30 = vmul.f32 %v4190_v48, %v1717_v57  ;;  %v4765_v58 = vld [vmem:[#allocation11_spill] sm:$0xff] }
 0x3f2   : > { %2103 = vst [vmem:[%s4661_s4 + $0x138] sm:$0xff] %v2039_v11  ;;  %v2040_v15 = vsel %vm1912_vm12, %v1848_v43, %v1976_v13  ;;  %v1978_v17 = vmul.f32 0.2, %v1850_v44  ;;  %v1718_v38 = vmul.f32 %v4192_v52, %v4754_v46  ;;  %v1719_v6 = vmul.f32 %v4192_v52, %v4755_v8  ;;  %v4763_v43 = vld [vmem:[#allocation9_spill] sm:$0xff]  ;;  %v4766_v13 = vld [vmem:[#allocation12_spill] sm:$0xff] }
 0x3f3   : > { %2104 = vst [vmem:[%s4661_s4 + $0x140] sm:$0xff] %v2040_v15  ;;  %v2041_v4 = vsel %vm1913_vm13, %v1849_v14, %v1977_v45  ;;  %v1851_v19 = vadd.f32 %v4199_v40, %v1784_v30  ;;  %v1720_v2 = vmul.f32 %v4192_v52, %v4756_v59  ;;  %v1721_v60 = vmul.f32 %v4192_v52, %v4757_v42  ;;  %v4764_v14 = vld [vmem:[#allocation10_spill] sm:$0xff] }
 0x3f4   : > { %2105 = vst [vmem:[%s4661_s4 + $0x148] sm:$0xff] %v2041_v4  ;;  %v2042_v33 = vsel %vm1914_vm14, %v1850_v44, %v1978_v17  ;;  %v1785_v61 = vmul.f32 %v4190_v48, %v1718_v38  ;;  %v1786_v21 = vmul.f32 %v4190_v48, %v1719_v6  ;;  %v1722_v35 = vmul.f32 %v4192_v52, %v4758_v63 }
 0x3f5   : > { %2106 = vst [vmem:[%s4661_s4 + $0x150] sm:$0xff] %v2042_v33  ;;  %vm1915_vm15 = vcmp.gt.f32.partialorder %v1851_v19, 0.0  ;;  %v1979_v12 = vmul.f32 0.2, %v1851_v19  ;;  %v1787_v23 = vmul.f32 %v4190_v48, %v1720_v2  ;;  %v1788_v10 = vmul.f32 %v4190_v48, %v1721_v60 }
 0x3f6   : > { %v1852_v62 = vadd.f32 %v4199_v40, %v1785_v61  ;;  %v1853_v1 = vadd.f32 %v4199_v40, %v1786_v21  ;;  %v1789_v47 = vmul.f32 %v4190_v48, %v1722_v35  ;;  %v1723_v49 = vmul.f32 %v4192_v52, %v4759_v26 }
 0x3f7   : > { %v2043_v3 = vsel %vm1915_vm15, %v1851_v19, %v1979_v12  ;;  %v1854_v54 = vadd.f32 %v4199_v40, %v1787_v23  ;;  %v1855_v32 = vadd.f32 %v4199_v40, %v1788_v10  ;;  %v1724_v51 = vmul.f32 %v4192_v52, %v4760_v5  ;;  %v4767_v12 = vld [vmem:[#allocation13_spill] sm:$0xff]  ;;  %v4769_v5 = vld [vmem:[#allocation15_spill] sm:$0xff] }
 0x3f8   : > { %2107 = vst [vmem:[%s4661_s4 + $0x158] sm:$0xff] %v2043_v3  ;;  %vm1916_vm0 = vcmp.gt.f32.partialorder %v1852_v62, 0.0  ;;  %v1980_v25 = vmul.f32 0.2, %v1852_v62  ;;  %vm1917_vm1 = vcmp.gt.f32.partialorder %v1853_v1, 0.0  ;;  %v1856_v27 = vadd.f32 %v4199_v40, %v1789_v47 }
 0x3f9   : > { %v1981_v7 = vmul.f32 0.2, %v1853_v1  ;;  %vm1918_vm2 = vcmp.gt.f32.partialorder %v1854_v54, 0.0  ;;  %v1982_v28 = vmul.f32 0.2, %v1854_v54  ;;  %vm1919_vm3 = vcmp.gt.f32.partialorder %v1855_v32, 0.0 }
 0x3fa   : > { %v2044_v50 = vsel %vm1916_vm0, %v1852_v62, %v1980_v25  ;;  %v1983_v29 = vmul.f32 0.2, %v1855_v32  ;;  %vm1920_vm4 = vcmp.gt.f32.partialorder %v1856_v27, 0.0  ;;  %v1984_v31 = vmul.f32 0.2, %v1856_v27 }
 0x3fb   : > { %2108 = vst [vmem:[%s4661_s4 + $0x160] sm:$0xff] %v2044_v50  ;;  %v2045_v37 = vsel %vm1917_vm1, %v1853_v1, %v1981_v7  ;;  %v2046_v18 = vsel %vm1918_vm2, %v1854_v54, %v1982_v28  ;;  %v1790_v22 = vmul.f32 %v4190_v48, %v1723_v49  ;;  %v1791_v53 = vmul.f32 %v4190_v48, %v1724_v51  ;;  %v4768_v54 = vld [vmem:[#allocation14_spill] sm:$0xff]  ;;  %v4770_v7 = vld [vmem:[#allocation16_spill] sm:$0xff]  ;;  %v4771_v50 = vld [vmem:[#allocation17_spill] sm:$0xff] }
 0x3fc   : > { %2109 = vst [vmem:[%s4661_s4 + $0x168] sm:$0xff] %v2045_v37  ;;  %v2047_v36 = vsel %vm1919_vm3, %v1855_v32, %v1983_v29  ;;  %v2048_v16 = vsel %vm1920_vm4, %v1856_v27, %v1984_v31  ;;  %v1725_v41 = vmul.f32 %v4192_v52, %v4761_v55  ;;  %v1726_v20 = vmul.f32 %v4192_v52, %v4762_v34 }
 0x3fd   : > { %2110 = vst [vmem:[%s4661_s4 + $0x170] sm:$0xff] %v2046_v18  ;;  %v1857_v0 = vadd.f32 %v4199_v40, %v1790_v22  ;;  %v1858_v9 = vadd.f32 %v4199_v40, %v1791_v53  ;;  %v1727_v24 = vmul.f32 %v4192_v52, %v4763_v43  ;;  %v1728_v44 = vmul.f32 %v4192_v52, %v4764_v14  ;;  %v4772_v22 = vld [vmem:[#allocation18_spill] sm:$0xff] }
 0x3fe   : > { %2111 = vst [vmem:[%s4661_s4 + $0x178] sm:$0xff] %v2047_v36  ;;  %v1792_v56 = vmul.f32 %v4190_v48, %v1725_v41  ;;  %v1793_v57 = vmul.f32 %v4190_v48, %v1726_v20  ;;  %v1729_v11 = vmul.f32 %v4192_v52, %v4765_v58  ;;  %v1730_v45 = vmul.f32 %v4192_v52, %v4766_v13 }
 0x3ff   : > { %2112 = vst [vmem:[%s4661_s4 + $0x180] sm:$0xff] %v2048_v16  ;;  %vm1921_vm5 = vcmp.gt.f32.partialorder %v1857_v0, 0.0  ;;  %v1985_v30 = vmul.f32 0.2, %v1857_v0  ;;  %vm1922_vm6 = vcmp.gt.f32.partialorder %v1858_v9, 0.0  ;;  %v1794_v15 = vmul.f32 %v4190_v48, %v1727_v24 }
 0x400   : > { %v1986_v17 = vmul.f32 0.2, %v1858_v9  ;;  %v1859_v46 = vadd.f32 %v4199_v40, %v1792_v56  ;;  %v1860_v38 = vadd.f32 %v4199_v40, %v1793_v57  ;;  %v1795_v8 = vmul.f32 %v4190_v48, %v1728_v44 }
 0x401   : > { %v2049_v6 = vsel %vm1921_vm5, %v1857_v0, %v1985_v30  ;;  %v1861_v4 = vadd.f32 %v4199_v40, %v1794_v15  ;;  %v1796_v19 = vmul.f32 %v4190_v48, %v1729_v11  ;;  %v1797_v59 = vmul.f32 %v4190_v48, %v1730_v45 }
 0x402   : > { %2113 = vst [vmem:[%s4661_s4 + $0x188] sm:$0xff] %v2049_v6  ;;  %v2050_v2 = vsel %vm1922_vm6, %v1858_v9, %v1986_v17  ;;  %vm1923_vm7 = vcmp.gt.f32.partialorder %v1859_v46, 0.0  ;;  %v1987_v42 = vmul.f32 0.2, %v1859_v46  ;;  %vm1924_vm8 = vcmp.gt.f32.partialorder %v1860_v38, 0.0 }
 0x403   : > { %2114 = vst [vmem:[%s4661_s4 + $0x190] sm:$0xff] %v2050_v2  ;;  %v1988_v60 = vmul.f32 0.2, %v1860_v38  ;;  %vm1925_vm9 = vcmp.gt.f32.partialorder %v1861_v4, 0.0  ;;  %v1989_v33 = vmul.f32 0.2, %v1861_v4  ;;  %v1862_v61 = vadd.f32 %v4199_v40, %v1795_v8 }
 0x404   : > { %v2051_v21 = vsel %vm1923_vm7, %v1859_v46, %v1987_v42  ;;  %v1863_v63 = vadd.f32 %v4199_v40, %v1796_v19  ;;  %v1864_v35 = vadd.f32 %v4199_v40, %v1797_v59  ;;  %v1731_v23 = vmul.f32 %v4192_v52, %v4767_v12 }
 0x405   : > { %2115 = vst [vmem:[%s4661_s4 + $0x198] sm:$0xff] %v2051_v21  ;;  %v2052_v10 = vsel %vm1924_vm8, %v1860_v38, %v1988_v60  ;;  %v2053_v62 = vsel %vm1925_vm9, %v1861_v4, %v1989_v33  ;;  %vm1926_vm10 = vcmp.gt.f32.partialorder %v1862_v61, 0.0  ;;  %v1990_v1 = vmul.f32 0.2, %v1862_v61 }
 0x406   : > { %2116 = vst [vmem:[%s4661_s4 + $0x1a0] sm:$0xff] %v2052_v10  ;;  %vm1927_vm11 = vcmp.gt.f32.partialorder %v1863_v63, 0.0  ;;  %v1991_v47 = vmul.f32 0.2, %v1863_v63  ;;  %vm1928_vm12 = vcmp.gt.f32.partialorder %v1864_v35, 0.0  ;;  %v1798_v26 = vmul.f32 %v4190_v48, %v1731_v23 }
 0x407   : > { %2117 = vst [vmem:[%s4661_s4 + $0x1a8] sm:$0xff] %v2053_v62  ;;  %v2054_v49 = vsel %vm1926_vm10, %v1862_v61, %v1990_v1  ;;  %v1992_v3 = vmul.f32 0.2, %v1864_v35  ;;  %v1732_v32 = vmul.f32 %v4192_v52, %v4768_v54  ;;  %v1733_v51 = vmul.f32 %v4192_v52, %v4769_v5 }
 0x408   : > { %2118 = vst [vmem:[%s4661_s4 + $0x1b0] sm:$0xff] %v2054_v49  ;;  %v2055_v25 = vsel %vm1927_vm11, %v1863_v63, %v1991_v47  ;;  %v1865_v27 = vadd.f32 %v4199_v40, %v1798_v26  ;;  %v1734_v28 = vmul.f32 %v4192_v52, %v4770_v7  ;;  %v1735_v29 = vmul.f32 %v4192_v52, %v4771_v50 }
 0x409   : > { %2119 = vst [vmem:[%s4661_s4 + $0x1b8] sm:$0xff] %v2055_v25  ;;  %v2056_v31 = vsel %vm1928_vm12, %v1864_v35, %v1992_v3  ;;  %v1799_v37 = vmul.f32 %v4190_v48, %v1732_v32  ;;  %v1800_v18 = vmul.f32 %v4190_v48, %v1733_v51  ;;  %v1736_v53 = vmul.f32 %v4192_v52, %v4772_v22 }
 0x40a   : > { %2120 = vst [vmem:[%s4661_s4 + $0x1c0] sm:$0xff] %v2056_v31  ;;  %vm1929_vm13 = vcmp.gt.f32.partialorder %v1865_v27, 0.0  ;;  %v1993_v36 = vmul.f32 0.2, %v1865_v27  ;;  %v1801_v16 = vmul.f32 %v4190_v48, %v1734_v28  ;;  %v1802_v55 = vmul.f32 %v4190_v48, %v1735_v29 }
 0x40b   : > { %v1866_v41 = vadd.f32 %v4199_v40, %v1799_v37  ;;  %v1867_v34 = vadd.f32 %v4199_v40, %v1800_v18  ;;  %v1803_v20 = vmul.f32 %v4190_v48, %v1736_v53  ;;  %v1737_v24 = vmul.f32 %v4192_v52, %v4178_v39 }
 0x40c   : > { %v2057_v0 = vsel %vm1929_vm13, %v1865_v27, %v1993_v36  ;;  %v1868_v9 = vadd.f32 %v4199_v40, %v1801_v16  ;;  %v1869_v43 = vadd.f32 %v4199_v40, %v1802_v55 }
 0x40d   : > { %2121 = vst [vmem:[%s4661_s4 + $0x1c8] sm:$0xff] %v2057_v0  ;;  %vm1930_vm14 = vcmp.gt.f32.partialorder %v1866_v41, 0.0  ;;  %v1994_v14 = vmul.f32 0.2, %v1866_v41  ;;  %vm1931_vm15 = vcmp.gt.f32.partialorder %v1867_v34, 0.0  ;;  %v1870_v44 = vadd.f32 %v4199_v40, %v1803_v20 }
 0x40e   : > { %v1995_v56 = vmul.f32 0.2, %v1867_v34  ;;  %vm1932_vm0 = vcmp.gt.f32.partialorder %v1868_v9, 0.0  ;;  %v1996_v57 = vmul.f32 0.2, %v1868_v9  ;;  %vm1933_vm1 = vcmp.gt.f32.partialorder %v1869_v43, 0.0 }
 0x40f   : > { %v2058_v58 = vsel %vm1930_vm14, %v1866_v41, %v1994_v14  ;;  %v1997_v11 = vmul.f32 0.2, %v1869_v43  ;;  %vm1934_vm2 = vcmp.gt.f32.partialorder %v1870_v44, 0.0  ;;  %v1998_v13 = vmul.f32 0.2, %v1870_v44 }
 0x410   : > { %2122 = vst [vmem:[%s4661_s4 + $0x1d0] sm:$0xff] %v2058_v58  ;;  %v2059_v39 = vsel %vm1931_vm15, %v1867_v34, %v1995_v56  ;;  %v2060_v52 = vsel %vm1932_vm0, %v1868_v9, %v1996_v57  ;;  %v1804_v45 = vmul.f32 %v4190_v48, %v1737_v24 }
 0x411   : > { %2123 = vst [vmem:[%s4661_s4 + $0x1d8] sm:$0xff] %v2059_v39  ;;  %v2061_v30 = vsel %vm1933_vm1, %v1869_v43, %v1997_v11  ;;  %v2062_v15 = vsel %vm1934_vm2, %v1870_v44, %v1998_v13 }
 0x412   : > { %2124 = vst [vmem:[%s4661_s4 + $0x1e0] sm:$0xff] %v2060_v52  ;;  %v1871_v17 = vadd.f32 %v4199_v40, %v1804_v45 }
 0x413   : > { %2125 = vst [vmem:[%s4661_s4 + $0x1e8] sm:$0xff] %v2061_v30 }
 0x414   : > { %2126 = vst [vmem:[%s4661_s4 + $0x1f0] sm:$0xff] %v2062_v15  ;;  %vm1935_vm3 = vcmp.gt.f32.partialorder %v1871_v17, 0.0  ;;  %v1999_v48 = vmul.f32 0.2, %v1871_v17 }
 0x416   : > { %v2063_v46 = vsel %vm1935_vm3, %v1871_v17, %v1999_v48 }
 0x417   : > { %2127 = vst [vmem:[%s4661_s4 + $0x1f8] sm:$0xff] %v2063_v46 }
 0x418 PF: > { %p11_p11 = scmp.ge.s32.totalorder %s2323_s19, 6   ;;  %s4773_s15 = smov %s2271_s16 }
 0x419   : > { %s4774_s16 = smov %s2332_s22  ;;  %s4775_s17 = smov %s2323_s19 }
 0x41a   :  { %13 = sbr.rel (!%p11_p11) target bundleno = 2 (0x2), region = 101 }

// kernel: discriminator_forward.6
= control target key start
LH: loop header
LB: loop body
LE: loop exit
PB: predicated region body
PF: predicated region fallthrough
CT: control target
= control target key end

     0   :  { %s1378_s15 = smov 0   ;;  %s1380_s16 = smov 0   ;;  %s2522_s0 = inlined_call_operand.vmem [shape: f32[128,2048], index: 0, kind: input, shape index: {}]   ;;  %s2523_s1 = inlined_call_operand.vmem [shape: f32[2048,256], index: 1, kind: input, shape index: {}]   ;;  %s2524_s2 = inlined_call_operand.vmem [shape: f32[1,256], index: 2, kind: input, shape index: {}]   ;;  %s2525_s3 = inlined_call_operand.vmem [shape: f32[1,256], index: 3, kind: input, shape index: {}]   ;;  %s2526_s4 = inlined_call_operand.vmem [shape: f32[128,256], index: 4, kind: output, shape index: {}]  }
   0x1   :  { %s1382_s17 = smov 0  }
   0x2 LB: > { %s1394_s18 = sadd.s32 4294967295, %s1349_s17   ;;  %s1397_s19 = sadd.s32 1, %s1349_s17   ;;  %s1349_s17 = sphi %s1382_s17, %s2531_s17   ;;  %s1345_s16 = sphi %s1380_s16, %s2530_s16   ;;  %s1341_s15 = sphi %s1378_s15, %s2529_s15  }
   0x3   : > { %s18_s20 = ssub.s32 %s1349_s17, %s1397_s19  ;;  %s21_s21 = sadd.s32 1, %s1345_s16 }
   0x4   : > { %p19_p0 = scmp.eq.s32.totalorder %s18_s20, 0  ;;  %p28_p1 = scmp.ne.s32.totalorder %s1345_s16, %s1341_s15 }
   0x5   : > { %p29_p2 = scmp.eq.s32.totalorder %s1349_s17, 0  ;;  %p1280_p4 = scmp.ge.s32.totalorder %s1349_s17, 8 }
   0x6   : > { %s1406_s22 = scalar_select %p19_p0, %s1345_s16, %s21_s21  }
   0x7   : > { %p30_p3 = por %p29_p2, %p28_p1  ;;  %149 = sbr.rel (%p1280_p4) target bundleno = 48 (0x30), region = 24 }
   0xc   : > { %152 = sbr.rel (!%p30_p3) target bundleno = 48 (0x30), region = 28  ;;  %s154_s23 = sand.u32 (%p30_p3), 1, %s1345_s16  }
   0xd   : > { %s1293_s24 = sshll.u32 (%p30_p3), %s1349_s17, 4  ;;  %s1281_s25 = sshll.u32 (%p30_p3), %s154_s23, 8 }
   0xe   : > { %s1414_s28 = scalar_lea.vmem (%p30_p3), %s2522_s0, %s1293_s24  ;;  %s1419_s29 = scalar_lea.vmem (%p30_p3), [#allocation2], %s1281_s25 }
   0xf   : > { %v172_v0 = vld [vmem:[%s1414_s28] sm:$0xff] (%p30_p3)  ;;  %v174_v1 = vld [vmem:[%s1414_s28 + $0x8] sm:$0xff] (%p30_p3) }
  0x10   : > { %v176_v2 = vld [vmem:[%s1414_s28 + $0x80] sm:$0xff] (%p30_p3)  ;;  %173 = vst [vmem:[%s1419_s29] sm:$0xff] (%p30_p3), %v172_v0  ;;  %v178_v3 = vld [vmem:[%s1414_s28 + $0x88] sm:$0xff] (%p30_p3) }
  0x11   : > { %175 = vst [vmem:[%s1419_s29 + $0x8] sm:$0xff] %v174_v1  ;;  %v180_v4 = vld [vmem:[%s1414_s28 + $0x100] sm:$0xff]  ;;  %v182_v5 = vld [vmem:[%s1414_s28 + $0x108] sm:$0xff] }
  0x12   : > { %177 = vst [vmem:[%s1419_s29 + $0x10] sm:$0xff] %v176_v2  ;;  %v184_v6 = vld [vmem:[%s1414_s28 + $0x180] sm:$0xff]  ;;  %v186_v7 = vld [vmem:[%s1414_s28 + $0x188] sm:$0xff] }
  0x13   : > { %179 = vst [vmem:[%s1419_s29 + $0x18] sm:$0xff] %v178_v3  ;;  %v188_v8 = vld [vmem:[%s1414_s28 + $0x200] sm:$0xff]  ;;  %v190_v9 = vld [vmem:[%s1414_s28 + $0x208] sm:$0xff] }
  0x14   : > { %181 = vst [vmem:[%s1419_s29 + $0x20] sm:$0xff] %v180_v4  ;;  %v192_v10 = vld [vmem:[%s1414_s28 + $0x280] sm:$0xff]  ;;  %v194_v11 = vld [vmem:[%s1414_s28 + $0x288] sm:$0xff] }
  0x15   : > { %183 = vst [vmem:[%s1419_s29 + $0x28] sm:$0xff] %v182_v5  ;;  %v196_v12 = vld [vmem:[%s1414_s28 + $0x300] sm:$0xff]  ;;  %v198_v13 = vld [vmem:[%s1414_s28 + $0x308] sm:$0xff] }
  0x16   : > { %185 = vst [vmem:[%s1419_s29 + $0x30] sm:$0xff] %v184_v6  ;;  %v200_v14 = vld [vmem:[%s1414_s28 + $0x380] sm:$0xff]  ;;  %v202_v15 = vld [vmem:[%s1414_s28 + $0x388] sm:$0xff] }
  0x17   : > { %187 = vst [vmem:[%s1419_s29 + $0x38] sm:$0xff] %v186_v7  ;;  %v204_v16 = vld [vmem:[%s1414_s28 + $0x400] sm:$0xff]  ;;  %v206_v17 = vld [vmem:[%s1414_s28 + $0x408] sm:$0xff] }
  0x18   : > { %189 = vst [vmem:[%s1419_s29 + $0x40] sm:$0xff] %v188_v8  ;;  %v208_v18 = vld [vmem:[%s1414_s28 + $0x480] sm:$0xff]  ;;  %v210_v19 = vld [vmem:[%s1414_s28 + $0x488] sm:$0xff] }
  0x19   : > { %191 = vst [vmem:[%s1419_s29 + $0x48] sm:$0xff] %v190_v9  ;;  %v212_v20 = vld [vmem:[%s1414_s28 + $0x500] sm:$0xff]  ;;  %v214_v21 = vld [vmem:[%s1414_s28 + $0x508] sm:$0xff] }
  0x1a   : > { %193 = vst [vmem:[%s1419_s29 + $0x50] sm:$0xff] %v192_v10  ;;  %v216_v22 = vld [vmem:[%s1414_s28 + $0x580] sm:$0xff]  ;;  %v218_v23 = vld [vmem:[%s1414_s28 + $0x588] sm:$0xff] }
  0x1b   : > { %195 = vst [vmem:[%s1419_s29 + $0x58] sm:$0xff] %v194_v11  ;;  %v220_v24 = vld [vmem:[%s1414_s28 + $0x600] sm:$0xff]  ;;  %v222_v25 = vld [vmem:[%s1414_s28 + $0x608] sm:$0xff] }
  0x1c   : > { %197 = vst [vmem:[%s1419_s29 + $0x60] sm:$0xff] %v196_v12  ;;  %v224_v26 = vld [vmem:[%s1414_s28 + $0x680] sm:$0xff]  ;;  %v226_v27 = vld [vmem:[%s1414_s28 + $0x688] sm:$0xff] }
  0x1d   : > { %199 = vst [vmem:[%s1419_s29 + $0x68] sm:$0xff] %v198_v13  ;;  %v228_v28 = vld [vmem:[%s1414_s28 + $0x700] sm:$0xff]  ;;  %v230_v29 = vld [vmem:[%s1414_s28 + $0x708] sm:$0xff] }
  0x1e   : > { %201 = vst [vmem:[%s1419_s29 + $0x70] sm:$0xff] %v200_v14  ;;  %v232_v30 = vld [vmem:[%s1414_s28 + $0x780] sm:$0xff]  ;;  %v234_v31 = vld [vmem:[%s1414_s28 + $0x788] sm:$0xff] }
  0x1f   : > { %203 = vst [vmem:[%s1419_s29 + $0x78] sm:$0xff] %v202_v15 }
  0x20   : > { %205 = vst [vmem:[%s1419_s29 + $0x80] sm:$0xff] %v204_v16 }
  0x21   : > { %207 = vst [vmem:[%s1419_s29 + $0x88] sm:$0xff] %v206_v17 }
  0x22   : > { %209 = vst [vmem:[%s1419_s29 + $0x90] sm:$0xff] %v208_v18 }
  0x23   : > { %211 = vst [vmem:[%s1419_s29 + $0x98] sm:$0xff] %v210_v19 }
  0x24   : > { %213 = vst [vmem:[%s1419_s29 + $0xa0] sm:$0xff] %v212_v20 }
  0x25   : > { %215 = vst [vmem:[%s1419_s29 + $0xa8] sm:$0xff] %v214_v21 }
  0x26   : > { %217 = vst [vmem:[%s1419_s29 + $0xb0] sm:$0xff] %v216_v22 }
  0x27   : > { %219 = vst [vmem:[%s1419_s29 + $0xb8] sm:$0xff] %v218_v23 }
  0x28   : > { %221 = vst [vmem:[%s1419_s29 + $0xc0] sm:$0xff] %v220_v24 }
  0x29   : > { %223 = vst [vmem:[%s1419_s29 + $0xc8] sm:$0xff] %v222_v25 }
  0x2a   : > { %225 = vst [vmem:[%s1419_s29 + $0xd0] sm:$0xff] %v224_v26 }
  0x2b   : > { %227 = vst [vmem:[%s1419_s29 + $0xd8] sm:$0xff] %v226_v27 }
  0x2c   : > { %229 = vst [vmem:[%s1419_s29 + $0xe0] sm:$0xff] %v228_v28 }
  0x2d   : > { %231 = vst [vmem:[%s1419_s29 + $0xe8] sm:$0xff] %v230_v29 }
  0x2e   : > { %233 = vst [vmem:[%s1419_s29 + $0xf0] sm:$0xff] %v232_v30 }
  0x2f   : > { %235 = vst [vmem:[%s1419_s29 + $0xf8] sm:$0xff] %v234_v31 }
  0x30 PF: > { %p1284_p5 = scmp.ge.s32.totalorder %s1349_s17, 1  ;;  %p250_p6 = scmp.lt.s32.totalorder %s1349_s17, 9 }
  0x32   : > { %p251_p7 = pnand %p1284_p5, %p250_p6 }
  0x33   : > { %s257_s30 = sand.u32 (!%p251_p7), 1, %s1341_s15   ;;  %s1286_s5 = sshll.u32 (!%p251_p7), %s1394_s18, 5 }
  0x34   : > { %254 = sbr.rel (%p251_p7) target bundleno = 554 (0x22a), region = 55  ;;  %s1285_s6 = sshll.u32 (!%p251_p7), %s257_s30, 8 }
  0x35   : > { %p285_p8 = scmp.lt.s32.totalorder (!%p251_p7), %s1286_s5, 255  ;;  %s1491_s11 = scalar_lea.vmem (!%p251_p7), [#allocation2], %s1285_s6 }
  0x36   : > { %p1289_p9 = scmp.ne.s32.totalorder (!%p251_p7), %s1394_s18, 0 }
  0x39   : > { %s2533_s5 = smov (!%p285_p8, %s1286_s5), 255  ;;  %294 = sbr.rel (%p1289_p9) target bundleno = 95 (0x5f), region = 63 }
  0x3a   : > { %s1294_s7 = sshll.u32 %s2533_s5, 4 }
  0x3b   : > { %s1489_s10 = scalar_lea.vmem %s2523_s1, %s1294_s7 }
  0x3e   : > { %v1351_v32 = vmov 0.0  }
  0x3f   : > { %295 = vst [vmem:[%s2526_s4] sm:$0xff] %v1351_v32 }
  0x40   : > { %296 = vst [vmem:[%s2526_s4 + $0x8] sm:$0xff] %v1351_v32 }
  0x41   : > { %297 = vst [vmem:[%s2526_s4 + $0x10] sm:$0xff] %v1351_v32 }
  0x42   : > { %298 = vst [vmem:[%s2526_s4 + $0x18] sm:$0xff] %v1351_v32 }
  0x43   : > { %299 = vst [vmem:[%s2526_s4 + $0x20] sm:$0xff] %v1351_v32 }
  0x44   : > { %300 = vst [vmem:[%s2526_s4 + $0x28] sm:$0xff] %v1351_v32 }
  0x45   : > { %301 = vst [vmem:[%s2526_s4 + $0x30] sm:$0xff] %v1351_v32 }
  0x46   : > { %302 = vst [vmem:[%s2526_s4 + $0x38] sm:$0xff] %v1351_v32 }
  0x47   : > { %303 = vst [vmem:[%s2526_s4 + $0x40] sm:$0xff] %v1351_v32 }
  0x48   : > { %304 = vst [vmem:[%s2526_s4 + $0x48] sm:$0xff] %v1351_v32 }
  0x49   : > { %305 = vst [vmem:[%s2526_s4 + $0x50] sm:$0xff] %v1351_v32 }
  0x4a   : > { %306 = vst [vmem:[%s2526_s4 + $0x58] sm:$0xff] %v1351_v32 }
  0x4b   : > { %307 = vst [vmem:[%s2526_s4 + $0x60] sm:$0xff] %v1351_v32 }
  0x4c   : > { %308 = vst [vmem:[%s2526_s4 + $0x68] sm:$0xff] %v1351_v32 }
  0x4d   : > { %309 = vst [vmem:[%s2526_s4 + $0x70] sm:$0xff] %v1351_v32 }
  0x4e   : > { %310 = vst [vmem:[%s2526_s4 + $0x78] sm:$0xff] %v1351_v32 }
  0x4f   : > { %311 = vst [vmem:[%s2526_s4 + $0x80] sm:$0xff] %v1351_v32 }
  0x50   : > { %312 = vst [vmem:[%s2526_s4 + $0x88] sm:$0xff] %v1351_v32 }
  0x51   : > { %313 = vst [vmem:[%s2526_s4 + $0x90] sm:$0xff] %v1351_v32 }
  0x52   : > { %314 = vst [vmem:[%s2526_s4 + $0x98] sm:$0xff] %v1351_v32 }
  0x53   : > { %315 = vst [vmem:[%s2526_s4 + $0xa0] sm:$0xff] %v1351_v32 }
  0x54   : > { %316 = vst [vmem:[%s2526_s4 + $0xa8] sm:$0xff] %v1351_v32 }
  0x55   : > { %317 = vst [vmem:[%s2526_s4 + $0xb0] sm:$0xff] %v1351_v32 }
  0x56   : > { %318 = vst [vmem:[%s2526_s4 + $0xb8] sm:$0xff] %v1351_v32 }
  0x57   : > { %319 = vst [vmem:[%s2526_s4 + $0xc0] sm:$0xff] %v1351_v32 }
  0x58   : > { %320 = vst [vmem:[%s2526_s4 + $0xc8] sm:$0xff] %v1351_v32 }
  0x59   : > { %321 = vst [vmem:[%s2526_s4 + $0xd0] sm:$0xff] %v1351_v32 }
  0x5a   : > { %322 = vst [vmem:[%s2526_s4 + $0xd8] sm:$0xff] %v1351_v32 }
  0x5b   : > { %323 = vst [vmem:[%s2526_s4 + $0xe0] sm:$0xff] %v1351_v32 }
  0x5c   : > { %324 = vst [vmem:[%s2526_s4 + $0xe8] sm:$0xff] %v1351_v32 }
  0x5d   : > { %325 = vst [vmem:[%s2526_s4 + $0xf0] sm:$0xff] %v1351_v32 }
  0x5e   : > { %326 = vst [vmem:[%s2526_s4 + $0xf8] sm:$0xff] %v1351_v32 }
  0x5f PF: > { %v422_v33 = vld [vmem:[%s1489_s10 + $0xf8] sm:$0xff]  ;;  %v420_v35 = vld [vmem:[%s1489_s10 + $0xe8] sm:$0xff]  ;;  %v421_v39 = vld [vmem:[%s1489_s10 + $0xf0] sm:$0xff]  ;;  %p1290_p10 = scmp.ne.s32.totalorder %s1394_s18, 7 }
  0x60   : > { %v454_v34 = vld [vmem:[%s1489_s10 + $0x1f8] sm:$0xff]  ;;  %585 = vmatpush.msra.mxu2 %v422_v33  ;;  %v452_v36 = vld [vmem:[%s1489_s10 + $0x1e8] sm:$0xff]  ;;  %v453_v40 = vld [vmem:[%s1489_s10 + $0x1f0] sm:$0xff]  ;;  %455 = vmatpush.msra.mxu0 %v421_v39 }
  0x61   : > { %650 = vmatpush.msra.mxu3 %v454_v34  ;;  %v418_v37 = vld [vmem:[%s1489_s10 + $0xd8] sm:$0xff]  ;;  %v419_v41 = vld [vmem:[%s1489_s10 + $0xe0] sm:$0xff]  ;;  %520 = vmatpush.msra.mxu1 %v453_v40  ;;  %v416_v43 = vld [vmem:[%s1489_s10 + $0xc8] sm:$0xff] }
  0x62   : > { %v450_v38 = vld [vmem:[%s1489_s10 + $0x1d8] sm:$0xff]  ;;  %586 = vmatpush.msra.mxu2 %v420_v35  ;;  %v451_v42 = vld [vmem:[%s1489_s10 + $0x1e0] sm:$0xff]  ;;  %v448_v44 = vld [vmem:[%s1489_s10 + $0x1c8] sm:$0xff]  ;;  %456 = vmatpush.msra.mxu0 %v419_v41 }
  0x63   : > { %651 = vmatpush.msra.mxu3 %v452_v36  ;;  %v417_v45 = vld [vmem:[%s1489_s10 + $0xd0] sm:$0xff]  ;;  %521 = vmatpush.msra.mxu1 %v451_v42  ;;  %v414_v47 = vld [vmem:[%s1489_s10 + $0xb8] sm:$0xff]  ;;  %v415_v49 = vld [vmem:[%s1489_s10 + $0xc0] sm:$0xff] }
  0x64   : > { %587 = vmatpush.msra.mxu2 %v418_v37  ;;  %v449_v46 = vld [vmem:[%s1489_s10 + $0x1d0] sm:$0xff]  ;;  %v446_v48 = vld [vmem:[%s1489_s10 + $0x1b8] sm:$0xff]  ;;  %v447_v50 = vld [vmem:[%s1489_s10 + $0x1c0] sm:$0xff]  ;;  %457 = vmatpush.msra.mxu0 %v417_v45 }
  0x65   : > { %652 = vmatpush.msra.mxu3 %v450_v38  ;;  %522 = vmatpush.msra.mxu1 %v449_v46  ;;  %v412_v51 = vld [vmem:[%s1489_s10 + $0xa8] sm:$0xff]  ;;  %v413_v53 = vld [vmem:[%s1489_s10 + $0xb0] sm:$0xff]  ;;  %v410_v55 = vld [vmem:[%s1489_s10 + $0x98] sm:$0xff] }
  0x66   : > { %588 = vmatpush.msra.mxu2 %v416_v43  ;;  %v444_v52 = vld [vmem:[%s1489_s10 + $0x1a8] sm:$0xff]  ;;  %v445_v54 = vld [vmem:[%s1489_s10 + $0x1b0] sm:$0xff]  ;;  %458 = vmatpush.msra.mxu0 %v415_v49  ;;  %v442_v56 = vld [vmem:[%s1489_s10 + $0x198] sm:$0xff] }
  0x67   : > { %653 = vmatpush.msra.mxu3 %v448_v44  ;;  %523 = vmatpush.msra.mxu1 %v447_v50  ;;  %v411_v57 = vld [vmem:[%s1489_s10 + $0xa0] sm:$0xff]  ;;  %v408_v59 = vld [vmem:[%s1489_s10 + $0x88] sm:$0xff]  ;;  %v409_v61 = vld [vmem:[%s1489_s10 + $0x90] sm:$0xff] }
  0x68   : > { %589 = vmatpush.msra.mxu2 %v414_v47  ;;  %v443_v58 = vld [vmem:[%s1489_s10 + $0x1a0] sm:$0xff]  ;;  %459 = vmatpush.msra.mxu0 %v413_v53  ;;  %v440_v60 = vld [vmem:[%s1489_s10 + $0x188] sm:$0xff]  ;;  %v441_v62 = vld [vmem:[%s1489_s10 + $0x190] sm:$0xff] }
  0x69   : > { %654 = vmatpush.msra.mxu3 %v446_v48  ;;  %524 = vmatpush.msra.mxu1 %v445_v54  ;;  %v406_v63 = vld [vmem:[%s1489_s10 + $0x78] sm:$0xff]  ;;  %v407_v1 = vld [vmem:[%s1489_s10 + $0x80] sm:$0xff]  ;;  %v404_v3 = vld [vmem:[%s1489_s10 + $0x68] sm:$0xff] }
  0x6a   : > { %590 = vmatpush.msra.mxu2 %v412_v51  ;;  %460 = vmatpush.msra.mxu0 %v411_v57  ;;  %v438_v0 = vld [vmem:[%s1489_s10 + $0x178] sm:$0xff]  ;;  %v439_v2 = vld [vmem:[%s1489_s10 + $0x180] sm:$0xff]  ;;  %v436_v4 = vld [vmem:[%s1489_s10 + $0x168] sm:$0xff] }
  0x6b   : > { %655 = vmatpush.msra.mxu3 %v444_v52  ;;  %525 = vmatpush.msra.mxu1 %v443_v58  ;;  %v405_v5 = vld [vmem:[%s1489_s10 + $0x70] sm:$0xff]  ;;  %v402_v7 = vld [vmem:[%s1489_s10 + $0x58] sm:$0xff]  ;;  %v403_v9 = vld [vmem:[%s1489_s10 + $0x60] sm:$0xff] }
  0x6c   : > { %591 = vmatpush.msra.mxu2 %v410_v55  ;;  %461 = vmatpush.msra.mxu0 %v409_v61  ;;  %v437_v6 = vld [vmem:[%s1489_s10 + $0x170] sm:$0xff]  ;;  %v434_v8 = vld [vmem:[%s1489_s10 + $0x158] sm:$0xff]  ;;  %v435_v10 = vld [vmem:[%s1489_s10 + $0x160] sm:$0xff] }
  0x6d   : > { %656 = vmatpush.msra.mxu3 %v442_v56  ;;  %526 = vmatpush.msra.mxu1 %v441_v62  ;;  %v400_v11 = vld [vmem:[%s1489_s10 + $0x48] sm:$0xff]  ;;  %v401_v13 = vld [vmem:[%s1489_s10 + $0x50] sm:$0xff]  ;;  %v398_v15 = vld [vmem:[%s1489_s10 + $0x38] sm:$0xff] }
  0x6e   : > { %592 = vmatpush.msra.mxu2 %v408_v59  ;;  %462 = vmatpush.msra.mxu0 %v407_v1  ;;  %v432_v12 = vld [vmem:[%s1489_s10 + $0x148] sm:$0xff]  ;;  %v433_v14 = vld [vmem:[%s1489_s10 + $0x150] sm:$0xff]  ;;  %v430_v16 = vld [vmem:[%s1489_s10 + $0x138] sm:$0xff] }
  0x6f   : > { %657 = vmatpush.msra.mxu3 %v440_v60  ;;  %527 = vmatpush.msra.mxu1 %v439_v2  ;;  %v399_v17 = vld [vmem:[%s1489_s10 + $0x40] sm:$0xff]  ;;  %v396_v19 = vld [vmem:[%s1489_s10 + $0x28] sm:$0xff]  ;;  %v397_v21 = vld [vmem:[%s1489_s10 + $0x30] sm:$0xff] }
  0x70   : > { %593 = vmatpush.msra.mxu2 %v406_v63  ;;  %463 = vmatpush.msra.mxu0 %v405_v5  ;;  %v431_v18 = vld [vmem:[%s1489_s10 + $0x140] sm:$0xff]  ;;  %v428_v20 = vld [vmem:[%s1489_s10 + $0x128] sm:$0xff]  ;;  %v429_v22 = vld [vmem:[%s1489_s10 + $0x130] sm:$0xff] }
  0x71   : > { %658 = vmatpush.msra.mxu3 %v438_v0  ;;  %528 = vmatpush.msra.mxu1 %v437_v6  ;;  %v394_v23 = vld [vmem:[%s1489_s10 + $0x18] sm:$0xff]  ;;  %v395_v25 = vld [vmem:[%s1489_s10 + $0x20] sm:$0xff]  ;;  %v392_v27 = vld [vmem:[%s1489_s10 + $0x8] sm:$0xff] }
  0x72   : > { %594 = vmatpush.msra.mxu2 %v404_v3  ;;  %464 = vmatpush.msra.mxu0 %v403_v9  ;;  %v426_v24 = vld [vmem:[%s1489_s10 + $0x118] sm:$0xff]  ;;  %v427_v26 = vld [vmem:[%s1489_s10 + $0x120] sm:$0xff]  ;;  %v424_v28 = vld [vmem:[%s1489_s10 + $0x108] sm:$0xff] }
  0x73   : > { %659 = vmatpush.msra.mxu3 %v436_v4  ;;  %529 = vmatpush.msra.mxu1 %v435_v10  ;;  %v359_v29 = vld [vmem:[%s1491_s11] sm:$0xff]  ;;  %v360_v30 = vld [vmem:[%s1491_s11 + $0x8] sm:$0xff]  ;;  %v393_v31 = vld [vmem:[%s1489_s10 + $0x10] sm:$0xff] }
  0x74   : > { %595 = vmatpush.msra.mxu2 %v402_v7  ;;  %465 = vmatpush.msra.mxu0 %v401_v13  ;;  %v425_v32 = vld [vmem:[%s1489_s10 + $0x110] sm:$0xff]  ;;  %v391_v33 = vld [vmem:[%s1489_s10] sm:$0xff]  ;;  %v362_v36 = vld [vmem:[%s1491_s11 + $0x18] sm:$0xff] }
  0x75   : > { %660 = vmatpush.msra.mxu3 %v434_v8  ;;  %530 = vmatpush.msra.mxu1 %v433_v14  ;;  %v423_v34 = vld [vmem:[%s1489_s10 + $0x100] sm:$0xff]  ;;  %v361_v35 = vld [vmem:[%s1491_s11 + $0x10] sm:$0xff]  ;;  %v364_v38 = vld [vmem:[%s1491_s11 + $0x28] sm:$0xff] }
  0x76   : > { %596 = vmatpush.msra.mxu2 %v400_v11  ;;  %466 = vmatpush.msra.mxu0 %v399_v17  ;;  %v363_v37 = vld [vmem:[%s1491_s11 + $0x20] sm:$0xff]  ;;  %v365_v39 = vld [vmem:[%s1491_s11 + $0x30] sm:$0xff]  ;;  %v366_v40 = vld [vmem:[%s1491_s11 + $0x38] sm:$0xff] }
  0x77   : > { %661 = vmatpush.msra.mxu3 %v432_v12  ;;  %531 = vmatpush.msra.mxu1 %v431_v18  ;;  %v367_v41 = vld [vmem:[%s1491_s11 + $0x40] sm:$0xff]  ;;  %v368_v42 = vld [vmem:[%s1491_s11 + $0x48] sm:$0xff]  ;;  %v369_v43 = vld [vmem:[%s1491_s11 + $0x50] sm:$0xff] }
  0x78   : > { %597 = vmatpush.msra.mxu2 %v398_v15  ;;  %467 = vmatpush.msra.mxu0 %v397_v21  ;;  %v370_v44 = vld [vmem:[%s1491_s11 + $0x58] sm:$0xff]  ;;  %v371_v45 = vld [vmem:[%s1491_s11 + $0x60] sm:$0xff]  ;;  %v372_v46 = vld [vmem:[%s1491_s11 + $0x68] sm:$0xff] }
  0x79   : > { %662 = vmatpush.msra.mxu3 %v430_v16  ;;  %532 = vmatpush.msra.mxu1 %v429_v22  ;;  %v373_v47 = vld [vmem:[%s1491_s11 + $0x70] sm:$0xff]  ;;  %v374_v48 = vld [vmem:[%s1491_s11 + $0x78] sm:$0xff]  ;;  %v375_v49 = vld [vmem:[%s1491_s11 + $0x80] sm:$0xff] }
  0x7a   : > { %598 = vmatpush.msra.mxu2 %v396_v19  ;;  %468 = vmatpush.msra.mxu0 %v395_v25  ;;  %v376_v50 = vld [vmem:[%s1491_s11 + $0x88] sm:$0xff]  ;;  %v377_v51 = vld [vmem:[%s1491_s11 + $0x90] sm:$0xff]  ;;  %v378_v52 = vld [vmem:[%s1491_s11 + $0x98] sm:$0xff] }
  0x7b   : > { %663 = vmatpush.msra.mxu3 %v428_v20  ;;  %533 = vmatpush.msra.mxu1 %v427_v26  ;;  %v379_v53 = vld [vmem:[%s1491_s11 + $0xa0] sm:$0xff]  ;;  %v380_v54 = vld [vmem:[%s1491_s11 + $0xa8] sm:$0xff]  ;;  %v381_v55 = vld [vmem:[%s1491_s11 + $0xb0] sm:$0xff] }
  0x7c   : > { %599 = vmatpush.msra.mxu2 %v394_v23  ;;  %469 = vmatpush.msra.mxu0 %v393_v31  ;;  %v382_v56 = vld [vmem:[%s1491_s11 + $0xb8] sm:$0xff]  ;;  %v383_v57 = vld [vmem:[%s1491_s11 + $0xc0] sm:$0xff]  ;;  %v384_v58 = vld [vmem:[%s1491_s11 + $0xc8] sm:$0xff] }
  0x7d   : > { %664 = vmatpush.msra.mxu3 %v426_v24  ;;  %534 = vmatpush.msra.mxu1 %v425_v32  ;;  %v385_v59 = vld [vmem:[%s1491_s11 + $0xd0] sm:$0xff]  ;;  %v386_v60 = vld [vmem:[%s1491_s11 + $0xd8] sm:$0xff]  ;;  %v387_v61 = vld [vmem:[%s1491_s11 + $0xe0] sm:$0xff] }
  0x7e   : > { %600 = vmatpush.msra.mxu2 %v392_v27  ;;  %470 = vmatpush.msra.mxu0 %v391_v33  ;;  %v388_v62 = vld [vmem:[%s1491_s11 + $0xe8] sm:$0xff]  ;;  %v389_v63 = vld [vmem:[%s1491_s11 + $0xf0] sm:$0xff]  ;;  %v390_v0 = vld [vmem:[%s1491_s11 + $0xf8] sm:$0xff] }
  0x7f   : > { %665 = vmatpush.msra.mxu3 %v424_v28  ;;  %601 = vmatmul.f32.vlgmr.msra.gmra.mxu2 %v359_v29  ;;  %v327_v2 = vld [vmem:[%s2526_s4] sm:$0xff]  ;;  %v328_v6 = vld [vmem:[%s2526_s4 + $0x8] sm:$0xff]  ;;  %v329_v12 = vld [vmem:[%s2526_s4 + $0x10] sm:$0xff] }
  0x80   : > { %666 = vmatmul.f32.vlgmr.msra.gmra.mxu3 %v360_v30  ;;  %535 = vmatpush.msra.mxu1 %v423_v34  ;;  %v330_v16 = vld [vmem:[%s2526_s4 + $0x18] sm:$0xff]  ;;  %v331_v22 = vld [vmem:[%s2526_s4 + $0x20] sm:$0xff]  ;;  %v332_v26 = vld [vmem:[%s2526_s4 + $0x28] sm:$0xff] }
  0x81   : > { %471 = vmatmul.f32.vlgmr.msra.gmra.mxu0 %v359_v29  ;;  %536 = vmatmul.f32.vlgmr.msra.gmra.mxu1 %v360_v30  ;;  %v333_v32 = vld [vmem:[%s2526_s4 + $0x30] sm:$0xff] }
  0x87   : > { %604 = vmatmul.f32.gmra.mxu2 %v361_v35 }
  0x88   : > { %669 = vmatmul.f32.gmra.mxu3 %v362_v36 }
  0x89   : > { %474 = vmatmul.f32.gmra.mxu0 %v361_v35  ;;  %539 = vmatmul.f32.gmra.mxu1 %v362_v36  ;;  %v334_v36 = vld [vmem:[%s2526_s4 + $0x38] sm:$0xff] }
  0x8f   : > { %607 = vmatmul.f32.gmra.mxu2 %v363_v37 }
  0x90   : > { %672 = vmatmul.f32.gmra.mxu3 %v364_v38 }
  0x91   : > { %477 = vmatmul.f32.gmra.mxu0 %v363_v37  ;;  %542 = vmatmul.f32.gmra.mxu1 %v364_v38 }
  0x97   : > { %610 = vmatmul.f32.gmra.mxu2 %v365_v39 }
  0x98   : > { %675 = vmatmul.f32.gmra.mxu3 %v366_v40 }
  0x99   : > { %480 = vmatmul.f32.gmra.mxu0 %v365_v39  ;;  %545 = vmatmul.f32.gmra.mxu1 %v366_v40 }
  0x9f   : > { %613 = vmatmul.f32.gmra.mxu2 %v367_v41 }
  0xa0   : > { %678 = vmatmul.f32.gmra.mxu3 %v368_v42 }
  0xa1   : > { %483 = vmatmul.f32.gmra.mxu0 %v367_v41  ;;  %548 = vmatmul.f32.gmra.mxu1 %v368_v42  ;;  %v335_v42 = vld [vmem:[%s2526_s4 + $0x40] sm:$0xff] }
  0xa7   : > { %616 = vmatmul.f32.gmra.mxu2 %v369_v43 }
  0xa8   : > { %681 = vmatmul.f32.gmra.mxu3 %v370_v44 }
  0xa9   : > { %486 = vmatmul.f32.gmra.mxu0 %v369_v43  ;;  %551 = vmatmul.f32.gmra.mxu1 %v370_v44 }
  0xaf   : > { %619 = vmatmul.f32.gmra.mxu2 %v371_v45 }
  0xb0   : > { %684 = vmatmul.f32.gmra.mxu3 %v372_v46 }
  0xb1   : > { %489 = vmatmul.f32.gmra.mxu0 %v371_v45  ;;  %554 = vmatmul.f32.gmra.mxu1 %v372_v46  ;;  %v336_v46 = vld [vmem:[%s2526_s4 + $0x48] sm:$0xff] }
  0xb7   : > { %622 = vmatmul.f32.gmra.mxu2 %v373_v47 }
  0xb8   : > { %687 = vmatmul.f32.gmra.mxu3 %v374_v48 }
  0xb9   : > { %492 = vmatmul.f32.gmra.mxu0 %v373_v47  ;;  %557 = vmatmul.f32.gmra.mxu1 %v374_v48 }
  0xbf   : > { %625 = vmatmul.f32.gmra.mxu2 %v375_v49 }
  0xc0   : > { %690 = vmatmul.f32.gmra.mxu3 %v376_v50 }
  0xc1   : > { %495 = vmatmul.f32.gmra.mxu0 %v375_v49  ;;  %560 = vmatmul.f32.gmra.mxu1 %v376_v50 }
  0xc7   : > { %628 = vmatmul.f32.gmra.mxu2 %v377_v51 }
  0xc8   : > { %693 = vmatmul.f32.gmra.mxu3 %v378_v52 }
  0xc9   : > { %498 = vmatmul.f32.gmra.mxu0 %v377_v51  ;;  %563 = vmatmul.f32.gmra.mxu1 %v378_v52  ;;  %v337_v52 = vld [vmem:[%s2526_s4 + $0x50] sm:$0xff] }
  0xcf   : > { %631 = vmatmul.f32.gmra.mxu2 %v379_v53 }
  0xd0   : > { %696 = vmatmul.f32.gmra.mxu3 %v380_v54 }
  0xd1   : > { %501 = vmatmul.f32.gmra.mxu0 %v379_v53  ;;  %566 = vmatmul.f32.gmra.mxu1 %v380_v54 }
  0xd7   : > { %634 = vmatmul.f32.gmra.mxu2 %v381_v55 }
  0xd8   : > { %699 = vmatmul.f32.gmra.mxu3 %v382_v56 }
  0xd9   : > { %504 = vmatmul.f32.gmra.mxu0 %v381_v55  ;;  %569 = vmatmul.f32.gmra.mxu1 %v382_v56  ;;  %v338_v56 = vld [vmem:[%s2526_s4 + $0x58] sm:$0xff] }
  0xdf   : > { %637 = vmatmul.f32.gmra.mxu2 %v383_v57 }
  0xe0   : > { %702 = vmatmul.f32.gmra.mxu3 %v384_v58 }
  0xe1   : > { %507 = vmatmul.f32.gmra.mxu0 %v383_v57  ;;  %572 = vmatmul.f32.gmra.mxu1 %v384_v58 }
  0xe7   : > { %640 = vmatmul.f32.gmra.mxu2 %v385_v59 }
  0xe8   : > { %705 = vmatmul.f32.gmra.mxu3 %v386_v60 }
  0xe9   : > { %510 = vmatmul.f32.gmra.mxu0 %v385_v59  ;;  %575 = vmatmul.f32.gmra.mxu1 %v386_v60 }
  0xef   : > { %643 = vmatmul.f32.gmra.mxu2 %v387_v61 }
  0xf0   : > { %708 = vmatmul.f32.gmra.mxu3 %v388_v62 }
  0xf1   : > { %513 = vmatmul.f32.gmra.mxu0 %v387_v61  ;;  %578 = vmatmul.f32.gmra.mxu1 %v388_v62  ;;  %v339_v62 = vld [vmem:[%s2526_s4 + $0x60] sm:$0xff] }
  0xf7   : > { %646 = vmatmul.f32.gmra.mxu2 %v389_v63 }
  0xf8   : > { %711 = vmatmul.f32.gmra.mxu3 %v390_v0 }
  0xf9   : > { %516 = vmatmul.f32.gmra.mxu0 %v389_v63  ;;  %581 = vmatmul.f32.gmra.mxu1 %v390_v0 }
  0xfe   : > { %v472_v1 = vpop.f32.mrf.mxu0  ;;  %v537_v3 = vpop.f32.mrf.mxu1 }
  0xff   : > { %v538_v4 = vadd.f32 %v537_v3, %v472_v1 }
 0x101   : > { %v715_v8 = vadd.f32 %v538_v4, %v327_v2  ;;  %v340_v2 = vld [vmem:[%s2526_s4 + $0x68] sm:$0xff] }
 0x102   : > { %v602_v5 = vpop.f32.mrf.mxu2 }
 0x103   : > { %v667_v7 = vpop.f32.mrf.mxu3  ;;  %747 = vst [vmem:[%s2526_s4] sm:$0xff] %v715_v8  ;;  %v341_v8 = vld [vmem:[%s2526_s4 + $0x70] sm:$0xff] }
 0x104   : > { %v668_v9 = vadd.f32 %v667_v7, %v602_v5 }
 0x106   : > { %v716_v10 = vadd.f32 %v668_v9, %v328_v6  ;;  %v475_v11 = vpop.f32.mrf.mxu0  ;;  %v540_v13 = vpop.f32.mrf.mxu1 }
 0x107   : > { %v541_v14 = vadd.f32 %v540_v13, %v475_v11 }
 0x108   : > { %748 = vst [vmem:[%s2526_s4 + $0x8] sm:$0xff] %v716_v10 }
 0x109   : > { %v717_v18 = vadd.f32 %v541_v14, %v329_v12  ;;  %v342_v12 = vld [vmem:[%s2526_s4 + $0x78] sm:$0xff] }
 0x10a   : > { %v605_v15 = vpop.f32.mrf.mxu2 }
 0x10b   : > { %v670_v17 = vpop.f32.mrf.mxu3  ;;  %749 = vst [vmem:[%s2526_s4 + $0x10] sm:$0xff] %v717_v18  ;;  %v343_v18 = vld [vmem:[%s2526_s4 + $0x80] sm:$0xff] }
 0x10c   : > { %v671_v19 = vadd.f32 %v670_v17, %v605_v15 }
 0x10e   : > { %v718_v20 = vadd.f32 %v671_v19, %v330_v16  ;;  %v478_v21 = vpop.f32.mrf.mxu0  ;;  %v543_v23 = vpop.f32.mrf.mxu1 }
 0x10f   : > { %v544_v24 = vadd.f32 %v543_v23, %v478_v21 }
 0x110   : > { %750 = vst [vmem:[%s2526_s4 + $0x18] sm:$0xff] %v718_v20 }
 0x111   : > { %v719_v28 = vadd.f32 %v544_v24, %v331_v22  ;;  %v344_v22 = vld [vmem:[%s2526_s4 + $0x88] sm:$0xff] }
 0x112   : > { %v608_v25 = vpop.f32.mrf.mxu2 }
 0x113   : > { %v673_v27 = vpop.f32.mrf.mxu3  ;;  %751 = vst [vmem:[%s2526_s4 + $0x20] sm:$0xff] %v719_v28  ;;  %v345_v28 = vld [vmem:[%s2526_s4 + $0x90] sm:$0xff] }
 0x114   : > { %v674_v29 = vadd.f32 %v673_v27, %v608_v25 }
 0x116   : > { %v720_v30 = vadd.f32 %v674_v29, %v332_v26  ;;  %v481_v31 = vpop.f32.mrf.mxu0  ;;  %v546_v33 = vpop.f32.mrf.mxu1 }
 0x117   : > { %v547_v34 = vadd.f32 %v546_v33, %v481_v31 }
 0x118   : > { %752 = vst [vmem:[%s2526_s4 + $0x28] sm:$0xff] %v720_v30 }
 0x119   : > { %v721_v38 = vadd.f32 %v547_v34, %v333_v32  ;;  %v346_v32 = vld [vmem:[%s2526_s4 + $0x98] sm:$0xff] }
 0x11a   : > { %v611_v35 = vpop.f32.mrf.mxu2 }
 0x11b   : > { %v676_v37 = vpop.f32.mrf.mxu3  ;;  %753 = vst [vmem:[%s2526_s4 + $0x30] sm:$0xff] %v721_v38  ;;  %v347_v38 = vld [vmem:[%s2526_s4 + $0xa0] sm:$0xff] }
 0x11c   : > { %v677_v39 = vadd.f32 %v676_v37, %v611_v35 }
 0x11e   : > { %v722_v40 = vadd.f32 %v677_v39, %v334_v36  ;;  %v484_v41 = vpop.f32.mrf.mxu0  ;;  %v549_v43 = vpop.f32.mrf.mxu1 }
 0x11f   : > { %v550_v44 = vadd.f32 %v549_v43, %v484_v41 }
 0x120   : > { %754 = vst [vmem:[%s2526_s4 + $0x38] sm:$0xff] %v722_v40 }
 0x121   : > { %v723_v48 = vadd.f32 %v550_v44, %v335_v42  ;;  %v348_v42 = vld [vmem:[%s2526_s4 + $0xa8] sm:$0xff] }
 0x122   : > { %v614_v45 = vpop.f32.mrf.mxu2 }
 0x123   : > { %v679_v47 = vpop.f32.mrf.mxu3  ;;  %755 = vst [vmem:[%s2526_s4 + $0x40] sm:$0xff] %v723_v48  ;;  %v349_v48 = vld [vmem:[%s2526_s4 + $0xb0] sm:$0xff] }
 0x124   : > { %v680_v49 = vadd.f32 %v679_v47, %v614_v45 }
 0x126   : > { %v724_v50 = vadd.f32 %v680_v49, %v336_v46  ;;  %v487_v51 = vpop.f32.mrf.mxu0  ;;  %v552_v53 = vpop.f32.mrf.mxu1 }
 0x127   : > { %v553_v54 = vadd.f32 %v552_v53, %v487_v51 }
 0x128   : > { %756 = vst [vmem:[%s2526_s4 + $0x48] sm:$0xff] %v724_v50 }
 0x129   : > { %v725_v58 = vadd.f32 %v553_v54, %v337_v52  ;;  %v350_v52 = vld [vmem:[%s2526_s4 + $0xb8] sm:$0xff] }
 0x12a   : > { %v617_v55 = vpop.f32.mrf.mxu2 }
 0x12b   : > { %v682_v57 = vpop.f32.mrf.mxu3  ;;  %757 = vst [vmem:[%s2526_s4 + $0x50] sm:$0xff] %v725_v58  ;;  %v351_v58 = vld [vmem:[%s2526_s4 + $0xc0] sm:$0xff] }
 0x12c   : > { %v683_v59 = vadd.f32 %v682_v57, %v617_v55 }
 0x12e   : > { %v726_v60 = vadd.f32 %v683_v59, %v338_v56  ;;  %v490_v61 = vpop.f32.mrf.mxu0  ;;  %v555_v63 = vpop.f32.mrf.mxu1 }
 0x12f   : > { %v556_v0 = vadd.f32 %v555_v63, %v490_v61 }
 0x130   : > { %758 = vst [vmem:[%s2526_s4 + $0x58] sm:$0xff] %v726_v60 }
 0x131   : > { %v727_v4 = vadd.f32 %v556_v0, %v339_v62  ;;  %v352_v62 = vld [vmem:[%s2526_s4 + $0xc8] sm:$0xff] }
 0x132   : > { %v620_v1 = vpop.f32.mrf.mxu2 }
 0x133   : > { %v685_v3 = vpop.f32.mrf.mxu3  ;;  %759 = vst [vmem:[%s2526_s4 + $0x60] sm:$0xff] %v727_v4  ;;  %v353_v4 = vld [vmem:[%s2526_s4 + $0xd0] sm:$0xff] }
 0x134   : > { %v686_v5 = vadd.f32 %v685_v3, %v620_v1 }
 0x136   : > { %v728_v6 = vadd.f32 %v686_v5, %v340_v2  ;;  %v493_v7 = vpop.f32.mrf.mxu0  ;;  %v558_v9 = vpop.f32.mrf.mxu1 }
 0x137   : > { %v559_v10 = vadd.f32 %v558_v9, %v493_v7 }
 0x138   : > { %760 = vst [vmem:[%s2526_s4 + $0x68] sm:$0xff] %v728_v6 }
 0x139   : > { %v729_v14 = vadd.f32 %v559_v10, %v341_v8  ;;  %v354_v8 = vld [vmem:[%s2526_s4 + $0xd8] sm:$0xff] }
 0x13a   : > { %v623_v11 = vpop.f32.mrf.mxu2 }
 0x13b   : > { %v688_v13 = vpop.f32.mrf.mxu3  ;;  %761 = vst [vmem:[%s2526_s4 + $0x70] sm:$0xff] %v729_v14  ;;  %v355_v14 = vld [vmem:[%s2526_s4 + $0xe0] sm:$0xff] }
 0x13c   : > { %v689_v15 = vadd.f32 %v688_v13, %v623_v11 }
 0x13e   : > { %v730_v16 = vadd.f32 %v689_v15, %v342_v12  ;;  %v496_v17 = vpop.f32.mrf.mxu0  ;;  %v561_v19 = vpop.f32.mrf.mxu1 }
 0x13f   : > { %v562_v20 = vadd.f32 %v561_v19, %v496_v17 }
 0x140   : > { %762 = vst [vmem:[%s2526_s4 + $0x78] sm:$0xff] %v730_v16 }
 0x141   : > { %v731_v24 = vadd.f32 %v562_v20, %v343_v18  ;;  %v356_v18 = vld [vmem:[%s2526_s4 + $0xe8] sm:$0xff] }
 0x142   : > { %v626_v21 = vpop.f32.mrf.mxu2 }
 0x143   : > { %v691_v23 = vpop.f32.mrf.mxu3  ;;  %763 = vst [vmem:[%s2526_s4 + $0x80] sm:$0xff] %v731_v24  ;;  %v357_v24 = vld [vmem:[%s2526_s4 + $0xf0] sm:$0xff] }
 0x144   : > { %v692_v25 = vadd.f32 %v691_v23, %v626_v21 }
 0x146   : > { %v732_v26 = vadd.f32 %v692_v25, %v344_v22  ;;  %v499_v27 = vpop.f32.mrf.mxu0  ;;  %v564_v29 = vpop.f32.mrf.mxu1 }
 0x147   : > { %v565_v30 = vadd.f32 %v564_v29, %v499_v27 }
 0x148   : > { %764 = vst [vmem:[%s2526_s4 + $0x88] sm:$0xff] %v732_v26 }
 0x149   : > { %v733_v34 = vadd.f32 %v565_v30, %v345_v28  ;;  %v358_v28 = vld [vmem:[%s2526_s4 + $0xf8] sm:$0xff] }
 0x14a   : > { %v629_v31 = vpop.f32.mrf.mxu2 }
 0x14b   : > { %v694_v33 = vpop.f32.mrf.mxu3  ;;  %765 = vst [vmem:[%s2526_s4 + $0x90] sm:$0xff] %v733_v34 }
 0x14c   : > { %v695_v35 = vadd.f32 %v694_v33, %v629_v31 }
 0x14e   : > { %v734_v36 = vadd.f32 %v695_v35, %v346_v32  ;;  %v502_v37 = vpop.f32.mrf.mxu0  ;;  %v567_v39 = vpop.f32.mrf.mxu1 }
 0x14f   : > { %v568_v40 = vadd.f32 %v567_v39, %v502_v37 }
 0x150   : > { %766 = vst [vmem:[%s2526_s4 + $0x98] sm:$0xff] %v734_v36 }
 0x151   : > { %v735_v44 = vadd.f32 %v568_v40, %v347_v38 }
 0x152   : > { %v632_v41 = vpop.f32.mrf.mxu2 }
 0x153   : > { %v697_v43 = vpop.f32.mrf.mxu3  ;;  %767 = vst [vmem:[%s2526_s4 + $0xa0] sm:$0xff] %v735_v44 }
 0x154   : > { %v698_v45 = vadd.f32 %v697_v43, %v632_v41 }
 0x156   : > { %v736_v46 = vadd.f32 %v698_v45, %v348_v42  ;;  %v505_v47 = vpop.f32.mrf.mxu0  ;;  %v570_v49 = vpop.f32.mrf.mxu1 }
 0x157   : > { %v571_v50 = vadd.f32 %v570_v49, %v505_v47 }
 0x158   : > { %768 = vst [vmem:[%s2526_s4 + $0xa8] sm:$0xff] %v736_v46 }
 0x159   : > { %v737_v54 = vadd.f32 %v571_v50, %v349_v48 }
 0x15a   : > { %v635_v51 = vpop.f32.mrf.mxu2 }
 0x15b   : > { %v700_v53 = vpop.f32.mrf.mxu3  ;;  %769 = vst [vmem:[%s2526_s4 + $0xb0] sm:$0xff] %v737_v54 }
 0x15c   : > { %v701_v55 = vadd.f32 %v700_v53, %v635_v51 }
 0x15e   : > { %v738_v56 = vadd.f32 %v701_v55, %v350_v52  ;;  %v508_v57 = vpop.f32.mrf.mxu0  ;;  %v573_v59 = vpop.f32.mrf.mxu1 }
 0x15f   : > { %v574_v60 = vadd.f32 %v573_v59, %v508_v57 }
 0x160   : > { %770 = vst [vmem:[%s2526_s4 + $0xb8] sm:$0xff] %v738_v56 }
 0x161   : > { %v739_v0 = vadd.f32 %v574_v60, %v351_v58 }
 0x162   : > { %v638_v61 = vpop.f32.mrf.mxu2 }
 0x163   : > { %v703_v63 = vpop.f32.mrf.mxu3  ;;  %771 = vst [vmem:[%s2526_s4 + $0xc0] sm:$0xff] %v739_v0 }
 0x164   : > { %v704_v1 = vadd.f32 %v703_v63, %v638_v61 }
 0x166   : > { %v740_v2 = vadd.f32 %v704_v1, %v352_v62  ;;  %v511_v3 = vpop.f32.mrf.mxu0  ;;  %v576_v5 = vpop.f32.mrf.mxu1 }
 0x167   : > { %v577_v6 = vadd.f32 %v576_v5, %v511_v3 }
 0x168   : > { %772 = vst [vmem:[%s2526_s4 + $0xc8] sm:$0xff] %v740_v2 }
 0x169   : > { %v741_v10 = vadd.f32 %v577_v6, %v353_v4 }
 0x16a   : > { %v641_v7 = vpop.f32.mrf.mxu2 }
 0x16b   : > { %v706_v9 = vpop.f32.mrf.mxu3  ;;  %773 = vst [vmem:[%s2526_s4 + $0xd0] sm:$0xff] %v741_v10 }
 0x16c   : > { %v707_v11 = vadd.f32 %v706_v9, %v641_v7 }
 0x16e   : > { %v742_v12 = vadd.f32 %v707_v11, %v354_v8  ;;  %v514_v13 = vpop.f32.mrf.mxu0  ;;  %v579_v15 = vpop.f32.mrf.mxu1 }
 0x16f   : > { %v580_v16 = vadd.f32 %v579_v15, %v514_v13 }
 0x170   : > { %774 = vst [vmem:[%s2526_s4 + $0xd8] sm:$0xff] %v742_v12 }
 0x171   : > { %v743_v20 = vadd.f32 %v580_v16, %v355_v14 }
 0x172   : > { %v644_v17 = vpop.f32.mrf.mxu2 }
 0x173   : > { %v709_v19 = vpop.f32.mrf.mxu3  ;;  %775 = vst [vmem:[%s2526_s4 + $0xe0] sm:$0xff] %v743_v20 }
 0x174   : > { %v710_v21 = vadd.f32 %v709_v19, %v644_v17 }
 0x176   : > { %v744_v22 = vadd.f32 %v710_v21, %v356_v18  ;;  %v517_v23 = vpop.f32.mrf.mxu0  ;;  %v582_v25 = vpop.f32.mrf.mxu1 }
 0x177   : > { %v583_v26 = vadd.f32 %v582_v25, %v517_v23 }
 0x178   : > { %776 = vst [vmem:[%s2526_s4 + $0xe8] sm:$0xff] %v744_v22 }
 0x179   : > { %v745_v30 = vadd.f32 %v583_v26, %v357_v24 }
 0x17a   : > { %v647_v27 = vpop.f32.mrf.mxu2 }
 0x17b   : > { %v712_v29 = vpop.f32.mrf.mxu3  ;;  %777 = vst [vmem:[%s2526_s4 + $0xf0] sm:$0xff] %v745_v30 }
 0x17c   : > { %v713_v31 = vadd.f32 %v712_v29, %v647_v27  ;;  %782 = sbr.rel (%p1290_p10) target bundleno = 554 (0x22a), region = 67 }
 0x17e   : > { %v746_v32 = vadd.f32 %v713_v31, %v358_v28 }
 0x180   : > { %778 = vst [vmem:[%s2526_s4 + $0xf8] sm:$0xff] %v746_v32 }
 0x181   : > { %v1882_v33 = vld [vmem:[%s2526_s4] sm:$0xff]  ;;  %v1887_v34 = vld [vmem:[%s2526_s4 + $0x10] sm:$0xff]  ;;  %v1916_v42 = vld [vmem:[%s2526_s4 + $0x8] sm:$0xff]  ;;  %v1352_v62 = vmov 128.0  }
 0x182   : > { %v1892_v35 = vld [vmem:[%s2526_s4 + $0x20] sm:$0xff]  ;;  %v817_v36 = vadd.f32 %v1887_v34, %v1882_v33  ;;  %v1899_v37 = vld [vmem:[%s2526_s4 + $0x30] sm:$0xff]  ;;  %v1921_v43 = vld [vmem:[%s2526_s4 + $0x18] sm:$0xff]  ;;  %1321 = vrcp.f32 %v1352_v62 }
 0x183   : > { %v1905_v39 = vld [vmem:[%s2526_s4 + $0x40] sm:$0xff]  ;;  %v1910_v40 = vld [vmem:[%s2526_s4 + $0x50] sm:$0xff]  ;;  %v1926_v44 = vld [vmem:[%s2526_s4 + $0x28] sm:$0xff]  ;;  %v838_v46 = vadd.f32 %v1921_v43, %v1916_v42 }
 0x184   : > { %v818_v38 = vadd.f32 %v817_v36, %v1892_v35  ;;  %v1934_v47 = vld [vmem:[%s2526_s4 + $0x60] sm:$0xff]  ;;  %v1939_v48 = vld [vmem:[%s2526_s4 + $0x38] sm:$0xff]  ;;  %v1946_v51 = vld [vmem:[%s2526_s4 + $0x70] sm:$0xff] }
 0x185   : > { %v839_v50 = vadd.f32 %v838_v46, %v1926_v44  ;;  %v1951_v52 = vld [vmem:[%s2526_s4 + $0x48] sm:$0xff]  ;;  %v1958_v55 = vld [vmem:[%s2526_s4 + $0x80] sm:$0xff]  ;;  %v1963_v56 = vld [vmem:[%s2526_s4 + $0x58] sm:$0xff] }
 0x186   : > { %v819_v41 = vadd.f32 %v818_v38, %v1899_v37  ;;  %v1970_v59 = vld [vmem:[%s2526_s4 + $0x90] sm:$0xff]  ;;  %v1975_v60 = vld [vmem:[%s2526_s4 + $0x68] sm:$0xff]  ;;  %v1982_v0 = vld [vmem:[%s2526_s4 + $0xa0] sm:$0xff] }
 0x187   : > { %v840_v54 = vadd.f32 %v839_v50, %v1939_v48  ;;  %v1987_v1 = vld [vmem:[%s2526_s4 + $0x78] sm:$0xff]  ;;  %v1994_v4 = vld [vmem:[%s2526_s4 + $0xb0] sm:$0xff]  ;;  %v1999_v5 = vld [vmem:[%s2526_s4 + $0x88] sm:$0xff] }
 0x188   : > { %v820_v45 = vadd.f32 %v819_v41, %v1905_v39  ;;  %v2006_v8 = vld [vmem:[%s2526_s4 + $0xc0] sm:$0xff]  ;;  %v2011_v9 = vld [vmem:[%s2526_s4 + $0x98] sm:$0xff]  ;;  %v1322_v10 = vpop.eup %1321  ;;  %v2018_v13 = vld [vmem:[%s2526_s4 + $0xd0] sm:$0xff] }
 0x189   : > { %v841_v58 = vadd.f32 %v840_v54, %v1951_v52  ;;  %v2023_v14 = vld [vmem:[%s2526_s4 + $0xa8] sm:$0xff]  ;;  %v2030_v17 = vld [vmem:[%s2526_s4 + $0xe0] sm:$0xff]  ;;  %v860_v18 = vmul.f32 128.0, %v1322_v10  ;;  %v2035_v19 = vld [vmem:[%s2526_s4 + $0xb8] sm:$0xff]  ;;  %vm864_vm0 = vweird.f32 %v1322_v10 }
 0x18a   : > { %v821_v49 = vadd.f32 %v820_v45, %v1910_v40  ;;  %v2042_v22 = vld [vmem:[%s2526_s4 + $0xf0] sm:$0xff]  ;;  %v2047_v23 = vld [vmem:[%s2526_s4 + $0xc8] sm:$0xff]  ;;  %v2054_v27 = vld [vmem:[%s2526_s4 + $0xd8] sm:$0xff] }
 0x18b   : > { %v842_v63 = vadd.f32 %v841_v58, %v1963_v56  ;;  %v861_v26 = vsub.f32 1.0, %v860_v18  ;;  %v2061_v30 = vld [vmem:[%s2526_s4 + $0xe8] sm:$0xff]  ;;  %v2067_v38 = vld [vmem:[%s2526_s4 + $0xf8] sm:$0xff] }
 0x18c   : > { %v822_v53 = vadd.f32 %v821_v49, %v1934_v47 }
 0x18d   : > { %v843_v3 = vadd.f32 %v842_v63, %v1975_v60  ;;  %v862_v36 = vmul.f32 %v1322_v10, %v861_v26 }
 0x18e   : > { %v823_v57 = vadd.f32 %v822_v53, %v1946_v51 }
 0x18f   : > { %v844_v7 = vadd.f32 %v843_v3, %v1987_v1  ;;  %v863_v50 = vadd.f32 %v1322_v10, %v862_v36 }
 0x190   : > { %v824_v61 = vadd.f32 %v823_v57, %v1958_v55 }
 0x191   : > { %v845_v12 = vadd.f32 %v844_v7, %v1999_v5  ;;  %v2071_v58 = vsel %vm864_vm0, %v1322_v10, %v863_v50 }
 0x192   : > { %v825_v2 = vadd.f32 %v824_v61, %v1970_v59 }
 0x193   : > { %v846_v16 = vadd.f32 %v845_v12, %v2011_v9 }
 0x194   : > { %v826_v6 = vadd.f32 %v825_v2, %v1982_v0 }
 0x195   : > { %v847_v21 = vadd.f32 %v846_v16, %v2023_v14 }
 0x196   : > { %v827_v11 = vadd.f32 %v826_v6, %v1994_v4 }
 0x197   : > { %v848_v25 = vadd.f32 %v847_v21, %v2035_v19 }
 0x198   : > { %v828_v15 = vadd.f32 %v827_v11, %v2006_v8 }
 0x199   : > { %v849_v29 = vadd.f32 %v848_v25, %v2047_v23 }
 0x19a   : > { %v829_v20 = vadd.f32 %v828_v15, %v2018_v13 }
 0x19b   : > { %v850_v32 = vadd.f32 %v849_v29, %v2054_v27 }
 0x19c   : > { %v830_v24 = vadd.f32 %v829_v20, %v2030_v17 }
 0x19d   : > { %v851_v45 = vadd.f32 %v850_v32, %v2061_v30 }
 0x19e   : > { %v831_v28 = vadd.f32 %v830_v24, %v2042_v22 }
 0x19f   : > { %v852_v49 = vadd.f32 %v851_v45, %v2067_v38 }
 0x1a0   : > { %v832_v31 = vrot.slane %v831_v28, 4 }
 0x1a1   : > { %v853_v54 = vrot.slane %v852_v49, 4 }
 0x1a2   : > { %v833_v41 = vadd.f32 %v832_v31, %v831_v28 }
 0x1a3   : > { %v854_v62 = vadd.f32 %v853_v54, %v852_v49 }
 0x1a4   : > { %v834_v46 = vrot.slane %v833_v41, 2 }
 0x1a5   : > { %v855_v6 = vrot.slane %v854_v62, 2 }
 0x1a6   : > { %v835_v53 = vadd.f32 %v834_v46, %v833_v41 }
 0x1a7   : > { %v856_v15 = vadd.f32 %v855_v6, %v854_v62 }
 0x1a8   : > { %v836_v57 = vrot.slane %v835_v53, 1 }
 0x1a9   : > { %v857_v18 = vrot.slane %v856_v15, 1 }
 0x1aa   : > { %v837_v61 = vadd.f32 %v836_v57, %v835_v53 }
 0x1ac   : > { %v866_v63 = vmul.f32 %v2071_v58, %v837_v61 }
 0x1ae   : > { %v2075_v2 = vsub.f32 %v1882_v33, %v866_v63  ;;  %v2078_v3 = vsub.f32 %v1887_v34, %v866_v63  ;;  %v2081_v7 = vsub.f32 %v1892_v35, %v866_v63  ;;  %v2084_v11 = vsub.f32 %v1899_v37, %v866_v63 }
 0x1af   : > { %v2091_v33 = vsub.f32 %v1905_v39, %v866_v63  ;;  %v2096_v16 = vsub.f32 %v1910_v40, %v866_v63  ;;  %v2101_v20 = vsub.f32 %v1934_v47, %v866_v63  ;;  %v858_v39 = vadd.f32 %v857_v18, %v856_v15 }
 0x1b0   : > { %v900_v10 = vmul.f32 %v2075_v2, %v2075_v2  ;;  %v902_v12 = vmul.f32 %v2078_v3, %v2078_v3  ;;  %v904_v34 = vmul.f32 %v2081_v7, %v2081_v7  ;;  %v906_v35 = vmul.f32 %v2084_v11, %v2084_v11 }
 0x1b1   : > { %v908_v21 = vmul.f32 %v2091_v33, %v2091_v33  ;;  %v2106_v25 = vsub.f32 %v1946_v51, %v866_v63  ;;  %v910_v40 = vmul.f32 %v2096_v16, %v2096_v16  ;;  %v2111_v28 = vmul.f32 %v2071_v58, %v858_v39 }
 0x1b2   : > { %v932_v37 = vadd.f32 %v902_v12, %v900_v10  ;;  %v2114_v29 = vsub.f32 %v1958_v55, %v866_v63  ;;  %v912_v47 = vmul.f32 %v2101_v20, %v2101_v20  ;;  %v2127_v36 = vsub.f32 %v1970_v59, %v866_v63 }
 0x1b3   : > { %v2120_v32 = vsub.f32 %v1916_v42, %v2111_v28  ;;  %v2124_v51 = vsub.f32 %v1921_v43, %v2111_v28  ;;  %v914_v41 = vmul.f32 %v2106_v25, %v2106_v25  ;;  %v2133_v45 = vsub.f32 %v1926_v44, %v2111_v28 }
 0x1b4   : > { %v933_v24 = vadd.f32 %v932_v37, %v904_v34  ;;  %v2136_v46 = vsub.f32 %v1982_v0, %v866_v63  ;;  %v916_v42 = vmul.f32 %v2114_v29, %v2114_v29  ;;  %v2142_v43 = vsub.f32 %v1939_v48, %v2111_v28 }
 0x1b5   : > { %v901_v59 = vmul.f32 %v2120_v32, %v2120_v32  ;;  %v903_v50 = vmul.f32 %v2124_v51, %v2124_v51  ;;  %v2149_v44 = vsub.f32 %v1994_v4, %v866_v63  ;;  %v918_v0 = vmul.f32 %v2127_v36, %v2127_v36 }
 0x1b6   : > { %v934_v26 = vadd.f32 %v933_v24, %v906_v35  ;;  %v2155_v54 = vsub.f32 %v1951_v52, %v2111_v28  ;;  %v905_v48 = vmul.f32 %v2133_v45, %v2133_v45  ;;  %v2160_v57 = vsub.f32 %v2006_v8, %v866_v63 }
 0x1b7   : > { %v920_v61 = vmul.f32 %v2136_v46, %v2136_v46  ;;  %v2166_v4 = vsub.f32 %v1963_v56, %v2111_v28  ;;  %v907_v6 = vmul.f32 %v2142_v43, %v2142_v43  ;;  %v953_v10 = vadd.f32 %v903_v50, %v901_v59 }
 0x1b8   : > { %v935_v31 = vadd.f32 %v934_v26, %v908_v21  ;;  %v2171_v52 = vsub.f32 %v2018_v13, %v866_v63  ;;  %v922_v12 = vmul.f32 %v2149_v44, %v2149_v44  ;;  %v2177_v15 = vsub.f32 %v1975_v60, %v2111_v28 }
 0x1b9   : > { %v909_v34 = vmul.f32 %v2155_v54, %v2155_v54  ;;  %v954_v56 = vadd.f32 %v953_v10, %v905_v48  ;;  %v2182_v35 = vsub.f32 %v2030_v17, %v866_v63  ;;  %v924_v37 = vmul.f32 %v2160_v57, %v2160_v57 }
 0x1ba   : > { %v936_v55 = vadd.f32 %v935_v31, %v910_v40  ;;  %v2188_v18 = vsub.f32 %v1987_v1, %v2111_v28  ;;  %v911_v21 = vmul.f32 %v2166_v4, %v2166_v4  ;;  %v2193_v24 = vsub.f32 %v2042_v22, %v866_v63 }
 0x1bb   : > { %v955_v60 = vadd.f32 %v954_v56, %v907_v6  ;;  %v926_v39 = vmul.f32 %v2171_v52, %v2171_v52  ;;  %v2199_v40 = vsub.f32 %v1999_v5, %v2111_v28  ;;  %v913_v26 = vmul.f32 %v2177_v15, %v2177_v15 }
 0x1bc   : > { %v937_v49 = vadd.f32 %v936_v55, %v912_v47  ;;  %v928_v47 = vmul.f32 %v2182_v35, %v2182_v35  ;;  %v2207_v22 = vsub.f32 %v2011_v9, %v2111_v28  ;;  %v915_v63 = vmul.f32 %v2188_v18, %v2188_v18 }
 0x1bd   : > { %v956_v1 = vadd.f32 %v955_v60, %v909_v34  ;;  %v930_v5 = vmul.f32 %v2193_v24, %v2193_v24  ;;  %v2221_v9 = vsub.f32 %v2035_v19, %v2111_v28  ;;  %v2233_v10 = vsub.f32 %v2054_v27, %v2111_v28 }
 0x1be   : > { %v938_v53 = vadd.f32 %v937_v49, %v914_v41  ;;  %v917_v49 = vmul.f32 %v2199_v40, %v2199_v40  ;;  %v2239_v34 = vsub.f32 %v2061_v30, %v2111_v28 }
 0x1bf   : > { %v957_v41 = vadd.f32 %v956_v1, %v911_v21  ;;  %v923_v19 = vmul.f32 %v2221_v9, %v2221_v9  ;;  %v927_v27 = vmul.f32 %v2233_v10, %v2233_v10 }
 0x1c0   : > { %v939_v62 = vadd.f32 %v938_v53, %v916_v42  ;;  %v2215_v42 = vsub.f32 %v2023_v14, %v2111_v28 }
 0x1c1   : > { %v958_v59 = vadd.f32 %v957_v41, %v913_v26 }
 0x1c2   : > { %v940_v8 = vadd.f32 %v939_v62, %v918_v0  ;;  %v919_v0 = vmul.f32 %v2207_v22, %v2207_v22  ;;  %v921_v14 = vmul.f32 %v2215_v42, %v2215_v42 }
 0x1c3   : > { %v959_v53 = vadd.f32 %v958_v59, %v915_v63 }
 0x1c4   : > { %v941_v13 = vadd.f32 %v940_v8, %v920_v61  ;;  %v2227_v61 = vsub.f32 %v2047_v23, %v2111_v28 }
 0x1c5   : > { %v960_v62 = vadd.f32 %v959_v53, %v917_v49 }
 0x1c6   : > { %v942_v17 = vadd.f32 %v941_v13, %v922_v12  ;;  %v925_v23 = vmul.f32 %v2227_v61, %v2227_v61  ;;  %v2245_v13 = vsub.f32 %v2067_v38, %v2111_v28 }
 0x1c7   : > { %v961_v12 = vadd.f32 %v960_v62, %v919_v0 }
 0x1c8   : > { %v943_v31 = vadd.f32 %v942_v17, %v924_v37  ;;  %v931_v26 = vmul.f32 %v2245_v13, %v2245_v13 }
 0x1c9   : > { %v962_v56 = vadd.f32 %v961_v12, %v921_v14 }
 0x1ca   : > { %v944_v55 = vadd.f32 %v943_v31, %v926_v39  ;;  %v929_v39 = vmul.f32 %v2239_v34, %v2239_v34 }
 0x1cb   : > { %v963_v21 = vadd.f32 %v962_v56, %v923_v19 }
 0x1cc   : > { %v945_v50 = vadd.f32 %v944_v55, %v928_v47 }
 0x1cd   : > { %v964_v17 = vadd.f32 %v963_v21, %v925_v23 }
 0x1ce   : > { %v946_v48 = vadd.f32 %v945_v50, %v930_v5 }
 0x1cf   : > { %v965_v1 = vadd.f32 %v964_v17, %v927_v27 }
 0x1d0   : > { %v947_v6 = vrot.slane %v946_v48, 4 }
 0x1d1   : > { %v966_v31 = vadd.f32 %v965_v1, %v929_v39 }
 0x1d2   : > { %v948_v8 = vadd.f32 %v947_v6, %v946_v48  ;;  %v815_v6 = vld [vmem:[%s2524_s2] sm:$0x3] }
 0x1d3   : > { %v967_v38 = vadd.f32 %v966_v31, %v931_v26  ;;  %v2261_v56 = vperm.slane %v815_v6, 0 }
 0x1d4   : > { %v949_v37 = vrot.slane %v948_v8, 2 }
 0x1d5   : > { %v968_v41 = vrot.slane %v967_v38, 4 }
 0x1d6   : > { %v950_v60 = vadd.f32 %v949_v37, %v948_v8  ;;  %v816_v8 = vld [vmem:[%s2525_s3] sm:$0x3] }
 0x1d7   : > { %v969_v5 = vadd.f32 %v968_v41, %v967_v38  ;;  %v2265_v27 = vperm.slane %v816_v8, 0  ;;  %v2269_v21 = vperm.slane %v816_v8, 1 }
 0x1d8   : > { %v951_v30 = vrot.slane %v950_v60, 1 }
 0x1d9   : > { %v970_v55 = vrot.slane %v969_v5, 2 }
 0x1da   : > { %v952_v47 = vadd.f32 %v951_v30, %v950_v60 }
 0x1db   : > { %v971_v49 = vadd.f32 %v970_v55, %v969_v5 }
 0x1dc   : > { %v974_v63 = vmul.f32 %v952_v47, %v2071_v58 }
 0x1dd   : > { %v972_v0 = vrot.slane %v971_v49, 1 }
 0x1de   : > { %v976_v28 = vadd.f32 1e-05, %v974_v63 }
 0x1df   : > { %v973_v48 = vadd.f32 %v972_v0, %v971_v49 }
 0x1e0   : > { %1323 = vrsqrt.f32 %v976_v28  ;;  %vm984_vm1 = vweird.f32 %v976_v28 }
 0x1e1   : > { %v975_v62 = vmul.f32 %v973_v48, %v2071_v58  ;;  %v2267_v58 = vperm.slane %v815_v6, 1 }
 0x1e3   : > { %v977_v12 = vadd.f32 1e-05, %v975_v62 }
 0x1e5   : > { %1325 = vrsqrt.f32 %v977_v12  ;;  %vm994_vm4 = vweird.f32 %v977_v12 }
 0x1e6   : > { %v1324_v59 = vpop.eup %1323 }
 0x1e7   : > { %v979_v50 = vmul.f32 %v1324_v59, %v976_v28  ;;  %vm985_vm2 = vweird.f32 %v1324_v59 }
 0x1e8   : > { %vm986_vm3 = vmor %vm984_vm1, %vm985_vm2 }
 0x1e9   : > { %v980_v53 = vmul.f32 %v1324_v59, %v979_v50 }
 0x1eb   : > { %v981_v14 = vmul.f32 0.5, %v980_v53  ;;  %v1326_v63 = vpop.eup %1325 }
 0x1ec   : > { %vm995_vm5 = vweird.f32 %v1326_v63 }
 0x1ed   : > { %v982_v19 = vsub.f32 1.5, %v981_v14  ;;  %vm2310_vm12 = vmor %vm994_vm4, %vm995_vm5 }
 0x1ef   : > { %v983_v23 = vmul.f32 %v1324_v59, %v982_v19 }
 0x1f1   : > { %v2263_v37 = vsel %vm986_vm3, %v1324_v59, %v983_v23 }
 0x1f2   : > { %v998_v60 = vmul.f32 %v2263_v37, %v2075_v2  ;;  %v1000_v39 = vmul.f32 %v2263_v37, %v2078_v3  ;;  %v1002_v17 = vmul.f32 %v2263_v37, %v2081_v7  ;;  %v1004_v30 = vmul.f32 %v2263_v37, %v2084_v11 }
 0x1f3   : > { %v1006_v26 = vmul.f32 %v2263_v37, %v2091_v33  ;;  %v1008_v1 = vmul.f32 %v2263_v37, %v2096_v16  ;;  %v1010_v47 = vmul.f32 %v2263_v37, %v2101_v20  ;;  %v1012_v2 = vmul.f32 %v2263_v37, %v2106_v25 }
 0x1f4   : > { %v1035_v3 = vmul.f32 %v2261_v56, %v998_v60  ;;  %v1037_v31 = vmul.f32 %v2261_v56, %v1000_v39  ;;  %v1039_v7 = vmul.f32 %v2261_v56, %v1002_v17  ;;  %v1041_v11 = vmul.f32 %v2261_v56, %v1004_v30 }
 0x1f5   : > { %v1043_v33 = vmul.f32 %v2261_v56, %v1006_v26  ;;  %v1045_v38 = vmul.f32 %v2261_v56, %v1008_v1  ;;  %v1047_v16 = vmul.f32 %v2261_v56, %v1010_v47  ;;  %v1049_v20 = vmul.f32 %v2261_v56, %v1012_v2 }
 0x1f6   : > { %v1072_v28 = vadd.f32 %v2265_v27, %v1035_v3  ;;  %v989_v25 = vmul.f32 %v1326_v63, %v977_v12  ;;  %v1074_v41 = vadd.f32 %v2265_v27, %v1037_v31  ;;  %v1076_v5 = vadd.f32 %v2265_v27, %v1039_v7 }
 0x1f7   : > { %v1078_v55 = vadd.f32 %v2265_v27, %v1041_v11  ;;  %v1080_v49 = vadd.f32 %v2265_v27, %v1043_v33  ;;  %v1082_v59 = vadd.f32 %v2265_v27, %v1045_v38  ;;  %v1084_v30 = vadd.f32 %v2265_v27, %v1047_v16 }
 0x1f8   : > { %vm1104_vm6 = vcmp.gt.f32.partialorder %v1072_v28, 0.0  ;;  %v1136_v50 = vmul.f32 0.2, %v1072_v28  ;;  %v990_v0 = vmul.f32 %v1326_v63, %v989_v25  ;;  %vm1106_vm7 = vcmp.gt.f32.partialorder %v1074_v41, 0.0 }
 0x1f9   : > { %v1138_v53 = vmul.f32 0.2, %v1074_v41  ;;  %vm1108_vm8 = vcmp.gt.f32.partialorder %v1076_v5, 0.0  ;;  %v1140_v48 = vmul.f32 0.2, %v1076_v5  ;;  %vm1110_vm9 = vcmp.gt.f32.partialorder %v1078_v55, 0.0 }
 0x1fa   : > { %v1168_v14 = vsel %vm1104_vm6, %v1072_v28, %v1136_v50  ;;  %v991_v62 = vmul.f32 0.5, %v990_v0  ;;  %v1142_v6 = vmul.f32 0.2, %v1078_v55  ;;  %vm1112_vm10 = vcmp.gt.f32.partialorder %v1080_v49, 0.0 }
 0x1fb   : > { %1200 = vst [vmem:[%s2526_s4] sm:$0xff] %v1168_v14  ;;  %v1170_v19 = vsel %vm1106_vm7, %v1074_v41, %v1138_v53  ;;  %v1172_v8 = vsel %vm1108_vm8, %v1076_v5, %v1140_v48  ;;  %v1144_v23 = vmul.f32 0.2, %v1080_v49  ;;  %vm1114_vm11 = vcmp.gt.f32.partialorder %v1082_v59, 0.0 }
 0x1fc   : > { %v992_v60 = vsub.f32 1.5, %v991_v62  ;;  %1202 = vst [vmem:[%s2526_s4 + $0x10] sm:$0xff] %v1170_v19  ;;  %v1174_v39 = vsel %vm1110_vm9, %v1078_v55, %v1142_v6  ;;  %v1146_v17 = vmul.f32 0.2, %v1082_v59  ;;  %v1086_v47 = vadd.f32 %v2265_v27, %v1049_v20 }
 0x1fd   : > { %1204 = vst [vmem:[%s2526_s4 + $0x20] sm:$0xff] %v1172_v8  ;;  %v1176_v1 = vsel %vm1112_vm10, %v1080_v49, %v1144_v23  ;;  %v1014_v2 = vmul.f32 %v2263_v37, %v2114_v29  ;;  %v1016_v3 = vmul.f32 %v2263_v37, %v2127_v36  ;;  %vm1116_vm13 = vcmp.gt.f32.partialorder %v1084_v30, 0.0 }
 0x1fe   : > { %v993_v31 = vmul.f32 %v1326_v63, %v992_v60  ;;  %1206 = vst [vmem:[%s2526_s4 + $0x30] sm:$0xff] %v1174_v39  ;;  %v1178_v12 = vsel %vm1114_vm11, %v1082_v59, %v1146_v17  ;;  %v1148_v7 = vmul.f32 0.2, %v1084_v30  ;;  %vm1118_vm14 = vcmp.gt.f32.partialorder %v1086_v47, 0.0 }
 0x1ff   : > { %1208 = vst [vmem:[%s2526_s4 + $0x40] sm:$0xff] %v1176_v1  ;;  %v1150_v11 = vmul.f32 0.2, %v1086_v47  ;;  %v1051_v33 = vmul.f32 %v2261_v56, %v1014_v2  ;;  %v1053_v29 = vmul.f32 %v2261_v56, %v1016_v3  ;;  %v2339_v16 = vmul.f32 %v2263_v37, %v2136_v46 }
 0x200   : > { %v2332_v36 = vsel %vm2310_vm12, %v1326_v63, %v993_v31  ;;  %1210 = vst [vmem:[%s2526_s4 + $0x50] sm:$0xff] %v1178_v12  ;;  %v1180_v38 = vsel %vm1116_vm13, %v1084_v30, %v1148_v7  ;;  %v2343_v20 = vmul.f32 %v2263_v37, %v2149_v44 }
 0x201   : > { %v999_v28 = vmul.f32 %v2332_v36, %v2120_v32  ;;  %v1001_v63 = vmul.f32 %v2332_v36, %v2124_v51  ;;  %v1003_v25 = vmul.f32 %v2332_v36, %v2133_v45  ;;  %v1005_v41 = vmul.f32 %v2332_v36, %v2142_v43  ;;  %1212 = vst [vmem:[%s2526_s4 + $0x60] sm:$0xff] %v1180_v38 }
 0x202   : > { %v1007_v46 = vmul.f32 %v2332_v36, %v2155_v54  ;;  %v1009_v44 = vmul.f32 %v2332_v36, %v2166_v4  ;;  %v1011_v32 = vmul.f32 %v2332_v36, %v2177_v15  ;;  %v1182_v51 = vsel %vm1118_vm14, %v1086_v47, %v1150_v11 }
 0x203   : > { %v1036_v45 = vmul.f32 %v2267_v58, %v999_v28  ;;  %v1038_v5 = vmul.f32 %v2267_v58, %v1001_v63  ;;  %v1040_v43 = vmul.f32 %v2267_v58, %v1003_v25  ;;  %v1042_v55 = vmul.f32 %v2267_v58, %v1005_v41  ;;  %1214 = vst [vmem:[%s2526_s4 + $0x70] sm:$0xff] %v1182_v51 }
 0x204   : > { %v1044_v54 = vmul.f32 %v2267_v58, %v1007_v46  ;;  %v1046_v4 = vmul.f32 %v2267_v58, %v1009_v44  ;;  %v1048_v15 = vmul.f32 %v2267_v58, %v1011_v32  ;;  %v1013_v49 = vmul.f32 %v2332_v36, %v2188_v18 }
 0x205   : > { %v1073_v59 = vadd.f32 %v2269_v21, %v1036_v45  ;;  %v1075_v50 = vadd.f32 %v2269_v21, %v1038_v5  ;;  %v1077_v0 = vadd.f32 %v2269_v21, %v1040_v43  ;;  %v1079_v53 = vadd.f32 %v2269_v21, %v1042_v55 }
 0x206   : > { %v1081_v48 = vadd.f32 %v2269_v21, %v1044_v54  ;;  %v1083_v14 = vadd.f32 %v2269_v21, %v1046_v4  ;;  %v1085_v62 = vadd.f32 %v2269_v21, %v1048_v15  ;;  %v1050_v6 = vmul.f32 %v2267_v58, %v1013_v49 }
 0x207   : > { %vm1105_vm15 = vcmp.gt.f32.partialorder %v1073_v59, 0.0  ;;  %v1137_v19 = vmul.f32 0.2, %v1073_v59  ;;  %vm1107_vm0 = vcmp.gt.f32.partialorder %v1075_v50, 0.0  ;;  %v1139_v18 = vmul.f32 0.2, %v1075_v50 }
 0x208   : > { %vm1109_vm1 = vcmp.gt.f32.partialorder %v1077_v0, 0.0  ;;  %v1141_v8 = vmul.f32 0.2, %v1077_v0  ;;  %vm1111_vm2 = vcmp.gt.f32.partialorder %v1079_v53, 0.0  ;;  %v1143_v23 = vmul.f32 0.2, %v1079_v53 }
 0x209   : > { %v1169_v60 = vsel %vm1105_vm15, %v1073_v59, %v1137_v19  ;;  %v1171_v39 = vsel %vm1107_vm0, %v1075_v50, %v1139_v18  ;;  %vm1113_vm3 = vcmp.gt.f32.partialorder %v1081_v48, 0.0  ;;  %v1145_v17 = vmul.f32 0.2, %v1081_v48 }
 0x20a   : > { %1201 = vst [vmem:[%s2526_s4 + $0x8] sm:$0xff] %v1169_v60  ;;  %v1173_v30 = vsel %vm1109_vm1, %v1077_v0, %v1141_v8  ;;  %v1175_v26 = vsel %vm1111_vm2, %v1079_v53, %v1143_v23  ;;  %vm1115_vm4 = vcmp.gt.f32.partialorder %v1083_v14, 0.0  ;;  %v1147_v1 = vmul.f32 0.2, %v1083_v14 }
 0x20b   : > { %1203 = vst [vmem:[%s2526_s4 + $0x18] sm:$0xff] %v1171_v39  ;;  %v1177_v47 = vsel %vm1113_vm3, %v1081_v48, %v1145_v17  ;;  %vm1117_vm5 = vcmp.gt.f32.partialorder %v1085_v62, 0.0  ;;  %v1149_v2 = vmul.f32 0.2, %v1085_v62  ;;  %v1087_v3 = vadd.f32 %v2269_v21, %v1050_v6 }
 0x20c   : > { %1205 = vst [vmem:[%s2526_s4 + $0x28] sm:$0xff] %v1173_v30  ;;  %v1179_v31 = vsel %vm1115_vm4, %v1083_v14, %v1147_v1  ;;  %v1088_v12 = vadd.f32 %v2265_v27, %v1051_v33  ;;  %v1015_v7 = vmul.f32 %v2332_v36, %v2199_v40  ;;  %v1090_v11 = vadd.f32 %v2265_v27, %v1053_v29 }
 0x20d   : > { %1207 = vst [vmem:[%s2526_s4 + $0x38] sm:$0xff] %v1175_v26  ;;  %v1181_v38 = vsel %vm1117_vm5, %v1085_v62, %v1149_v2  ;;  %vm1119_vm6 = vcmp.gt.f32.partialorder %v1087_v3, 0.0  ;;  %v1151_v28 = vmul.f32 0.2, %v1087_v3  ;;  %v1017_v63 = vmul.f32 %v2332_v36, %v2207_v22 }
 0x20e   : > { %1209 = vst [vmem:[%s2526_s4 + $0x48] sm:$0xff] %v1177_v47  ;;  %vm1120_vm7 = vcmp.gt.f32.partialorder %v1088_v12, 0.0  ;;  %v1152_v33 = vmul.f32 0.2, %v1088_v12  ;;  %v1052_v40 = vmul.f32 %v2267_v58, %v1015_v7  ;;  %vm1122_vm8 = vcmp.gt.f32.partialorder %v1090_v11, 0.0 }
 0x20f   : > { %1211 = vst [vmem:[%s2526_s4 + $0x58] sm:$0xff] %v1179_v31  ;;  %v1183_v29 = vsel %vm1119_vm6, %v1087_v3, %v1151_v28  ;;  %v1154_v25 = vmul.f32 0.2, %v1090_v11  ;;  %v1054_v41 = vmul.f32 %v2267_v58, %v1017_v63  ;;  %v1055_v22 = vmul.f32 %v2261_v56, %v2339_v16 }
 0x210   : > { %1213 = vst [vmem:[%s2526_s4 + $0x68] sm:$0xff] %v1181_v38  ;;  %v1184_v46 = vsel %vm1120_vm7, %v1088_v12, %v1152_v33  ;;  %v1089_v44 = vadd.f32 %v2269_v21, %v1052_v40  ;;  %v1019_v32 = vmul.f32 %v2332_v36, %v2215_v42  ;;  %v1057_v51 = vmul.f32 %v2261_v56, %v2343_v20 }
 0x211   : > { %1215 = vst [vmem:[%s2526_s4 + $0x78] sm:$0xff] %v1183_v29  ;;  %v1186_v45 = vsel %vm1122_vm8, %v1090_v11, %v1154_v25  ;;  %v1091_v16 = vadd.f32 %v2269_v21, %v1054_v41  ;;  %v1092_v5 = vadd.f32 %v2265_v27, %v1055_v22  ;;  %v1021_v43 = vmul.f32 %v2332_v36, %v2221_v9 }
 0x212   : > { %1216 = vst [vmem:[%s2526_s4 + $0x80] sm:$0xff] %v1184_v46  ;;  %vm1121_vm9 = vcmp.gt.f32.partialorder %v1089_v44, 0.0  ;;  %v1153_v42 = vmul.f32 0.2, %v1089_v44  ;;  %v1056_v20 = vmul.f32 %v2267_v58, %v1019_v32  ;;  %v1094_v55 = vadd.f32 %v2265_v27, %v1057_v51 }
 0x213   : > { %1218 = vst [vmem:[%s2526_s4 + $0x90] sm:$0xff] %v1186_v45  ;;  %vm1123_vm10 = vcmp.gt.f32.partialorder %v1091_v16, 0.0  ;;  %v1155_v54 = vmul.f32 0.2, %v1091_v16  ;;  %vm1124_vm11 = vcmp.gt.f32.partialorder %v1092_v5, 0.0  ;;  %v1058_v4 = vmul.f32 %v2267_v58, %v1021_v43 }
 0x214   : > { %v1185_v9 = vsel %vm1121_vm9, %v1089_v44, %v1153_v42  ;;  %v1156_v15 = vmul.f32 0.2, %v1092_v5  ;;  %v1093_v49 = vadd.f32 %v2269_v21, %v1056_v20  ;;  %vm1126_vm12 = vcmp.gt.f32.partialorder %v1094_v55, 0.0 }
 0x215   : > { %1217 = vst [vmem:[%s2526_s4 + $0x88] sm:$0xff] %v1185_v9  ;;  %v1187_v59 = vsel %vm1123_vm10, %v1091_v16, %v1155_v54  ;;  %v1158_v50 = vmul.f32 0.2, %v1094_v55  ;;  %v1095_v0 = vadd.f32 %v2269_v21, %v1058_v4  ;;  %v1022_v53 = vmul.f32 %v2263_v37, %v2160_v57 }
 0x216   : > { %1219 = vst [vmem:[%s2526_s4 + $0x98] sm:$0xff] %v1187_v59  ;;  %v1188_v48 = vsel %vm1124_vm11, %v1092_v5, %v1156_v15  ;;  %vm1125_vm13 = vcmp.gt.f32.partialorder %v1093_v49, 0.0  ;;  %v1157_v14 = vmul.f32 0.2, %v1093_v49  ;;  %v1023_v62 = vmul.f32 %v2332_v36, %v2227_v61 }
 0x217   : > { %1220 = vst [vmem:[%s2526_s4 + $0xa0] sm:$0xff] %v1188_v48  ;;  %v1190_v6 = vsel %vm1126_vm12, %v1094_v55, %v1158_v50  ;;  %vm1127_vm14 = vcmp.gt.f32.partialorder %v1095_v0, 0.0  ;;  %v1159_v19 = vmul.f32 0.2, %v1095_v0  ;;  %v1059_v18 = vmul.f32 %v2261_v56, %v1022_v53 }
 0x218   : > { %v1189_v57 = vsel %vm1125_vm13, %v1093_v49, %v1157_v14  ;;  %1222 = vst [vmem:[%s2526_s4 + $0xb0] sm:$0xff] %v1190_v6  ;;  %v1060_v8 = vmul.f32 %v2267_v58, %v1023_v62  ;;  %v1024_v23 = vmul.f32 %v2263_v37, %v2171_v52  ;;  %v1025_v61 = vmul.f32 %v2332_v36, %v2233_v10 }
 0x219   : > { %1221 = vst [vmem:[%s2526_s4 + $0xa8] sm:$0xff] %v1189_v57  ;;  %v1191_v60 = vsel %vm1127_vm14, %v1095_v0, %v1159_v19  ;;  %v1096_v39 = vadd.f32 %v2265_v27, %v1059_v18  ;;  %v1026_v17 = vmul.f32 %v2263_v37, %v2182_v35  ;;  %v1027_v30 = vmul.f32 %v2332_v36, %v2239_v34 }
 0x21a   : > { %1223 = vst [vmem:[%s2526_s4 + $0xb8] sm:$0xff] %v1191_v60  ;;  %v1097_v52 = vadd.f32 %v2269_v21, %v1060_v8  ;;  %v1061_v10 = vmul.f32 %v2261_v56, %v1024_v23  ;;  %v1062_v26 = vmul.f32 %v2267_v58, %v1025_v61  ;;  %v1028_v1 = vmul.f32 %v2263_v37, %v2193_v24 }
 0x21b   : > { %vm1128_vm15 = vcmp.gt.f32.partialorder %v1096_v39, 0.0  ;;  %v1160_v47 = vmul.f32 0.2, %v1096_v39  ;;  %v1063_v35 = vmul.f32 %v2261_v56, %v1026_v17  ;;  %v1064_v2 = vmul.f32 %v2267_v58, %v1027_v30 }
 0x21c   : > { %vm1129_vm0 = vcmp.gt.f32.partialorder %v1097_v52, 0.0  ;;  %v1161_v34 = vmul.f32 0.2, %v1097_v52  ;;  %v1098_v3 = vadd.f32 %v2265_v27, %v1061_v10  ;;  %v1099_v31 = vadd.f32 %v2269_v21, %v1062_v26 }
 0x21d   : > { %v1192_v12 = vsel %vm1128_vm15, %v1096_v39, %v1160_v47  ;;  %v1100_v7 = vadd.f32 %v2265_v27, %v1063_v35  ;;  %v1101_v11 = vadd.f32 %v2269_v21, %v1064_v2  ;;  %v1065_v38 = vmul.f32 %v2261_v56, %v1028_v1 }
 0x21e   : > { %1224 = vst [vmem:[%s2526_s4 + $0xc0] sm:$0xff] %v1192_v12  ;;  %v1193_v24 = vsel %vm1129_vm0, %v1097_v52, %v1161_v34  ;;  %vm1130_vm1 = vcmp.gt.f32.partialorder %v1098_v3, 0.0  ;;  %v1162_v37 = vmul.f32 0.2, %v1098_v3  ;;  %vm1131_vm2 = vcmp.gt.f32.partialorder %v1099_v31, 0.0 }
 0x21f   : > { %1225 = vst [vmem:[%s2526_s4 + $0xc8] sm:$0xff] %v1193_v24  ;;  %v1163_v28 = vmul.f32 0.2, %v1099_v31  ;;  %vm1132_vm3 = vcmp.gt.f32.partialorder %v1100_v7, 0.0  ;;  %v1164_v63 = vmul.f32 0.2, %v1100_v7  ;;  %v1102_v33 = vadd.f32 %v2265_v27, %v1065_v38 }
 0x220   : > { %v1194_v40 = vsel %vm1130_vm1, %v1098_v3, %v1162_v37  ;;  %vm1133_vm4 = vcmp.gt.f32.partialorder %v1101_v11, 0.0  ;;  %v1165_v56 = vmul.f32 0.2, %v1101_v11  ;;  %v1029_v29 = vmul.f32 %v2332_v36, %v2245_v13 }
 0x221   : > { %1226 = vst [vmem:[%s2526_s4 + $0xd0] sm:$0xff] %v1194_v40  ;;  %v1195_v25 = vsel %vm1131_vm2, %v1099_v31, %v1163_v28  ;;  %v1196_v41 = vsel %vm1132_vm3, %v1100_v7, %v1164_v63  ;;  %vm1134_vm5 = vcmp.gt.f32.partialorder %v1102_v33, 0.0  ;;  %v1166_v22 = vmul.f32 0.2, %v1102_v33 }
 0x222   : > { %1227 = vst [vmem:[%s2526_s4 + $0xd8] sm:$0xff] %v1195_v25  ;;  %v1197_v46 = vsel %vm1133_vm4, %v1101_v11, %v1165_v56  ;;  %v1066_v27 = vmul.f32 %v2267_v58, %v1029_v29 }
 0x223   : > { %1228 = vst [vmem:[%s2526_s4 + $0xe0] sm:$0xff] %v1196_v41  ;;  %v1198_v13 = vsel %vm1134_vm5, %v1102_v33, %v1166_v22 }
 0x224   : > { %1229 = vst [vmem:[%s2526_s4 + $0xe8] sm:$0xff] %v1197_v46  ;;  %v1103_v36 = vadd.f32 %v2269_v21, %v1066_v27 }
 0x225   : > { %1230 = vst [vmem:[%s2526_s4 + $0xf0] sm:$0xff] %v1198_v13 }
 0x226   : > { %vm1135_vm6 = vcmp.gt.f32.partialorder %v1103_v36, 0.0  ;;  %v1167_v44 = vmul.f32 0.2, %v1103_v36 }
 0x228   : > { %v1199_v32 = vsel %vm1135_vm6, %v1103_v36, %v1167_v44 }
 0x229   : > { %1231 = vst [vmem:[%s2526_s4 + $0xf8] sm:$0xff] %v1199_v32 }
 0x22a PF: > { %p11_p11 = scmp.ge.s32.totalorder %s1397_s19, 10   ;;  %s2529_s15 = smov %s1345_s16 }
 0x22b   : > { %s2530_s16 = smov %s1406_s22  ;;  %s2531_s17 = smov %s1397_s19 }
 0x22c   :  { %13 = sbr.rel (!%p11_p11) target bundleno = 2 (0x2), region = 101 }

// kernel: discriminator_forward.7
= control target key start
LH: loop header
LB: loop body
LE: loop exit
PB: predicated region body
PF: predicated region fallthrough
CT: control target
= control target key end

     0   :  { %s1677_s18 = smov 0   ;;  %s1679_s19 = smov 0   ;;  %s2309_s0 = inlined_call_operand.vmem [shape: f32[32,4096], index: 0, kind: input, shape index: {}]   ;;  %s2310_s1 = inlined_call_operand.vmem [shape: f32[4096,512], index: 1, kind: input, shape index: {}]   ;;  %s2311_s2 = inlined_call_operand.vmem [shape: f32[1,512], index: 2, kind: input, shape index: {}]   ;;  %s2312_s3 = inlined_call_operand.vmem [shape: f32[1,512], index: 3, kind: input, shape index: {}]   ;;  %s2313_s4 = inlined_call_operand.vmem [shape: f32[16,512], index: 4, kind: input, shape index: {}]   ;;  %s2314_s5 = inlined_call_operand.vmem [shape: f32[2,1], index: 5, kind: output, shape index: {}]  }
   0x1   :  { %s1681_s20 = smov 0  }
   0x2 LB: > { %s1693_s21 = sadd.s32 4294967295, %s1643_s20   ;;  %s1696_s22 = sadd.s32 1, %s1643_s20   ;;  %s1643_s20 = sphi %s1681_s20, %s2317_s20   ;;  %s1639_s19 = sphi %s1679_s19, %s2316_s19   ;;  %s1635_s18 = sphi %s1677_s18, %s2315_s18  }
   0x3   : > { %s19_s23 = ssub.s32 %s1643_s20, %s1696_s22  ;;  %s22_s24 = sadd.s32 1, %s1639_s19 }
   0x4   : > { %p20_p0 = scmp.eq.s32.totalorder %s19_s23, 0  ;;  %p29_p1 = scmp.ne.s32.totalorder %s1639_s19, %s1635_s18 }
   0x5   : > { %p30_p2 = scmp.eq.s32.totalorder %s1643_s20, 0  ;;  %p1565_p4 = scmp.ge.s32.totalorder %s1643_s20, 8 }
   0x6   : > { %s1705_s25 = scalar_select %p20_p0, %s1639_s19, %s22_s24  }
   0x7   : > { %p31_p3 = por %p30_p2, %p29_p1  ;;  %174 = sbr.rel (%p1565_p4) target bundleno = 32 (0x20), region = 28 }
   0xc   : > { %177 = sbr.rel (!%p31_p3) target bundleno = 32 (0x20), region = 32  ;;  %s179_s26 = sand.u32 (%p31_p3), 1, %s1639_s19  }
   0xd   : > { %s1579_s27 = sshll.u32 (%p31_p3), %s1643_s20, 5  ;;  %s1566_s28 = sshll.u32 (%p31_p3), %s179_s26, 7 }
   0xe   : > { %s1713_s6 = scalar_lea.vmem (%p31_p3), %s2309_s0, %s1579_s27  ;;  %s181_s7 = scalar_lea.vmem (%p31_p3), [#allocation3], %s1566_s28 }
   0xf   : > { %v197_v0 = vld [vmem:[%s1713_s6] sm:$0xff] (%p31_p3)  ;;  %v199_v1 = vld [vmem:[%s1713_s6 + $0x8] sm:$0xff] (%p31_p3)  ;;  %v201_v2 = vld [vmem:[%s1713_s6 + $0x10] sm:$0xff] (%p31_p3) }
  0x10   : > { %198 = vst [vmem:[%s181_s7] sm:$0xff] (%p31_p3), %v197_v0  ;;  %v203_v3 = vld [vmem:[%s1713_s6 + $0x18] sm:$0xff] (%p31_p3)  ;;  %v205_v4 = vld [vmem:[%s1713_s6 + $0x100] sm:$0xff] (%p31_p3)  ;;  %v207_v5 = vld [vmem:[%s1713_s6 + $0x108] sm:$0xff] (%p31_p3) }
  0x11   : > { %200 = vst [vmem:[%s181_s7 + $0x8] sm:$0xff] %v199_v1  ;;  %v209_v6 = vld [vmem:[%s1713_s6 + $0x110] sm:$0xff]  ;;  %v211_v7 = vld [vmem:[%s1713_s6 + $0x118] sm:$0xff]  ;;  %v213_v8 = vld [vmem:[%s1713_s6 + $0x200] sm:$0xff] }
  0x12   : > { %202 = vst [vmem:[%s181_s7 + $0x10] sm:$0xff] %v201_v2  ;;  %v215_v9 = vld [vmem:[%s1713_s6 + $0x208] sm:$0xff]  ;;  %v217_v10 = vld [vmem:[%s1713_s6 + $0x210] sm:$0xff]  ;;  %v219_v11 = vld [vmem:[%s1713_s6 + $0x218] sm:$0xff] }
  0x13   : > { %204 = vst [vmem:[%s181_s7 + $0x18] sm:$0xff] %v203_v3  ;;  %v221_v12 = vld [vmem:[%s1713_s6 + $0x300] sm:$0xff]  ;;  %v223_v13 = vld [vmem:[%s1713_s6 + $0x308] sm:$0xff]  ;;  %v225_v14 = vld [vmem:[%s1713_s6 + $0x310] sm:$0xff] }
  0x14   : > { %206 = vst [vmem:[%s181_s7 + $0x20] sm:$0xff] %v205_v4  ;;  %v227_v15 = vld [vmem:[%s1713_s6 + $0x318] sm:$0xff] }
  0x15   : > { %208 = vst [vmem:[%s181_s7 + $0x28] sm:$0xff] %v207_v5 }
  0x16   : > { %210 = vst [vmem:[%s181_s7 + $0x30] sm:$0xff] %v209_v6 }
  0x17   : > { %212 = vst [vmem:[%s181_s7 + $0x38] sm:$0xff] %v211_v7 }
  0x18   : > { %214 = vst [vmem:[%s181_s7 + $0x40] sm:$0xff] %v213_v8 }
  0x19   : > { %216 = vst [vmem:[%s181_s7 + $0x48] sm:$0xff] %v215_v9 }
  0x1a   : > { %218 = vst [vmem:[%s181_s7 + $0x50] sm:$0xff] %v217_v10 }
  0x1b   : > { %220 = vst [vmem:[%s181_s7 + $0x58] sm:$0xff] %v219_v11 }
  0x1c   : > { %222 = vst [vmem:[%s181_s7 + $0x60] sm:$0xff] %v221_v12 }
  0x1d   : > { %224 = vst [vmem:[%s181_s7 + $0x68] sm:$0xff] %v223_v13 }
  0x1e   : > { %226 = vst [vmem:[%s181_s7 + $0x70] sm:$0xff] %v225_v14 }
  0x1f   : > { %228 = vst [vmem:[%s181_s7 + $0x78] sm:$0xff] %v227_v15 }
  0x20 PF: > { %p1569_p5 = scmp.ge.s32.totalorder %s1643_s20, 1  ;;  %p243_p6 = scmp.lt.s32.totalorder %s1643_s20, 9 }
  0x22   : > { %p244_p7 = pnand %p1569_p5, %p243_p6 }
  0x23   : > { %s250_s8 = sand.u32 (!%p244_p7), 1, %s1635_s18   ;;  %s1571_s9 = sshll.u32 (!%p244_p7), %s1693_s21, 6 }
  0x24   : > { %247 = sbr.rel (%p244_p7) target bundleno = 675 (0x2a3), region = 59  ;;  %s1570_s10 = sshll.u32 (!%p244_p7), %s250_s8, 7 }
  0x25   : > { %p280_p8 = scmp.lt.s32.totalorder (!%p244_p7), %s1571_s9, 511  ;;  %s1740_s15 = scalar_lea.vmem (!%p244_p7), [#allocation3], %s1570_s10 }
  0x26   : > { %p1574_p9 = scmp.ne.s32.totalorder (!%p244_p7), %s1693_s21, 0 }
  0x29   : > { %s2319_s9 = smov (!%p280_p8, %s1571_s9), 511  ;;  %289 = sbr.rel (%p1574_p9) target bundleno = 63 (0x3f), region = 67 }
  0x2a   : > { %s1580_s11 = sshll.u32 %s2319_s9, 5 }
  0x2b   : > { %s1738_s14 = scalar_lea.vmem %s2310_s1, %s1580_s11 }
  0x2e   : > { %v1645_v16 = vmov 0.0  }
  0x2f   : > { %290 = vst [vmem:[#allocation2 + $0x30] sm:$0xff] %v1645_v16 }
  0x30   : > { %291 = vst [vmem:[#allocation2] sm:$0xff] %v1645_v16 }
  0x31   : > { %292 = vst [vmem:[#allocation2 + $0x58] sm:$0xff] %v1645_v16 }
  0x32   : > { %293 = vst [vmem:[#allocation2 + $0x18] sm:$0xff] %v1645_v16 }
  0x33   : > { %294 = vst [vmem:[#allocation2 + $0x50] sm:$0xff] %v1645_v16 }
  0x34   : > { %295 = vst [vmem:[#allocation2 + $0x68] sm:$0xff] %v1645_v16 }
  0x35   : > { %296 = vst [vmem:[#allocation2 + $0x8] sm:$0xff] %v1645_v16 }
  0x36   : > { %297 = vst [vmem:[#allocation2 + $0x48] sm:$0xff] %v1645_v16 }
  0x37   : > { %298 = vst [vmem:[#allocation2 + $0x40] sm:$0xff] %v1645_v16 }
  0x38   : > { %299 = vst [vmem:[#allocation2 + $0x20] sm:$0xff] %v1645_v16 }
  0x39   : > { %300 = vst [vmem:[#allocation2 + $0x10] sm:$0xff] %v1645_v16 }
  0x3a   : > { %301 = vst [vmem:[#allocation2 + $0x38] sm:$0xff] %v1645_v16 }
  0x3b   : > { %302 = vst [vmem:[#allocation2 + $0x60] sm:$0xff] %v1645_v16 }
  0x3c   : > { %303 = vst [vmem:[#allocation2 + $0x70] sm:$0xff] %v1645_v16 }
  0x3d   : > { %304 = vst [vmem:[#allocation2 + $0x78] sm:$0xff] %v1645_v16 }
  0x3e   : > { %305 = vst [vmem:[#allocation2 + $0x28] sm:$0xff] %v1645_v16 }
  0x3f PF: > { %v526_v17 = vld [vmem:[%s1738_s14 + $0x5e0] sm:$0xff]  ;;  %v1806_v15 = vld [vmem:[%s1740_s15 + $0x10] sm:$0xff]  ;;  %v1809_v16 = vld [vmem:[%s1740_s15 + $0x18] sm:$0xff]  ;;  %p1575_p10 = scmp.ne.s32.totalorder %s1693_s21, 7 }
  0x40   : > { %v522_v18 = vld [vmem:[%s1738_s14 + $0x5c0] sm:$0xff]  ;;  %652 = vmatpush.msra.mxu2 %v526_v17  ;;  %v527_v17 = vld [vmem:[%s1738_s14 + $0x5e8] sm:$0xff] }
  0x41   : > { %v590_v19 = vld [vmem:[%s1738_s14 + $0x7e0] sm:$0xff] }
  0x42   : > { %681 = vmatpush.msra.mxu3 %v590_v19  ;;  %v398_v20 = vld [vmem:[%s1738_s14 + $0x1e0] sm:$0xff]  ;;  %653 = vmatpush.msra.mxu2 %v522_v18  ;;  %v591_v18 = vld [vmem:[%s1738_s14 + $0x7e8] sm:$0xff] }
  0x43   : > { %v462_v21 = vld [vmem:[%s1738_s14 + $0x3e0] sm:$0xff]  ;;  %594 = vmatpush.msra.mxu0 %v398_v20 }
  0x44   : > { %v518_v22 = vld [vmem:[%s1738_s14 + $0x5a0] sm:$0xff]  ;;  %623 = vmatpush.msra.mxu1 %v462_v21  ;;  %v523_v21 = vld [vmem:[%s1738_s14 + $0x5c8] sm:$0xff] }
  0x45   : > { %v586_v23 = vld [vmem:[%s1738_s14 + $0x7c0] sm:$0xff]  ;;  %654 = vmatpush.msra.mxu2 %v518_v22 }
  0x46   : > { %v394_v24 = vld [vmem:[%s1738_s14 + $0x1c0] sm:$0xff]  ;;  %682 = vmatpush.msra.mxu3 %v586_v23  ;;  %v1822_v23 = vld [vmem:[%s1740_s15 + $0x8] sm:$0xff] }
  0x47   : > { %v458_v25 = vld [vmem:[%s1738_s14 + $0x3c0] sm:$0xff]  ;;  %595 = vmatpush.msra.mxu0 %v394_v24  ;;  %v399_v24 = vld [vmem:[%s1738_s14 + $0x1e8] sm:$0xff] }
  0x48   : > { %v582_v26 = vld [vmem:[%s1738_s14 + $0x7a0] sm:$0xff]  ;;  %624 = vmatpush.msra.mxu1 %v458_v25  ;;  %v463_v25 = vld [vmem:[%s1738_s14 + $0x3e8] sm:$0xff] }
  0x49   : > { %v390_v27 = vld [vmem:[%s1738_s14 + $0x1a0] sm:$0xff]  ;;  %683 = vmatpush.msra.mxu3 %v582_v26  ;;  %v519_v26 = vld [vmem:[%s1738_s14 + $0x5a8] sm:$0xff] }
  0x4a   : > { %v514_v28 = vld [vmem:[%s1738_s14 + $0x580] sm:$0xff]  ;;  %596 = vmatpush.msra.mxu0 %v390_v27  ;;  %v587_v27 = vld [vmem:[%s1738_s14 + $0x7c8] sm:$0xff] }
  0x4b   : > { %v454_v29 = vld [vmem:[%s1738_s14 + $0x3a0] sm:$0xff]  ;;  %655 = vmatpush.msra.mxu2 %v514_v28  ;;  %v395_v28 = vld [vmem:[%s1738_s14 + $0x1c8] sm:$0xff] }
  0x4c   : > { %v578_v30 = vld [vmem:[%s1738_s14 + $0x780] sm:$0xff]  ;;  %625 = vmatpush.msra.mxu1 %v454_v29  ;;  %v459_v29 = vld [vmem:[%s1738_s14 + $0x3c8] sm:$0xff] }
  0x4d   : > { %v386_v31 = vld [vmem:[%s1738_s14 + $0x180] sm:$0xff]  ;;  %684 = vmatpush.msra.mxu3 %v578_v30  ;;  %v515_v30 = vld [vmem:[%s1738_s14 + $0x588] sm:$0xff] }
  0x4e   : > { %v450_v32 = vld [vmem:[%s1738_s14 + $0x380] sm:$0xff]  ;;  %597 = vmatpush.msra.mxu0 %v386_v31  ;;  %v583_v31 = vld [vmem:[%s1738_s14 + $0x7a8] sm:$0xff] }
  0x4f   : > { %v510_v33 = vld [vmem:[%s1738_s14 + $0x560] sm:$0xff]  ;;  %626 = vmatpush.msra.mxu1 %v450_v32  ;;  %v1835_v32 = vld [vmem:[%s1740_s15 + $0x30] sm:$0xff] }
  0x50   : > { %v574_v34 = vld [vmem:[%s1738_s14 + $0x760] sm:$0xff]  ;;  %656 = vmatpush.msra.mxu2 %v510_v33  ;;  %v391_v33 = vld [vmem:[%s1738_s14 + $0x1a8] sm:$0xff] }
  0x51   : > { %v382_v35 = vld [vmem:[%s1738_s14 + $0x160] sm:$0xff]  ;;  %685 = vmatpush.msra.mxu3 %v574_v34  ;;  %v455_v34 = vld [vmem:[%s1738_s14 + $0x3a8] sm:$0xff] }
  0x52   : > { %v446_v36 = vld [vmem:[%s1738_s14 + $0x360] sm:$0xff]  ;;  %598 = vmatpush.msra.mxu0 %v382_v35  ;;  %v511_v35 = vld [vmem:[%s1738_s14 + $0x568] sm:$0xff] }
  0x53   : > { %v506_v37 = vld [vmem:[%s1738_s14 + $0x540] sm:$0xff]  ;;  %627 = vmatpush.msra.mxu1 %v446_v36  ;;  %v579_v36 = vld [vmem:[%s1738_s14 + $0x788] sm:$0xff] }
  0x54   : > { %v570_v38 = vld [vmem:[%s1738_s14 + $0x740] sm:$0xff]  ;;  %657 = vmatpush.msra.mxu2 %v506_v37  ;;  %v1843_v37 = vld [vmem:[%s1740_s15 + $0x38] sm:$0xff] }
  0x55   : > { %v378_v39 = vld [vmem:[%s1738_s14 + $0x140] sm:$0xff]  ;;  %686 = vmatpush.msra.mxu3 %v570_v38  ;;  %v387_v38 = vld [vmem:[%s1738_s14 + $0x188] sm:$0xff] }
  0x56   : > { %v442_v40 = vld [vmem:[%s1738_s14 + $0x340] sm:$0xff]  ;;  %599 = vmatpush.msra.mxu0 %v378_v39  ;;  %v451_v39 = vld [vmem:[%s1738_s14 + $0x388] sm:$0xff] }
  0x57   : > { %v502_v41 = vld [vmem:[%s1738_s14 + $0x520] sm:$0xff]  ;;  %628 = vmatpush.msra.mxu1 %v442_v40  ;;  %v507_v40 = vld [vmem:[%s1738_s14 + $0x548] sm:$0xff] }
  0x58   : > { %v566_v42 = vld [vmem:[%s1738_s14 + $0x720] sm:$0xff]  ;;  %658 = vmatpush.msra.mxu2 %v502_v41  ;;  %v575_v41 = vld [vmem:[%s1738_s14 + $0x768] sm:$0xff] }
  0x59   : > { %v374_v43 = vld [vmem:[%s1738_s14 + $0x120] sm:$0xff]  ;;  %687 = vmatpush.msra.mxu3 %v566_v42 }
  0x5a   : > { %v438_v44 = vld [vmem:[%s1738_s14 + $0x320] sm:$0xff]  ;;  %600 = vmatpush.msra.mxu0 %v374_v43  ;;  %v1854_v43 = vld [vmem:[%s1740_s15 + $0x28] sm:$0xff] }
  0x5b   : > { %v498_v45 = vld [vmem:[%s1738_s14 + $0x500] sm:$0xff]  ;;  %629 = vmatpush.msra.mxu1 %v438_v44  ;;  %v383_v44 = vld [vmem:[%s1738_s14 + $0x168] sm:$0xff] }
  0x5c   : > { %v562_v46 = vld [vmem:[%s1738_s14 + $0x700] sm:$0xff]  ;;  %659 = vmatpush.msra.mxu2 %v498_v45  ;;  %v447_v45 = vld [vmem:[%s1738_s14 + $0x368] sm:$0xff] }
  0x5d   : > { %v370_v47 = vld [vmem:[%s1738_s14 + $0x100] sm:$0xff]  ;;  %688 = vmatpush.msra.mxu3 %v562_v46  ;;  %v503_v46 = vld [vmem:[%s1738_s14 + $0x528] sm:$0xff] }
  0x5e   : > { %v434_v48 = vld [vmem:[%s1738_s14 + $0x300] sm:$0xff]  ;;  %601 = vmatpush.msra.mxu0 %v370_v47  ;;  %v571_v47 = vld [vmem:[%s1738_s14 + $0x748] sm:$0xff] }
  0x5f   : > { %v494_v49 = vld [vmem:[%s1738_s14 + $0x4e0] sm:$0xff]  ;;  %630 = vmatpush.msra.mxu1 %v434_v48  ;;  %v379_v48 = vld [vmem:[%s1738_s14 + $0x148] sm:$0xff] }
  0x60   : > { %v558_v50 = vld [vmem:[%s1738_s14 + $0x6e0] sm:$0xff]  ;;  %660 = vmatpush.msra.mxu2 %v494_v49  ;;  %v443_v49 = vld [vmem:[%s1738_s14 + $0x348] sm:$0xff] }
  0x61   : > { %v366_v51 = vld [vmem:[%s1738_s14 + $0xe0] sm:$0xff]  ;;  %689 = vmatpush.msra.mxu3 %v558_v50  ;;  %v499_v50 = vld [vmem:[%s1738_s14 + $0x508] sm:$0xff] }
  0x62   : > { %v430_v52 = vld [vmem:[%s1738_s14 + $0x2e0] sm:$0xff]  ;;  %602 = vmatpush.msra.mxu0 %v366_v51  ;;  %v567_v51 = vld [vmem:[%s1738_s14 + $0x728] sm:$0xff] }
  0x63   : > { %v490_v53 = vld [vmem:[%s1738_s14 + $0x4c0] sm:$0xff]  ;;  %631 = vmatpush.msra.mxu1 %v430_v52  ;;  %v1867_v52 = vld [vmem:[%s1740_s15 + $0x50] sm:$0xff] }
  0x64   : > { %v554_v54 = vld [vmem:[%s1738_s14 + $0x6c0] sm:$0xff]  ;;  %661 = vmatpush.msra.mxu2 %v490_v53  ;;  %v375_v53 = vld [vmem:[%s1738_s14 + $0x128] sm:$0xff] }
  0x65   : > { %v362_v55 = vld [vmem:[%s1738_s14 + $0xc0] sm:$0xff]  ;;  %690 = vmatpush.msra.mxu3 %v554_v54  ;;  %v439_v54 = vld [vmem:[%s1738_s14 + $0x328] sm:$0xff] }
  0x66   : > { %v426_v56 = vld [vmem:[%s1738_s14 + $0x2c0] sm:$0xff]  ;;  %603 = vmatpush.msra.mxu0 %v362_v55  ;;  %v495_v55 = vld [vmem:[%s1738_s14 + $0x4e8] sm:$0xff] }
  0x67   : > { %v486_v57 = vld [vmem:[%s1738_s14 + $0x4a0] sm:$0xff]  ;;  %632 = vmatpush.msra.mxu1 %v426_v56  ;;  %v563_v56 = vld [vmem:[%s1738_s14 + $0x708] sm:$0xff] }
  0x68   : > { %v550_v58 = vld [vmem:[%s1738_s14 + $0x6a0] sm:$0xff]  ;;  %662 = vmatpush.msra.mxu2 %v486_v57  ;;  %v1875_v57 = vld [vmem:[%s1740_s15 + $0x58] sm:$0xff] }
  0x69   : > { %v358_v59 = vld [vmem:[%s1738_s14 + $0xa0] sm:$0xff]  ;;  %691 = vmatpush.msra.mxu3 %v550_v58  ;;  %v371_v58 = vld [vmem:[%s1738_s14 + $0x108] sm:$0xff] }
  0x6a   : > { %v422_v60 = vld [vmem:[%s1738_s14 + $0x2a0] sm:$0xff]  ;;  %604 = vmatpush.msra.mxu0 %v358_v59  ;;  %v435_v59 = vld [vmem:[%s1738_s14 + $0x308] sm:$0xff] }
  0x6b   : > { %v482_v61 = vld [vmem:[%s1738_s14 + $0x480] sm:$0xff]  ;;  %633 = vmatpush.msra.mxu1 %v422_v60  ;;  %v491_v60 = vld [vmem:[%s1738_s14 + $0x4c8] sm:$0xff] }
  0x6c   : > { %v546_v62 = vld [vmem:[%s1738_s14 + $0x680] sm:$0xff]  ;;  %663 = vmatpush.msra.mxu2 %v482_v61  ;;  %v559_v61 = vld [vmem:[%s1738_s14 + $0x6e8] sm:$0xff] }
  0x6d   : > { %v354_v63 = vld [vmem:[%s1738_s14 + $0x80] sm:$0xff]  ;;  %692 = vmatpush.msra.mxu3 %v546_v62 }
  0x6e   : > { %v418_v0 = vld [vmem:[%s1738_s14 + $0x280] sm:$0xff]  ;;  %605 = vmatpush.msra.mxu0 %v354_v63  ;;  %v1886_v63 = vld [vmem:[%s1740_s15 + $0x48] sm:$0xff] }
  0x6f   : > { %v478_v1 = vld [vmem:[%s1738_s14 + $0x460] sm:$0xff]  ;;  %634 = vmatpush.msra.mxu1 %v418_v0  ;;  %v367_v0 = vld [vmem:[%s1738_s14 + $0xe8] sm:$0xff] }
  0x70   : > { %v542_v2 = vld [vmem:[%s1738_s14 + $0x660] sm:$0xff]  ;;  %664 = vmatpush.msra.mxu2 %v478_v1  ;;  %v431_v1 = vld [vmem:[%s1738_s14 + $0x2e8] sm:$0xff] }
  0x71   : > { %v350_v3 = vld [vmem:[%s1738_s14 + $0x60] sm:$0xff]  ;;  %693 = vmatpush.msra.mxu3 %v542_v2  ;;  %v487_v2 = vld [vmem:[%s1738_s14 + $0x4a8] sm:$0xff] }
  0x72   : > { %v414_v4 = vld [vmem:[%s1738_s14 + $0x260] sm:$0xff]  ;;  %606 = vmatpush.msra.mxu0 %v350_v3  ;;  %v555_v3 = vld [vmem:[%s1738_s14 + $0x6c8] sm:$0xff] }
  0x73   : > { %v474_v5 = vld [vmem:[%s1738_s14 + $0x440] sm:$0xff]  ;;  %635 = vmatpush.msra.mxu1 %v414_v4  ;;  %v363_v4 = vld [vmem:[%s1738_s14 + $0xc8] sm:$0xff] }
  0x74   : > { %v538_v6 = vld [vmem:[%s1738_s14 + $0x640] sm:$0xff]  ;;  %665 = vmatpush.msra.mxu2 %v474_v5  ;;  %v427_v5 = vld [vmem:[%s1738_s14 + $0x2c8] sm:$0xff] }
  0x75   : > { %v346_v7 = vld [vmem:[%s1738_s14 + $0x40] sm:$0xff]  ;;  %694 = vmatpush.msra.mxu3 %v538_v6  ;;  %v483_v6 = vld [vmem:[%s1738_s14 + $0x488] sm:$0xff] }
  0x76   : > { %v410_v8 = vld [vmem:[%s1738_s14 + $0x240] sm:$0xff]  ;;  %607 = vmatpush.msra.mxu0 %v346_v7  ;;  %v551_v7 = vld [vmem:[%s1738_s14 + $0x6a8] sm:$0xff] }
  0x77   : > { %v470_v9 = vld [vmem:[%s1738_s14 + $0x420] sm:$0xff]  ;;  %636 = vmatpush.msra.mxu1 %v410_v8  ;;  %v1899_v8 = vld [vmem:[%s1740_s15 + $0x70] sm:$0xff] }
  0x78   : > { %v534_v10 = vld [vmem:[%s1738_s14 + $0x620] sm:$0xff]  ;;  %666 = vmatpush.msra.mxu2 %v470_v9  ;;  %v359_v9 = vld [vmem:[%s1738_s14 + $0xa8] sm:$0xff] }
  0x79   : > { %v342_v11 = vld [vmem:[%s1738_s14 + $0x20] sm:$0xff]  ;;  %695 = vmatpush.msra.mxu3 %v534_v10  ;;  %v423_v10 = vld [vmem:[%s1738_s14 + $0x2a8] sm:$0xff] }
  0x7a   : > { %v406_v12 = vld [vmem:[%s1738_s14 + $0x220] sm:$0xff]  ;;  %608 = vmatpush.msra.mxu0 %v342_v11  ;;  %v479_v11 = vld [vmem:[%s1738_s14 + $0x468] sm:$0xff] }
  0x7b   : > { %v466_v13 = vld [vmem:[%s1738_s14 + $0x400] sm:$0xff]  ;;  %637 = vmatpush.msra.mxu1 %v406_v12  ;;  %v547_v12 = vld [vmem:[%s1738_s14 + $0x688] sm:$0xff] }
  0x7c   : > { %v530_v14 = vld [vmem:[%s1738_s14 + $0x600] sm:$0xff]  ;;  %667 = vmatpush.msra.mxu2 %v466_v13  ;;  %v1907_v13 = vld [vmem:[%s1740_s15 + $0x78] sm:$0xff] }
  0x7d   : > { %696 = vmatpush.msra.mxu3 %v530_v14  ;;  %v338_v19 = vld [vmem:[%s1738_s14] sm:$0xff]  ;;  %668 = vmatmul.f32.vlgmr.msra.gmra.mxu2 %v1806_v15  ;;  %v355_v14 = vld [vmem:[%s1738_s14 + $0x88] sm:$0xff] }
  0x7e   : > { %v402_v20 = vld [vmem:[%s1738_s14 + $0x200] sm:$0xff]  ;;  %697 = vmatmul.f32.vlgmr.msra.gmra.mxu3 %v1809_v16  ;;  %768 = vmatpush.msrb.mxu2 %v527_v17  ;;  %v419_v17 = vld [vmem:[%s1738_s14 + $0x288] sm:$0xff] }
  0x7f   : > { %v1819_v22 = vld [vmem:[%s1740_s15] sm:$0xff]  ;;  %797 = vmatpush.msrb.mxu3 %v591_v18  ;;  %609 = vmatpush.msra.mxu0 %v338_v19  ;;  %v475_v18 = vld [vmem:[%s1738_s14 + $0x448] sm:$0xff] }
  0x80   : > { %638 = vmatpush.msra.mxu1 %v402_v20  ;;  %769 = vmatpush.msrb.mxu2 %v523_v21  ;;  %v1850_v42 = vld [vmem:[%s1740_s15 + $0x20] sm:$0xff]  ;;  %v543_v19 = vld [vmem:[%s1738_s14 + $0x668] sm:$0xff] }
  0x81   : > { %610 = vmatmul.f32.vlgmr.msra.gmra.mxu0 %v1819_v22  ;;  %639 = vmatmul.f32.vlgmr.msra.gmra.mxu1 %v1822_v23  ;;  %v1882_v62 = vld [vmem:[%s1740_s15 + $0x40] sm:$0xff]  ;;  %v1918_v21 = vld [vmem:[%s1740_s15 + $0x68] sm:$0xff] }
  0x82   : > { %710 = vmatpush.msrb.mxu0 %v399_v24  ;;  %739 = vmatpush.msrb.mxu1 %v463_v25  ;;  %v1914_v20 = vld [vmem:[%s1740_s15 + $0x60] sm:$0xff]  ;;  %v351_v24 = vld [vmem:[%s1738_s14 + $0x68] sm:$0xff] }
  0x83   : > { %770 = vmatpush.msrb.mxu2 %v519_v26  ;;  %798 = vmatpush.msrb.mxu3 %v587_v27  ;;  %v415_v25 = vld [vmem:[%s1738_s14 + $0x268] sm:$0xff] }
  0x84   : > { %711 = vmatpush.msrb.mxu0 %v395_v28  ;;  %740 = vmatpush.msrb.mxu1 %v459_v29  ;;  %v471_v26 = vld [vmem:[%s1738_s14 + $0x428] sm:$0xff] }
  0x85   : > { %771 = vmatpush.msrb.mxu2 %v515_v30  ;;  %799 = vmatpush.msrb.mxu3 %v583_v31  ;;  %v539_v27 = vld [vmem:[%s1738_s14 + $0x648] sm:$0xff] }
  0x86   : > { %671 = vmatmul.f32.gmra.mxu2 %v1835_v32  ;;  %712 = vmatpush.msrb.mxu0 %v391_v33  ;;  %v347_v28 = vld [vmem:[%s1738_s14 + $0x48] sm:$0xff] }
  0x87   : > { %741 = vmatpush.msrb.mxu1 %v455_v34  ;;  %772 = vmatpush.msrb.mxu2 %v511_v35  ;;  %v411_v29 = vld [vmem:[%s1738_s14 + $0x248] sm:$0xff] }
  0x88   : > { %800 = vmatpush.msrb.mxu3 %v579_v36  ;;  %713 = vmatpush.msrb.mxu0 %v387_v38  ;;  %v467_v30 = vld [vmem:[%s1738_s14 + $0x408] sm:$0xff]  ;;  %v528_v36 = vld [vmem:[%s1738_s14 + $0x5f0] sm:$0xff] }
  0x89   : > { %700 = vmatmul.f32.gmra.mxu3 %v1843_v37  ;;  %742 = vmatpush.msrb.mxu1 %v451_v39  ;;  %v535_v31 = vld [vmem:[%s1738_s14 + $0x628] sm:$0xff] }
  0x8a   : > { %773 = vmatpush.msrb.mxu2 %v507_v40  ;;  %801 = vmatpush.msrb.mxu3 %v575_v41  ;;  %v343_v33 = vld [vmem:[%s1738_s14 + $0x28] sm:$0xff]  ;;  %v524_v40 = vld [vmem:[%s1738_s14 + $0x5d0] sm:$0xff] }
  0x8b   : > { %613 = vmatmul.f32.gmra.mxu0 %v1850_v42  ;;  %642 = vmatmul.f32.gmra.mxu1 %v1854_v43  ;;  %v407_v34 = vld [vmem:[%s1738_s14 + $0x228] sm:$0xff]  ;;  %v592_v41 = vld [vmem:[%s1738_s14 + $0x7f0] sm:$0xff] }
  0x8c   : > { %714 = vmatpush.msrb.mxu0 %v383_v44  ;;  %743 = vmatpush.msrb.mxu1 %v447_v45  ;;  %v531_v35 = vld [vmem:[%s1738_s14 + $0x608] sm:$0xff]  ;;  %v400_v44 = vld [vmem:[%s1738_s14 + $0x1f0] sm:$0xff] }
  0x8d   : > { %774 = vmatpush.msrb.mxu2 %v503_v46  ;;  %802 = vmatpush.msrb.mxu3 %v571_v47  ;;  %v339_v38 = vld [vmem:[%s1738_s14 + $0x8] sm:$0xff]  ;;  %v464_v45 = vld [vmem:[%s1738_s14 + $0x3f0] sm:$0xff] }
  0x8e   : > { %715 = vmatpush.msrb.mxu0 %v379_v48  ;;  %744 = vmatpush.msrb.mxu1 %v443_v49  ;;  %v403_v39 = vld [vmem:[%s1738_s14 + $0x208] sm:$0xff]  ;;  %v520_v46 = vld [vmem:[%s1738_s14 + $0x5b0] sm:$0xff] }
  0x8f   : > { %775 = vmatpush.msrb.mxu2 %v499_v50  ;;  %803 = vmatpush.msrb.mxu3 %v567_v51  ;;  %v588_v47 = vld [vmem:[%s1738_s14 + $0x7d0] sm:$0xff] }
  0x90   : > { %674 = vmatmul.f32.gmra.mxu2 %v1867_v52  ;;  %716 = vmatpush.msrb.mxu0 %v375_v53  ;;  %v396_v48 = vld [vmem:[%s1738_s14 + $0x1d0] sm:$0xff] }
  0x91   : > { %745 = vmatpush.msrb.mxu1 %v439_v54  ;;  %776 = vmatpush.msrb.mxu2 %v495_v55  ;;  %v460_v49 = vld [vmem:[%s1738_s14 + $0x3d0] sm:$0xff] }
  0x92   : > { %804 = vmatpush.msrb.mxu3 %v563_v56  ;;  %717 = vmatpush.msrb.mxu0 %v371_v58  ;;  %v516_v50 = vld [vmem:[%s1738_s14 + $0x590] sm:$0xff] }
  0x93   : > { %703 = vmatmul.f32.gmra.mxu3 %v1875_v57  ;;  %746 = vmatpush.msrb.mxu1 %v435_v59  ;;  %v584_v51 = vld [vmem:[%s1738_s14 + $0x7b0] sm:$0xff] }
  0x94   : > { %777 = vmatpush.msrb.mxu2 %v491_v60  ;;  %805 = vmatpush.msrb.mxu3 %v559_v61  ;;  %v392_v53 = vld [vmem:[%s1738_s14 + $0x1b0] sm:$0xff] }
  0x95   : > { %616 = vmatmul.f32.gmra.mxu0 %v1882_v62  ;;  %645 = vmatmul.f32.gmra.mxu1 %v1886_v63  ;;  %v456_v54 = vld [vmem:[%s1738_s14 + $0x3b0] sm:$0xff] }
  0x96   : > { %718 = vmatpush.msrb.mxu0 %v367_v0  ;;  %747 = vmatpush.msrb.mxu1 %v431_v1  ;;  %v512_v55 = vld [vmem:[%s1738_s14 + $0x570] sm:$0xff] }
  0x97   : > { %778 = vmatpush.msrb.mxu2 %v487_v2  ;;  %806 = vmatpush.msrb.mxu3 %v555_v3  ;;  %v580_v56 = vld [vmem:[%s1738_s14 + $0x790] sm:$0xff] }
  0x98   : > { %719 = vmatpush.msrb.mxu0 %v363_v4  ;;  %748 = vmatpush.msrb.mxu1 %v427_v5  ;;  %v388_v58 = vld [vmem:[%s1738_s14 + $0x190] sm:$0xff] }
  0x99   : > { %779 = vmatpush.msrb.mxu2 %v483_v6  ;;  %807 = vmatpush.msrb.mxu3 %v551_v7  ;;  %v452_v59 = vld [vmem:[%s1738_s14 + $0x390] sm:$0xff] }
  0x9a   : > { %677 = vmatmul.f32.gmra.mxu2 %v1899_v8  ;;  %720 = vmatpush.msrb.mxu0 %v359_v9  ;;  %v508_v60 = vld [vmem:[%s1738_s14 + $0x550] sm:$0xff] }
  0x9b   : > { %749 = vmatpush.msrb.mxu1 %v423_v10  ;;  %780 = vmatpush.msrb.mxu2 %v479_v11  ;;  %v576_v61 = vld [vmem:[%s1738_s14 + $0x770] sm:$0xff] }
  0x9c   : > { %808 = vmatpush.msrb.mxu3 %v547_v12  ;;  %721 = vmatpush.msrb.mxu0 %v355_v14  ;;  %v384_v0 = vld [vmem:[%s1738_s14 + $0x170] sm:$0xff] }
  0x9d   : > { %706 = vmatmul.f32.gmra.mxu3 %v1907_v13  ;;  %750 = vmatpush.msrb.mxu1 %v419_v17  ;;  %v448_v1 = vld [vmem:[%s1738_s14 + $0x370] sm:$0xff] }
  0x9e   : > { %781 = vmatpush.msrb.mxu2 %v475_v18  ;;  %809 = vmatpush.msrb.mxu3 %v543_v19  ;;  %v504_v2 = vld [vmem:[%s1738_s14 + $0x530] sm:$0xff] }
  0x9f   : > { %619 = vmatmul.f32.gmra.mxu0 %v1914_v20  ;;  %648 = vmatmul.f32.gmra.mxu1 %v1918_v21  ;;  %v572_v3 = vld [vmem:[%s1738_s14 + $0x750] sm:$0xff] }
  0xa0   : > { %722 = vmatpush.msrb.mxu0 %v351_v24  ;;  %751 = vmatpush.msrb.mxu1 %v415_v25  ;;  %v380_v4 = vld [vmem:[%s1738_s14 + $0x150] sm:$0xff] }
  0xa1   : > { %782 = vmatpush.msrb.mxu2 %v471_v26  ;;  %810 = vmatpush.msrb.mxu3 %v539_v27  ;;  %v444_v5 = vld [vmem:[%s1738_s14 + $0x350] sm:$0xff] }
  0xa2   : > { %723 = vmatpush.msrb.mxu0 %v347_v28  ;;  %752 = vmatpush.msrb.mxu1 %v411_v29  ;;  %v500_v6 = vld [vmem:[%s1738_s14 + $0x510] sm:$0xff] }
  0xa3   : > { %783 = vmatpush.msrb.mxu2 %v467_v30  ;;  %811 = vmatpush.msrb.mxu3 %v535_v31  ;;  %v568_v7 = vld [vmem:[%s1738_s14 + $0x730] sm:$0xff] }
  0xa4   : > { %724 = vmatpush.msrb.mxu0 %v343_v33  ;;  %753 = vmatpush.msrb.mxu1 %v407_v34  ;;  %v376_v9 = vld [vmem:[%s1738_s14 + $0x130] sm:$0xff] }
  0xa5   : > { %784 = vmatmul.f32.vlgmr.msrb.gmra.mxu2 %v1806_v15  ;;  %812 = vmatpush.msrb.mxu3 %v531_v35  ;;  %v440_v10 = vld [vmem:[%s1738_s14 + $0x330] sm:$0xff] }
  0xa6   : > { %884 = vmatpush.msra.mxu2 %v528_v36  ;;  %725 = vmatpush.msrb.mxu0 %v339_v38  ;;  %v496_v11 = vld [vmem:[%s1738_s14 + $0x4f0] sm:$0xff] }
  0xa7   : > { %754 = vmatpush.msrb.mxu1 %v403_v39  ;;  %813 = vmatmul.f32.vlgmr.msrb.gmra.mxu3 %v1809_v16  ;;  %v564_v12 = vld [vmem:[%s1738_s14 + $0x710] sm:$0xff] }
  0xa8   : > { %885 = vmatpush.msra.mxu2 %v524_v40  ;;  %913 = vmatpush.msra.mxu3 %v592_v41  ;;  %v372_v14 = vld [vmem:[%s1738_s14 + $0x110] sm:$0xff] }
  0xa9   : > { %726 = vmatmul.f32.vlgmr.msrb.gmra.mxu0 %v1819_v22  ;;  %755 = vmatmul.f32.vlgmr.msrb.gmra.mxu1 %v1822_v23  ;;  %v436_v17 = vld [vmem:[%s1738_s14 + $0x310] sm:$0xff] }
  0xaa   : > { %826 = vmatpush.msra.mxu0 %v400_v44  ;;  %855 = vmatpush.msra.mxu1 %v464_v45  ;;  %v492_v18 = vld [vmem:[%s1738_s14 + $0x4d0] sm:$0xff] }
  0xab   : > { %886 = vmatpush.msra.mxu2 %v520_v46  ;;  %914 = vmatpush.msra.mxu3 %v588_v47  ;;  %v560_v19 = vld [vmem:[%s1738_s14 + $0x6f0] sm:$0xff] }
  0xac   : > { %827 = vmatpush.msra.mxu0 %v396_v48  ;;  %856 = vmatpush.msra.mxu1 %v460_v49  ;;  %v368_v24 = vld [vmem:[%s1738_s14 + $0xf0] sm:$0xff] }
  0xad   : > { %887 = vmatpush.msra.mxu2 %v516_v50  ;;  %915 = vmatpush.msra.mxu3 %v584_v51  ;;  %v432_v25 = vld [vmem:[%s1738_s14 + $0x2f0] sm:$0xff] }
  0xae   : > { %787 = vmatmul.f32.gmra.mxu2 %v1835_v32  ;;  %828 = vmatpush.msra.mxu0 %v392_v53  ;;  %v488_v26 = vld [vmem:[%s1738_s14 + $0x4b0] sm:$0xff] }
  0xaf   : > { %857 = vmatpush.msra.mxu1 %v456_v54  ;;  %888 = vmatpush.msra.mxu2 %v512_v55  ;;  %v556_v27 = vld [vmem:[%s1738_s14 + $0x6d0] sm:$0xff] }
  0xb0   : > { %916 = vmatpush.msra.mxu3 %v580_v56  ;;  %829 = vmatpush.msra.mxu0 %v388_v58  ;;  %v364_v28 = vld [vmem:[%s1738_s14 + $0xd0] sm:$0xff]  ;;  %v529_v56 = vld [vmem:[%s1738_s14 + $0x5f8] sm:$0xff] }
  0xb1   : > { %816 = vmatmul.f32.gmra.mxu3 %v1843_v37  ;;  %858 = vmatpush.msra.mxu1 %v452_v59  ;;  %v428_v29 = vld [vmem:[%s1738_s14 + $0x2d0] sm:$0xff] }
  0xb2   : > { %889 = vmatpush.msra.mxu2 %v508_v60  ;;  %917 = vmatpush.msra.mxu3 %v576_v61  ;;  %v484_v30 = vld [vmem:[%s1738_s14 + $0x490] sm:$0xff]  ;;  %v525_v60 = vld [vmem:[%s1738_s14 + $0x5d8] sm:$0xff] }
  0xb3   : > { %729 = vmatmul.f32.gmra.mxu0 %v1850_v42  ;;  %758 = vmatmul.f32.gmra.mxu1 %v1854_v43  ;;  %v552_v31 = vld [vmem:[%s1738_s14 + $0x6b0] sm:$0xff]  ;;  %v593_v61 = vld [vmem:[%s1738_s14 + $0x7f8] sm:$0xff] }
  0xb4   : > { %830 = vmatpush.msra.mxu0 %v384_v0  ;;  %859 = vmatpush.msra.mxu1 %v448_v1  ;;  %v360_v33 = vld [vmem:[%s1738_s14 + $0xb0] sm:$0xff]  ;;  %v401_v0 = vld [vmem:[%s1738_s14 + $0x1f8] sm:$0xff] }
  0xb5   : > { %890 = vmatpush.msra.mxu2 %v504_v2  ;;  %918 = vmatpush.msra.mxu3 %v572_v3  ;;  %v424_v34 = vld [vmem:[%s1738_s14 + $0x2b0] sm:$0xff]  ;;  %v465_v1 = vld [vmem:[%s1738_s14 + $0x3f8] sm:$0xff] }
  0xb6   : > { %831 = vmatpush.msra.mxu0 %v380_v4  ;;  %860 = vmatpush.msra.mxu1 %v444_v5  ;;  %v480_v35 = vld [vmem:[%s1738_s14 + $0x470] sm:$0xff]  ;;  %v521_v2 = vld [vmem:[%s1738_s14 + $0x5b8] sm:$0xff] }
  0xb7   : > { %891 = vmatpush.msra.mxu2 %v500_v6  ;;  %919 = vmatpush.msra.mxu3 %v568_v7  ;;  %v548_v36 = vld [vmem:[%s1738_s14 + $0x690] sm:$0xff]  ;;  %v589_v3 = vld [vmem:[%s1738_s14 + $0x7d8] sm:$0xff] }
  0xb8   : > { %790 = vmatmul.f32.gmra.mxu2 %v1867_v52  ;;  %832 = vmatpush.msra.mxu0 %v376_v9  ;;  %v356_v38 = vld [vmem:[%s1738_s14 + $0x90] sm:$0xff]  ;;  %v397_v4 = vld [vmem:[%s1738_s14 + $0x1d8] sm:$0xff] }
  0xb9   : > { %861 = vmatpush.msra.mxu1 %v440_v10  ;;  %892 = vmatpush.msra.mxu2 %v496_v11  ;;  %v420_v39 = vld [vmem:[%s1738_s14 + $0x290] sm:$0xff]  ;;  %v461_v5 = vld [vmem:[%s1738_s14 + $0x3d8] sm:$0xff] }
  0xba   : > { %920 = vmatpush.msra.mxu3 %v564_v12  ;;  %833 = vmatpush.msra.mxu0 %v372_v14  ;;  %v476_v40 = vld [vmem:[%s1738_s14 + $0x450] sm:$0xff]  ;;  %v517_v6 = vld [vmem:[%s1738_s14 + $0x598] sm:$0xff] }
  0xbb   : > { %819 = vmatmul.f32.gmra.mxu3 %v1875_v57  ;;  %862 = vmatpush.msra.mxu1 %v436_v17  ;;  %v544_v41 = vld [vmem:[%s1738_s14 + $0x670] sm:$0xff]  ;;  %v585_v7 = vld [vmem:[%s1738_s14 + $0x7b8] sm:$0xff] }
  0xbc   : > { %893 = vmatpush.msra.mxu2 %v492_v18  ;;  %921 = vmatpush.msra.mxu3 %v560_v19  ;;  %v352_v44 = vld [vmem:[%s1738_s14 + $0x70] sm:$0xff]  ;;  %v393_v9 = vld [vmem:[%s1738_s14 + $0x1b8] sm:$0xff] }
  0xbd   : > { %732 = vmatmul.f32.gmra.mxu0 %v1882_v62  ;;  %761 = vmatmul.f32.gmra.mxu1 %v1886_v63  ;;  %v416_v45 = vld [vmem:[%s1738_s14 + $0x270] sm:$0xff]  ;;  %v457_v10 = vld [vmem:[%s1738_s14 + $0x3b8] sm:$0xff] }
  0xbe   : > { %834 = vmatpush.msra.mxu0 %v368_v24  ;;  %863 = vmatpush.msra.mxu1 %v432_v25  ;;  %v472_v46 = vld [vmem:[%s1738_s14 + $0x430] sm:$0xff]  ;;  %v513_v11 = vld [vmem:[%s1738_s14 + $0x578] sm:$0xff] }
  0xbf   : > { %894 = vmatpush.msra.mxu2 %v488_v26  ;;  %922 = vmatpush.msra.mxu3 %v556_v27  ;;  %v540_v47 = vld [vmem:[%s1738_s14 + $0x650] sm:$0xff]  ;;  %v581_v12 = vld [vmem:[%s1738_s14 + $0x798] sm:$0xff] }
  0xc0   : > { %835 = vmatpush.msra.mxu0 %v364_v28  ;;  %864 = vmatpush.msra.mxu1 %v428_v29  ;;  %v348_v48 = vld [vmem:[%s1738_s14 + $0x50] sm:$0xff]  ;;  %v389_v14 = vld [vmem:[%s1738_s14 + $0x198] sm:$0xff] }
  0xc1   : > { %895 = vmatpush.msra.mxu2 %v484_v30  ;;  %923 = vmatpush.msra.mxu3 %v552_v31  ;;  %v412_v49 = vld [vmem:[%s1738_s14 + $0x250] sm:$0xff]  ;;  %v453_v17 = vld [vmem:[%s1738_s14 + $0x398] sm:$0xff] }
  0xc2   : > { %793 = vmatmul.f32.gmra.mxu2 %v1899_v8  ;;  %836 = vmatpush.msra.mxu0 %v360_v33  ;;  %v468_v50 = vld [vmem:[%s1738_s14 + $0x410] sm:$0xff]  ;;  %v509_v18 = vld [vmem:[%s1738_s14 + $0x558] sm:$0xff] }
  0xc3   : > { %865 = vmatpush.msra.mxu1 %v424_v34  ;;  %896 = vmatpush.msra.mxu2 %v480_v35  ;;  %v536_v51 = vld [vmem:[%s1738_s14 + $0x630] sm:$0xff]  ;;  %v577_v19 = vld [vmem:[%s1738_s14 + $0x778] sm:$0xff] }
  0xc4   : > { %924 = vmatpush.msra.mxu3 %v548_v36  ;;  %837 = vmatpush.msra.mxu0 %v356_v38  ;;  %v344_v53 = vld [vmem:[%s1738_s14 + $0x30] sm:$0xff]  ;;  %v385_v24 = vld [vmem:[%s1738_s14 + $0x178] sm:$0xff] }
  0xc5   : > { %822 = vmatmul.f32.gmra.mxu3 %v1907_v13  ;;  %866 = vmatpush.msra.mxu1 %v420_v39  ;;  %v408_v54 = vld [vmem:[%s1738_s14 + $0x230] sm:$0xff]  ;;  %v449_v25 = vld [vmem:[%s1738_s14 + $0x378] sm:$0xff] }
  0xc6   : > { %897 = vmatpush.msra.mxu2 %v476_v40  ;;  %925 = vmatpush.msra.mxu3 %v544_v41  ;;  %v532_v55 = vld [vmem:[%s1738_s14 + $0x610] sm:$0xff]  ;;  %v505_v26 = vld [vmem:[%s1738_s14 + $0x538] sm:$0xff] }
  0xc7   : > { %735 = vmatmul.f32.gmra.mxu0 %v1914_v20  ;;  %764 = vmatmul.f32.gmra.mxu1 %v1918_v21  ;;  %v340_v58 = vld [vmem:[%s1738_s14 + $0x10] sm:$0xff]  ;;  %v573_v27 = vld [vmem:[%s1738_s14 + $0x758] sm:$0xff] }
  0xc8   : > { %838 = vmatpush.msra.mxu0 %v352_v44  ;;  %867 = vmatpush.msra.mxu1 %v416_v45  ;;  %v404_v59 = vld [vmem:[%s1738_s14 + $0x210] sm:$0xff]  ;;  %v381_v28 = vld [vmem:[%s1738_s14 + $0x158] sm:$0xff] }
  0xc9   : > { %898 = vmatpush.msra.mxu2 %v472_v46  ;;  %926 = vmatpush.msra.mxu3 %v540_v47  ;;  %v445_v29 = vld [vmem:[%s1738_s14 + $0x358] sm:$0xff] }
  0xca   : > { %839 = vmatpush.msra.mxu0 %v348_v48  ;;  %868 = vmatpush.msra.mxu1 %v412_v49  ;;  %v501_v30 = vld [vmem:[%s1738_s14 + $0x518] sm:$0xff] }
  0xcb   : > { %899 = vmatpush.msra.mxu2 %v468_v50  ;;  %927 = vmatpush.msra.mxu3 %v536_v51  ;;  %v569_v31 = vld [vmem:[%s1738_s14 + $0x738] sm:$0xff] }
  0xcc   : > { %840 = vmatpush.msra.mxu0 %v344_v53  ;;  %869 = vmatpush.msra.mxu1 %v408_v54  ;;  %v377_v33 = vld [vmem:[%s1738_s14 + $0x138] sm:$0xff] }
  0xcd   : > { %900 = vmatmul.f32.vlgmr.msra.gmra.mxu2 %v1806_v15  ;;  %928 = vmatpush.msra.mxu3 %v532_v55  ;;  %v441_v34 = vld [vmem:[%s1738_s14 + $0x338] sm:$0xff] }
  0xce   : > { %1000 = vmatpush.msrb.mxu2 %v529_v56  ;;  %841 = vmatpush.msra.mxu0 %v340_v58  ;;  %v497_v35 = vld [vmem:[%s1738_s14 + $0x4f8] sm:$0xff] }
  0xcf   : > { %870 = vmatpush.msra.mxu1 %v404_v59  ;;  %929 = vmatmul.f32.vlgmr.msra.gmra.mxu3 %v1809_v16  ;;  %v565_v36 = vld [vmem:[%s1738_s14 + $0x718] sm:$0xff] }
  0xd0   : > { %1001 = vmatpush.msrb.mxu2 %v525_v60  ;;  %1029 = vmatpush.msrb.mxu3 %v593_v61  ;;  %v373_v38 = vld [vmem:[%s1738_s14 + $0x118] sm:$0xff] }
  0xd1   : > { %842 = vmatmul.f32.vlgmr.msra.gmra.mxu0 %v1819_v22  ;;  %871 = vmatmul.f32.vlgmr.msra.gmra.mxu1 %v1822_v23  ;;  %v437_v39 = vld [vmem:[%s1738_s14 + $0x318] sm:$0xff] }
  0xd2   : > { %942 = vmatpush.msrb.mxu0 %v401_v0  ;;  %971 = vmatpush.msrb.mxu1 %v465_v1  ;;  %v493_v40 = vld [vmem:[%s1738_s14 + $0x4d8] sm:$0xff] }
  0xd3   : > { %1002 = vmatpush.msrb.mxu2 %v521_v2  ;;  %1030 = vmatpush.msrb.mxu3 %v589_v3  ;;  %v561_v41 = vld [vmem:[%s1738_s14 + $0x6f8] sm:$0xff] }
  0xd4   : > { %943 = vmatpush.msrb.mxu0 %v397_v4  ;;  %972 = vmatpush.msrb.mxu1 %v461_v5  ;;  %v369_v44 = vld [vmem:[%s1738_s14 + $0xf8] sm:$0xff] }
  0xd5   : > { %1003 = vmatpush.msrb.mxu2 %v517_v6  ;;  %1031 = vmatpush.msrb.mxu3 %v585_v7  ;;  %v433_v45 = vld [vmem:[%s1738_s14 + $0x2f8] sm:$0xff] }
  0xd6   : > { %903 = vmatmul.f32.gmra.mxu2 %v1835_v32  ;;  %944 = vmatpush.msrb.mxu0 %v393_v9  ;;  %v489_v46 = vld [vmem:[%s1738_s14 + $0x4b8] sm:$0xff] }
  0xd7   : > { %973 = vmatpush.msrb.mxu1 %v457_v10  ;;  %1004 = vmatpush.msrb.mxu2 %v513_v11  ;;  %v557_v47 = vld [vmem:[%s1738_s14 + $0x6d8] sm:$0xff] }
  0xd8   : > { %1032 = vmatpush.msrb.mxu3 %v581_v12  ;;  %945 = vmatpush.msrb.mxu0 %v389_v14  ;;  %v365_v48 = vld [vmem:[%s1738_s14 + $0xd8] sm:$0xff] }
  0xd9   : > { %932 = vmatmul.f32.gmra.mxu3 %v1843_v37  ;;  %974 = vmatpush.msrb.mxu1 %v453_v17  ;;  %v429_v49 = vld [vmem:[%s1738_s14 + $0x2d8] sm:$0xff] }
  0xda   : > { %1005 = vmatpush.msrb.mxu2 %v509_v18  ;;  %1033 = vmatpush.msrb.mxu3 %v577_v19  ;;  %v485_v50 = vld [vmem:[%s1738_s14 + $0x498] sm:$0xff] }
  0xdb   : > { %845 = vmatmul.f32.gmra.mxu0 %v1850_v42  ;;  %874 = vmatmul.f32.gmra.mxu1 %v1854_v43  ;;  %v553_v51 = vld [vmem:[%s1738_s14 + $0x6b8] sm:$0xff] }
  0xdc   : > { %946 = vmatpush.msrb.mxu0 %v385_v24  ;;  %975 = vmatpush.msrb.mxu1 %v449_v25  ;;  %v361_v53 = vld [vmem:[%s1738_s14 + $0xb8] sm:$0xff] }
  0xdd   : > { %1006 = vmatpush.msrb.mxu2 %v505_v26  ;;  %1034 = vmatpush.msrb.mxu3 %v573_v27  ;;  %v425_v54 = vld [vmem:[%s1738_s14 + $0x2b8] sm:$0xff]  ;;  %v306_v26 = vld [vmem:[#allocation2 + $0x30] sm:$0xff] }
  0xde   : > { %947 = vmatpush.msrb.mxu0 %v381_v28  ;;  %976 = vmatpush.msrb.mxu1 %v445_v29  ;;  %v481_v55 = vld [vmem:[%s1738_s14 + $0x478] sm:$0xff]  ;;  %v310_v28 = vld [vmem:[#allocation2 + $0x50] sm:$0xff] }
  0xdf   : > { %1007 = vmatpush.msrb.mxu2 %v501_v30  ;;  %1035 = vmatpush.msrb.mxu3 %v569_v31  ;;  %v549_v56 = vld [vmem:[%s1738_s14 + $0x698] sm:$0xff] }
  0xe0   : > { %906 = vmatmul.f32.gmra.mxu2 %v1867_v52  ;;  %948 = vmatpush.msrb.mxu0 %v377_v33  ;;  %v357_v58 = vld [vmem:[%s1738_s14 + $0x98] sm:$0xff] }
  0xe1   : > { %977 = vmatpush.msrb.mxu1 %v441_v34  ;;  %1008 = vmatpush.msrb.mxu2 %v497_v35  ;;  %v421_v59 = vld [vmem:[%s1738_s14 + $0x298] sm:$0xff]  ;;  %v314_v34 = vld [vmem:[#allocation2 + $0x40] sm:$0xff] }
  0xe2   : > { %1036 = vmatpush.msrb.mxu3 %v565_v36  ;;  %949 = vmatpush.msrb.mxu0 %v373_v38  ;;  %v477_v60 = vld [vmem:[%s1738_s14 + $0x458] sm:$0xff] }
  0xe3   : > { %935 = vmatmul.f32.gmra.mxu3 %v1875_v57  ;;  %978 = vmatpush.msrb.mxu1 %v437_v39  ;;  %v545_v61 = vld [vmem:[%s1738_s14 + $0x678] sm:$0xff] }
  0xe4   : > { %1009 = vmatpush.msrb.mxu2 %v493_v40  ;;  %1037 = vmatpush.msrb.mxu3 %v561_v41  ;;  %v353_v0 = vld [vmem:[%s1738_s14 + $0x78] sm:$0xff]  ;;  %v318_v41 = vld [vmem:[#allocation2 + $0x60] sm:$0xff] }
  0xe5   : > { %848 = vmatmul.f32.gmra.mxu0 %v1882_v62  ;;  %877 = vmatmul.f32.gmra.mxu1 %v1886_v63  ;;  %v417_v1 = vld [vmem:[%s1738_s14 + $0x278] sm:$0xff] }
  0xe6   : > { %950 = vmatpush.msrb.mxu0 %v369_v44  ;;  %979 = vmatpush.msrb.mxu1 %v433_v45  ;;  %v473_v2 = vld [vmem:[%s1738_s14 + $0x438] sm:$0xff] }
  0xe7   : > { %1010 = vmatpush.msrb.mxu2 %v489_v46  ;;  %1038 = vmatpush.msrb.mxu3 %v557_v47  ;;  %v541_v3 = vld [vmem:[%s1738_s14 + $0x658] sm:$0xff] }
  0xe8   : > { %951 = vmatpush.msrb.mxu0 %v365_v48  ;;  %980 = vmatpush.msrb.mxu1 %v429_v49  ;;  %v349_v4 = vld [vmem:[%s1738_s14 + $0x58] sm:$0xff] }
  0xe9   : > { %1011 = vmatpush.msrb.mxu2 %v485_v50  ;;  %1039 = vmatpush.msrb.mxu3 %v553_v51  ;;  %v413_v5 = vld [vmem:[%s1738_s14 + $0x258] sm:$0xff]  ;;  %v307_v50 = vld [vmem:[#allocation2] sm:$0xff] }
  0xea   : > { %909 = vmatmul.f32.gmra.mxu2 %v1899_v8  ;;  %952 = vmatpush.msrb.mxu0 %v361_v53  ;;  %v469_v6 = vld [vmem:[%s1738_s14 + $0x418] sm:$0xff] }
  0xeb   : > { %981 = vmatpush.msrb.mxu1 %v425_v54  ;;  %1012 = vmatpush.msrb.mxu2 %v481_v55  ;;  %v537_v7 = vld [vmem:[%s1738_s14 + $0x638] sm:$0xff] }
  0xec   : > { %1040 = vmatpush.msrb.mxu3 %v549_v56  ;;  %953 = vmatpush.msrb.mxu0 %v357_v58  ;;  %v345_v9 = vld [vmem:[%s1738_s14 + $0x38] sm:$0xff] }
  0xed   : > { %938 = vmatmul.f32.gmra.mxu3 %v1907_v13  ;;  %982 = vmatpush.msrb.mxu1 %v421_v59  ;;  %v409_v10 = vld [vmem:[%s1738_s14 + $0x238] sm:$0xff] }
  0xee   : > { %1013 = vmatpush.msrb.mxu2 %v477_v60  ;;  %1041 = vmatpush.msrb.mxu3 %v545_v61  ;;  %v533_v11 = vld [vmem:[%s1738_s14 + $0x618] sm:$0xff] }
  0xef   : > { %851 = vmatmul.f32.gmra.mxu0 %v1914_v20  ;;  %880 = vmatmul.f32.gmra.mxu1 %v1918_v21  ;;  %v341_v12 = vld [vmem:[%s1738_s14 + $0x18] sm:$0xff] }
  0xf0   : > { %954 = vmatpush.msrb.mxu0 %v353_v0  ;;  %983 = vmatpush.msrb.mxu1 %v417_v1  ;;  %v405_v14 = vld [vmem:[%s1738_s14 + $0x218] sm:$0xff]  ;;  %v311_v0 = vld [vmem:[#allocation2 + $0x68] sm:$0xff] }
  0xf1   : > { %1014 = vmatpush.msrb.mxu2 %v473_v2  ;;  %1042 = vmatpush.msrb.mxu3 %v541_v3 }
  0xf2   : > { %955 = vmatpush.msrb.mxu0 %v349_v4  ;;  %984 = vmatpush.msrb.mxu1 %v413_v5 }
  0xf3   : > { %1015 = vmatpush.msrb.mxu2 %v469_v6  ;;  %1043 = vmatpush.msrb.mxu3 %v537_v7 }
  0xf4   : > { %956 = vmatpush.msrb.mxu0 %v345_v9  ;;  %985 = vmatpush.msrb.mxu1 %v409_v10  ;;  %v315_v10 = vld [vmem:[#allocation2 + $0x20] sm:$0xff] }
  0xf5   : > { %1016 = vmatmul.f32.vlgmr.msrb.gmra.mxu2 %v1806_v15  ;;  %1044 = vmatpush.msrb.mxu3 %v533_v11 }
  0xf6   : > { %957 = vmatpush.msrb.mxu0 %v341_v12  ;;  %986 = vmatpush.msrb.mxu1 %v405_v14 }
  0xf7   : > { %1045 = vmatmul.f32.vlgmr.msrb.gmra.mxu3 %v1809_v16  ;;  %958 = vmatmul.f32.vlgmr.msrb.gmra.mxu0 %v1819_v22 }
  0xf8   : > { %987 = vmatmul.f32.vlgmr.msrb.gmra.mxu1 %v1822_v23 }
  0xfd   : > { %1019 = vmatmul.f32.gmra.mxu2 %v1835_v32 }
  0xfe   : > { %v611_v17 = vpop.f32.mrf.mxu0  ;;  %v640_v18 = vpop.f32.mrf.mxu1 }
  0xff   : > { %1048 = vmatmul.f32.gmra.mxu3 %v1843_v37  ;;  %961 = vmatmul.f32.gmra.mxu0 %v1850_v42  ;;  %v641_v15 = vadd.f32 %v640_v18, %v611_v17 }
 0x100   : > { %990 = vmatmul.f32.gmra.mxu1 %v1854_v43  ;;  %v669_v19 = vpop.f32.mrf.mxu2 }
 0x101   : > { %v698_v24 = vpop.f32.mrf.mxu3  ;;  %v670_v25 = vadd.f32 %v669_v19, %v641_v15 }
 0x103   : > { %v699_v16 = vadd.f32 %v698_v24, %v670_v25  ;;  %v319_v25 = vld [vmem:[#allocation2 + $0x70] sm:$0xff] }
 0x105   : > { %1022 = vmatmul.f32.gmra.mxu2 %v1867_v52  ;;  %v1058_v22 = vadd.f32 %v699_v16, %v306_v26 }
 0x107   : > { %1051 = vmatmul.f32.gmra.mxu3 %v1875_v57  ;;  %964 = vmatmul.f32.gmra.mxu0 %v1882_v62  ;;  %1074 = vst [vmem:[#allocation2 + $0x30] sm:$0xff] %v1058_v22 }
 0x108   : > { %993 = vmatmul.f32.gmra.mxu1 %v1886_v63  ;;  %v614_v23 = vpop.f32.mrf.mxu0  ;;  %v643_v32 = vpop.f32.mrf.mxu1 }
 0x109   : > { %v672_v37 = vpop.f32.mrf.mxu2  ;;  %v644_v42 = vadd.f32 %v643_v32, %v614_v23 }
 0x10b   : > { %v673_v43 = vadd.f32 %v672_v37, %v644_v42 }
 0x10c   : > { %v701_v27 = vpop.f32.mrf.mxu3 }
 0x10d   : > { %1025 = vmatmul.f32.gmra.mxu2 %v1899_v8  ;;  %v702_v29 = vadd.f32 %v701_v27, %v673_v43  ;;  %v308_v43 = vld [vmem:[#allocation2 + $0x58] sm:$0xff] }
 0x10f   : > { %1054 = vmatmul.f32.gmra.mxu3 %v1907_v13  ;;  %967 = vmatmul.f32.gmra.mxu0 %v1914_v20  ;;  %v1062_v52 = vadd.f32 %v702_v29, %v310_v28 }
 0x110   : > { %996 = vmatmul.f32.gmra.mxu1 %v1918_v21 }
 0x111   : > { %1078 = vst [vmem:[#allocation2 + $0x50] sm:$0xff] %v1062_v52 }
 0x112   : > { %v617_v57 = vpop.f32.mrf.mxu0  ;;  %v646_v62 = vpop.f32.mrf.mxu1 }
 0x113   : > { %v675_v63 = vpop.f32.mrf.mxu2  ;;  %v647_v30 = vadd.f32 %v646_v62, %v617_v57 }
 0x115   : > { %v676_v31 = vadd.f32 %v675_v63, %v647_v30 }
 0x116   : > { %v704_v33 = vpop.f32.mrf.mxu3 }
 0x117   : > { %v705_v35 = vadd.f32 %v704_v33, %v676_v31  ;;  %v312_v33 = vld [vmem:[#allocation2 + $0x8] sm:$0xff] }
 0x119   : > { %v1066_v36 = vadd.f32 %v705_v35, %v314_v34 }
 0x11b   : > { %1082 = vst [vmem:[#allocation2 + $0x40] sm:$0xff] %v1066_v36 }
 0x11c   : > { %v620_v8 = vpop.f32.mrf.mxu0  ;;  %v649_v38 = vpop.f32.mrf.mxu1 }
 0x11d   : > { %v678_v39 = vpop.f32.mrf.mxu2  ;;  %v650_v13 = vadd.f32 %v649_v38, %v620_v8 }
 0x11f   : > { %v679_v40 = vadd.f32 %v678_v39, %v650_v13 }
 0x120   : > { %v707_v20 = vpop.f32.mrf.mxu3 }
 0x121   : > { %v708_v21 = vadd.f32 %v707_v20, %v679_v40  ;;  %v316_v20 = vld [vmem:[#allocation2 + $0x10] sm:$0xff] }
 0x123   : > { %v1070_v44 = vadd.f32 %v708_v21, %v318_v41 }
 0x125   : > { %1086 = vst [vmem:[#allocation2 + $0x60] sm:$0xff] %v1070_v44 }
 0x126   : > { %v727_v45 = vpop.f32.mrf.mxu0  ;;  %v756_v46 = vpop.f32.mrf.mxu1 }
 0x127   : > { %v757_v47 = vadd.f32 %v756_v46, %v727_v45 }
 0x128   : > { %v785_v48 = vpop.f32.mrf.mxu2 }
 0x129   : > { %v786_v49 = vadd.f32 %v785_v48, %v757_v47 }
 0x12a   : > { %v814_v51 = vpop.f32.mrf.mxu3 }
 0x12b   : > { %v815_v53 = vadd.f32 %v814_v51, %v786_v49 }
 0x12d   : > { %v1059_v54 = vadd.f32 %v815_v53, %v307_v50  ;;  %v320_v50 = vld [vmem:[#allocation2 + $0x78] sm:$0xff] }
 0x12f   : > { %1075 = vst [vmem:[#allocation2] sm:$0xff] %v1059_v54 }
 0x130   : > { %v730_v55 = vpop.f32.mrf.mxu0  ;;  %v759_v56 = vpop.f32.mrf.mxu1 }
 0x131   : > { %v788_v58 = vpop.f32.mrf.mxu2  ;;  %v760_v59 = vadd.f32 %v759_v56, %v730_v55 }
 0x133   : > { %v789_v60 = vadd.f32 %v788_v58, %v760_v59 }
 0x134   : > { %v817_v61 = vpop.f32.mrf.mxu3 }
 0x135   : > { %v818_v1 = vadd.f32 %v817_v61, %v789_v60  ;;  %v309_v60 = vld [vmem:[#allocation2 + $0x18] sm:$0xff] }
 0x137   : > { %v1063_v2 = vadd.f32 %v818_v1, %v311_v0 }
 0x139   : > { %1079 = vst [vmem:[#allocation2 + $0x68] sm:$0xff] %v1063_v2 }
 0x13a   : > { %v733_v3 = vpop.f32.mrf.mxu0  ;;  %v762_v4 = vpop.f32.mrf.mxu1 }
 0x13b   : > { %v791_v5 = vpop.f32.mrf.mxu2  ;;  %v763_v6 = vadd.f32 %v762_v4, %v733_v3 }
 0x13d   : > { %v792_v7 = vadd.f32 %v791_v5, %v763_v6 }
 0x13e   : > { %v820_v9 = vpop.f32.mrf.mxu3 }
 0x13f   : > { %v821_v11 = vadd.f32 %v820_v9, %v792_v7  ;;  %v313_v7 = vld [vmem:[#allocation2 + $0x48] sm:$0xff] }
 0x141   : > { %v1067_v12 = vadd.f32 %v821_v11, %v315_v10 }
 0x143   : > { %1083 = vst [vmem:[#allocation2 + $0x20] sm:$0xff] %v1067_v12 }
 0x144   : > { %v736_v14 = vpop.f32.mrf.mxu0  ;;  %v765_v17 = vpop.f32.mrf.mxu1 }
 0x145   : > { %v794_v18 = vpop.f32.mrf.mxu2  ;;  %v766_v15 = vadd.f32 %v765_v17, %v736_v14 }
 0x147   : > { %v795_v19 = vadd.f32 %v794_v18, %v766_v15 }
 0x148   : > { %v823_v24 = vpop.f32.mrf.mxu3 }
 0x149   : > { %v824_v26 = vadd.f32 %v823_v24, %v795_v19  ;;  %v317_v19 = vld [vmem:[#allocation2 + $0x38] sm:$0xff] }
 0x14b   : > { %v1071_v16 = vadd.f32 %v824_v26, %v319_v25 }
 0x14d   : > { %1087 = vst [vmem:[#allocation2 + $0x70] sm:$0xff] %v1071_v16 }
 0x14e   : > { %v843_v22 = vpop.f32.mrf.mxu0  ;;  %v872_v23 = vpop.f32.mrf.mxu1 }
 0x14f   : > { %v873_v32 = vadd.f32 %v872_v23, %v843_v22 }
 0x150   : > { %v901_v37 = vpop.f32.mrf.mxu2 }
 0x151   : > { %v902_v42 = vadd.f32 %v901_v37, %v873_v32 }
 0x152   : > { %v930_v27 = vpop.f32.mrf.mxu3 }
 0x153   : > { %v931_v28 = vadd.f32 %v930_v27, %v902_v42  ;;  %v321_v42 = vld [vmem:[#allocation2 + $0x28] sm:$0xff] }
 0x155   : > { %v1060_v29 = vadd.f32 %v931_v28, %v308_v43 }
 0x157   : > { %1076 = vst [vmem:[#allocation2 + $0x58] sm:$0xff] %v1060_v29 }
 0x158   : > { %v846_v52 = vpop.f32.mrf.mxu0  ;;  %v875_v57 = vpop.f32.mrf.mxu1 }
 0x159   : > { %v904_v62 = vpop.f32.mrf.mxu2  ;;  %v876_v63 = vadd.f32 %v875_v57, %v846_v52 }
 0x15b   : > { %v905_v30 = vadd.f32 %v904_v62, %v876_v63 }
 0x15c   : > { %v933_v31 = vpop.f32.mrf.mxu3 }
 0x15d   : > { %v934_v34 = vadd.f32 %v933_v31, %v905_v30 }
 0x15f   : > { %v1064_v35 = vadd.f32 %v934_v34, %v312_v33 }
 0x161   : > { %1080 = vst [vmem:[#allocation2 + $0x8] sm:$0xff] %v1064_v35 }
 0x162   : > { %v849_v36 = vpop.f32.mrf.mxu0  ;;  %v878_v8 = vpop.f32.mrf.mxu1 }
 0x163   : > { %v907_v38 = vpop.f32.mrf.mxu2  ;;  %v879_v39 = vadd.f32 %v878_v8, %v849_v36 }
 0x165   : > { %v908_v13 = vadd.f32 %v907_v38, %v879_v39 }
 0x166   : > { %v936_v40 = vpop.f32.mrf.mxu3 }
 0x167   : > { %v937_v41 = vadd.f32 %v936_v40, %v908_v13 }
 0x169   : > { %v1068_v21 = vadd.f32 %v937_v41, %v316_v20 }
 0x16b   : > { %1084 = vst [vmem:[#allocation2 + $0x10] sm:$0xff] %v1068_v21 }
 0x16c   : > { %v852_v44 = vpop.f32.mrf.mxu0  ;;  %v881_v45 = vpop.f32.mrf.mxu1 }
 0x16d   : > { %v910_v46 = vpop.f32.mrf.mxu2  ;;  %v882_v47 = vadd.f32 %v881_v45, %v852_v44 }
 0x16f   : > { %v911_v48 = vadd.f32 %v910_v46, %v882_v47 }
 0x170   : > { %v939_v49 = vpop.f32.mrf.mxu3 }
 0x171   : > { %v940_v51 = vadd.f32 %v939_v49, %v911_v48 }
 0x173   : > { %v1072_v53 = vadd.f32 %v940_v51, %v320_v50 }
 0x174   : > { %v959_v54 = vpop.f32.mrf.mxu0 }
 0x175   : > { %v988_v55 = vpop.f32.mrf.mxu1  ;;  %1088 = vst [vmem:[#allocation2 + $0x78] sm:$0xff] %v1072_v53 }
 0x176   : > { %v989_v56 = vadd.f32 %v988_v55, %v959_v54 }
 0x178   : > { %v1017_v58 = vpop.f32.mrf.mxu2 }
 0x179   : > { %v1018_v59 = vadd.f32 %v1017_v58, %v989_v56 }
 0x17a   : > { %v1046_v61 = vpop.f32.mrf.mxu3 }
 0x17b   : > { %v1047_v0 = vadd.f32 %v1046_v61, %v1018_v59 }
 0x17c   : > { %v962_v2 = vpop.f32.mrf.mxu0 }
 0x17d   : > { %v1061_v1 = vadd.f32 %v1047_v0, %v309_v60  ;;  %v991_v3 = vpop.f32.mrf.mxu1 }
 0x17e   : > { %v992_v4 = vadd.f32 %v991_v3, %v962_v2 }
 0x17f   : > { %1077 = vst [vmem:[#allocation2 + $0x18] sm:$0xff] %v1061_v1 }
 0x180   : > { %v1020_v5 = vpop.f32.mrf.mxu2 }
 0x181   : > { %v1021_v6 = vadd.f32 %v1020_v5, %v992_v4 }
 0x182   : > { %v1049_v9 = vpop.f32.mrf.mxu3 }
 0x183   : > { %v1050_v10 = vadd.f32 %v1049_v9, %v1021_v6 }
 0x184   : > { %v965_v12 = vpop.f32.mrf.mxu0 }
 0x185   : > { %v1065_v11 = vadd.f32 %v1050_v10, %v313_v7  ;;  %v994_v14 = vpop.f32.mrf.mxu1 }
 0x186   : > { %v995_v17 = vadd.f32 %v994_v14, %v965_v12 }
 0x187   : > { %1081 = vst [vmem:[#allocation2 + $0x48] sm:$0xff] %v1065_v11 }
 0x188   : > { %v1023_v18 = vpop.f32.mrf.mxu2 }
 0x189   : > { %v1024_v15 = vadd.f32 %v1023_v18, %v995_v17 }
 0x18a   : > { %v1052_v24 = vpop.f32.mrf.mxu3 }
 0x18b   : > { %v1053_v25 = vadd.f32 %v1052_v24, %v1024_v15 }
 0x18c   : > { %v968_v16 = vpop.f32.mrf.mxu0 }
 0x18d   : > { %v1069_v26 = vadd.f32 %v1053_v25, %v317_v19  ;;  %v997_v22 = vpop.f32.mrf.mxu1 }
 0x18e   : > { %v998_v23 = vadd.f32 %v997_v22, %v968_v16 }
 0x18f   : > { %1085 = vst [vmem:[#allocation2 + $0x38] sm:$0xff] %v1069_v26 }
 0x190   : > { %v1026_v32 = vpop.f32.mrf.mxu2 }
 0x191   : > { %v1027_v37 = vadd.f32 %v1026_v32, %v998_v23 }
 0x192   : > { %v1055_v43 = vpop.f32.mrf.mxu3 }
 0x193   : > { %v1056_v27 = vadd.f32 %v1055_v43, %v1027_v37  ;;  %1093 = sbr.rel (%p1575_p10) target bundleno = 675 (0x2a3), region = 71 }
 0x195   : > { %v1073_v28 = vadd.f32 %v1056_v27, %v321_v42 }
 0x197   : > { %1089 = vst [vmem:[#allocation2 + $0x28] sm:$0xff] %v1073_v28 }
 0x198   : > { %v2112_v29 = vld [vmem:[#allocation2 + $0x30] sm:$0xff]  ;;  %v2114_v52 = vld [vmem:[#allocation2] sm:$0xff]  ;;  %v2116_v57 = vld [vmem:[#allocation2 + $0x58] sm:$0xff]  ;;  %v1646_v31 = vmov 32.0  }
 0x199   : > { %v2118_v62 = vld [vmem:[#allocation2 + $0x18] sm:$0xff]  ;;  %v2120_v63 = vld [vmem:[#allocation2 + $0x50] sm:$0xff]  ;;  %v2122_v30 = vld [vmem:[#allocation2 + $0x68] sm:$0xff]  ;;  %1607 = vrcp.f32 %v1646_v31 }
 0x19a   : > { %v2124_v33 = vld [vmem:[#allocation2 + $0x8] sm:$0xff]  ;;  %v2128_v35 = vld [vmem:[#allocation2 + $0x40] sm:$0xff]  ;;  %v1112_v36 = vadd.f32 %v2120_v63, %v2112_v29  ;;  %v1121_v8 = vadd.f32 %v2122_v30, %v2114_v52  ;;  %v1104_v39 = vld [vmem:[#allocation2 + $0x10] sm:$0xff] }
 0x19b   : > { %v2126_v34 = vld [vmem:[#allocation2 + $0x48] sm:$0xff]  ;;  %v1103_v38 = vld [vmem:[#allocation2 + $0x20] sm:$0xff]  ;;  %v1105_v13 = vld [vmem:[#allocation2 + $0x38] sm:$0xff]  ;;  %v1130_v40 = vadd.f32 %v2124_v33, %v2116_v57 }
 0x19c   : > { %v1139_v20 = vadd.f32 %v2126_v34, %v2118_v62  ;;  %v1106_v41 = vld [vmem:[#allocation2 + $0x60] sm:$0xff]  ;;  %v1107_v21 = vld [vmem:[#allocation2 + $0x70] sm:$0xff]  ;;  %v1108_v44 = vld [vmem:[#allocation2 + $0x78] sm:$0xff]  ;;  %v1113_v45 = vadd.f32 %v1112_v36, %v2128_v35  ;;  %v1122_v46 = vadd.f32 %v1121_v8, %v1103_v38 }
 0x19d   : > { %v1131_v48 = vadd.f32 %v1130_v40, %v1104_v39 }
 0x19e   : > { %v1109_v47 = vld [vmem:[#allocation2 + $0x28] sm:$0xff]  ;;  %v1140_v49 = vadd.f32 %v1139_v20, %v1105_v13  ;;  %v1114_v50 = vadd.f32 %v1113_v45, %v1106_v41  ;;  %v1123_v51 = vadd.f32 %v1122_v46, %v1107_v21 }
 0x19f   : > { %v1608_v53 = vpop.eup %1607  ;;  %v1132_v54 = vadd.f32 %v1131_v48, %v1108_v44 }
 0x1a0   : > { %v1141_v55 = vadd.f32 %v1140_v49, %v1109_v47  ;;  %v1115_v56 = vrot.slane %v1114_v50, 4  ;;  %v1124_v58 = vrot.slane %v1123_v51, 4  ;;  %v1149_v59 = vmul.f32 32.0, %v1608_v53 }
 0x1a1   : > { %v1133_v60 = vrot.slane %v1132_v54, 4  ;;  %vm1153_vm0 = vweird.f32 %v1608_v53 }
 0x1a2   : > { %v1142_v61 = vrot.slane %v1141_v55, 4  ;;  %v1116_v0 = vadd.f32 %v1115_v56, %v1114_v50  ;;  %v1125_v1 = vadd.f32 %v1124_v58, %v1123_v51  ;;  %v1150_v2 = vsub.f32 1.0, %v1149_v59 }
 0x1a3   : > { %v1134_v3 = vadd.f32 %v1133_v60, %v1132_v54 }
 0x1a4   : > { %v1143_v4 = vadd.f32 %v1142_v61, %v1141_v55  ;;  %v1117_v5 = vrot.slane %v1116_v0, 2  ;;  %v1126_v6 = vrot.slane %v1125_v1, 2  ;;  %v1151_v7 = vmul.f32 %v1608_v53, %v1150_v2 }
 0x1a5   : > { %v1135_v9 = vrot.slane %v1134_v3, 2 }
 0x1a6   : > { %v1144_v10 = vrot.slane %v1143_v4, 2  ;;  %v1118_v11 = vadd.f32 %v1117_v5, %v1116_v0  ;;  %v1127_v12 = vadd.f32 %v1126_v6, %v1125_v1  ;;  %v1152_v14 = vadd.f32 %v1608_v53, %v1151_v7 }
 0x1a7   : > { %v1136_v17 = vadd.f32 %v1135_v9, %v1134_v3 }
 0x1a8   : > { %v1145_v18 = vadd.f32 %v1144_v10, %v1143_v4  ;;  %v1119_v15 = vrot.slane %v1118_v11, 1  ;;  %v1128_v19 = vrot.slane %v1127_v12, 1  ;;  %v2139_v26 = vsel %vm1153_vm0, %v1608_v53, %v1152_v14 }
 0x1a9   : > { %v1137_v24 = vrot.slane %v1136_v17, 1 }
 0x1aa   : > { %v1146_v25 = vrot.slane %v1145_v18, 1  ;;  %v1120_v16 = vadd.f32 %v1119_v15, %v1118_v11  ;;  %v1129_v22 = vadd.f32 %v1128_v19, %v1127_v12 }
 0x1ab   : > { %v1138_v23 = vadd.f32 %v1137_v24, %v1136_v17 }
 0x1ac   : > { %v1147_v32 = vadd.f32 %v1146_v25, %v1145_v18  ;;  %v1155_v37 = vmul.f32 %v2139_v26, %v1120_v16  ;;  %v1156_v42 = vmul.f32 %v2139_v26, %v1129_v22 }
 0x1ad   : > { %v1157_v43 = vmul.f32 %v2139_v26, %v1138_v23 }
 0x1ae   : > { %v1158_v27 = vmul.f32 %v2139_v26, %v1147_v32  ;;  %v2146_v28 = vsub.f32 %v2112_v29, %v1155_v37  ;;  %v2149_v31 = vsub.f32 %v2114_v52, %v1156_v42  ;;  %v2152_v36 = vsub.f32 %v2120_v63, %v1155_v37 }
 0x1af   : > { %v2155_v8 = vsub.f32 %v2122_v30, %v1156_v42  ;;  %v2158_v40 = vsub.f32 %v2116_v57, %v1157_v43  ;;  %v2164_v45 = vsub.f32 %v2124_v33, %v1157_v43  ;;  %v2170_v52 = vsub.f32 %v2128_v35, %v1155_v37 }
 0x1b0   : > { %v2161_v20 = vsub.f32 %v2118_v62, %v1158_v27  ;;  %v2167_v29 = vsub.f32 %v2126_v34, %v1158_v27  ;;  %v2172_v63 = vsub.f32 %v1103_v38, %v1156_v42  ;;  %v2174_v46 = vsub.f32 %v1104_v39, %v1157_v43 }
 0x1b1   : > { %v2176_v30 = vsub.f32 %v1105_v13, %v1158_v27  ;;  %v2178_v57 = vsub.f32 %v1106_v41, %v1155_v37  ;;  %v2180_v48 = vsub.f32 %v1107_v21, %v1156_v42  ;;  %v2182_v62 = vsub.f32 %v1108_v44, %v1157_v43 }
 0x1b2   : > { %v2184_v33 = vsub.f32 %v1109_v47, %v1158_v27  ;;  %v1175_v34 = vmul.f32 %v2146_v28, %v2146_v28  ;;  %v1176_v35 = vmul.f32 %v2149_v31, %v2149_v31  ;;  %v1177_v38 = vmul.f32 %v2158_v40, %v2158_v40 }
 0x1b3   : > { %v1178_v39 = vmul.f32 %v2161_v20, %v2161_v20  ;;  %v1179_v13 = vmul.f32 %v2152_v36, %v2152_v36  ;;  %v1180_v41 = vmul.f32 %v2155_v8, %v2155_v8  ;;  %v1181_v21 = vmul.f32 %v2164_v45, %v2164_v45 }
 0x1b4   : > { %v1182_v44 = vmul.f32 %v2167_v29, %v2167_v29  ;;  %v1183_v47 = vmul.f32 %v2170_v52, %v2170_v52  ;;  %v1184_v49 = vmul.f32 %v2172_v63, %v2172_v63  ;;  %v1185_v50 = vmul.f32 %v2174_v46, %v2174_v46 }
 0x1b5   : > { %v1186_v51 = vmul.f32 %v2176_v30, %v2176_v30  ;;  %v1187_v53 = vmul.f32 %v2178_v57, %v2178_v57  ;;  %v1188_v54 = vmul.f32 %v2180_v48, %v2180_v48  ;;  %v1189_v55 = vmul.f32 %v2182_v62, %v2182_v62 }
 0x1b6   : > { %v1190_v56 = vmul.f32 %v2184_v33, %v2184_v33  ;;  %v1191_v58 = vadd.f32 %v1179_v13, %v1175_v34  ;;  %v1200_v59 = vadd.f32 %v1180_v41, %v1176_v35  ;;  %v1209_v60 = vadd.f32 %v1181_v21, %v1177_v38 }
 0x1b7   : > { %v1218_v61 = vadd.f32 %v1182_v44, %v1178_v39 }
 0x1b8   : > { %v1192_v0 = vadd.f32 %v1191_v58, %v1183_v47  ;;  %v1201_v1 = vadd.f32 %v1200_v59, %v1184_v49  ;;  %v1210_v2 = vadd.f32 %v1209_v60, %v1185_v50 }
 0x1b9   : > { %v1219_v3 = vadd.f32 %v1218_v61, %v1186_v51 }
 0x1ba   : > { %v1193_v4 = vadd.f32 %v1192_v0, %v1187_v53  ;;  %v1202_v5 = vadd.f32 %v1201_v1, %v1188_v54  ;;  %v1211_v6 = vadd.f32 %v1210_v2, %v1189_v55 }
 0x1bb   : > { %v1220_v7 = vadd.f32 %v1219_v3, %v1190_v56  ;;  %v1110_v56 = vld [vmem:[%s2311_s2] sm:$0xf] }
 0x1bc   : > { %v1194_v9 = vrot.slane %v1193_v4, 4  ;;  %v1203_v10 = vrot.slane %v1202_v5, 4  ;;  %v1212_v11 = vrot.slane %v1211_v6, 4  ;;  %v2225_v3 = vperm.slane %v1110_v56, 0 }
 0x1bd   : > { %v1221_v12 = vrot.slane %v1220_v7, 4 }
 0x1be   : > { %v1195_v14 = vadd.f32 %v1194_v9, %v1193_v4  ;;  %v1204_v17 = vadd.f32 %v1203_v10, %v1202_v5  ;;  %v1213_v18 = vadd.f32 %v1212_v11, %v1211_v6  ;;  %v2227_v4 = vperm.slane %v1110_v56, 1  ;;  %v1111_v10 = vld [vmem:[%s2312_s3] sm:$0xf] }
 0x1bf   : > { %v1222_v15 = vadd.f32 %v1221_v12, %v1220_v7 }
 0x1c0   : > { %v1196_v19 = vrot.slane %v1195_v14, 2  ;;  %v1205_v24 = vrot.slane %v1204_v17, 2  ;;  %v1214_v25 = vrot.slane %v1213_v18, 2 }
 0x1c1   : > { %v1223_v16 = vrot.slane %v1222_v15, 2 }
 0x1c2   : > { %v1197_v22 = vadd.f32 %v1196_v19, %v1195_v14  ;;  %v1206_v23 = vadd.f32 %v1205_v24, %v1204_v17  ;;  %v1215_v32 = vadd.f32 %v1214_v25, %v1213_v18  ;;  %v1294_v19 = vperm.slane %v1110_v56, 2 }
 0x1c3   : > { %v1224_v37 = vadd.f32 %v1223_v16, %v1222_v15  ;;  %v1295_v24 = vperm.slane %v1110_v56, 3 }
 0x1c4   : > { %v1198_v42 = vrot.slane %v1197_v22, 1  ;;  %v1207_v43 = vrot.slane %v1206_v23, 1  ;;  %v1216_v27 = vrot.slane %v1215_v32, 1 }
 0x1c5   : > { %v1225_v34 = vrot.slane %v1224_v37, 1 }
 0x1c6   : > { %v1199_v35 = vadd.f32 %v1198_v42, %v1197_v22  ;;  %v1208_v38 = vadd.f32 %v1207_v43, %v1206_v23  ;;  %v1217_v39 = vadd.f32 %v1216_v27, %v1215_v32  ;;  %v1317_v22 = vperm.slane %v1111_v10, 0 }
 0x1c7   : > { %v1226_v13 = vadd.f32 %v1225_v34, %v1224_v37  ;;  %v1318_v23 = vperm.slane %v1111_v10, 1  ;;  %v1319_v42 = vperm.slane %v1111_v10, 2  ;;  %v1320_v43 = vperm.slane %v1111_v10, 3 }
 0x1c8   : > { %v1227_v41 = vmul.f32 %v1199_v35, %v2139_v26  ;;  %v1228_v21 = vmul.f32 %v1208_v38, %v2139_v26  ;;  %v1229_v44 = vmul.f32 %v1217_v39, %v2139_v26 }
 0x1c9   : > { %v1230_v47 = vmul.f32 %v1226_v13, %v2139_v26 }
 0x1ca   : > { %v1231_v49 = vadd.f32 1e-05, %v1227_v41  ;;  %v1232_v50 = vadd.f32 1e-05, %v1228_v21  ;;  %v1233_v51 = vadd.f32 1e-05, %v1229_v44 }
 0x1cb   : > { %v1234_v53 = vadd.f32 1e-05, %v1230_v47 }
 0x1cc   : > { %1609 = vrsqrt.f32 %v1231_v49  ;;  %vm1241_vm1 = vweird.f32 %v1231_v49  ;;  %vm1251_vm3 = vweird.f32 %v1232_v50  ;;  %vm1261_vm5 = vweird.f32 %v1233_v51 }
 0x1cd   : > { %1611 = vrsqrt.f32 %v1232_v50  ;;  %vm1271_vm8 = vweird.f32 %v1234_v53 }
 0x1ce   : > { %1613 = vrsqrt.f32 %v1233_v51 }
 0x1cf   : > { %1615 = vrsqrt.f32 %v1234_v53 }
 0x1d2   : > { %v1610_v54 = vpop.eup %1609 }
 0x1d3   : > { %v1612_v55 = vpop.eup %1611  ;;  %v1236_v58 = vmul.f32 %v1610_v54, %v1231_v49  ;;  %vm1242_vm2 = vweird.f32 %v1610_v54 }
 0x1d4   : > { %v1614_v59 = vpop.eup %1613  ;;  %v1246_v60 = vmul.f32 %v1612_v55, %v1232_v50  ;;  %vm1252_vm4 = vweird.f32 %v1612_v55  ;;  %vm1243_vm7 = vmor %vm1241_vm1, %vm1242_vm2 }
 0x1d5   : > { %v1616_v61 = vpop.eup %1615  ;;  %v1237_v0 = vmul.f32 %v1610_v54, %v1236_v58  ;;  %v1256_v26 = vmul.f32 %v1614_v59, %v1233_v51  ;;  %vm1262_vm6 = vweird.f32 %v1614_v59  ;;  %vm1253_vm10 = vmor %vm1251_vm3, %vm1252_vm4 }
 0x1d6   : > { %v1247_v1 = vmul.f32 %v1612_v55, %v1246_v60  ;;  %v1266_v2 = vmul.f32 %v1616_v61, %v1234_v53  ;;  %vm1272_vm9 = vweird.f32 %v1616_v61  ;;  %vm1263_vm11 = vmor %vm1261_vm5, %vm1262_vm6 }
 0x1d7   : > { %v1238_v5 = vmul.f32 0.5, %v1237_v0  ;;  %v1257_v6 = vmul.f32 %v1614_v59, %v1256_v26  ;;  %vm1273_vm12 = vmor %vm1271_vm8, %vm1272_vm9 }
 0x1d8   : > { %v1248_v7 = vmul.f32 0.5, %v1247_v1  ;;  %v1267_v9 = vmul.f32 %v1616_v61, %v1266_v2 }
 0x1d9   : > { %v1239_v11 = vsub.f32 1.5, %v1238_v5  ;;  %v1258_v12 = vmul.f32 0.5, %v1257_v6 }
 0x1da   : > { %v1249_v14 = vsub.f32 1.5, %v1248_v7  ;;  %v1268_v17 = vmul.f32 0.5, %v1267_v9 }
 0x1db   : > { %v1240_v18 = vmul.f32 %v1610_v54, %v1239_v11  ;;  %v1259_v15 = vsub.f32 1.5, %v1258_v12 }
 0x1dc   : > { %v1250_v25 = vmul.f32 %v1612_v55, %v1249_v14  ;;  %v1269_v16 = vsub.f32 1.5, %v1268_v17 }
 0x1dd   : > { %v1244_v32 = vsel %vm1243_vm7, %v1610_v54, %v1240_v18  ;;  %v1260_v37 = vmul.f32 %v1614_v59, %v1259_v15 }
 0x1de   : > { %v1254_v27 = vsel %vm1253_vm10, %v1612_v55, %v1250_v25  ;;  %v1270_v34 = vmul.f32 %v1616_v61, %v1269_v16  ;;  %v1275_v35 = vmul.f32 %v1244_v32, %v2146_v28  ;;  %v1279_v38 = vmul.f32 %v1244_v32, %v2152_v36 }
 0x1df   : > { %v1264_v39 = vsel %vm1263_vm11, %v1614_v59, %v1260_v37  ;;  %v1276_v13 = vmul.f32 %v1254_v27, %v2149_v31  ;;  %v1280_v41 = vmul.f32 %v1254_v27, %v2155_v8  ;;  %v1283_v21 = vmul.f32 %v1244_v32, %v2170_v52 }
 0x1e0   : > { %v1274_v44 = vsel %vm1273_vm12, %v1616_v61, %v1270_v34  ;;  %v1277_v47 = vmul.f32 %v1264_v39, %v2158_v40  ;;  %v1281_v49 = vmul.f32 %v1264_v39, %v2164_v45  ;;  %v1284_v50 = vmul.f32 %v1254_v27, %v2172_v63 }
 0x1e1   : > { %v1278_v51 = vmul.f32 %v1274_v44, %v2161_v20  ;;  %v1282_v28 = vmul.f32 %v1274_v44, %v2167_v29  ;;  %v1285_v36 = vmul.f32 %v1264_v39, %v2174_v46  ;;  %v1286_v53 = vmul.f32 %v1274_v44, %v2176_v30 }
 0x1e2   : > { %v1287_v31 = vmul.f32 %v1244_v32, %v2178_v57  ;;  %v1288_v8 = vmul.f32 %v1254_v27, %v2180_v48  ;;  %v1289_v52 = vmul.f32 %v1264_v39, %v2182_v62  ;;  %v1290_v40 = vmul.f32 %v1274_v44, %v2184_v33 }
 0x1e3   : > { %v1300_v45 = vmul.f32 %v2225_v3, %v1275_v35  ;;  %v1301_v63 = vmul.f32 %v2227_v4, %v1276_v13  ;;  %v1302_v54 = vmul.f32 %v1294_v19, %v1277_v47  ;;  %v1303_v20 = vmul.f32 %v1295_v24, %v1278_v51  ;;  %v1391_v51 = vld [vmem:[%s2313_s4 + $0x10] sm:$0xff] }
 0x1e4   : > { %v1304_v29 = vmul.f32 %v2225_v3, %v1279_v38  ;;  %v1305_v46 = vmul.f32 %v2227_v4, %v1280_v41  ;;  %v1306_v55 = vmul.f32 %v1294_v19, %v1281_v49  ;;  %v1307_v30 = vmul.f32 %v1295_v24, %v1282_v28  ;;  %v1389_v49 = vld [vmem:[%s2313_s4] sm:$0xff] }
 0x1e5   : > { %v1308_v57 = vmul.f32 %v2225_v3, %v1283_v21  ;;  %v1309_v48 = vmul.f32 %v2227_v4, %v1284_v50  ;;  %v1310_v56 = vmul.f32 %v1294_v19, %v1285_v36  ;;  %v1311_v62 = vmul.f32 %v1295_v24, %v1286_v53  ;;  %v1390_v50 = vld [vmem:[%s2313_s4 + $0x8] sm:$0xff] }
 0x1e6   : > { %v1312_v33 = vmul.f32 %v2225_v3, %v1287_v31  ;;  %v1313_v58 = vmul.f32 %v2227_v4, %v1288_v8  ;;  %v1314_v59 = vmul.f32 %v1294_v19, %v1289_v52  ;;  %v1315_v60 = vmul.f32 %v1295_v24, %v1290_v40  ;;  %v1392_v8 = vld [vmem:[%s2313_s4 + $0x18] sm:$0xff]  ;;  %v1393_v52 = vld [vmem:[%s2313_s4 + $0x20] sm:$0xff]  ;;  %v1394_v40 = vld [vmem:[%s2313_s4 + $0x28] sm:$0xff] }
 0x1e7   : > { %v1325_v61 = vadd.f32 %v1317_v22, %v1300_v45  ;;  %v1326_v0 = vadd.f32 %v1318_v23, %v1301_v63  ;;  %v1327_v26 = vadd.f32 %v1319_v42, %v1302_v54  ;;  %v1328_v1 = vadd.f32 %v1320_v43, %v1303_v20 }
 0x1e8   : > { %v1329_v2 = vadd.f32 %v1317_v22, %v1304_v29  ;;  %v1330_v5 = vadd.f32 %v1318_v23, %v1305_v46  ;;  %v1331_v6 = vadd.f32 %v1319_v42, %v1306_v55  ;;  %v1332_v7 = vadd.f32 %v1320_v43, %v1307_v30  ;;  %v1395_v29 = vld [vmem:[%s2313_s4 + $0x30] sm:$0xff]  ;;  %v1396_v46 = vld [vmem:[%s2313_s4 + $0x38] sm:$0xff] }
 0x1e9   : > { %v1333_v9 = vadd.f32 %v1317_v22, %v1308_v57  ;;  %v1334_v10 = vadd.f32 %v1318_v23, %v1309_v48  ;;  %v1335_v11 = vadd.f32 %v1319_v42, %v1310_v56  ;;  %v1336_v12 = vadd.f32 %v1320_v43, %v1311_v62 }
 0x1ea   : > { %v1337_v14 = vadd.f32 %v1317_v22, %v1312_v33  ;;  %v1338_v17 = vadd.f32 %v1318_v23, %v1313_v58  ;;  %v1339_v18 = vadd.f32 %v1319_v42, %v1314_v59  ;;  %v1340_v3 = vadd.f32 %v1320_v43, %v1315_v60 }
 0x1eb   : > { %vm1341_vm13 = vcmp.gt.f32.partialorder %v1325_v61, 0.0  ;;  %vm1342_vm14 = vcmp.gt.f32.partialorder %v1326_v0, 0.0  ;;  %vm1343_vm15 = vcmp.gt.f32.partialorder %v1327_v26, 0.0  ;;  %vm1344_vm0 = vcmp.gt.f32.partialorder %v1328_v1, 0.0 }
 0x1ec   : > { %vm1345_vm1 = vcmp.gt.f32.partialorder %v1329_v2, 0.0  ;;  %vm1346_vm2 = vcmp.gt.f32.partialorder %v1330_v5, 0.0  ;;  %vm1347_vm3 = vcmp.gt.f32.partialorder %v1331_v6, 0.0  ;;  %vm1348_vm4 = vcmp.gt.f32.partialorder %v1332_v7, 0.0 }
 0x1ed   : > { %vm1349_vm5 = vcmp.gt.f32.partialorder %v1333_v9, 0.0  ;;  %vm1350_vm6 = vcmp.gt.f32.partialorder %v1334_v10, 0.0  ;;  %vm1351_vm7 = vcmp.gt.f32.partialorder %v1335_v11, 0.0  ;;  %vm1352_vm8 = vcmp.gt.f32.partialorder %v1336_v12, 0.0 }
 0x1ee   : > { %vm1353_vm9 = vcmp.gt.f32.partialorder %v1337_v14, 0.0  ;;  %vm1354_vm10 = vcmp.gt.f32.partialorder %v1338_v17, 0.0  ;;  %vm1355_vm11 = vcmp.gt.f32.partialorder %v1339_v18, 0.0  ;;  %vm1356_vm12 = vcmp.gt.f32.partialorder %v1340_v3, 0.0 }
 0x1ef   : > { %v1357_v4 = vmul.f32 0.2, %v1325_v61  ;;  %v1358_v15 = vmul.f32 0.2, %v1326_v0  ;;  %v1359_v19 = vmul.f32 0.2, %v1327_v26 }
 0x1f0   : > { %v1360_v24 = vmul.f32 0.2, %v1328_v1  ;;  %v1361_v25 = vmul.f32 0.2, %v1329_v2  ;;  %v1362_v16 = vmul.f32 0.2, %v1330_v5 }
 0x1f1   : > { %v1363_v22 = vmul.f32 0.2, %v1331_v6  ;;  %v1364_v23 = vmul.f32 0.2, %v1332_v7  ;;  %v1365_v32 = vmul.f32 0.2, %v1333_v9  ;;  %v1373_v37 = vsel %vm1341_vm13, %v1325_v61, %v1357_v4 }
 0x1f2   : > { %v1366_v42 = vmul.f32 0.2, %v1334_v10  ;;  %v1367_v43 = vmul.f32 0.2, %v1335_v11  ;;  %v1368_v27 = vmul.f32 0.2, %v1336_v12  ;;  %v1374_v34 = vsel %vm1342_vm14, %v1326_v0, %v1358_v15 }
 0x1f3   : > { %v1369_v35 = vmul.f32 0.2, %v1337_v14  ;;  %v1370_v38 = vmul.f32 0.2, %v1338_v17  ;;  %v1371_v39 = vmul.f32 0.2, %v1339_v18  ;;  %v1375_v13 = vsel %vm1343_vm15, %v1327_v26, %v1359_v19 }
 0x1f4   : > { %v1372_v41 = vmul.f32 0.2, %v1340_v3  ;;  %v1376_v21 = vsel %vm1344_vm0, %v1328_v1, %v1360_v24  ;;  %v1377_v44 = vsel %vm1345_vm1, %v1329_v2, %v1361_v25  ;;  %v1378_v47 = vsel %vm1346_vm2, %v1330_v5, %v1362_v16 }
 0x1f5   : > { %v1379_v28 = vsel %vm1347_vm3, %v1331_v6, %v1363_v22  ;;  %v1380_v36 = vsel %vm1348_vm4, %v1332_v7, %v1364_v23  ;;  %v1381_v53 = vsel %vm1349_vm5, %v1333_v9, %v1365_v32  ;;  %v1382_v31 = vsel %vm1350_vm6, %v1334_v10, %v1366_v42 }
 0x1f6   : > { %v1383_v45 = vsel %vm1351_vm7, %v1335_v11, %v1367_v43  ;;  %v1384_v63 = vsel %vm1352_vm8, %v1336_v12, %v1368_v27  ;;  %v1385_v54 = vsel %vm1353_vm9, %v1337_v14, %v1369_v35  ;;  %v1386_v20 = vsel %vm1354_vm10, %v1338_v17, %v1370_v38 }
 0x1f7   : > { %v1387_v55 = vsel %vm1355_vm11, %v1339_v18, %v1371_v39  ;;  %v1388_v30 = vsel %vm1356_vm12, %v1340_v3, %v1372_v41  ;;  %v1397_v57 = vmul.f32 %v1389_v49, %v1373_v37  ;;  %v1398_v48 = vmul.f32 %v1390_v50, %v1374_v34 }
 0x1f8   : > { %v1399_v56 = vmul.f32 %v1391_v51, %v1375_v13  ;;  %v1400_v62 = vmul.f32 %v1392_v8, %v1376_v21  ;;  %v1401_v33 = vmul.f32 %v1393_v52, %v1377_v44  ;;  %v1402_v58 = vmul.f32 %v1394_v40, %v1378_v47 }
 0x1f9   : > { %v1403_v59 = vmul.f32 %v1395_v29, %v1379_v28  ;;  %v1404_v60 = vmul.f32 %v1396_v46, %v1380_v36  ;;  %v1405_v61 = vmul.f32 %v1389_v49, %v1381_v53  ;;  %v1406_v0 = vmul.f32 %v1390_v50, %v1382_v31 }
 0x1fa   : > { %v1407_v26 = vmul.f32 %v1391_v51, %v1383_v45  ;;  %v1408_v1 = vmul.f32 %v1392_v8, %v1384_v63  ;;  %v1409_v2 = vmul.f32 %v1393_v52, %v1385_v54  ;;  %v1410_v5 = vmul.f32 %v1394_v40, %v1386_v20 }
 0x1fb   : > { %v1411_v6 = vmul.f32 %v1395_v29, %v1387_v55  ;;  %v1412_v7 = vmul.f32 %v1396_v46, %v1388_v30  ;;  %v1413_v9 = vadd.f32 %v1401_v33, %v1397_v57  ;;  %v1420_v10 = vadd.f32 %v1402_v58, %v1398_v48 }
 0x1fc   : > { %v1427_v11 = vadd.f32 %v1403_v59, %v1399_v56  ;;  %v1434_v12 = vadd.f32 %v1404_v60, %v1400_v62  ;;  %v1441_v14 = vadd.f32 %v1409_v2, %v1405_v61  ;;  %v1448_v17 = vadd.f32 %v1410_v5, %v1406_v0 }
 0x1fd   : > { %v1414_v18 = vrot.slane %v1413_v9, 4  ;;  %v1421_v3 = vrot.slane %v1420_v10, 4  ;;  %v1455_v4 = vadd.f32 %v1411_v6, %v1407_v26  ;;  %v1462_v15 = vadd.f32 %v1412_v7, %v1408_v1 }
 0x1fe   : > { %v1428_v19 = vrot.slane %v1427_v11, 4  ;;  %v1435_v24 = vrot.slane %v1434_v12, 4  ;;  %v1442_v25 = vrot.slane %v1441_v14, 4  ;;  %v1449_v16 = vrot.slane %v1448_v17, 4 }
 0x1ff   : > { %v1415_v22 = vadd.f32 %v1414_v18, %v1413_v9  ;;  %v1422_v23 = vadd.f32 %v1421_v3, %v1420_v10  ;;  %v1456_v32 = vrot.slane %v1455_v4, 4  ;;  %v1463_v37 = vrot.slane %v1462_v15, 4 }
 0x200   : > { %v1429_v42 = vadd.f32 %v1428_v19, %v1427_v11  ;;  %v1436_v43 = vadd.f32 %v1435_v24, %v1434_v12  ;;  %v1443_v27 = vadd.f32 %v1442_v25, %v1441_v14  ;;  %v1450_v34 = vadd.f32 %v1449_v16, %v1448_v17 }
 0x201   : > { %v1416_v35 = vrot.slane %v1415_v22, 2  ;;  %v1423_v38 = vrot.slane %v1422_v23, 2  ;;  %v1457_v39 = vadd.f32 %v1456_v32, %v1455_v4  ;;  %v1464_v13 = vadd.f32 %v1463_v37, %v1462_v15 }
 0x202   : > { %v1430_v41 = vrot.slane %v1429_v42, 2  ;;  %v1437_v21 = vrot.slane %v1436_v43, 2  ;;  %v1444_v44 = vrot.slane %v1443_v27, 2  ;;  %v1451_v47 = vrot.slane %v1450_v34, 2 }
 0x203   : > { %v1417_v49 = vadd.f32 %v1416_v35, %v1415_v22  ;;  %v1424_v50 = vadd.f32 %v1423_v38, %v1422_v23  ;;  %v1458_v51 = vrot.slane %v1457_v39, 2  ;;  %v1465_v28 = vrot.slane %v1464_v13, 2 }
 0x204   : > { %v1431_v36 = vadd.f32 %v1430_v41, %v1429_v42  ;;  %v1438_v53 = vadd.f32 %v1437_v21, %v1436_v43  ;;  %v1445_v31 = vadd.f32 %v1444_v44, %v1443_v27  ;;  %v1452_v8 = vadd.f32 %v1451_v47, %v1450_v34 }
 0x205   : > { %v1418_v52 = vrot.slane %v1417_v49, 1  ;;  %v1425_v40 = vrot.slane %v1424_v50, 1  ;;  %v1459_v45 = vadd.f32 %v1458_v51, %v1457_v39  ;;  %v1466_v63 = vadd.f32 %v1465_v28, %v1464_v13 }
 0x206   : > { %v1432_v54 = vrot.slane %v1431_v36, 1  ;;  %v1439_v20 = vrot.slane %v1438_v53, 1  ;;  %v1446_v29 = vrot.slane %v1445_v31, 1  ;;  %v1453_v46 = vrot.slane %v1452_v8, 1 }
 0x207   : > { %v1419_v55 = vadd.f32 %v1418_v52, %v1417_v49  ;;  %v1426_v30 = vadd.f32 %v1425_v40, %v1424_v50  ;;  %v1460_v57 = vrot.slane %v1459_v45, 1  ;;  %v1467_v48 = vrot.slane %v1466_v63, 1 }
 0x208   : > { %v1433_v56 = vadd.f32 %v1432_v54, %v1431_v36  ;;  %v1440_v62 = vadd.f32 %v1439_v20, %v1438_v53  ;;  %v1447_v33 = vadd.f32 %v1446_v29, %v1445_v31  ;;  %v1454_v58 = vadd.f32 %v1453_v46, %v1452_v8 }
 0x209   : > { %v1461_v59 = vadd.f32 %v1460_v57, %v1459_v45  ;;  %v1468_v60 = vadd.f32 %v1467_v48, %v1466_v63  ;;  %vm1477_vm13 = vcmask 1041409   ;;  %vm1486_vm14 = vcmask 1041408  }
 0x20a   : > { %v1478_v61 = vsel %vm1477_vm13, %v1447_v33, %v1419_v55  ;;  %v1479_v0 = vsel %vm1477_vm13, %v1454_v58, %v1426_v30  ;;  %vm1515_vm2 = vcmask 1024  }
 0x20b   : > { %v1480_v26 = vsel %vm1477_vm13, %v1461_v59, %v1433_v56  ;;  %v1481_v1 = vsel %vm1477_vm13, %v1468_v60, %v1440_v62  ;;  %v1487_v2 = vsel %vm1486_vm14, %v1478_v61, 0.0  ;;  %v1488_v5 = vsel %vm1486_vm14, %v1479_v0, 0.0 }
 0x20c   : > { %v1489_v6 = vadd.f32 %v1488_v5, %v1487_v2  ;;  %v1490_v7 = vsel %vm1486_vm14, %v1480_v26, 0.0  ;;  %v1492_v9 = vsel %vm1486_vm14, %v1481_v1, 0.0 }
 0x20e   : > { %v1491_v10 = vadd.f32 %v1490_v7, %v1489_v6 }
 0x210   : > { %v1493_v11 = vadd.f32 %v1492_v9, %v1491_v10 }
 0x212   : > { %1494 = vadd.xlane.f32.xlu0 %v1493_v11 }
 0x285   : > { %v1495_v12 = vpop.xlane.xlu0 %1494 }
 0x286   : > { %v1576_v14 = vmul.f32 -1.442695, %v1495_v12 }
 0x288   : > { %1617 = vpow2.f32 %v1576_v14 }
 0x28e   : > { %v1618_v17 = vpop.eup %1617 }
 0x28f   : > { %v1499_v18 = vadd.f32 1.0, %v1618_v17 }
 0x291   : > { %1619 = vrcp.f32 %v1499_v18  ;;  %v1511_v19 = vand.u32 2147483648, %v1499_v18  ;;  %v1509_v25 = vand.u32 2147483647, %v1499_v18  ;;  %vm1505_vm0 = vweird.f32 %v1499_v18 }
 0x293   : > { %v1512_v22 = vor.u32 1.1754944e-38, %v1511_v19  ;;  %vm1510_vm3 = vcmp.eq.f32.partialorder %v1509_v25, 8.507059e+37 }
 0x297   : > { %v1620_v3 = vpop.eup %1619 }
 0x298   : > { %v1501_v4 = vmul.f32 %v1620_v3, %v1499_v18  ;;  %vm1506_vm15 = vweird.f32 %v1620_v3 }
 0x299   : > { %vm1507_vm1 = vmor %vm1505_vm0, %vm1506_vm15 }
 0x29a   : > { %v1502_v15 = vsub.f32 1.0, %v1501_v4 }
 0x29c   : > { %v1503_v24 = vmul.f32 %v1620_v3, %v1502_v15 }
 0x29e   : > { %v1504_v16 = vadd.f32 %v1620_v3, %v1503_v24 }
 0x2a0   : > { %v1508_v23 = vsel %vm1507_vm1, %v1620_v3, %v1504_v16 }
 0x2a1   : > { %v1513_v32 = vsel %vm1510_vm3, %v1512_v22, %v1508_v23 }
 0x2a2   : > { %1516 = vst.msk [vmem:[%s2314_s5] sm:$0x3] %vm1515_vm2, %v1513_v32 }
 0x2a3 PF: > { %p12_p11 = scmp.ge.s32.totalorder %s1696_s22, 10   ;;  %s2315_s18 = smov %s1639_s19 }
 0x2a4   : > { %s2316_s19 = smov %s1705_s25  ;;  %s2317_s20 = smov %s1696_s22 }
 0x2a5   :  { %14 = sbr.rel (!%p12_p11) target bundleno = 2 (0x2), region = 105 }

</bundles_post_ra>
